<compile_context>
chip_gen: v7x
topology: tpu7x:2x2x1
jax: 0.10.0
libtpu: 0.0.40
codegen_flags: <defaults>
</compile_context>

<pallas_src>
import math

import jax
import jax.numpy as jnp
from jax.experimental import pallas as pl
from jax.experimental.pallas import tpu as pltpu

EPS = 1e-5
ACTION_COUNT = 6
ACTION_PAD = 128            # head output padded to one full lane width
FC_K = 64 * 26 * 19         # 31616
FC_K_PAD = 32768            # zero-padded fc1 contraction
FC_TK = 8192                # fc1 K tile  -> 4 reduction steps
FC_TN = 256                 # fc1 N tile  -> 2 "parallel" halves (v7x megacore)


# ----------------------------------------------------------------------------
# Conv layers as operand-swapped matmuls:  ReLU(W @ A^T + shift)
# ----------------------------------------------------------------------------
def _conv_kernel(w_ref, a_ref, t_ref, o_ref):
  # (Cout, K) bf16 @ (K, tn) bf16 on the MXU with f32 accumulation.
  acc = jnp.dot(w_ref[...], a_ref[...], preferred_element_type=jnp.float32)
  y = acc + t_ref[...]                       # folded conv bias + BN shift
  o_ref[...] = jnp.maximum(y, 0.0).astype(o_ref.dtype)


def conv_mm(w_mat, a_t, shift, tn):
  """ReLU(w_mat @ a_t + shift); spatial (lane) dim tiled and 'parallel'."""
  cout, K = w_mat.shape
  K2, mp = a_t.shape
  assert K == K2 and mp % tn == 0
  return pl.pallas_call(
      _conv_kernel,
      out_shape=jax.ShapeDtypeStruct((cout, mp), jnp.bfloat16),
      grid_spec=pltpu.PrefetchScalarGridSpec(
          num_scalar_prefetch=0,
          grid=(mp // tn,),
          in_specs=[
              pl.BlockSpec((cout, K), lambda n: (0, 0)),   # weights stay resident
              pl.BlockSpec((K, tn), lambda n: (0, n)),     # im2col^T tile (pipelined)
              pl.BlockSpec((cout, 1), lambda n: (0, 0)),   # per-channel shift
          ],
          out_specs=pl.BlockSpec((cout, tn), lambda n: (0, n)),
      ),
      compiler_params=pltpu.CompilerParams(
          dimension_semantics=("parallel",)),
  )(w_mat, a_t, shift)


# ----------------------------------------------------------------------------
# Fused fc1 + BatchNorm1d + output-head matmul (partial logits per N-half)
# ----------------------------------------------------------------------------
def _fc1_head_kernel(a_ref, w_ref, t_ref, wo_ref, o_ref, acc_ref):
  k = pl.program_id(1)

  @pl.when(k == 0)
  def _():
    acc_ref[...] = jnp.zeros_like(acc_ref)

  acc_ref[...] += jnp.dot(a_ref[...], w_ref[...],
                          preferred_element_type=jnp.float32)

  @pl.when(k == pl.num_programs(1) - 1)
  def _():
    h = acc_ref[...] + t_ref[...]            # fc1 bias + BN1d affine (folded)
    # Partial action logits from this N-half of h against its slice of the
    # output-head weight; halves are summed outside (cross-core reduction).
    part = jnp.dot(h, wo_ref[...], preferred_element_type=jnp.float32)
    o_ref[...] = part[None].astype(o_ref.dtype)


def fc1_head(f_pad, wf, tf, wo):
  B, kp = f_pad.shape
  n = wf.shape[1]
  nj = n // FC_TN
  nk = kp // FC_TK
  return pl.pallas_call(
      _fc1_head_kernel,
      out_shape=jax.ShapeDtypeStruct((nj, B, ACTION_PAD), jnp.float32),
      grid_spec=pltpu.PrefetchScalarGridSpec(
          num_scalar_prefetch=0,
          grid=(nj, nk),
          in_specs=[
              pl.BlockSpec((B, FC_TK), lambda j, k: (0, k)),
              pl.BlockSpec((FC_TK, FC_TN), lambda j, k: (k, j)),
              pl.BlockSpec((1, FC_TN), lambda j, k: (0, j)),
              pl.BlockSpec((FC_TN, ACTION_PAD), lambda j, k: (j, 0)),
          ],
          out_specs=pl.BlockSpec((1, B, ACTION_PAD), lambda j, k: (j, 0, 0)),
          scratch_shapes=[pltpu.VMEM((B, FC_TN), jnp.float32)],
      ),
      compiler_params=pltpu.CompilerParams(
          dimension_semantics=("parallel", "arbitrary"),
          vmem_limit_bytes=32 * 1024 * 1024,
      ),
  )(f_pad, wf, tf, wo)


# ----------------------------------------------------------------------------
# Glue: channel-major im2col^T (pure JAX slices/stack) and BN folding.
# ----------------------------------------------------------------------------
def im2col_t(x_cbhw, kh, kw, stride, pad, tn):
  """(C,B,H,W) -> bf16 (C*kh*kw, round_up(B*OH*OW, tn)); rows in (c,kh,kw) order."""
  x_cbhw = x_cbhw.astype(jnp.bfloat16)
  C, B, H, W = x_cbhw.shape
  xp = jnp.pad(x_cbhw, ((0, 0), (0, 0), (pad, pad), (pad, pad)))
  OH = (H + 2 * pad - kh) // stride + 1
  OW = (W + 2 * pad - kw) // stride + 1
  cols = []
  for i in range(kh):
    for j in range(kw):
      cols.append(xp[:, :, i:i + stride * (OH - 1) + 1:stride,
                     j:j + stride * (OW - 1) + 1:stride])
  a = jnp.stack(cols, axis=1)                 # (C, kh*kw, B, OH, OW)
  m = B * OH * OW
  a = a.reshape(C * kh * kw, m)
  mp = ((m + tn - 1) // tn) * tn
  a = jnp.pad(a, ((0, 0), (0, mp - m)))       # zero cols; sliced off after matmul
  return a, OH, OW, m


def _fold_bn(gamma, beta, mean, var):
  s = gamma / jnp.sqrt(var + EPS)
  return s, beta - mean * s


def prepare_params(p):
  """One-time repack (run OUTSIDE the jitted hot path)."""
  q = {}

  def conv_pack(w, b, gamma=None, beta=None, mean=None, var=None):
    cout = w.shape[0]
    wm = w.reshape(cout, -1).astype(jnp.float32)      # rows (c, kh, kw) order
    if gamma is None:
      s = jnp.ones((cout,), jnp.float32)
      t = b.astype(jnp.float32)
    else:
      s, t0 = _fold_bn(gamma, beta, mean, var)
      t = t0 + b * s
    return ((wm * s[:, None]).astype(jnp.bfloat16),
            t.reshape(cout, 1).astype(jnp.float32))

  q["w1"], q["t1"] = conv_pack(p["w1"], p["b1"], p["g1"], p["be1"], p["m1"], p["v1"])
  q["w2"], q["t2"] = conv_pack(p["w2"], p["b2"], p["g2"], p["be2"], p["m2"], p["v2"])
  q["w3"], q["t3"] = conv_pack(p["w3"], p["b3"])

  # fc1: fold BN1d scale into columns, transpose to (K, 512), zero-pad K, bf16.
  sf, tf0 = _fold_bn(p["gf"], p["bef"], p["mf"], p["vf"])
  wf = (p["wf1"].astype(jnp.float32) * sf[:, None]).T          # (31616, 512)
  q["wf"] = jnp.pad(wf, ((0, FC_K_PAD - FC_K), (0, 0))).astype(jnp.bfloat16)
  q["tf"] = (tf0 + p["bf1"] * sf).reshape(1, 512).astype(jnp.float32)

  # output head: (A, 512) -> (512, ACTION_PAD), zero-padded extra actions.
  wo = jnp.zeros((512, ACTION_PAD), jnp.float32)
  q["wo"] = wo.at[:, :ACTION_COUNT].set(p["wo"].T.astype(jnp.float32))
  q["bo"] = p["bo"].astype(jnp.float32)
  return q


# ----------------------------------------------------------------------------
# Full forward pass.
# ----------------------------------------------------------------------------
def forward(x, q):
  B = x.shape[0]
  # NCHW -> channel-major (C, B, H, W) once; conv activations stay there.
  xc = jnp.transpose(x, (1, 0, 2, 3))

  # conv1 (4->32, k8 s4 p1) + BN + ReLU
  a, oh, ow, m = im2col_t(xc, 8, 8, 4, 1, tn=1024)
  y = conv_mm(q["w1"], a, q["t1"], tn=1024)            # (32, mp) bf16
  xc = y[:, :m].reshape(32, B, oh, ow)

  # conv2 (32->64, k4 s2 p1) + BN + ReLU
  a, oh, ow, m = im2col_t(xc, 4, 4, 2, 1, tn=512)
  y = conv_mm(q["w2"], a, q["t2"], tn=512)             # (64, mp) bf16
  xc = y[:, :m].reshape(64, B, oh, ow)

  # conv3 (64->64, k3 s1 p1) + ReLU (no BN)
  a, oh, ow, m = im2col_t(xc, 3, 3, 1, 1, tn=512)
  y = conv_mm(q["w3"], a, q["t3"], tn=512)             # (64, mp) bf16
  xc = y[:, :m].reshape(64, B, oh, ow)

  # flatten in PyTorch NCHW order (c, h, w per sample); pad K for fc1 tiling.
  f = jnp.transpose(xc, (1, 0, 2, 3)).reshape(B, 64 * oh * ow)
  f = jnp.pad(f, ((0, 0), (0, FC_K_PAD - f.shape[1]))).astype(jnp.bfloat16)

  # fused fc1 + BN1d + head matmul -> partial logits per parallel N-half.
  part = fc1_head(f, q["wf"], q["tf"], q["wo"])        # (2, B, ACTION_PAD)

  # TODO(synk): the final (B, A) bias-add + softmax stays in XLA; it is the
  # cross-TensorCore reduction over the two parallel fc1 halves (~12 flops).
  logits = part.sum(axis=0)[:, :ACTION_COUNT] + q["bo"]
  return jax.nn.softmax(logits, axis=-1)


# ----------------------------------------------------------------------------
# Pure-JAX reference (for correctness check).
# ----------------------------------------------------------------------------
def ref_forward(x, p):
  hi = jax.lax.Precision.HIGHEST

  def conv(x, w, b, stride, pad):
    y = jax.lax.conv_general_dilated(
        x, w, (stride, stride), [(pad, pad), (pad, pad)],
        dimension_numbers=("NCHW", "OIHW", "NCHW"), precision=hi)
    return y + b[None, :, None, None]

  def bn2d(y, g, be, m, v):
    s = g / jnp.sqrt(v + EPS)
    return y * s[None, :, None, None] + (be - m * s)[None, :, None, None]

  x1 = jax.nn.relu(bn2d(conv(x, p["w1"], p["b1"], 4, 1),
                        p["g1"], p["be1"], p["m1"], p["v1"]))
  x2 = jax.nn.relu(bn2d(conv(x1, p["w2"], p["b2"], 2, 1),
                        p["g2"], p["be2"], p["m2"], p["v2"]))
  x3 = jax.nn.relu(conv(x2, p["w3"], p["b3"], 1, 1))
  f = x3.reshape(x.shape[0], -1)
  h = jnp.dot(f, p["wf1"].T, precision=hi) + p["bf1"]
  s = p["gf"] / jnp.sqrt(p["vf"] + EPS)
  h = h * s + (p["bef"] - p["mf"] * s)
  logits = jnp.dot(h, p["wo"].T, precision=hi) + p["bo"]
  return jax.nn.softmax(logits, axis=1)


# ----------------------------------------------------------------------------
# Deterministic parameter init (shapes from AtariActorModel.__init__).
# ----------------------------------------------------------------------------
def init_params(key):
  ks = jax.random.split(key, 24)
  u = lambda k, shp, b: jax.random.uniform(k, shp, jnp.float32, -b, b)

  p = {}
  b1 = 1.0 / math.sqrt(4 * 8 * 8)
  p["w1"], p["b1"] = u(ks[0], (32, 4, 8, 8), b1), u(ks[1], (32,), b1)
  p["g1"] = 1.0 + 0.2 * jax.random.uniform(ks[2], (32,), jnp.float32, -1, 1)
  p["be1"] = u(ks[3], (32,), 0.1)
  p["m1"] = u(ks[4], (32,), 0.1)
  p["v1"] = 1.0 + 0.5 * jax.random.uniform(ks[5], (32,), jnp.float32, -1, 1)
  b2 = 1.0 / math.sqrt(32 * 4 * 4)
  p["w2"], p["b2"] = u(ks[6], (64, 32, 4, 4), b2), u(ks[7], (64,), b2)
  p["g2"] = 1.0 + 0.2 * jax.random.uniform(ks[8], (64,), jnp.float32, -1, 1)
  p["be2"] = u(ks[9], (64,), 0.1)
  p["m2"] = u(ks[10], (64,), 0.1)
  p["v2"] = 1.0 + 0.5 * jax.random.uniform(ks[11], (64,), jnp.float32, -1, 1)
  b3 = 1.0 / math.sqrt(64 * 3 * 3)
  p["w3"], p["b3"] = u(ks[12], (64, 64, 3, 3), b3), u(ks[13], (64,), b3)
  bf = 1.0 / math.sqrt(64 * 26 * 19)
  p["wf1"], p["bf1"] = u(ks[14], (512, 64 * 26 * 19), bf), u(ks[15], (512,), bf)
  p["gf"] = 1.0 + 0.2 * jax.random.uniform(ks[16], (512,), jnp.float32, -1, 1)
  p["bef"] = u(ks[17], (512,), 0.1)
  p["mf"] = u(ks[18], (512,), 0.1)
  p["vf"] = 1.0 + 0.5 * jax.random.uniform(ks[19], (512,), jnp.float32, -1, 1)
  bo = 1.0 / math.sqrt(512)
  p["wo"], p["bo"] = u(ks[20], (ACTION_COUNT, 512), bo), u(ks[21], (ACTION_COUNT,), bo)
  return p


if __name__ == "__main__":
  key = jax.random.PRNGKey(0)
  kx, kp = jax.random.split(key)
  params = init_params(kp)
  prep = prepare_params(params)   # one-time repack, outside the jitted hot path
  # batch=2, 4-channel 210x160 Atari frames (spatial size implied by fc1 dims)
  img = jax.random.uniform(kx, (2, 4, 210, 160), jnp.float32)

  probs = jax.jit(forward)(img, prep)
  probs = jax.block_until_ready(probs)

  ref = jax.block_until_ready(ref_forward(img, params))

  assert probs.shape == (2, ACTION_COUNT)
  assert float(jnp.max(jnp.abs(jnp.sum(probs, axis=1) - 1.0))) < 1e-4
  assert float(jnp.max(jnp.abs(probs - ref))) < 2e-2

  print("KERNEL_OK")
</pallas_src>

<mosaic_0001>
module attributes {stable_mosaic.version = 11 : i64} {
  func.func @_conv_kernel(%arg0: i32, %arg1: memref<32x256xbf16, #tpu.memory_space<vmem>>, %arg2: memref<256x1024xbf16, #tpu.memory_space<vmem>>, %arg3: memref<32x1xf32, #tpu.memory_space<vmem>>, %arg4: memref<32x1024xbf16, #tpu.memory_space<vmem>>) attributes {dimension_semantics = [#tpu.dimension_semantics<parallel>], iteration_bounds = array<i64: 4>, scalar_prefetch = 0 : i64, scratch_operands = 0 : i64, tpu.core_type = #tpu.core_type<tc>, window_params = [{pipeline_mode = #tpu.pipeline_mode<synchronous>, transform_indices = @transform_0, window_bounds = array<i64: 32, 256>}, {transform_indices = @transform_1, window_bounds = array<i64: 256, 1024>}, {pipeline_mode = #tpu.pipeline_mode<synchronous>, transform_indices = @transform_2, window_bounds = array<i64: 32, 1>}, {transform_indices = @transform_3, window_bounds = array<i64: 32, 1024>}]} {
    %c0 = arith.constant 0 : index
    %c0_0 = arith.constant 0 : index
    %0 = vector.load %arg1[%c0, %c0_0] : memref<32x256xbf16, #tpu.memory_space<vmem>>, vector<32x256xbf16>
    %c0_1 = arith.constant 0 : index
    %c0_2 = arith.constant 0 : index
    %1 = vector.load %arg2[%c0_1, %c0_2] : memref<256x1024xbf16, #tpu.memory_space<vmem>>, vector<256x1024xbf16>
    %cst = arith.constant dense<0.000000e+00> : vector<32x1024xf32>
    %2 = tpu.matmul %0, %1, %cst {dimension_numbers = #tpu.dot_dimension_numbers<[1], [0], [0], [1], [0, 0, 1, 1], [], []>} : vector<32x256xbf16>, vector<256x1024xbf16>, vector<32x1024xf32> -> vector<32x1024xf32>
    %c0_3 = arith.constant 0 : index
    %c0_4 = arith.constant 0 : index
    %3 = vector.load %arg3[%c0_3, %c0_4] : memref<32x1xf32, #tpu.memory_space<vmem>>, vector<32x1xf32>
    %4 = vector.broadcast %3 : vector<32x1xf32> to vector<32x1024xf32>
    %5 = arith.addf %2, %4 : vector<32x1024xf32>
    %cst_5 = arith.constant 0.000000e+00 : f32
    %6 = vector.broadcast %cst_5 : f32 to vector<32x1024xf32>
    %7 = arith.maximumf %5, %6 : vector<32x1024xf32>
    %8 = arith.truncf %7 : vector<32x1024xf32> to vector<32x1024xbf16>
    %c0_6 = arith.constant 0 : index
    %c0_7 = arith.constant 0 : index
    %9 = vector.load %arg4[%c0_6, %c0_7] : memref<32x1024xbf16, #tpu.memory_space<vmem>>, vector<32x1024xbf16>
    tpu.vector_store %arg4[%c0_6, %c0_7], %8 {strides = array<i32>} : memref<32x1024xbf16, #tpu.memory_space<vmem>>, vector<32x1024xbf16>,
    return
  }
  func.func @transform_0(%arg0: i32) -> (i32, i32) {
    %c0_i32 = arith.constant 0 : i32
    %c0_i32_0 = arith.constant 0 : i32
    %c0_i32_1 = arith.constant 0 : i32
    return %c0_i32, %c0_i32_0 : i32, i32
  }
  func.func @transform_1(%arg0: i32) -> (i32, i32) {
    %c0_i32 = arith.constant 0 : i32
    %c0_i32_0 = arith.constant 0 : i32
    return %c0_i32, %arg0 : i32, i32
  }
  func.func @transform_2(%arg0: i32) -> (i32, i32) {
    %c0_i32 = arith.constant 0 : i32
    %c0_i32_0 = arith.constant 0 : i32
    %c0_i32_1 = arith.constant 0 : i32
    return %c0_i32, %c0_i32_0 : i32, i32
  }
  func.func @transform_3(%arg0: i32) -> (i32, i32) {
    %c0_i32 = arith.constant 0 : i32
    %c0_i32_0 = arith.constant 0 : i32
    return %c0_i32, %arg0 : i32, i32
  }
}

module attributes {stable_mosaic.version = 11 : i64} {
  func.func @_conv_kernel(%arg0: i32, %arg1: memref<64x512xbf16, #tpu.memory_space<vmem>>, %arg2: memref<512x512xbf16, #tpu.memory_space<vmem>>, %arg3: memref<64x1xf32, #tpu.memory_space<vmem>>, %arg4: memref<64x512xbf16, #tpu.memory_space<vmem>>) attributes {dimension_semantics = [#tpu.dimension_semantics<parallel>], iteration_bounds = array<i64: 2>, scalar_prefetch = 0 : i64, scratch_operands = 0 : i64, tpu.core_type = #tpu.core_type<tc>, window_params = [{pipeline_mode = #tpu.pipeline_mode<synchronous>, transform_indices = @transform_0, window_bounds = array<i64: 64, 512>}, {transform_indices = @transform_1, window_bounds = array<i64: 512, 512>}, {pipeline_mode = #tpu.pipeline_mode<synchronous>, transform_indices = @transform_2, window_bounds = array<i64: 64, 1>}, {transform_indices = @transform_3, window_bounds = array<i64: 64, 512>}]} {
    %c0 = arith.constant 0 : index
    %c0_0 = arith.constant 0 : index
    %0 = vector.load %arg1[%c0, %c0_0] : memref<64x512xbf16, #tpu.memory_space<vmem>>, vector<64x512xbf16>
    %c0_1 = arith.constant 0 : index
    %c0_2 = arith.constant 0 : index
    %1 = vector.load %arg2[%c0_1, %c0_2] : memref<512x512xbf16, #tpu.memory_space<vmem>>, vector<512x512xbf16>
    %cst = arith.constant dense<0.000000e+00> : vector<64x512xf32>
    %2 = tpu.matmul %0, %1, %cst {dimension_numbers = #tpu.dot_dimension_numbers<[1], [0], [0], [1], [0, 0, 1, 1], [], []>} : vector<64x512xbf16>, vector<512x512xbf16>, vector<64x512xf32> -> vector<64x512xf32>
    %c0_3 = arith.constant 0 : index
    %c0_4 = arith.constant 0 : index
    %3 = vector.load %arg3[%c0_3, %c0_4] : memref<64x1xf32, #tpu.memory_space<vmem>>, vector<64x1xf32>
    %4 = vector.broadcast %3 : vector<64x1xf32> to vector<64x512xf32>
    %5 = arith.addf %2, %4 : vector<64x512xf32>
    %cst_5 = arith.constant 0.000000e+00 : f32
    %6 = vector.broadcast %cst_5 : f32 to vector<64x512xf32>
    %7 = arith.maximumf %5, %6 : vector<64x512xf32>
    %8 = arith.truncf %7 : vector<64x512xf32> to vector<64x512xbf16>
    %c0_6 = arith.constant 0 : index
    %c0_7 = arith.constant 0 : index
    %9 = vector.load %arg4[%c0_6, %c0_7] : memref<64x512xbf16, #tpu.memory_space<vmem>>, vector<64x512xbf16>
    tpu.vector_store %arg4[%c0_6, %c0_7], %8 {strides = array<i32>} : memref<64x512xbf16, #tpu.memory_space<vmem>>, vector<64x512xbf16>,
    return
  }
  func.func @transform_0(%arg0: i32) -> (i32, i32) {
    %c0_i32 = arith.constant 0 : i32
    %c0_i32_0 = arith.constant 0 : i32
    %c0_i32_1 = arith.constant 0 : i32
    return %c0_i32, %c0_i32_0 : i32, i32
  }
  func.func @transform_1(%arg0: i32) -> (i32, i32) {
    %c0_i32 = arith.constant 0 : i32
    %c0_i32_0 = arith.constant 0 : i32
    return %c0_i32, %arg0 : i32, i32
  }
  func.func @transform_2(%arg0: i32) -> (i32, i32) {
    %c0_i32 = arith.constant 0 : i32
    %c0_i32_0 = arith.constant 0 : i32
    %c0_i32_1 = arith.constant 0 : i32
    return %c0_i32, %c0_i32_0 : i32, i32
  }
  func.func @transform_3(%arg0: i32) -> (i32, i32) {
    %c0_i32 = arith.constant 0 : i32
    %c0_i32_0 = arith.constant 0 : i32
    return %c0_i32, %arg0 : i32, i32
  }
}

module attributes {stable_mosaic.version = 11 : i64} {
  func.func @_conv_kernel(%arg0: i32, %arg1: memref<64x576xbf16, #tpu.memory_space<vmem>>, %arg2: memref<576x512xbf16, #tpu.memory_space<vmem>>, %arg3: memref<64x1xf32, #tpu.memory_space<vmem>>, %arg4: memref<64x512xbf16, #tpu.memory_space<vmem>>) attributes {dimension_semantics = [#tpu.dimension_semantics<parallel>], iteration_bounds = array<i64: 2>, scalar_prefetch = 0 : i64, scratch_operands = 0 : i64, tpu.core_type = #tpu.core_type<tc>, window_params = [{pipeline_mode = #tpu.pipeline_mode<synchronous>, transform_indices = @transform_0, window_bounds = array<i64: 64, 576>}, {transform_indices = @transform_1, window_bounds = array<i64: 576, 512>}, {pipeline_mode = #tpu.pipeline_mode<synchronous>, transform_indices = @transform_2, window_bounds = array<i64: 64, 1>}, {transform_indices = @transform_3, window_bounds = array<i64: 64, 512>}]} {
    %c0 = arith.constant 0 : index
    %c0_0 = arith.constant 0 : index
    %0 = vector.load %arg1[%c0, %c0_0] : memref<64x576xbf16, #tpu.memory_space<vmem>>, vector<64x576xbf16>
    %c0_1 = arith.constant 0 : index
    %c0_2 = arith.constant 0 : index
    %1 = vector.load %arg2[%c0_1, %c0_2] : memref<576x512xbf16, #tpu.memory_space<vmem>>, vector<576x512xbf16>
    %cst = arith.constant dense<0.000000e+00> : vector<64x512xf32>
    %2 = tpu.matmul %0, %1, %cst {dimension_numbers = #tpu.dot_dimension_numbers<[1], [0], [0], [1], [0, 0, 1, 1], [], []>} : vector<64x576xbf16>, vector<576x512xbf16>, vector<64x512xf32> -> vector<64x512xf32>
    %c0_3 = arith.constant 0 : index
    %c0_4 = arith.constant 0 : index
    %3 = vector.load %arg3[%c0_3, %c0_4] : memref<64x1xf32, #tpu.memory_space<vmem>>, vector<64x1xf32>
    %4 = vector.broadcast %3 : vector<64x1xf32> to vector<64x512xf32>
    %5 = arith.addf %2, %4 : vector<64x512xf32>
    %cst_5 = arith.constant 0.000000e+00 : f32
    %6 = vector.broadcast %cst_5 : f32 to vector<64x512xf32>
    %7 = arith.maximumf %5, %6 : vector<64x512xf32>
    %8 = arith.truncf %7 : vector<64x512xf32> to vector<64x512xbf16>
    %c0_6 = arith.constant 0 : index
    %c0_7 = arith.constant 0 : index
    %9 = vector.load %arg4[%c0_6, %c0_7] : memref<64x512xbf16, #tpu.memory_space<vmem>>, vector<64x512xbf16>
    tpu.vector_store %arg4[%c0_6, %c0_7], %8 {strides = array<i32>} : memref<64x512xbf16, #tpu.memory_space<vmem>>, vector<64x512xbf16>,
    return
  }
  func.func @transform_0(%arg0: i32) -> (i32, i32) {
    %c0_i32 = arith.constant 0 : i32
    %c0_i32_0 = arith.constant 0 : i32
    %c0_i32_1 = arith.constant 0 : i32
    return %c0_i32, %c0_i32_0 : i32, i32
  }
  func.func @transform_1(%arg0: i32) -> (i32, i32) {
    %c0_i32 = arith.constant 0 : i32
    %c0_i32_0 = arith.constant 0 : i32
    return %c0_i32, %arg0 : i32, i32
  }
  func.func @transform_2(%arg0: i32) -> (i32, i32) {
    %c0_i32 = arith.constant 0 : i32
    %c0_i32_0 = arith.constant 0 : i32
    %c0_i32_1 = arith.constant 0 : i32
    return %c0_i32, %c0_i32_0 : i32, i32
  }
  func.func @transform_3(%arg0: i32) -> (i32, i32) {
    %c0_i32 = arith.constant 0 : i32
    %c0_i32_0 = arith.constant 0 : i32
    return %c0_i32, %arg0 : i32, i32
  }
}

module attributes {stable_mosaic.version = 11 : i64} {
  func.func @_fc1_head_kernel(%arg0: i32, %arg1: i32, %arg2: memref<2x8192xbf16, #tpu.memory_space<vmem>>, %arg3: memref<8192x256xbf16, #tpu.memory_space<vmem>>, %arg4: memref<1x256xf32, #tpu.memory_space<vmem>>, %arg5: memref<256x128xf32, #tpu.memory_space<vmem>>, %arg6: memref<1x2x128xf32, #tpu.memory_space<vmem>>, %arg7: memref<2x256xf32, #tpu.memory_space<vmem>>) attributes {dimension_semantics = [#tpu.dimension_semantics<parallel>, #tpu.dimension_semantics<arbitrary>], iteration_bounds = array<i64: 2, 4>, scalar_prefetch = 0 : i64, scratch_operands = 1 : i64, tpu.core_type = #tpu.core_type<tc>, window_params = [{transform_indices = @transform_0, window_bounds = array<i64: 2, 8192>}, {transform_indices = @transform_1, window_bounds = array<i64: 8192, 256>}, {transform_indices = @transform_2, window_bounds = array<i64: 1, 256>}, {transform_indices = @transform_3, window_bounds = array<i64: 256, 128>}, {transform_indices = @transform_4, window_bounds = array<i64: 1, 2, 128>}]} {
    %c0_i32 = arith.constant 0 : i32
    %0 = arith.cmpi eq, %arg1, %c0_i32 : i32
    %1 = arith.extui %0 : i1 to i32
    %c0_i32_0 = arith.constant 0 : i32
    %2 = arith.cmpi ne, %1, %c0_i32_0 : i32
    scf.if %2 {
      %cst_9 = arith.constant 0.000000e+00 : f32
      %12 = vector.broadcast %cst_9 : f32 to vector<2x256xf32>
      %c0_10 = arith.constant 0 : index
      %c0_11 = arith.constant 0 : index
      %13 = vector.load %arg7[%c0_10, %c0_11] : memref<2x256xf32, #tpu.memory_space<vmem>>, vector<2x256xf32>
      tpu.vector_store %arg7[%c0_10, %c0_11], %12 {strides = array<i32>} : memref<2x256xf32, #tpu.memory_space<vmem>>, vector<2x256xf32>,
    } else {
    }
    %c0 = arith.constant 0 : index
    %c0_1 = arith.constant 0 : index
    %3 = vector.load %arg7[%c0, %c0_1] : memref<2x256xf32, #tpu.memory_space<vmem>>, vector<2x256xf32>
    %c0_2 = arith.constant 0 : index
    %c0_3 = arith.constant 0 : index
    %4 = vector.load %arg2[%c0_2, %c0_3] : memref<2x8192xbf16, #tpu.memory_space<vmem>>, vector<2x8192xbf16>
    %c0_4 = arith.constant 0 : index
    %c0_5 = arith.constant 0 : index
    %5 = vector.load %arg3[%c0_4, %c0_5] : memref<8192x256xbf16, #tpu.memory_space<vmem>>, vector<8192x256xbf16>
    %cst = arith.constant dense<0.000000e+00> : vector<2x256xf32>
    %6 = tpu.matmul %4, %5, %cst {dimension_numbers = #tpu.dot_dimension_numbers<[1], [0], [0], [1], [0, 0, 1, 1], [], []>} : vector<2x8192xbf16>, vector<8192x256xbf16>, vector<2x256xf32> -> vector<2x256xf32>
    %7 = arith.addf %3, %6 : vector<2x256xf32>
    %c0_6 = arith.constant 0 : index
    %c0_7 = arith.constant 0 : index
    %8 = vector.load %arg7[%c0_6, %c0_7] : memref<2x256xf32, #tpu.memory_space<vmem>>, vector<2x256xf32>
    tpu.vector_store %arg7[%c0_6, %c0_7], %7 {strides = array<i32>} : memref<2x256xf32, #tpu.memory_space<vmem>>, vector<2x256xf32>,
    %c3_i32 = arith.constant 3 : i32
    %9 = arith.cmpi eq, %arg1, %c3_i32 : i32
    %10 = arith.extui %9 : i1 to i32
    %c0_i32_8 = arith.constant 0 : i32
    %11 = arith.cmpi ne, %10, %c0_i32_8 : i32
    scf.if %11 {
      %c0_9 = arith.constant 0 : index
      %c0_10 = arith.constant 0 : index
      %12 = vector.load %arg7[%c0_9, %c0_10] : memref<2x256xf32, #tpu.memory_space<vmem>>, vector<2x256xf32>
      %c0_11 = arith.constant 0 : index
      %c0_12 = arith.constant 0 : index
      %13 = vector.load %arg4[%c0_11, %c0_12] : memref<1x256xf32, #tpu.memory_space<vmem>>, vector<1x256xf32>
      %14 = vector.broadcast %13 : vector<1x256xf32> to vector<2x256xf32>
      %15 = arith.addf %12, %14 : vector<2x256xf32>
      %c0_13 = arith.constant 0 : index
      %c0_14 = arith.constant 0 : index
      %16 = vector.load %arg5[%c0_13, %c0_14] : memref<256x128xf32, #tpu.memory_space<vmem>>, vector<256x128xf32>
      %cst_15 = arith.constant dense<0.000000e+00> : vector<2x128xf32>
      %17 = tpu.matmul %15, %16, %cst_15 {dimension_numbers = #tpu.dot_dimension_numbers<[1], [0], [0], [1], [0, 0, 1, 1], [], []>} : vector<2x256xf32>, vector<256x128xf32>, vector<2x128xf32> -> vector<2x128xf32>
      %18 = vector.shape_cast %17 : vector<2x128xf32> to vector<1x2x128xf32>
      %c0_16 = arith.constant 0 : index
      %c0_17 = arith.constant 0 : index
      %c0_18 = arith.constant 0 : index
      %19 = vector.load %arg6[%c0_16, %c0_17, %c0_18] : memref<1x2x128xf32, #tpu.memory_space<vmem>>, vector<1x2x128xf32>
      tpu.vector_store %arg6[%c0_16, %c0_17, %c0_18], %18 {strides = array<i32>} : memref<1x2x128xf32, #tpu.memory_space<vmem>>, vector<1x2x128xf32>,
    } else {
    }
    return
  }
  func.func @transform_0(%arg0: i32, %arg1: i32) -> (i32, i32) {
    %c0_i32 = arith.constant 0 : i32
    %c0_i32_0 = arith.constant 0 : i32
    return %c0_i32, %arg1 : i32, i32
  }
  func.func @transform_1(%arg0: i32, %arg1: i32) -> (i32, i32) {
    %c0_i32 = arith.constant 0 : i32
    return %arg1, %arg0 : i32, i32
  }
  func.func @transform_2(%arg0: i32, %arg1: i32) -> (i32, i32) {
    %c0_i32 = arith.constant 0 : i32
    %c0_i32_0 = arith.constant 0 : i32
    return %c0_i32, %arg0 : i32, i32
  }
  func.func @transform_3(%arg0: i32, %arg1: i32) -> (i32, i32) {
    %c0_i32 = arith.constant 0 : i32
    %c0_i32_0 = arith.constant 0 : i32
    return %arg0, %c0_i32 : i32, i32
  }
  func.func @transform_4(%arg0: i32, %arg1: i32) -> (i32, i32, i32) {
    %c0_i32 = arith.constant 0 : i32
    %c0_i32_0 = arith.constant 0 : i32
    %c0_i32_1 = arith.constant 0 : i32
    return %arg0, %c0_i32, %c0_i32_0 : i32, i32, i32
  }
}

</mosaic_0001>

<bundles_post_ra>
// kernel: forward.4
= control target key start
LH: loop header
LB: loop body
LE: loop exit
PB: predicated region body
PF: predicated region fallthrough
CT: control target
= control target key end

     0   :  { %s1985_s12 = smov 0   ;;  %s1987_s13 = smov 0   ;;  %s2561_s0 = inlined_call_operand.vmem [shape: bf16[32,256], index: 0, kind: input, shape index: {}]   ;;  %s2562_s1 = inlined_call_operand.vmem [shape: bf16[256,4096], index: 1, kind: input, shape index: {}]   ;;  %s2563_s2 = inlined_call_operand.vmem [shape: f32[32,1], index: 2, kind: input, shape index: {}]   ;;  %s2564_s3 = inlined_call_operand.vmem [shape: bf16[32,4096], index: 3, kind: output, shape index: {}]  }
   0x1   :  { %s1989_s14 = smov 0  }
   0x2 LB: > { %s1726_s15 = sadd.s32 4294967295, %s1962_s14   ;;  %s2002_s16 = sadd.s32 1, %s1962_s14   ;;  %s1962_s14 = sphi %s1989_s14, %s2568_s14   ;;  %s1958_s13 = sphi %s1987_s13, %s2567_s13   ;;  %s1954_s12 = sphi %s1985_s12, %s2566_s12  }
   0x3   : > { %s38_s17 = ssub.s32 %s1962_s14, %s2002_s16  ;;  %s41_s18 = sadd.s32 1, %s1958_s13 }
   0x4   : > { %p39_p0 = scmp.eq.s32.totalorder %s38_s17, 0  ;;  %p48_p1 = scmp.ne.s32.totalorder %s1958_s13, %s1954_s12 }
   0x5   : > { %p49_p2 = scmp.eq.s32.totalorder %s1962_s14, 0  ;;  %p99_p3 = scmp.eq.s32.totalorder %s1726_s15, 3 }
   0x6   : > { %s2013_s19 = scalar_select %p39_p0, %s1958_s13, %s41_s18  }
   0x7   : > { %p50_p4 = por %p49_p2, %p48_p1  ;;  %p2015_p5 = por %p99_p3, %p48_p1 }
   0x8   : > { %p1729_p6 = scmp.ge.s32.totalorder %s1962_s14, 4 }
   0xa   : > { %127 = sbr.rel (%p1729_p6) target bundleno = 85 (0x55), region = 24 }
  0x11   : > { %130 = sbr.rel (!%p50_p4) target bundleno = 85 (0x55), region = 28  ;;  %s132_s21 = sand.u32 (%p50_p4), 1, %s1958_s13  }
  0x12   : > { %s1889_s22 = sshll.u32 (%p50_p4), %s1962_s14, 5  ;;  %s1730_s23 = sshll.u32 (%p50_p4), %s132_s21, 10 }
  0x13   : > { %s2025_s26 = scalar_lea.vmem (%p50_p4), %s2562_s1, %s1889_s22  ;;  %s2030_s27 = scalar_lea.vmem (%p50_p4), [#allocation2], %s1730_s23 }
  0x14   : > { %v150_v0 = vld [vmem:[%s2025_s26] sm:$0xff] (%p50_p4)  ;;  %v152_v1 = vld [vmem:[%s2025_s26 + $0x8] sm:$0xff] (%p50_p4)  ;;  %v154_v2 = vld [vmem:[%s2025_s26 + $0x10] sm:$0xff] (%p50_p4) }
  0x15   : > { %151 = vst [vmem:[%s2030_s27] sm:$0xff] (%p50_p4), %v150_v0  ;;  %153 = vst [vmem:[%s2030_s27 + $0x8] sm:$0xff] (%p50_p4), %v152_v1  ;;  %v156_v3 = vld [vmem:[%s2025_s26 + $0x18] sm:$0xff] (%p50_p4)  ;;  %v158_v4 = vld [vmem:[%s2025_s26 + $0x80] sm:$0xff] (%p50_p4) }
  0x16   : > { %155 = vst [vmem:[%s2030_s27 + $0x10] sm:$0xff] (%p50_p4), %v154_v2  ;;  %v160_v5 = vld [vmem:[%s2025_s26 + $0x88] sm:$0xff] (%p50_p4)  ;;  %157 = vst [vmem:[%s2030_s27 + $0x18] sm:$0xff] (%p50_p4), %v156_v3  ;;  %v162_v6 = vld [vmem:[%s2025_s26 + $0x90] sm:$0xff] (%p50_p4) }
  0x17   : > { %159 = vst [vmem:[%s2030_s27 + $0x20] sm:$0xff] (%p50_p4), %v158_v4  ;;  %161 = vst [vmem:[%s2030_s27 + $0x28] sm:$0xff] (%p50_p4), %v160_v5  ;;  %v164_v7 = vld [vmem:[%s2025_s26 + $0x98] sm:$0xff] (%p50_p4)  ;;  %v166_v8 = vld [vmem:[%s2025_s26 + $0x100] sm:$0xff] (%p50_p4) }
  0x18   : > { %163 = vst [vmem:[%s2030_s27 + $0x30] sm:$0xff] %v162_v6  ;;  %165 = vst [vmem:[%s2030_s27 + $0x38] sm:$0xff] %v164_v7  ;;  %v168_v9 = vld [vmem:[%s2025_s26 + $0x108] sm:$0xff]  ;;  %v170_v10 = vld [vmem:[%s2025_s26 + $0x110] sm:$0xff] }
  0x19   : > { %167 = vst [vmem:[%s2030_s27 + $0x40] sm:$0xff] %v166_v8  ;;  %v172_v11 = vld [vmem:[%s2025_s26 + $0x118] sm:$0xff]  ;;  %169 = vst [vmem:[%s2030_s27 + $0x48] sm:$0xff] %v168_v9  ;;  %v174_v12 = vld [vmem:[%s2025_s26 + $0x180] sm:$0xff] }
  0x1a   : > { %171 = vst [vmem:[%s2030_s27 + $0x50] sm:$0xff] %v170_v10  ;;  %173 = vst [vmem:[%s2030_s27 + $0x58] sm:$0xff] %v172_v11  ;;  %v176_v13 = vld [vmem:[%s2025_s26 + $0x188] sm:$0xff]  ;;  %v178_v14 = vld [vmem:[%s2025_s26 + $0x190] sm:$0xff] }
  0x1b   : > { %175 = vst [vmem:[%s2030_s27 + $0x60] sm:$0xff] %v174_v12  ;;  %177 = vst [vmem:[%s2030_s27 + $0x68] sm:$0xff] %v176_v13  ;;  %v180_v15 = vld [vmem:[%s2025_s26 + $0x198] sm:$0xff]  ;;  %v182_v16 = vld [vmem:[%s2025_s26 + $0x200] sm:$0xff] }
  0x1c   : > { %179 = vst [vmem:[%s2030_s27 + $0x70] sm:$0xff] %v178_v14  ;;  %v184_v17 = vld [vmem:[%s2025_s26 + $0x208] sm:$0xff]  ;;  %181 = vst [vmem:[%s2030_s27 + $0x78] sm:$0xff] %v180_v15  ;;  %v186_v18 = vld [vmem:[%s2025_s26 + $0x210] sm:$0xff] }
  0x1d   : > { %183 = vst [vmem:[%s2030_s27 + $0x80] sm:$0xff] %v182_v16  ;;  %185 = vst [vmem:[%s2030_s27 + $0x88] sm:$0xff] %v184_v17  ;;  %v188_v19 = vld [vmem:[%s2025_s26 + $0x218] sm:$0xff]  ;;  %v190_v20 = vld [vmem:[%s2025_s26 + $0x280] sm:$0xff] }
  0x1e   : > { %187 = vst [vmem:[%s2030_s27 + $0x90] sm:$0xff] %v186_v18  ;;  %189 = vst [vmem:[%s2030_s27 + $0x98] sm:$0xff] %v188_v19  ;;  %v192_v21 = vld [vmem:[%s2025_s26 + $0x288] sm:$0xff]  ;;  %v194_v22 = vld [vmem:[%s2025_s26 + $0x290] sm:$0xff] }
  0x1f   : > { %191 = vst [vmem:[%s2030_s27 + $0xa0] sm:$0xff] %v190_v20  ;;  %v196_v23 = vld [vmem:[%s2025_s26 + $0x298] sm:$0xff]  ;;  %193 = vst [vmem:[%s2030_s27 + $0xa8] sm:$0xff] %v192_v21  ;;  %v198_v24 = vld [vmem:[%s2025_s26 + $0x300] sm:$0xff] }
  0x20   : > { %195 = vst [vmem:[%s2030_s27 + $0xb0] sm:$0xff] %v194_v22  ;;  %197 = vst [vmem:[%s2030_s27 + $0xb8] sm:$0xff] %v196_v23  ;;  %v200_v25 = vld [vmem:[%s2025_s26 + $0x308] sm:$0xff]  ;;  %v202_v26 = vld [vmem:[%s2025_s26 + $0x310] sm:$0xff] }
  0x21   : > { %199 = vst [vmem:[%s2030_s27 + $0xc0] sm:$0xff] %v198_v24  ;;  %201 = vst [vmem:[%s2030_s27 + $0xc8] sm:$0xff] %v200_v25  ;;  %v204_v27 = vld [vmem:[%s2025_s26 + $0x318] sm:$0xff]  ;;  %v206_v28 = vld [vmem:[%s2025_s26 + $0x380] sm:$0xff] }
  0x22   : > { %203 = vst [vmem:[%s2030_s27 + $0xd0] sm:$0xff] %v202_v26  ;;  %v208_v29 = vld [vmem:[%s2025_s26 + $0x388] sm:$0xff]  ;;  %205 = vst [vmem:[%s2030_s27 + $0xd8] sm:$0xff] %v204_v27  ;;  %v210_v30 = vld [vmem:[%s2025_s26 + $0x390] sm:$0xff] }
  0x23   : > { %207 = vst [vmem:[%s2030_s27 + $0xe0] sm:$0xff] %v206_v28  ;;  %209 = vst [vmem:[%s2030_s27 + $0xe8] sm:$0xff] %v208_v29  ;;  %v212_v31 = vld [vmem:[%s2025_s26 + $0x398] sm:$0xff]  ;;  %v214_v32 = vld [vmem:[%s2025_s26 + $0x400] sm:$0xff] }
  0x24   : > { %211 = vst [vmem:[%s2030_s27 + $0xf0] sm:$0xff] %v210_v30  ;;  %213 = vst [vmem:[%s2030_s27 + $0xf8] sm:$0xff] %v212_v31  ;;  %v216_v33 = vld [vmem:[%s2025_s26 + $0x408] sm:$0xff]  ;;  %v218_v34 = vld [vmem:[%s2025_s26 + $0x410] sm:$0xff] }
  0x25   : > { %215 = vst [vmem:[%s2030_s27 + $0x100] sm:$0xff] %v214_v32  ;;  %v220_v35 = vld [vmem:[%s2025_s26 + $0x418] sm:$0xff]  ;;  %217 = vst [vmem:[%s2030_s27 + $0x108] sm:$0xff] %v216_v33  ;;  %v222_v36 = vld [vmem:[%s2025_s26 + $0x480] sm:$0xff] }
  0x26   : > { %219 = vst [vmem:[%s2030_s27 + $0x110] sm:$0xff] %v218_v34  ;;  %221 = vst [vmem:[%s2030_s27 + $0x118] sm:$0xff] %v220_v35  ;;  %v224_v37 = vld [vmem:[%s2025_s26 + $0x488] sm:$0xff]  ;;  %v226_v38 = vld [vmem:[%s2025_s26 + $0x490] sm:$0xff] }
  0x27   : > { %223 = vst [vmem:[%s2030_s27 + $0x120] sm:$0xff] %v222_v36  ;;  %225 = vst [vmem:[%s2030_s27 + $0x128] sm:$0xff] %v224_v37  ;;  %v228_v39 = vld [vmem:[%s2025_s26 + $0x498] sm:$0xff]  ;;  %v230_v40 = vld [vmem:[%s2025_s26 + $0x500] sm:$0xff] }
  0x28   : > { %227 = vst [vmem:[%s2030_s27 + $0x130] sm:$0xff] %v226_v38  ;;  %v232_v41 = vld [vmem:[%s2025_s26 + $0x508] sm:$0xff]  ;;  %229 = vst [vmem:[%s2030_s27 + $0x138] sm:$0xff] %v228_v39  ;;  %v234_v42 = vld [vmem:[%s2025_s26 + $0x510] sm:$0xff] }
  0x29   : > { %231 = vst [vmem:[%s2030_s27 + $0x140] sm:$0xff] %v230_v40  ;;  %233 = vst [vmem:[%s2030_s27 + $0x148] sm:$0xff] %v232_v41  ;;  %v236_v43 = vld [vmem:[%s2025_s26 + $0x518] sm:$0xff]  ;;  %v238_v44 = vld [vmem:[%s2025_s26 + $0x580] sm:$0xff] }
  0x2a   : > { %235 = vst [vmem:[%s2030_s27 + $0x150] sm:$0xff] %v234_v42  ;;  %237 = vst [vmem:[%s2030_s27 + $0x158] sm:$0xff] %v236_v43  ;;  %v240_v45 = vld [vmem:[%s2025_s26 + $0x588] sm:$0xff]  ;;  %v242_v46 = vld [vmem:[%s2025_s26 + $0x590] sm:$0xff] }
  0x2b   : > { %239 = vst [vmem:[%s2030_s27 + $0x160] sm:$0xff] %v238_v44  ;;  %v244_v47 = vld [vmem:[%s2025_s26 + $0x598] sm:$0xff]  ;;  %241 = vst [vmem:[%s2030_s27 + $0x168] sm:$0xff] %v240_v45  ;;  %v246_v48 = vld [vmem:[%s2025_s26 + $0x600] sm:$0xff] }
  0x2c   : > { %243 = vst [vmem:[%s2030_s27 + $0x170] sm:$0xff] %v242_v46  ;;  %245 = vst [vmem:[%s2030_s27 + $0x178] sm:$0xff] %v244_v47  ;;  %v248_v49 = vld [vmem:[%s2025_s26 + $0x608] sm:$0xff]  ;;  %v250_v50 = vld [vmem:[%s2025_s26 + $0x610] sm:$0xff] }
  0x2d   : > { %247 = vst [vmem:[%s2030_s27 + $0x180] sm:$0xff] %v246_v48  ;;  %249 = vst [vmem:[%s2030_s27 + $0x188] sm:$0xff] %v248_v49  ;;  %v252_v51 = vld [vmem:[%s2025_s26 + $0x618] sm:$0xff]  ;;  %v254_v52 = vld [vmem:[%s2025_s26 + $0x680] sm:$0xff] }
  0x2e   : > { %251 = vst [vmem:[%s2030_s27 + $0x190] sm:$0xff] %v250_v50  ;;  %v256_v53 = vld [vmem:[%s2025_s26 + $0x688] sm:$0xff]  ;;  %253 = vst [vmem:[%s2030_s27 + $0x198] sm:$0xff] %v252_v51  ;;  %v258_v54 = vld [vmem:[%s2025_s26 + $0x690] sm:$0xff] }
  0x2f   : > { %255 = vst [vmem:[%s2030_s27 + $0x1a0] sm:$0xff] %v254_v52  ;;  %257 = vst [vmem:[%s2030_s27 + $0x1a8] sm:$0xff] %v256_v53  ;;  %v260_v55 = vld [vmem:[%s2025_s26 + $0x698] sm:$0xff]  ;;  %v262_v56 = vld [vmem:[%s2025_s26 + $0x700] sm:$0xff] }
  0x30   : > { %259 = vst [vmem:[%s2030_s27 + $0x1b0] sm:$0xff] %v258_v54  ;;  %261 = vst [vmem:[%s2030_s27 + $0x1b8] sm:$0xff] %v260_v55  ;;  %v264_v57 = vld [vmem:[%s2025_s26 + $0x708] sm:$0xff]  ;;  %v266_v58 = vld [vmem:[%s2025_s26 + $0x710] sm:$0xff] }
  0x31   : > { %263 = vst [vmem:[%s2030_s27 + $0x1c0] sm:$0xff] %v262_v56  ;;  %v268_v59 = vld [vmem:[%s2025_s26 + $0x718] sm:$0xff]  ;;  %265 = vst [vmem:[%s2030_s27 + $0x1c8] sm:$0xff] %v264_v57  ;;  %v270_v60 = vld [vmem:[%s2025_s26 + $0x780] sm:$0xff] }
  0x32   : > { %267 = vst [vmem:[%s2030_s27 + $0x1d0] sm:$0xff] %v266_v58  ;;  %269 = vst [vmem:[%s2030_s27 + $0x1d8] sm:$0xff] %v268_v59  ;;  %v272_v61 = vld [vmem:[%s2025_s26 + $0x788] sm:$0xff]  ;;  %v274_v62 = vld [vmem:[%s2025_s26 + $0x790] sm:$0xff] }
  0x33   : > { %271 = vst [vmem:[%s2030_s27 + $0x1e0] sm:$0xff] %v270_v60  ;;  %273 = vst [vmem:[%s2030_s27 + $0x1e8] sm:$0xff] %v272_v61  ;;  %v276_v63 = vld [vmem:[%s2025_s26 + $0x798] sm:$0xff]  ;;  %v278_v0 = vld [vmem:[%s2025_s26 + $0x800] sm:$0xff] }
  0x34   : > { %275 = vst [vmem:[%s2030_s27 + $0x1f0] sm:$0xff] %v274_v62  ;;  %v280_v1 = vld [vmem:[%s2025_s26 + $0x808] sm:$0xff]  ;;  %277 = vst [vmem:[%s2030_s27 + $0x1f8] sm:$0xff] %v276_v63  ;;  %v282_v2 = vld [vmem:[%s2025_s26 + $0x810] sm:$0xff] }
  0x35   : > { %279 = vst [vmem:[%s2030_s27 + $0x200] sm:$0xff] %v278_v0  ;;  %281 = vst [vmem:[%s2030_s27 + $0x208] sm:$0xff] %v280_v1  ;;  %v284_v3 = vld [vmem:[%s2025_s26 + $0x818] sm:$0xff]  ;;  %v286_v4 = vld [vmem:[%s2025_s26 + $0x880] sm:$0xff] }
  0x36   : > { %283 = vst [vmem:[%s2030_s27 + $0x210] sm:$0xff] %v282_v2  ;;  %285 = vst [vmem:[%s2030_s27 + $0x218] sm:$0xff] %v284_v3  ;;  %v288_v5 = vld [vmem:[%s2025_s26 + $0x888] sm:$0xff]  ;;  %v290_v6 = vld [vmem:[%s2025_s26 + $0x890] sm:$0xff] }
  0x37   : > { %287 = vst [vmem:[%s2030_s27 + $0x220] sm:$0xff] %v286_v4  ;;  %v292_v7 = vld [vmem:[%s2025_s26 + $0x898] sm:$0xff]  ;;  %289 = vst [vmem:[%s2030_s27 + $0x228] sm:$0xff] %v288_v5  ;;  %v294_v8 = vld [vmem:[%s2025_s26 + $0x900] sm:$0xff] }
  0x38   : > { %291 = vst [vmem:[%s2030_s27 + $0x230] sm:$0xff] %v290_v6  ;;  %293 = vst [vmem:[%s2030_s27 + $0x238] sm:$0xff] %v292_v7  ;;  %v296_v9 = vld [vmem:[%s2025_s26 + $0x908] sm:$0xff]  ;;  %v298_v10 = vld [vmem:[%s2025_s26 + $0x910] sm:$0xff] }
  0x39   : > { %295 = vst [vmem:[%s2030_s27 + $0x240] sm:$0xff] %v294_v8  ;;  %297 = vst [vmem:[%s2030_s27 + $0x248] sm:$0xff] %v296_v9  ;;  %v300_v11 = vld [vmem:[%s2025_s26 + $0x918] sm:$0xff]  ;;  %v302_v12 = vld [vmem:[%s2025_s26 + $0x980] sm:$0xff] }
  0x3a   : > { %299 = vst [vmem:[%s2030_s27 + $0x250] sm:$0xff] %v298_v10  ;;  %v304_v13 = vld [vmem:[%s2025_s26 + $0x988] sm:$0xff]  ;;  %301 = vst [vmem:[%s2030_s27 + $0x258] sm:$0xff] %v300_v11  ;;  %v306_v14 = vld [vmem:[%s2025_s26 + $0x990] sm:$0xff] }
  0x3b   : > { %303 = vst [vmem:[%s2030_s27 + $0x260] sm:$0xff] %v302_v12  ;;  %305 = vst [vmem:[%s2030_s27 + $0x268] sm:$0xff] %v304_v13  ;;  %v308_v15 = vld [vmem:[%s2025_s26 + $0x998] sm:$0xff]  ;;  %v310_v16 = vld [vmem:[%s2025_s26 + $0xa00] sm:$0xff] }
  0x3c   : > { %307 = vst [vmem:[%s2030_s27 + $0x270] sm:$0xff] %v306_v14  ;;  %309 = vst [vmem:[%s2030_s27 + $0x278] sm:$0xff] %v308_v15  ;;  %v312_v17 = vld [vmem:[%s2025_s26 + $0xa08] sm:$0xff]  ;;  %v314_v18 = vld [vmem:[%s2025_s26 + $0xa10] sm:$0xff] }
  0x3d   : > { %311 = vst [vmem:[%s2030_s27 + $0x280] sm:$0xff] %v310_v16  ;;  %v316_v19 = vld [vmem:[%s2025_s26 + $0xa18] sm:$0xff]  ;;  %313 = vst [vmem:[%s2030_s27 + $0x288] sm:$0xff] %v312_v17  ;;  %v318_v20 = vld [vmem:[%s2025_s26 + $0xa80] sm:$0xff] }
  0x3e   : > { %315 = vst [vmem:[%s2030_s27 + $0x290] sm:$0xff] %v314_v18  ;;  %317 = vst [vmem:[%s2030_s27 + $0x298] sm:$0xff] %v316_v19  ;;  %v320_v21 = vld [vmem:[%s2025_s26 + $0xa88] sm:$0xff]  ;;  %v322_v22 = vld [vmem:[%s2025_s26 + $0xa90] sm:$0xff] }
  0x3f   : > { %319 = vst [vmem:[%s2030_s27 + $0x2a0] sm:$0xff] %v318_v20  ;;  %321 = vst [vmem:[%s2030_s27 + $0x2a8] sm:$0xff] %v320_v21  ;;  %v324_v23 = vld [vmem:[%s2025_s26 + $0xa98] sm:$0xff]  ;;  %v326_v24 = vld [vmem:[%s2025_s26 + $0xb00] sm:$0xff] }
  0x40   : > { %323 = vst [vmem:[%s2030_s27 + $0x2b0] sm:$0xff] %v322_v22  ;;  %v328_v25 = vld [vmem:[%s2025_s26 + $0xb08] sm:$0xff]  ;;  %325 = vst [vmem:[%s2030_s27 + $0x2b8] sm:$0xff] %v324_v23  ;;  %v330_v26 = vld [vmem:[%s2025_s26 + $0xb10] sm:$0xff] }
  0x41   : > { %327 = vst [vmem:[%s2030_s27 + $0x2c0] sm:$0xff] %v326_v24  ;;  %329 = vst [vmem:[%s2030_s27 + $0x2c8] sm:$0xff] %v328_v25  ;;  %v332_v27 = vld [vmem:[%s2025_s26 + $0xb18] sm:$0xff]  ;;  %v334_v28 = vld [vmem:[%s2025_s26 + $0xb80] sm:$0xff] }
  0x42   : > { %331 = vst [vmem:[%s2030_s27 + $0x2d0] sm:$0xff] %v330_v26  ;;  %333 = vst [vmem:[%s2030_s27 + $0x2d8] sm:$0xff] %v332_v27  ;;  %v336_v29 = vld [vmem:[%s2025_s26 + $0xb88] sm:$0xff]  ;;  %v338_v30 = vld [vmem:[%s2025_s26 + $0xb90] sm:$0xff] }
  0x43   : > { %335 = vst [vmem:[%s2030_s27 + $0x2e0] sm:$0xff] %v334_v28  ;;  %v340_v31 = vld [vmem:[%s2025_s26 + $0xb98] sm:$0xff]  ;;  %337 = vst [vmem:[%s2030_s27 + $0x2e8] sm:$0xff] %v336_v29  ;;  %v342_v32 = vld [vmem:[%s2025_s26 + $0xc00] sm:$0xff] }
  0x44   : > { %339 = vst [vmem:[%s2030_s27 + $0x2f0] sm:$0xff] %v338_v30  ;;  %341 = vst [vmem:[%s2030_s27 + $0x2f8] sm:$0xff] %v340_v31  ;;  %v344_v33 = vld [vmem:[%s2025_s26 + $0xc08] sm:$0xff]  ;;  %v346_v34 = vld [vmem:[%s2025_s26 + $0xc10] sm:$0xff] }
  0x45   : > { %343 = vst [vmem:[%s2030_s27 + $0x300] sm:$0xff] %v342_v32  ;;  %345 = vst [vmem:[%s2030_s27 + $0x308] sm:$0xff] %v344_v33  ;;  %v348_v35 = vld [vmem:[%s2025_s26 + $0xc18] sm:$0xff]  ;;  %v350_v36 = vld [vmem:[%s2025_s26 + $0xc80] sm:$0xff] }
  0x46   : > { %347 = vst [vmem:[%s2030_s27 + $0x310] sm:$0xff] %v346_v34  ;;  %v352_v37 = vld [vmem:[%s2025_s26 + $0xc88] sm:$0xff]  ;;  %349 = vst [vmem:[%s2030_s27 + $0x318] sm:$0xff] %v348_v35  ;;  %v354_v38 = vld [vmem:[%s2025_s26 + $0xc90] sm:$0xff] }
  0x47   : > { %351 = vst [vmem:[%s2030_s27 + $0x320] sm:$0xff] %v350_v36  ;;  %353 = vst [vmem:[%s2030_s27 + $0x328] sm:$0xff] %v352_v37  ;;  %v356_v39 = vld [vmem:[%s2025_s26 + $0xc98] sm:$0xff]  ;;  %v358_v40 = vld [vmem:[%s2025_s26 + $0xd00] sm:$0xff] }
  0x48   : > { %355 = vst [vmem:[%s2030_s27 + $0x330] sm:$0xff] %v354_v38  ;;  %357 = vst [vmem:[%s2030_s27 + $0x338] sm:$0xff] %v356_v39  ;;  %v360_v41 = vld [vmem:[%s2025_s26 + $0xd08] sm:$0xff]  ;;  %v362_v42 = vld [vmem:[%s2025_s26 + $0xd10] sm:$0xff] }
  0x49   : > { %359 = vst [vmem:[%s2030_s27 + $0x340] sm:$0xff] %v358_v40  ;;  %v364_v43 = vld [vmem:[%s2025_s26 + $0xd18] sm:$0xff]  ;;  %361 = vst [vmem:[%s2030_s27 + $0x348] sm:$0xff] %v360_v41  ;;  %v366_v44 = vld [vmem:[%s2025_s26 + $0xd80] sm:$0xff] }
  0x4a   : > { %363 = vst [vmem:[%s2030_s27 + $0x350] sm:$0xff] %v362_v42  ;;  %365 = vst [vmem:[%s2030_s27 + $0x358] sm:$0xff] %v364_v43  ;;  %v368_v45 = vld [vmem:[%s2025_s26 + $0xd88] sm:$0xff]  ;;  %v370_v46 = vld [vmem:[%s2025_s26 + $0xd90] sm:$0xff] }
  0x4b   : > { %367 = vst [vmem:[%s2030_s27 + $0x360] sm:$0xff] %v366_v44  ;;  %369 = vst [vmem:[%s2030_s27 + $0x368] sm:$0xff] %v368_v45  ;;  %v372_v47 = vld [vmem:[%s2025_s26 + $0xd98] sm:$0xff]  ;;  %v374_v48 = vld [vmem:[%s2025_s26 + $0xe00] sm:$0xff] }
  0x4c   : > { %371 = vst [vmem:[%s2030_s27 + $0x370] sm:$0xff] %v370_v46  ;;  %v376_v49 = vld [vmem:[%s2025_s26 + $0xe08] sm:$0xff]  ;;  %373 = vst [vmem:[%s2030_s27 + $0x378] sm:$0xff] %v372_v47  ;;  %v378_v50 = vld [vmem:[%s2025_s26 + $0xe10] sm:$0xff] }
  0x4d   : > { %375 = vst [vmem:[%s2030_s27 + $0x380] sm:$0xff] %v374_v48  ;;  %377 = vst [vmem:[%s2030_s27 + $0x388] sm:$0xff] %v376_v49  ;;  %v380_v51 = vld [vmem:[%s2025_s26 + $0xe18] sm:$0xff]  ;;  %v382_v52 = vld [vmem:[%s2025_s26 + $0xe80] sm:$0xff] }
  0x4e   : > { %379 = vst [vmem:[%s2030_s27 + $0x390] sm:$0xff] %v378_v50  ;;  %381 = vst [vmem:[%s2030_s27 + $0x398] sm:$0xff] %v380_v51  ;;  %v384_v53 = vld [vmem:[%s2025_s26 + $0xe88] sm:$0xff]  ;;  %v386_v54 = vld [vmem:[%s2025_s26 + $0xe90] sm:$0xff] }
  0x4f   : > { %383 = vst [vmem:[%s2030_s27 + $0x3a0] sm:$0xff] %v382_v52  ;;  %v388_v55 = vld [vmem:[%s2025_s26 + $0xe98] sm:$0xff]  ;;  %385 = vst [vmem:[%s2030_s27 + $0x3a8] sm:$0xff] %v384_v53  ;;  %v390_v56 = vld [vmem:[%s2025_s26 + $0xf00] sm:$0xff] }
  0x50   : > { %387 = vst [vmem:[%s2030_s27 + $0x3b0] sm:$0xff] %v386_v54  ;;  %389 = vst [vmem:[%s2030_s27 + $0x3b8] sm:$0xff] %v388_v55  ;;  %v392_v57 = vld [vmem:[%s2025_s26 + $0xf08] sm:$0xff]  ;;  %v394_v58 = vld [vmem:[%s2025_s26 + $0xf10] sm:$0xff] }
  0x51   : > { %391 = vst [vmem:[%s2030_s27 + $0x3c0] sm:$0xff] %v390_v56  ;;  %393 = vst [vmem:[%s2030_s27 + $0x3c8] sm:$0xff] %v392_v57  ;;  %v396_v59 = vld [vmem:[%s2025_s26 + $0xf18] sm:$0xff]  ;;  %v398_v60 = vld [vmem:[%s2025_s26 + $0xf80] sm:$0xff] }
  0x52   : > { %395 = vst [vmem:[%s2030_s27 + $0x3d0] sm:$0xff] %v394_v58  ;;  %v400_v61 = vld [vmem:[%s2025_s26 + $0xf88] sm:$0xff]  ;;  %397 = vst [vmem:[%s2030_s27 + $0x3d8] sm:$0xff] %v396_v59  ;;  %v402_v62 = vld [vmem:[%s2025_s26 + $0xf90] sm:$0xff] }
  0x53   : > { %399 = vst [vmem:[%s2030_s27 + $0x3e0] sm:$0xff] %v398_v60  ;;  %401 = vst [vmem:[%s2030_s27 + $0x3e8] sm:$0xff] %v400_v61  ;;  %v404_v63 = vld [vmem:[%s2025_s26 + $0xf98] sm:$0xff] }
  0x54   : > { %403 = vst [vmem:[%s2030_s27 + $0x3f0] sm:$0xff] %v402_v62  ;;  %405 = vst [vmem:[%s2030_s27 + $0x3f8] sm:$0xff] %v404_v63 }
  0x55 PF: > { %p1733_p7 = scmp.ge.s32.totalorder %s1962_s14, 1  ;;  %p410_p8 = scmp.lt.s32.totalorder %s1962_s14, 5 }
  0x57   : > { %p411_p9 = pnand %p1733_p7, %p410_p8 }
  0x58   : > { %s417_s28 = sand.u32 (!%p411_p9), 1, %s1954_s12   ;;  %v2291_v0 = vld [vmem:[%s2561_s0 + $0x4] ss:$8 sps:$4 sm:$0xff] (!%p411_p9)   ;;  %v1964_v43 = vmov (!%p411_p9), 0  }
  0x59   : > { %414 = sbr.rel (%p411_p9) target bundleno = 461 (0x1cd), region = 51  ;;  %s1734_s4 = sshll.u32 (!%p411_p9), %s417_s28, 10  ;;  %1289 = vmatprep.mubr.bf16.mxu0 (!%p411_p9), %v2291_v0  ;;  %1342 = vmatprep.mubr.bf16.mxu1 (!%p411_p9), %v2291_v0 }
  0x5a   : > { %s2297_s5 = scalar_lea.vmem (!%p411_p9), [#allocation2], %s1734_s4  ;;  %1932 = vset.pattern.permute.xlu0 (!%p411_p9), %v1964_v43  ;;  %1933 = vset.pattern.permute.xlu1 (!%p411_p9), %v1964_v43  ;;  %v576_v43 = vld [vmem:[%s2563_s2 + $0x18] sm:$0xff] (!%p411_p9)  ;;  %s1735_s27 = sshll.u32 (!%p411_p9), %s417_s28, 7 }
  0x5b   : > { %v445_v1 = vld [vmem:[%s2297_s5] sm:$0xff] (!%p411_p9)  ;;  %v446_v3 = vld [vmem:[%s2297_s5 + $0x8] sm:$0xff] (!%p411_p9)  ;;  %s2484_s12 = scalar_lea.vmem (!%p411_p9), [#allocation3], %s1735_s27 }
  0x5c   : > { %v449_v2 = vld [vmem:[%s2297_s5 + $0x20] sm:$0xff] (!%p411_p9)  ;;  %v450_v5 = vld [vmem:[%s2297_s5 + $0x28] sm:$0xff] (!%p411_p9) }
  0x5d   : > { %v1741_v4 = vcombine.high (!%p411_p9), %v445_v1, %v449_v2  ;;  %v1740_v6 = vcombine.low (!%p411_p9), %v445_v1, %v449_v2  ;;  %v453_v7 = vld [vmem:[%s2297_s5 + $0x40] sm:$0xff] (!%p411_p9)  ;;  %v1743_v9 = vcombine.high (!%p411_p9), %v446_v3, %v450_v5  ;;  %v1742_v10 = vcombine.low (!%p411_p9), %v446_v3, %v450_v5  ;;  %v454_v12 = vld [vmem:[%s2297_s5 + $0x48] sm:$0xff] (!%p411_p9) }
  0x5e   : > { %v457_v8 = vld [vmem:[%s2297_s5 + $0x60] sm:$0xff] (!%p411_p9)  ;;  %v458_v13 = vld [vmem:[%s2297_s5 + $0x68] sm:$0xff] (!%p411_p9) }
  0x5f   : > { %v1749_v11 = vcombine.high (!%p411_p9), %v453_v7, %v457_v8  ;;  %v461_v14 = vld [vmem:[%s2297_s5 + $0x80] sm:$0xff] (!%p411_p9)  ;;  %1257 = vmatprep.subr.bf16.mxu0 (!%p411_p9), %v1741_v4  ;;  %v1751_v15 = vcombine.high (!%p411_p9), %v454_v12, %v458_v13  ;;  %v462_v17 = vld [vmem:[%s2297_s5 + $0x88] sm:$0xff] (!%p411_p9)  ;;  %1310 = vmatprep.subr.bf16.mxu1 (!%p411_p9), %v1743_v9  ;;  %v1748_v19 = vcombine.low (!%p411_p9), %v453_v7, %v457_v8 }
  0x60   : > { %v465_v16 = vld [vmem:[%s2297_s5 + $0xa0] sm:$0xff]  ;;  %v466_v18 = vld [vmem:[%s2297_s5 + $0xa8] sm:$0xff]  ;;  %1258 = vmatpush1.bf16.msra.mxu0 %v1740_v6  ;;  %1311 = vmatpush1.bf16.msra.mxu1 %v1742_v10  ;;  %v1750_v20 = vcombine.low %v454_v12, %v458_v13  ;;  %s1906_s28 = sshll.u32 (%p2015_p5), %s1726_s15, 5 }
  0x61   : > { %1259 = vmatprep.subr.bf16.mxu0 %v1749_v11  ;;  %v1757_v21 = vcombine.high %v461_v14, %v465_v16  ;;  %1312 = vmatprep.subr.bf16.mxu1 %v1751_v15  ;;  %v1759_v22 = vcombine.high %v462_v17, %v466_v18  ;;  %v469_v23 = vld [vmem:[%s2297_s5 + $0xc0] sm:$0xff]  ;;  %v470_v25 = vld [vmem:[%s2297_s5 + $0xc8] sm:$0xff]  ;;  %v1756_v27 = vcombine.low %v461_v14, %v465_v16  ;;  %s1622_s20 = scalar_lea.vmem (%p2015_p5), %s2564_s3, %s1906_s28 }
  0x62   : > { %v473_v24 = vld [vmem:[%s2297_s5 + $0xe0] sm:$0xff]  ;;  %v474_v26 = vld [vmem:[%s2297_s5 + $0xe8] sm:$0xff]  ;;  %v1758_v28 = vcombine.low %v462_v17, %v466_v18 }
  0x63   : > { %v1765_v29 = vcombine.high %v469_v23, %v473_v24  ;;  %v1767_v30 = vcombine.high %v470_v25, %v474_v26  ;;  %v477_v31 = vld [vmem:[%s2297_s5 + $0x100] sm:$0xff]  ;;  %v478_v33 = vld [vmem:[%s2297_s5 + $0x108] sm:$0xff]  ;;  %v1764_v35 = vcombine.low %v469_v23, %v473_v24  ;;  %v1766_v36 = vcombine.low %v470_v25, %v474_v26 }
  0x64   : > { %1260 = vmatpush1.bf16.msra.mxu0 %v1748_v19  ;;  %1313 = vmatpush1.bf16.msra.mxu1 %v1750_v20  ;;  %v481_v32 = vld [vmem:[%s2297_s5 + $0x120] sm:$0xff]  ;;  %v482_v34 = vld [vmem:[%s2297_s5 + $0x128] sm:$0xff] }
  0x65   : > { %1261 = vmatprep.subr.bf16.mxu0 %v1757_v21  ;;  %1314 = vmatprep.subr.bf16.mxu1 %v1759_v22  ;;  %v1773_v37 = vcombine.high %v477_v31, %v481_v32  ;;  %v1775_v38 = vcombine.high %v478_v33, %v482_v34  ;;  %v485_v39 = vld [vmem:[%s2297_s5 + $0x140] sm:$0xff]  ;;  %v486_v41 = vld [vmem:[%s2297_s5 + $0x148] sm:$0xff]  ;;  %v1772_v44 = vcombine.low %v477_v31, %v481_v32 }
  0x66   : > { %v489_v40 = vld [vmem:[%s2297_s5 + $0x160] sm:$0xff]  ;;  %v490_v42 = vld [vmem:[%s2297_s5 + $0x168] sm:$0xff]  ;;  %v1774_v45 = vcombine.low %v478_v33, %v482_v34 }
  0x67   : > { %v1781_v46 = vcombine.high %v485_v39, %v489_v40  ;;  %v1783_v47 = vcombine.high %v486_v41, %v490_v42  ;;  %v493_v48 = vld [vmem:[%s2297_s5 + $0x180] sm:$0xff]  ;;  %v494_v50 = vld [vmem:[%s2297_s5 + $0x188] sm:$0xff]  ;;  %v1780_v52 = vcombine.low %v485_v39, %v489_v40  ;;  %v1782_v53 = vcombine.low %v486_v41, %v490_v42 }
  0x68   : > { %1262 = vmatpush1.bf16.msra.mxu0 %v1756_v27  ;;  %1315 = vmatpush1.bf16.msra.mxu1 %v1758_v28  ;;  %v497_v49 = vld [vmem:[%s2297_s5 + $0x1a0] sm:$0xff]  ;;  %v498_v51 = vld [vmem:[%s2297_s5 + $0x1a8] sm:$0xff] }
  0x69   : > { %1263 = vmatprep.subr.bf16.mxu0 %v1765_v29  ;;  %1316 = vmatprep.subr.bf16.mxu1 %v1767_v30  ;;  %v1789_v54 = vcombine.high %v493_v48, %v497_v49  ;;  %v1791_v55 = vcombine.high %v494_v50, %v498_v51  ;;  %v501_v56 = vld [vmem:[%s2297_s5 + $0x1c0] sm:$0xff]  ;;  %v502_v58 = vld [vmem:[%s2297_s5 + $0x1c8] sm:$0xff]  ;;  %v1788_v60 = vcombine.low %v493_v48, %v497_v49 }
  0x6a   : > { %v505_v57 = vld [vmem:[%s2297_s5 + $0x1e0] sm:$0xff]  ;;  %v506_v59 = vld [vmem:[%s2297_s5 + $0x1e8] sm:$0xff]  ;;  %v1790_v61 = vcombine.low %v494_v50, %v498_v51 }
  0x6b   : > { %v1797_v62 = vcombine.high %v501_v56, %v505_v57  ;;  %v1799_v63 = vcombine.high %v502_v58, %v506_v59  ;;  %v509_v1 = vld [vmem:[%s2297_s5 + $0x200] sm:$0xff]  ;;  %v510_v3 = vld [vmem:[%s2297_s5 + $0x208] sm:$0xff]  ;;  %v1796_v5 = vcombine.low %v501_v56, %v505_v57  ;;  %v1798_v6 = vcombine.low %v502_v58, %v506_v59 }
  0x6c   : > { %1264 = vmatpush1.bf16.msra.mxu0 %v1764_v35  ;;  %1317 = vmatpush1.bf16.msra.mxu1 %v1766_v36  ;;  %v513_v2 = vld [vmem:[%s2297_s5 + $0x220] sm:$0xff]  ;;  %v514_v4 = vld [vmem:[%s2297_s5 + $0x228] sm:$0xff] }
  0x6d   : > { %1265 = vmatprep.subr.bf16.mxu0 %v1773_v37  ;;  %1318 = vmatprep.subr.bf16.mxu1 %v1775_v38  ;;  %v1805_v7 = vcombine.high %v509_v1, %v513_v2  ;;  %v1807_v8 = vcombine.high %v510_v3, %v514_v4  ;;  %v517_v9 = vld [vmem:[%s2297_s5 + $0x240] sm:$0xff]  ;;  %v518_v11 = vld [vmem:[%s2297_s5 + $0x248] sm:$0xff]  ;;  %v1804_v13 = vcombine.low %v509_v1, %v513_v2  ;;  %v575_v38 = vld [vmem:[%s2563_s2 + $0x10] sm:$0xff] }
  0x6e   : > { %v521_v10 = vld [vmem:[%s2297_s5 + $0x260] sm:$0xff]  ;;  %v522_v12 = vld [vmem:[%s2297_s5 + $0x268] sm:$0xff]  ;;  %v1806_v14 = vcombine.low %v510_v3, %v514_v4  ;;  %589 = vperm.xlu1 %1933, %v575_v38  }
  0x6f   : > { %v1813_v15 = vcombine.high %v517_v9, %v521_v10  ;;  %v1815_v16 = vcombine.high %v518_v11, %v522_v12  ;;  %v525_v17 = vld [vmem:[%s2297_s5 + $0x280] sm:$0xff]  ;;  %v526_v19 = vld [vmem:[%s2297_s5 + $0x288] sm:$0xff]  ;;  %v1812_v21 = vcombine.low %v517_v9, %v521_v10  ;;  %v1814_v22 = vcombine.low %v518_v11, %v522_v12  ;;  %v452_v9 = vld [vmem:[%s2297_s5 + $0x38] sm:$0xff] }
  0x70   : > { %1266 = vmatpush1.bf16.msra.mxu0 %v1772_v44  ;;  %1319 = vmatpush1.bf16.msra.mxu1 %v1774_v45  ;;  %v529_v18 = vld [vmem:[%s2297_s5 + $0x2a0] sm:$0xff]  ;;  %v530_v20 = vld [vmem:[%s2297_s5 + $0x2a8] sm:$0xff] }
  0x71   : > { %1267 = vmatprep.subr.bf16.mxu0 %v1781_v46  ;;  %1320 = vmatprep.subr.bf16.mxu1 %v1783_v47  ;;  %v1821_v23 = vcombine.high %v525_v17, %v529_v18  ;;  %v1823_v24 = vcombine.high %v526_v19, %v530_v20  ;;  %v533_v25 = vld [vmem:[%s2297_s5 + $0x2c0] sm:$0xff]  ;;  %v534_v27 = vld [vmem:[%s2297_s5 + $0x2c8] sm:$0xff]  ;;  %v1820_v29 = vcombine.low %v525_v17, %v529_v18  ;;  %v456_v17 = vld [vmem:[%s2297_s5 + $0x58] sm:$0xff] }
  0x72   : > { %v537_v26 = vld [vmem:[%s2297_s5 + $0x2e0] sm:$0xff]  ;;  %v538_v28 = vld [vmem:[%s2297_s5 + $0x2e8] sm:$0xff]  ;;  %v1822_v30 = vcombine.low %v526_v19, %v530_v20  ;;  %594 = vperm.xlu1 %1933, %v576_v43   ;;  %v460_v18 = vld [vmem:[%s2297_s5 + $0x78] sm:$0xff] }
  0x73   : > { %v1829_v31 = vcombine.high %v533_v25, %v537_v26  ;;  %v1831_v32 = vcombine.high %v534_v27, %v538_v28  ;;  %v541_v33 = vld [vmem:[%s2297_s5 + $0x300] sm:$0xff]  ;;  %v542_v36 = vld [vmem:[%s2297_s5 + $0x308] sm:$0xff]  ;;  %v1828_v39 = vcombine.low %v533_v25, %v537_v26  ;;  %v1830_v41 = vcombine.low %v534_v27, %v538_v28  ;;  %v2393_v25 = vld [vmem:[%s2561_s0 + $0x14] ss:$8 sps:$4 sm:$0xff]  }
  0x74   : > { %1268 = vmatpush1.bf16.msra.mxu0 %v1780_v52  ;;  %1321 = vmatpush1.bf16.msra.mxu1 %v1782_v53  ;;  %v545_v34 = vld [vmem:[%s2297_s5 + $0x320] sm:$0xff]  ;;  %v546_v37 = vld [vmem:[%s2297_s5 + $0x328] sm:$0xff]  ;;  %v464_v26 = vld [vmem:[%s2297_s5 + $0x98] sm:$0xff] }
  0x75   : > { %1269 = vmatprep.subr.bf16.mxu0 %v1789_v54  ;;  %1322 = vmatprep.subr.bf16.mxu1 %v1791_v55  ;;  %v573_v35 = vld [vmem:[%s2563_s2] sm:$0xff]  ;;  %v574_v40 = vld [vmem:[%s2563_s2 + $0x8] sm:$0xff]  ;;  %v1837_v42 = vcombine.high %v541_v33, %v545_v34  ;;  %v1839_v44 = vcombine.high %v542_v36, %v546_v37  ;;  %v1836_v49 = vcombine.low %v541_v33, %v545_v34  ;;  %v468_v27 = vld [vmem:[%s2297_s5 + $0xb8] sm:$0xff] }
  0x76   : > { %579 = vperm.xlu0 %1932, %v573_v35   ;;  %v549_v45 = vld [vmem:[%s2297_s5 + $0x340] sm:$0xff]  ;;  %v550_v47 = vld [vmem:[%s2297_s5 + $0x348] sm:$0xff]  ;;  %v1838_v50 = vcombine.low %v542_v36, %v546_v37  ;;  %v475_v33 = vld [vmem:[%s2297_s5 + $0xf0] sm:$0xff]  ;;  %v1762_v38 = vcombine.low %v464_v26, %v468_v27 }
  0x77   : > { %v553_v46 = vld [vmem:[%s2297_s5 + $0x360] sm:$0xff]  ;;  %v554_v48 = vld [vmem:[%s2297_s5 + $0x368] sm:$0xff]  ;;  %v472_v34 = vld [vmem:[%s2297_s5 + $0xd8] sm:$0xff] }
  0x78   : > { %1270 = vmatpush1.bf16.msra.mxu0 %v1788_v60  ;;  %1323 = vmatpush1.bf16.msra.mxu1 %v1790_v61  ;;  %v1845_v51 = vcombine.high %v549_v45, %v553_v46  ;;  %v1847_v52 = vcombine.high %v550_v47, %v554_v48  ;;  %v557_v53 = vld [vmem:[%s2297_s5 + $0x380] sm:$0xff]  ;;  %v558_v55 = vld [vmem:[%s2297_s5 + $0x388] sm:$0xff]  ;;  %v1844_v57 = vcombine.low %v549_v45, %v553_v46  ;;  %v476_v35 = vld [vmem:[%s2297_s5 + $0xf8] sm:$0xff] }
  0x79   : > { %1271 = vmatprep.subr.bf16.mxu0 %v1797_v62  ;;  %1324 = vmatprep.subr.bf16.mxu1 %v1799_v63  ;;  %v561_v54 = vld [vmem:[%s2297_s5 + $0x3a0] sm:$0xff]  ;;  %v562_v56 = vld [vmem:[%s2297_s5 + $0x3a8] sm:$0xff]  ;;  %v1846_v58 = vcombine.low %v550_v47, %v554_v48  ;;  %v2408_v36 = vld [vmem:[%s2561_s0 + $0x10] ss:$8 sps:$4 sm:$0xff]   ;;  %v1770_v46 = vcombine.low %v472_v34, %v476_v35 }
  0x7a   : > { %584 = vperm.xlu0 %1932, %v574_v40   ;;  %v1853_v59 = vcombine.high %v557_v53, %v561_v54  ;;  %v1855_v60 = vcombine.high %v558_v55, %v562_v56  ;;  %v565_v61 = vld [vmem:[%s2297_s5 + $0x3c0] sm:$0xff]  ;;  %v566_v63 = vld [vmem:[%s2297_s5 + $0x3c8] sm:$0xff]  ;;  %v1852_v2 = vcombine.low %v557_v53, %v561_v54  ;;  %v1854_v3 = vcombine.low %v558_v55, %v562_v56  ;;  %v480_v43 = vld [vmem:[%s2297_s5 + $0x118] sm:$0xff] }
  0x7b   : > { %v569_v62 = vld [vmem:[%s2297_s5 + $0x3e0] sm:$0xff]  ;;  %v570_v1 = vld [vmem:[%s2297_s5 + $0x3e8] sm:$0xff]  ;;  %v1771_v40 = vcombine.high %v472_v34, %v476_v35  ;;  %v535_v35 = vld [vmem:[%s2297_s5 + $0x2d0] sm:$0xff] }
  0x7c   : > { %1272 = vmatpush1.bf16.msra.mxu0 %v1796_v5  ;;  %1325 = vmatpush1.bf16.msra.mxu1 %v1798_v6  ;;  %v1861_v4 = vcombine.high %v565_v61, %v569_v62  ;;  %v1863_v5 = vcombine.high %v566_v63, %v570_v1  ;;  %v447_v6 = vld [vmem:[%s2297_s5 + $0x10] sm:$0xff]  ;;  %v1860_v10 = vcombine.low %v565_v61, %v569_v62 }
  0x7d   : > { %1273 = vmatprep.subr.bf16.mxu0 %v1805_v7  ;;  %1326 = vmatprep.subr.bf16.mxu1 %v1807_v8  ;;  %v451_v7 = vld [vmem:[%s2297_s5 + $0x30] sm:$0xff]  ;;  %v448_v8 = vld [vmem:[%s2297_s5 + $0x18] sm:$0xff]  ;;  %v1862_v11 = vcombine.low %v566_v63, %v570_v1 }
  0x7e   : > { %v1745_v12 = vcombine.high %v447_v6, %v451_v7  ;;  %v1744_v19 = vcombine.low %v447_v6, %v451_v7  ;;  %v1746_v20 = vcombine.low %v448_v8, %v452_v9  ;;  %v503_v1 = vld [vmem:[%s2297_s5 + $0x1d0] sm:$0xff] }
  0x80   : > { %1274 = vmatpush1.bf16.msra.mxu0 %v1804_v13  ;;  %1327 = vmatpush1.bf16.msra.mxu1 %v1806_v14  ;;  %v1747_v13 = vcombine.high %v448_v8, %v452_v9  ;;  %v455_v14 = vld [vmem:[%s2297_s5 + $0x50] sm:$0xff] }
  0x81   : > { %1275 = vmatprep.subr.bf16.mxu0 %v1813_v15  ;;  %1328 = vmatprep.subr.bf16.mxu1 %v1815_v16  ;;  %v459_v15 = vld [vmem:[%s2297_s5 + $0x70] sm:$0xff]  ;;  %v2384_v16 = vld [vmem:[%s2561_s0] ss:$8 sps:$4 sm:$0xff]  }
  0x82   : > { %v1752_v28 = vcombine.low %v455_v14, %v459_v15  ;;  %v511_v9 = vld [vmem:[%s2297_s5 + $0x210] sm:$0xff] }
  0x84   : > { %1276 = vmatpush1.bf16.msra.mxu0 %v1812_v21  ;;  %1329 = vmatpush1.bf16.msra.mxu1 %v1814_v22  ;;  %v1753_v21 = vcombine.high %v455_v14, %v459_v15  ;;  %v1755_v22 = vcombine.high %v456_v17, %v460_v18 }
  0x85   : > { %1277 = vmatprep.subr.bf16.mxu0 %v1821_v23  ;;  %1330 = vmatprep.subr.bf16.mxu1 %v1823_v24  ;;  %v463_v23 = vld [vmem:[%s2297_s5 + $0x90] sm:$0xff] }
  0x86   : > { %v467_v24 = vld [vmem:[%s2297_s5 + $0xb0] sm:$0xff] }
  0x87   : > { %v1760_v37 = vcombine.low %v463_v23, %v467_v24 }
  0x88   : > { %1278 = vmatpush1.bf16.msra.mxu0 %v1820_v29  ;;  %1331 = vmatpush1.bf16.msra.mxu1 %v1822_v30  ;;  %v1754_v29 = vcombine.low %v456_v17, %v460_v18  ;;  %v1761_v30 = vcombine.high %v463_v23, %v467_v24  ;;  %v519_v18 = vld [vmem:[%s2297_s5 + $0x250] sm:$0xff] }
  0x89   : > { %1279 = vmatprep.subr.bf16.mxu0 %v1829_v31  ;;  %1332 = vmatprep.subr.bf16.mxu1 %v1831_v32  ;;  %v1763_v31 = vcombine.high %v464_v26, %v468_v27  ;;  %v471_v32 = vld [vmem:[%s2297_s5 + $0xd0] sm:$0xff] }
  0x8a   : > { %v1768_v45 = vcombine.low %v471_v32, %v475_v33  ;;  %v527_v27 = vld [vmem:[%s2297_s5 + $0x290] sm:$0xff] }
  0x8c   : > { %1280 = vmatpush1.bf16.msra.mxu0 %v1828_v39  ;;  %1333 = vmatpush1.bf16.msra.mxu1 %v1830_v41  ;;  %v1769_v39 = vcombine.high %v471_v32, %v475_v33  ;;  %v479_v41 = vld [vmem:[%s2297_s5 + $0x110] sm:$0xff] }
  0x8d   : > { %1281 = vmatprep.subr.bf16.mxu0 %v1837_v42  ;;  %1334 = vmatprep.subr.bf16.mxu1 %v1839_v44  ;;  %v483_v42 = vld [vmem:[%s2297_s5 + $0x130] sm:$0xff]  ;;  %v484_v44 = vld [vmem:[%s2297_s5 + $0x138] sm:$0xff] }
  0x8e   : > { %v1777_v47 = vcombine.high %v479_v41, %v483_v42  ;;  %v1779_v48 = vcombine.high %v480_v43, %v484_v44  ;;  %v1776_v53 = vcombine.low %v479_v41, %v483_v42  ;;  %v1778_v54 = vcombine.low %v480_v43, %v484_v44  ;;  %v543_v44 = vld [vmem:[%s2297_s5 + $0x310] sm:$0xff] }
  0x90   : > { %1282 = vmatpush1.bf16.msra.mxu0 %v1836_v49  ;;  %1335 = vmatpush1.bf16.msra.mxu1 %v1838_v50  ;;  %v487_v49 = vld [vmem:[%s2297_s5 + $0x150] sm:$0xff] }
  0x91   : > { %1283 = vmatprep.subr.bf16.mxu0 %v1845_v51  ;;  %1336 = vmatprep.subr.bf16.mxu1 %v1847_v52  ;;  %v491_v50 = vld [vmem:[%s2297_s5 + $0x170] sm:$0xff]  ;;  %v488_v51 = vld [vmem:[%s2297_s5 + $0x158] sm:$0xff] }
  0x92   : > { %v492_v52 = vld [vmem:[%s2297_s5 + $0x178] sm:$0xff]  ;;  %v1785_v55 = vcombine.high %v487_v49, %v491_v50  ;;  %v1784_v61 = vcombine.low %v487_v49, %v491_v50 }
  0x93   : > { %v1787_v56 = vcombine.high %v488_v51, %v492_v52 }
  0x94   : > { %1284 = vmatpush1.bf16.msra.mxu0 %v1844_v57  ;;  %1337 = vmatpush1.bf16.msra.mxu1 %v1846_v58  ;;  %v495_v57 = vld [vmem:[%s2297_s5 + $0x190] sm:$0xff] }
  0x95   : > { %1285 = vmatprep.subr.bf16.mxu0 %v1853_v59  ;;  %1338 = vmatprep.subr.bf16.mxu1 %v1855_v60  ;;  %v499_v58 = vld [vmem:[%s2297_s5 + $0x1b0] sm:$0xff]  ;;  %v496_v59 = vld [vmem:[%s2297_s5 + $0x198] sm:$0xff] }
  0x96   : > { %v500_v60 = vld [vmem:[%s2297_s5 + $0x1b8] sm:$0xff]  ;;  %v1793_v62 = vcombine.high %v495_v57, %v499_v58 }
  0x97   : > { %v1795_v63 = vcombine.high %v496_v59, %v500_v60  ;;  %v1794_v6 = vcombine.low %v496_v59, %v500_v60  ;;  %v559_v60 = vld [vmem:[%s2297_s5 + $0x390] sm:$0xff] }
  0x98   : > { %1286 = vmatpush1.bf16.msra.mxu0 %v1852_v2  ;;  %1339 = vmatpush1.bf16.msra.mxu1 %v1854_v3  ;;  %v507_v2 = vld [vmem:[%s2297_s5 + $0x1f0] sm:$0xff]  ;;  %v504_v3 = vld [vmem:[%s2297_s5 + $0x1d8] sm:$0xff] }
  0x99   : > { %1287 = vmatprep.subr.bf16.mxu0 %v1861_v4  ;;  %1340 = vmatprep.subr.bf16.mxu1 %v1863_v5  ;;  %v508_v4 = vld [vmem:[%s2297_s5 + $0x1f8] sm:$0xff]  ;;  %v1792_v5 = vcombine.low %v495_v57, %v499_v58  ;;  %v1801_v7 = vcombine.high %v503_v1, %v507_v2 }
  0x9a   : > { %v1803_v8 = vcombine.high %v504_v3, %v508_v4  ;;  %v1802_v14 = vcombine.low %v504_v3, %v508_v4  ;;  %v567_v4 = vld [vmem:[%s2297_s5 + $0x3d0] sm:$0xff] }
  0x9c   : > { %1288 = vmatpush1.bf16.msra.mxu0 %v1860_v10  ;;  %1341 = vmatpush1.bf16.msra.mxu1 %v1862_v11  ;;  %v515_v10 = vld [vmem:[%s2297_s5 + $0x230] sm:$0xff]  ;;  %v512_v11 = vld [vmem:[%s2297_s5 + $0x218] sm:$0xff] }
  0x9d   : > { %1363 = vmatprep.subr.bf16.mxu0 %v1745_v12  ;;  %1416 = vmatprep.subr.bf16.mxu1 %v1747_v13  ;;  %v516_v12 = vld [vmem:[%s2297_s5 + $0x238] sm:$0xff]  ;;  %v1800_v13 = vcombine.low %v503_v1, %v507_v2  ;;  %v1809_v15 = vcombine.high %v511_v9, %v515_v10 }
  0x9e   : > { %v1811_v17 = vcombine.high %v512_v11, %v516_v12  ;;  %v1810_v23 = vcombine.low %v512_v11, %v516_v12 }
  0x9f   : > { %1290 = vmatmul.mubr.bf16.vlgmr.msra.gmra.mrb[0].mxu0 %v2384_v16  ;;  %1343 = vmatmul.mubr.bf16.vlgmr.msra.gmra.mrb[0].mxu1 %v2384_v16 }
  0xa0   : > { %1364 = vmatpush1.bf16.msra.mxu0 %v1744_v19  ;;  %1417 = vmatpush1.bf16.msra.mxu1 %v1746_v20  ;;  %v523_v19 = vld [vmem:[%s2297_s5 + $0x270] sm:$0xff]  ;;  %v520_v20 = vld [vmem:[%s2297_s5 + $0x258] sm:$0xff] }
  0xa1   : > { %1365 = vmatprep.subr.bf16.mxu0 %v1753_v21  ;;  %1418 = vmatprep.subr.bf16.mxu1 %v1755_v22  ;;  %v524_v21 = vld [vmem:[%s2297_s5 + $0x278] sm:$0xff]  ;;  %v1808_v22 = vcombine.low %v511_v9, %v515_v10  ;;  %v1817_v24 = vcombine.high %v519_v18, %v523_v19 }
  0xa2   : > { %1299 = vmatprep.mubr.bf16.mxu0 %v2393_v25  ;;  %1352 = vmatprep.mubr.bf16.mxu1 %v2393_v25  ;;  %v1819_v26 = vcombine.high %v520_v20, %v524_v21  ;;  %v1818_v32 = vcombine.low %v520_v20, %v524_v21 }
  0xa4   : > { %1366 = vmatpush1.bf16.msra.mxu0 %v1752_v28  ;;  %1419 = vmatpush1.bf16.msra.mxu1 %v1754_v29  ;;  %v531_v28 = vld [vmem:[%s2297_s5 + $0x2b0] sm:$0xff]  ;;  %v528_v29 = vld [vmem:[%s2297_s5 + $0x298] sm:$0xff] }
  0xa5   : > { %1367 = vmatprep.subr.bf16.mxu0 %v1761_v30  ;;  %1420 = vmatprep.subr.bf16.mxu1 %v1763_v31  ;;  %v532_v30 = vld [vmem:[%s2297_s5 + $0x2b8] sm:$0xff]  ;;  %v1816_v31 = vcombine.low %v519_v18, %v523_v19  ;;  %v1825_v33 = vcombine.high %v527_v27, %v531_v28 }
  0xa6   : > { %v1827_v34 = vcombine.high %v528_v29, %v532_v30  ;;  %v1826_v41 = vcombine.low %v528_v29, %v532_v30 }
  0xa7   : > { %1300 = vmatmul.mubr.bf16.gmra.mrb[4].mxu0 %v2408_v36  ;;  %1353 = vmatmul.mubr.bf16.gmra.mrb[4].mxu1 %v2408_v36 }
  0xa8   : > { %1368 = vmatpush1.bf16.msra.mxu0 %v1760_v37  ;;  %1421 = vmatpush1.bf16.msra.mxu1 %v1762_v38  ;;  %v539_v37 = vld [vmem:[%s2297_s5 + $0x2f0] sm:$0xff]  ;;  %v536_v38 = vld [vmem:[%s2297_s5 + $0x2d8] sm:$0xff] }
  0xa9   : > { %1369 = vmatprep.subr.bf16.mxu0 %v1769_v39  ;;  %1422 = vmatprep.subr.bf16.mxu1 %v1771_v40  ;;  %v540_v39 = vld [vmem:[%s2297_s5 + $0x2f8] sm:$0xff]  ;;  %v1824_v40 = vcombine.low %v527_v27, %v531_v28  ;;  %v1833_v42 = vcombine.high %v535_v35, %v539_v37 }
  0xaa   : > { %1395 = vmatprep.mubr.bf16.mxu0 %v2291_v0  ;;  %1448 = vmatprep.mubr.bf16.mxu1 %v2291_v0  ;;  %v1786_v0 = vcombine.low %v488_v51, %v492_v52  ;;  %v1835_v43 = vcombine.high %v536_v38, %v540_v39  ;;  %v1834_v49 = vcombine.low %v536_v38, %v540_v39  ;;  %v551_v52 = vld [vmem:[%s2297_s5 + $0x350] sm:$0xff] }
  0xac   : > { %1370 = vmatpush1.bf16.msra.mxu0 %v1768_v45  ;;  %1423 = vmatpush1.bf16.msra.mxu1 %v1770_v46  ;;  %v547_v45 = vld [vmem:[%s2297_s5 + $0x330] sm:$0xff]  ;;  %v544_v46 = vld [vmem:[%s2297_s5 + $0x318] sm:$0xff] }
  0xad   : > { %1371 = vmatprep.subr.bf16.mxu0 %v1777_v47  ;;  %1424 = vmatprep.subr.bf16.mxu1 %v1779_v48  ;;  %v548_v47 = vld [vmem:[%s2297_s5 + $0x338] sm:$0xff]  ;;  %v1832_v48 = vcombine.low %v535_v35, %v539_v37  ;;  %v1841_v50 = vcombine.high %v543_v44, %v547_v45 }
  0xae   : > { %v1843_v51 = vcombine.high %v544_v46, %v548_v47  ;;  %v1842_v57 = vcombine.low %v544_v46, %v548_v47 }
  0xb0   : > { %1372 = vmatpush1.bf16.msra.mxu0 %v1776_v53  ;;  %1425 = vmatpush1.bf16.msra.mxu1 %v1778_v54  ;;  %v555_v53 = vld [vmem:[%s2297_s5 + $0x370] sm:$0xff]  ;;  %v552_v54 = vld [vmem:[%s2297_s5 + $0x358] sm:$0xff] }
  0xb1   : > { %1373 = vmatprep.subr.bf16.mxu0 %v1785_v55  ;;  %1426 = vmatprep.subr.bf16.mxu1 %v1787_v56  ;;  %v556_v55 = vld [vmem:[%s2297_s5 + $0x378] sm:$0xff]  ;;  %v1840_v56 = vcombine.low %v543_v44, %v547_v45  ;;  %v1849_v58 = vcombine.high %v551_v52, %v555_v53 }
  0xb2   : > { %v1851_v59 = vcombine.high %v552_v54, %v556_v55  ;;  %v1850_v1 = vcombine.low %v552_v54, %v556_v55 }
  0xb4   : > { %1374 = vmatpush1.bf16.msra.mxu0 %v1784_v61  ;;  %1427 = vmatpush1.bf16.msra.mxu1 %v1786_v0  ;;  %v563_v61 = vld [vmem:[%s2297_s5 + $0x3b0] sm:$0xff]  ;;  %v560_v0 = vld [vmem:[%s2297_s5 + $0x398] sm:$0xff] }
  0xb5   : > { %1375 = vmatprep.subr.bf16.mxu0 %v1793_v62  ;;  %1428 = vmatprep.subr.bf16.mxu1 %v1795_v63  ;;  %v564_v62 = vld [vmem:[%s2297_s5 + $0x3b8] sm:$0xff]  ;;  %v1848_v63 = vcombine.low %v551_v52, %v555_v53  ;;  %v1857_v2 = vcombine.high %v559_v60, %v563_v61 }
  0xb6   : > { %v1859_v3 = vcombine.high %v560_v0, %v564_v62  ;;  %v1858_v9 = vcombine.low %v560_v0, %v564_v62 }
  0xb8   : > { %1376 = vmatpush1.bf16.msra.mxu0 %v1792_v5  ;;  %1429 = vmatpush1.bf16.msra.mxu1 %v1794_v6  ;;  %v571_v5 = vld [vmem:[%s2297_s5 + $0x3f0] sm:$0xff]  ;;  %v568_v6 = vld [vmem:[%s2297_s5 + $0x3d8] sm:$0xff] }
  0xb9   : > { %1377 = vmatprep.subr.bf16.mxu0 %v1801_v7  ;;  %1430 = vmatprep.subr.bf16.mxu1 %v1803_v8  ;;  %v572_v7 = vld [vmem:[%s2297_s5 + $0x3f8] sm:$0xff]  ;;  %v1856_v8 = vcombine.low %v559_v60, %v563_v61  ;;  %v1865_v10 = vcombine.high %v567_v4, %v571_v5  ;;  %v1864_v12 = vcombine.low %v567_v4, %v571_v5 }
  0xba   : > { %v1867_v11 = vcombine.high %v568_v6, %v572_v7 }
  0xbc   : > { %1378 = vmatpush1.bf16.msra.mxu0 %v1800_v13  ;;  %1431 = vmatpush1.bf16.msra.mxu1 %v1802_v14  ;;  %v1866_v13 = vcombine.low %v568_v6, %v572_v7 }
  0xbd   : > { %1379 = vmatprep.subr.bf16.mxu0 %v1809_v15  ;;  %1432 = vmatprep.subr.bf16.mxu1 %v1811_v17 }
  0xc0   : > { %1380 = vmatpush1.bf16.msra.mxu0 %v1808_v22  ;;  %1433 = vmatpush1.bf16.msra.mxu1 %v1810_v23 }
  0xc1   : > { %1381 = vmatprep.subr.bf16.mxu0 %v1817_v24  ;;  %1434 = vmatprep.subr.bf16.mxu1 %v1819_v26 }
  0xc4   : > { %1382 = vmatpush1.bf16.msra.mxu0 %v1816_v31  ;;  %1435 = vmatpush1.bf16.msra.mxu1 %v1818_v32 }
  0xc5   : > { %1383 = vmatprep.subr.bf16.mxu0 %v1825_v33  ;;  %1436 = vmatprep.subr.bf16.mxu1 %v1827_v34 }
  0xc8   : > { %1384 = vmatpush1.bf16.msra.mxu0 %v1824_v40  ;;  %1437 = vmatpush1.bf16.msra.mxu1 %v1826_v41 }
  0xc9   : > { %1385 = vmatprep.subr.bf16.mxu0 %v1833_v42  ;;  %1438 = vmatprep.subr.bf16.mxu1 %v1835_v43 }
  0xcc   : > { %1386 = vmatpush1.bf16.msra.mxu0 %v1832_v48  ;;  %1439 = vmatpush1.bf16.msra.mxu1 %v1834_v49 }
  0xcd   : > { %1387 = vmatprep.subr.bf16.mxu0 %v1841_v50  ;;  %1440 = vmatprep.subr.bf16.mxu1 %v1843_v51 }
  0xd0   : > { %1388 = vmatpush1.bf16.msra.mxu0 %v1840_v56  ;;  %1441 = vmatpush1.bf16.msra.mxu1 %v1842_v57 }
  0xd1   : > { %1389 = vmatprep.subr.bf16.mxu0 %v1849_v58  ;;  %1442 = vmatprep.subr.bf16.mxu1 %v1851_v59 }
  0xd4   : > { %1390 = vmatpush1.bf16.msra.mxu0 %v1848_v63  ;;  %1443 = vmatpush1.bf16.msra.mxu1 %v1850_v1 }
  0xd5   : > { %1391 = vmatprep.subr.bf16.mxu0 %v1857_v2  ;;  %1444 = vmatprep.subr.bf16.mxu1 %v1859_v3 }
  0xd8   : > { %1392 = vmatpush1.bf16.msra.mxu0 %v1856_v8  ;;  %1445 = vmatpush1.bf16.msra.mxu1 %v1858_v9 }
  0xd9   : > { %1393 = vmatprep.subr.bf16.mxu0 %v1865_v10  ;;  %1446 = vmatprep.subr.bf16.mxu1 %v1867_v11 }
  0xdc   : > { %1394 = vmatpush1.bf16.msra.mxu0 %v1864_v12  ;;  %1447 = vmatpush1.bf16.msra.mxu1 %v1866_v13 }
  0xdf   : > { %1396 = vmatmul.mubr.bf16.vlgmr.msra.gmra.mrb[8].mxu0 %v2384_v16  ;;  %1449 = vmatmul.mubr.bf16.vlgmr.msra.gmra.mrb[8].mxu1 %v2384_v16 }
  0xe0   : > { %1405 = vmatprep.mubr.bf16.mxu0 %v2393_v25  ;;  %1458 = vmatprep.mubr.bf16.mxu1 %v2393_v25 }
  0xe7   : > { %1406 = vmatmul.mubr.bf16.gmra.mrb[12].mxu0 %v2408_v36  ;;  %1459 = vmatmul.mubr.bf16.gmra.mrb[12].mxu1 %v2408_v36 }
  0xed   : > { %v2470_v15 = vpop.permute.xlu1 %589 }
  0xf1   : > { %v2487_v45 = vpop.permute.xlu1 %594 }
  0xf5   : > { %v2468_v14 = vpop.permute.xlu0 %579 }
  0xf9   : > { %v2472_v18 = vpop.permute.xlu0 %584 }
 0x172   : > { %v1291_v17 = vpop.f32.mrb[0].mxu0  ;;  %v1344_v20 = vpop.f32.mrb[0].mxu1 }
 0x173   : > { %v1292_v19 = vadd.f32 %v1291_v17, %v2468_v14  ;;  %v1293_v21 = vpop.f32.mrb[1].mxu0  ;;  %v1345_v16 = vadd.f32 %v1344_v20, %v2468_v14  ;;  %v1346_v22 = vpop.f32.mrb[1].mxu1 }
 0x174   : > { %v1294_v25 = vadd.f32 %v1293_v21, %v2468_v14  ;;  %v1295_v23 = vpop.f32.mrb[2].mxu0  ;;  %v1347_v24 = vadd.f32 %v1346_v22, %v2468_v14  ;;  %v1348_v27 = vpop.f32.mrb[2].mxu1 }
 0x175   : > { %v1469_v36 = vmax.f32 %v1292_v19, 0.0  ;;  %v1296_v26 = vadd.f32 %v1295_v23, %v2472_v18  ;;  %v1297_v28 = vpop.f32.mrb[3].mxu0  ;;  %v1471_v29 = vmax.f32 %v1345_v16, 0.0  ;;  %v1349_v31 = vadd.f32 %v1348_v27, %v2472_v18  ;;  %v1350_v33 = vpop.f32.mrb[3].mxu1 }
 0x176   : > { %v1470_v30 = vmax.f32 %v1294_v25, 0.0  ;;  %v1298_v32 = vadd.f32 %v1297_v28, %v2472_v18  ;;  %v1472_v34 = vmax.f32 %v1347_v24, 0.0  ;;  %v1351_v37 = vadd.f32 %v1350_v33, %v2472_v18 }
 0x177   : > { %v1477_v35 = vmax.f32 %v1296_v26, 0.0  ;;  %v1479_v39 = vmax.f32 %v1349_v31, 0.0 }
 0x178   : > { %v1890_v38 = vpack.c.bf16 %v1470_v30, %v1469_v36  ;;  %v1478_v40 = vmax.f32 %v1298_v32, 0.0  ;;  %v1891_v41 = vpack.c.bf16 %v1472_v34, %v1471_v29  ;;  %v1480_v42 = vmax.f32 %v1351_v37, 0.0 }
 0x17a   : > { %1597 = vst [vmem:[%s2484_s12] sm:$0xff] %v1890_v38  ;;  %v1894_v43 = vpack.c.bf16 %v1478_v40, %v1477_v35  ;;  %v1301_v44 = vpop.f32.mrb[4].mxu0  ;;  %1598 = vst [vmem:[%s2484_s12 + $0x8] sm:$0xff] %v1891_v41  ;;  %v1895_v46 = vpack.c.bf16 %v1480_v42, %v1479_v39  ;;  %v1354_v48 = vpop.f32.mrb[4].mxu1 }
 0x17b   : > { %v1302_v47 = vadd.f32 %v1301_v44, %v2470_v15  ;;  %v1303_v49 = vpop.f32.mrb[5].mxu0  ;;  %v1355_v50 = vadd.f32 %v1354_v48, %v2470_v15  ;;  %v1356_v52 = vpop.f32.mrb[5].mxu1 }
 0x17c   : > { %1601 = vst [vmem:[%s2484_s12 + $0x20] sm:$0xff] %v1894_v43  ;;  %v1304_v51 = vadd.f32 %v1303_v49, %v2470_v15  ;;  %v1305_v53 = vpop.f32.mrb[6].mxu0  ;;  %1602 = vst [vmem:[%s2484_s12 + $0x28] sm:$0xff] %v1895_v46  ;;  %v1357_v55 = vadd.f32 %v1356_v52, %v2470_v15  ;;  %v1358_v56 = vpop.f32.mrb[6].mxu1 }
 0x17d   : > { %v1485_v54 = vmax.f32 %v1302_v47, 0.0  ;;  %v1306_v57 = vadd.f32 %v1305_v53, %v2487_v45  ;;  %v1307_v58 = vpop.f32.mrb[7].mxu0  ;;  %v1487_v59 = vmax.f32 %v1355_v50, 0.0  ;;  %v1359_v0 = vadd.f32 %v1358_v56, %v2487_v45  ;;  %v1360_v62 = vpop.f32.mrb[7].mxu1 }
 0x17e   : > { %v1486_v60 = vmax.f32 %v1304_v51, 0.0  ;;  %v1308_v61 = vadd.f32 %v1307_v58, %v2487_v45  ;;  %v1488_v63 = vmax.f32 %v1357_v55, 0.0  ;;  %v1361_v2 = vadd.f32 %v1360_v62, %v2487_v45 }
 0x17f   : > { %v1493_v1 = vmax.f32 %v1306_v57, 0.0  ;;  %v1495_v5 = vmax.f32 %v1359_v0, 0.0 }
 0x180   : > { %v1898_v3 = vpack.c.bf16 %v1486_v60, %v1485_v54  ;;  %v1494_v4 = vmax.f32 %v1308_v61, 0.0  ;;  %v1899_v6 = vpack.c.bf16 %v1488_v63, %v1487_v59  ;;  %v1496_v7 = vmax.f32 %v1361_v2, 0.0 }
 0x182   : > { %1605 = vst [vmem:[%s2484_s12 + $0x40] sm:$0xff] %v1898_v3  ;;  %v1902_v8 = vpack.c.bf16 %v1494_v4, %v1493_v1  ;;  %1606 = vst [vmem:[%s2484_s12 + $0x48] sm:$0xff] %v1899_v6  ;;  %v1903_v9 = vpack.c.bf16 %v1496_v7, %v1495_v5  ;;  %v1637_v3 = vld [vmem:[%s2484_s12 + $0x8] sm:$0xff] (%p2015_p5) }
 0x183   : > { %v1643_v6 = vld [vmem:[%s2484_s12 + $0x20] sm:$0xff] (%p2015_p5)  ;;  %v1645_v7 = vld [vmem:[%s2484_s12 + $0x28] sm:$0xff] (%p2015_p5)  ;;  %1638 = vst [vmem:[%s1622_s20 + $0x8] sm:$0xff] (%p2015_p5), %v1637_v3 }
 0x184   : > { %1609 = vst [vmem:[%s2484_s12 + $0x60] sm:$0xff] %v1902_v8  ;;  %1610 = vst [vmem:[%s2484_s12 + $0x68] sm:$0xff] %v1903_v9 }
 0x185   : > { %1644 = vst [vmem:[%s1622_s20 + $0x80] sm:$0xff] (%p2015_p5), %v1643_v6  ;;  %1646 = vst [vmem:[%s1622_s20 + $0x88] sm:$0xff] (%p2015_p5), %v1645_v7 }
 0x1b2   : > { %v1397_v10 = vpop.f32.mrb[8].mxu0  ;;  %v1450_v12 = vpop.f32.mrb[8].mxu1 }
 0x1b3   : > { %v1398_v11 = vadd.f32 %v1397_v10, %v2468_v14  ;;  %v1399_v13 = vpop.f32.mrb[9].mxu0  ;;  %v1451_v17 = vadd.f32 %v1450_v12, %v2468_v14  ;;  %v1452_v20 = vpop.f32.mrb[9].mxu1  ;;  %v1651_v10 = vld [vmem:[%s2484_s12 + $0x40] sm:$0xff] (%p2015_p5) }
 0x1b4   : > { %v1400_v19 = vadd.f32 %v1399_v13, %v2468_v14  ;;  %v1401_v21 = vpop.f32.mrb[10].mxu0  ;;  %v1453_v25 = vadd.f32 %v1452_v20, %v2468_v14  ;;  %v1454_v23 = vpop.f32.mrb[10].mxu1  ;;  %1652 = vst [vmem:[%s1622_s20 + $0x100] sm:$0xff] (%p2015_p5), %v1651_v10 }
 0x1b5   : > { %v1473_v16 = vmax.f32 %v1398_v11, 0.0  ;;  %v1402_v22 = vadd.f32 %v1401_v21, %v2472_v18  ;;  %v1403_v36 = vpop.f32.mrb[11].mxu0  ;;  %v1475_v24 = vmax.f32 %v1451_v17, 0.0  ;;  %v1455_v27 = vadd.f32 %v1454_v23, %v2472_v18  ;;  %v1456_v29 = vpop.f32.mrb[11].mxu1  ;;  %v1653_v11 = vld [vmem:[%s2484_s12 + $0x48] sm:$0xff] (%p2015_p5)  ;;  %v1659_v17 = vld [vmem:[%s2484_s12 + $0x60] sm:$0xff] (%p2015_p5) }
 0x1b6   : > { %v1474_v26 = vmax.f32 %v1400_v19, 0.0  ;;  %v1404_v28 = vadd.f32 %v1403_v36, %v2472_v18  ;;  %v1476_v30 = vmax.f32 %v1453_v25, 0.0  ;;  %v1457_v32 = vadd.f32 %v1456_v29, %v2472_v18  ;;  %1654 = vst [vmem:[%s1622_s20 + $0x108] sm:$0xff] (%p2015_p5), %v1653_v11  ;;  %v1661_v19 = vld [vmem:[%s2484_s12 + $0x68] sm:$0xff] (%p2015_p5)  ;;  %1660 = vst [vmem:[%s1622_s20 + $0x180] sm:$0xff] (%p2015_p5), %v1659_v17 }
 0x1b7   : > { %v1481_v31 = vmax.f32 %v1402_v22, 0.0  ;;  %v1483_v14 = vmax.f32 %v1455_v27, 0.0  ;;  %1662 = vst [vmem:[%s1622_s20 + $0x188] sm:$0xff] (%p2015_p5), %v1661_v19 }
 0x1b8   : > { %v1892_v33 = vpack.c.bf16 %v1474_v26, %v1473_v16  ;;  %v1482_v34 = vmax.f32 %v1404_v28, 0.0  ;;  %v1893_v35 = vpack.c.bf16 %v1476_v30, %v1475_v24  ;;  %v1484_v37 = vmax.f32 %v1457_v32, 0.0 }
 0x1ba   : > { %1599 = vst [vmem:[%s2484_s12 + $0x10] sm:$0xff] %v1892_v33  ;;  %v1896_v38 = vpack.c.bf16 %v1482_v34, %v1481_v31  ;;  %v1407_v39 = vpop.f32.mrb[12].mxu0  ;;  %1600 = vst [vmem:[%s2484_s12 + $0x18] sm:$0xff] %v1893_v35  ;;  %v1897_v40 = vpack.c.bf16 %v1484_v37, %v1483_v14  ;;  %v1460_v42 = vpop.f32.mrb[12].mxu1 }
 0x1bb   : > { %v1408_v41 = vadd.f32 %v1407_v39, %v2470_v15  ;;  %v1409_v43 = vpop.f32.mrb[13].mxu0  ;;  %v1461_v44 = vadd.f32 %v1460_v42, %v2470_v15  ;;  %v1462_v46 = vpop.f32.mrb[13].mxu1 }
 0x1bc   : > { %1603 = vst [vmem:[%s2484_s12 + $0x30] sm:$0xff] %v1896_v38  ;;  %v1410_v18 = vadd.f32 %v1409_v43, %v2470_v15  ;;  %v1411_v47 = vpop.f32.mrb[14].mxu0  ;;  %1604 = vst [vmem:[%s2484_s12 + $0x38] sm:$0xff] %v1897_v40  ;;  %v1463_v49 = vadd.f32 %v1462_v46, %v2470_v15  ;;  %v1464_v51 = vpop.f32.mrb[14].mxu1 }
 0x1bd   : > { %v1489_v48 = vmax.f32 %v1408_v41, 0.0  ;;  %v1412_v50 = vadd.f32 %v1411_v47, %v2487_v45  ;;  %v1413_v52 = vpop.f32.mrb[15].mxu0  ;;  %v1491_v53 = vmax.f32 %v1461_v44, 0.0  ;;  %v1465_v55 = vadd.f32 %v1464_v51, %v2487_v45  ;;  %v1466_v57 = vpop.f32.mrb[15].mxu1 }
 0x1be   : > { %v1490_v54 = vmax.f32 %v1410_v18, 0.0  ;;  %v1414_v56 = vadd.f32 %v1413_v52, %v2487_v45  ;;  %v1492_v58 = vmax.f32 %v1463_v49, 0.0  ;;  %v1467_v60 = vadd.f32 %v1466_v57, %v2487_v45  ;;  %1619 = sbr.rel (!%p2015_p5) target bundleno = 461 (0x1cd), region = 59  ;;  %v1635_v45 = vld [vmem:[%s2484_s12] sm:$0xff] (%p2015_p5) }
 0x1bf   : > { %v1497_v59 = vmax.f32 %v1412_v50, 0.0  ;;  %v1499_v61 = vmax.f32 %v1465_v55, 0.0  ;;  %1636 = vst [vmem:[%s1622_s20] sm:$0xff] (%p2015_p5), %v1635_v45 }
 0x1c0   : > { %v1900_v15 = vpack.c.bf16 %v1490_v54, %v1489_v48  ;;  %v1498_v0 = vmax.f32 %v1414_v56, 0.0  ;;  %v1901_v62 = vpack.c.bf16 %v1492_v58, %v1491_v53  ;;  %v1500_v63 = vmax.f32 %v1467_v60, 0.0 }
 0x1c1   : > { %v1639_v4 = vld [vmem:[%s2484_s12 + $0x10] sm:$0xff] (%p2015_p5)  ;;  %v1641_v5 = vld [vmem:[%s2484_s12 + $0x18] sm:$0xff] (%p2015_p5) }
 0x1c2   : > { %1607 = vst [vmem:[%s2484_s12 + $0x50] sm:$0xff] %v1900_v15  ;;  %v1904_v1 = vpack.c.bf16 %v1498_v0, %v1497_v59  ;;  %1608 = vst [vmem:[%s2484_s12 + $0x58] sm:$0xff] %v1901_v62  ;;  %v1905_v2 = vpack.c.bf16 %v1500_v63, %v1499_v61 }
 0x1c3   : > { %1640 = vst [vmem:[%s1622_s20 + $0x10] sm:$0xff] (%p2015_p5), %v1639_v4  ;;  %1642 = vst [vmem:[%s1622_s20 + $0x18] sm:$0xff] (%p2015_p5), %v1641_v5  ;;  %v1647_v8 = vld [vmem:[%s2484_s12 + $0x30] sm:$0xff] (%p2015_p5)  ;;  %v1649_v9 = vld [vmem:[%s2484_s12 + $0x38] sm:$0xff] (%p2015_p5) }
 0x1c4   : > { %1611 = vst [vmem:[%s2484_s12 + $0x70] sm:$0xff] %v1904_v1  ;;  %1612 = vst [vmem:[%s2484_s12 + $0x78] sm:$0xff] %v1905_v2 }
 0x1c5   : > { %1648 = vst [vmem:[%s1622_s20 + $0x90] sm:$0xff] %v1647_v8  ;;  %1650 = vst [vmem:[%s1622_s20 + $0x98] sm:$0xff] %v1649_v9 }
 0x1c9   : > { %v1655_v12 = vld [vmem:[%s2484_s12 + $0x50] sm:$0xff]  ;;  %v1657_v13 = vld [vmem:[%s2484_s12 + $0x58] sm:$0xff] }
 0x1ca   : > { %1656 = vst [vmem:[%s1622_s20 + $0x110] sm:$0xff] %v1655_v12  ;;  %1658 = vst [vmem:[%s1622_s20 + $0x118] sm:$0xff] %v1657_v13 }
 0x1cb   : > { %v1663_v20 = vld [vmem:[%s2484_s12 + $0x70] sm:$0xff]  ;;  %v1665_v21 = vld [vmem:[%s2484_s12 + $0x78] sm:$0xff] }
 0x1cc   : > { %1664 = vst [vmem:[%s1622_s20 + $0x190] sm:$0xff] %v1663_v20  ;;  %1666 = vst [vmem:[%s1622_s20 + $0x198] sm:$0xff] %v1665_v21 }
 0x1cd PF: > { %p10_p10 = scmp.ge.s32.totalorder %s2002_s16, 6   ;;  %s2566_s12 = smov %s1958_s13 }
 0x1ce   : > { %s2567_s13 = smov %s2013_s19  ;;  %s2568_s14 = smov %s2002_s16 }
 0x1cf   :  { %12 = sbr.rel (!%p10_p10) target bundleno = 2 (0x2), region = 113 }

// kernel: forward.5
= control target key start
LH: loop header
LB: loop body
LE: loop exit
PB: predicated region body
PF: predicated region fallthrough
CT: control target
= control target key end

     0   :  { %s2447_s12 = smov 0   ;;  %s2449_s13 = smov 0   ;;  %s3007_s0 = inlined_call_operand.vmem [shape: bf16[64,512], index: 0, kind: input, shape index: {}]   ;;  %s3008_s1 = inlined_call_operand.vmem [shape: bf16[512,1024], index: 1, kind: input, shape index: {}]   ;;  %s3009_s2 = inlined_call_operand.vmem [shape: f32[64,1], index: 2, kind: input, shape index: {}]   ;;  %s3010_s3 = inlined_call_operand.vmem [shape: bf16[64,1024], index: 3, kind: output, shape index: {}]  }
   0x1   :  { %s2451_s14 = smov 0  }
   0x2 LB: > { %s1902_s15 = sadd.s32 4294967295, %s2424_s14   ;;  %s2464_s16 = sadd.s32 1, %s2424_s14   ;;  %s2424_s14 = sphi %s2451_s14, %s3014_s14   ;;  %s2420_s13 = sphi %s2449_s13, %s3013_s13   ;;  %s2416_s12 = sphi %s2447_s12, %s3012_s12  }
   0x3   : > { %s38_s17 = ssub.s32 %s2424_s14, %s2464_s16  ;;  %s41_s18 = sadd.s32 1, %s2420_s13 }
   0x4   : > { %p39_p0 = scmp.eq.s32.totalorder %s38_s17, 0  ;;  %p48_p1 = scmp.ne.s32.totalorder %s2420_s13, %s2416_s12 }
   0x5   : > { %p49_p2 = scmp.eq.s32.totalorder %s2424_s14, 0  ;;  %p99_p3 = scmp.eq.s32.totalorder %s1902_s15, 1 }
   0x6   : > { %s2475_s19 = scalar_select %p39_p0, %s2420_s13, %s41_s18  }
   0x7   : > { %p50_p4 = por %p49_p2, %p48_p1  ;;  %p2477_p5 = por %p99_p3, %p48_p1 }
   0x8   : > { %p1905_p6 = scmp.ge.s32.totalorder %s2424_s14, 2 }
   0xa   : > { %127 = sbr.rel (%p1905_p6) target bundleno = 85 (0x55), region = 24 }
  0x11   : > { %130 = sbr.rel (!%p50_p4) target bundleno = 85 (0x55), region = 28  ;;  %s132_s21 = sand.u32 (%p50_p4), 1, %s2420_s13  }
  0x12   : > { %s2077_s22 = sshll.u32 (%p50_p4), %s2424_s14, 4  ;;  %s1906_s23 = sshll.u32 (%p50_p4), %s132_s21, 10 }
  0x13   : > { %s2487_s26 = scalar_lea.vmem (%p50_p4), %s3008_s1, %s2077_s22  ;;  %s2492_s27 = scalar_lea.vmem (%p50_p4), [#allocation2], %s1906_s23 }
  0x14   : > { %v150_v0 = vld [vmem:[%s2487_s26] sm:$0xff] (%p50_p4)  ;;  %v152_v1 = vld [vmem:[%s2487_s26 + $0x8] sm:$0xff] (%p50_p4) }
  0x15   : > { %v154_v2 = vld [vmem:[%s2487_s26 + $0x20] sm:$0xff] (%p50_p4)  ;;  %151 = vst [vmem:[%s2492_s27] sm:$0xff] (%p50_p4), %v150_v0  ;;  %153 = vst [vmem:[%s2492_s27 + $0x8] sm:$0xff] (%p50_p4), %v152_v1  ;;  %v156_v3 = vld [vmem:[%s2487_s26 + $0x28] sm:$0xff] (%p50_p4) }
  0x16   : > { %155 = vst [vmem:[%s2492_s27 + $0x10] sm:$0xff] (%p50_p4), %v154_v2  ;;  %v158_v4 = vld [vmem:[%s2487_s26 + $0x40] sm:$0xff] (%p50_p4)  ;;  %v160_v5 = vld [vmem:[%s2487_s26 + $0x48] sm:$0xff] (%p50_p4)  ;;  %157 = vst [vmem:[%s2492_s27 + $0x18] sm:$0xff] (%p50_p4), %v156_v3 }
  0x17   : > { %159 = vst [vmem:[%s2492_s27 + $0x20] sm:$0xff] (%p50_p4), %v158_v4  ;;  %161 = vst [vmem:[%s2492_s27 + $0x28] sm:$0xff] (%p50_p4), %v160_v5  ;;  %v162_v6 = vld [vmem:[%s2487_s26 + $0x60] sm:$0xff] (%p50_p4)  ;;  %v164_v7 = vld [vmem:[%s2487_s26 + $0x68] sm:$0xff] (%p50_p4) }
  0x18   : > { %v166_v8 = vld [vmem:[%s2487_s26 + $0x80] sm:$0xff]  ;;  %163 = vst [vmem:[%s2492_s27 + $0x30] sm:$0xff] %v162_v6  ;;  %165 = vst [vmem:[%s2492_s27 + $0x38] sm:$0xff] %v164_v7  ;;  %v168_v9 = vld [vmem:[%s2487_s26 + $0x88] sm:$0xff] }
  0x19   : > { %167 = vst [vmem:[%s2492_s27 + $0x40] sm:$0xff] %v166_v8  ;;  %v170_v10 = vld [vmem:[%s2487_s26 + $0xa0] sm:$0xff]  ;;  %v172_v11 = vld [vmem:[%s2487_s26 + $0xa8] sm:$0xff]  ;;  %169 = vst [vmem:[%s2492_s27 + $0x48] sm:$0xff] %v168_v9 }
  0x1a   : > { %171 = vst [vmem:[%s2492_s27 + $0x50] sm:$0xff] %v170_v10  ;;  %173 = vst [vmem:[%s2492_s27 + $0x58] sm:$0xff] %v172_v11  ;;  %v174_v12 = vld [vmem:[%s2487_s26 + $0xc0] sm:$0xff]  ;;  %v176_v13 = vld [vmem:[%s2487_s26 + $0xc8] sm:$0xff] }
  0x1b   : > { %v178_v14 = vld [vmem:[%s2487_s26 + $0xe0] sm:$0xff]  ;;  %175 = vst [vmem:[%s2492_s27 + $0x60] sm:$0xff] %v174_v12  ;;  %177 = vst [vmem:[%s2492_s27 + $0x68] sm:$0xff] %v176_v13  ;;  %v180_v15 = vld [vmem:[%s2487_s26 + $0xe8] sm:$0xff] }
  0x1c   : > { %179 = vst [vmem:[%s2492_s27 + $0x70] sm:$0xff] %v178_v14  ;;  %v182_v16 = vld [vmem:[%s2487_s26 + $0x100] sm:$0xff]  ;;  %v184_v17 = vld [vmem:[%s2487_s26 + $0x108] sm:$0xff]  ;;  %181 = vst [vmem:[%s2492_s27 + $0x78] sm:$0xff] %v180_v15 }
  0x1d   : > { %183 = vst [vmem:[%s2492_s27 + $0x80] sm:$0xff] %v182_v16  ;;  %185 = vst [vmem:[%s2492_s27 + $0x88] sm:$0xff] %v184_v17  ;;  %v186_v18 = vld [vmem:[%s2487_s26 + $0x120] sm:$0xff]  ;;  %v188_v19 = vld [vmem:[%s2487_s26 + $0x128] sm:$0xff] }
  0x1e   : > { %v190_v20 = vld [vmem:[%s2487_s26 + $0x140] sm:$0xff]  ;;  %187 = vst [vmem:[%s2492_s27 + $0x90] sm:$0xff] %v186_v18  ;;  %189 = vst [vmem:[%s2492_s27 + $0x98] sm:$0xff] %v188_v19  ;;  %v192_v21 = vld [vmem:[%s2487_s26 + $0x148] sm:$0xff] }
  0x1f   : > { %191 = vst [vmem:[%s2492_s27 + $0xa0] sm:$0xff] %v190_v20  ;;  %v194_v22 = vld [vmem:[%s2487_s26 + $0x160] sm:$0xff]  ;;  %v196_v23 = vld [vmem:[%s2487_s26 + $0x168] sm:$0xff]  ;;  %193 = vst [vmem:[%s2492_s27 + $0xa8] sm:$0xff] %v192_v21 }
  0x20   : > { %195 = vst [vmem:[%s2492_s27 + $0xb0] sm:$0xff] %v194_v22  ;;  %197 = vst [vmem:[%s2492_s27 + $0xb8] sm:$0xff] %v196_v23  ;;  %v198_v24 = vld [vmem:[%s2487_s26 + $0x180] sm:$0xff]  ;;  %v200_v25 = vld [vmem:[%s2487_s26 + $0x188] sm:$0xff] }
  0x21   : > { %v202_v26 = vld [vmem:[%s2487_s26 + $0x1a0] sm:$0xff]  ;;  %199 = vst [vmem:[%s2492_s27 + $0xc0] sm:$0xff] %v198_v24  ;;  %201 = vst [vmem:[%s2492_s27 + $0xc8] sm:$0xff] %v200_v25  ;;  %v204_v27 = vld [vmem:[%s2487_s26 + $0x1a8] sm:$0xff] }
  0x22   : > { %203 = vst [vmem:[%s2492_s27 + $0xd0] sm:$0xff] %v202_v26  ;;  %v206_v28 = vld [vmem:[%s2487_s26 + $0x1c0] sm:$0xff]  ;;  %v208_v29 = vld [vmem:[%s2487_s26 + $0x1c8] sm:$0xff]  ;;  %205 = vst [vmem:[%s2492_s27 + $0xd8] sm:$0xff] %v204_v27 }
  0x23   : > { %207 = vst [vmem:[%s2492_s27 + $0xe0] sm:$0xff] %v206_v28  ;;  %209 = vst [vmem:[%s2492_s27 + $0xe8] sm:$0xff] %v208_v29  ;;  %v210_v30 = vld [vmem:[%s2487_s26 + $0x1e0] sm:$0xff]  ;;  %v212_v31 = vld [vmem:[%s2487_s26 + $0x1e8] sm:$0xff] }
  0x24   : > { %v214_v32 = vld [vmem:[%s2487_s26 + $0x200] sm:$0xff]  ;;  %211 = vst [vmem:[%s2492_s27 + $0xf0] sm:$0xff] %v210_v30  ;;  %213 = vst [vmem:[%s2492_s27 + $0xf8] sm:$0xff] %v212_v31  ;;  %v216_v33 = vld [vmem:[%s2487_s26 + $0x208] sm:$0xff] }
  0x25   : > { %215 = vst [vmem:[%s2492_s27 + $0x100] sm:$0xff] %v214_v32  ;;  %v218_v34 = vld [vmem:[%s2487_s26 + $0x220] sm:$0xff]  ;;  %v220_v35 = vld [vmem:[%s2487_s26 + $0x228] sm:$0xff]  ;;  %217 = vst [vmem:[%s2492_s27 + $0x108] sm:$0xff] %v216_v33 }
  0x26   : > { %219 = vst [vmem:[%s2492_s27 + $0x110] sm:$0xff] %v218_v34  ;;  %221 = vst [vmem:[%s2492_s27 + $0x118] sm:$0xff] %v220_v35  ;;  %v222_v36 = vld [vmem:[%s2487_s26 + $0x240] sm:$0xff]  ;;  %v224_v37 = vld [vmem:[%s2487_s26 + $0x248] sm:$0xff] }
  0x27   : > { %v226_v38 = vld [vmem:[%s2487_s26 + $0x260] sm:$0xff]  ;;  %223 = vst [vmem:[%s2492_s27 + $0x120] sm:$0xff] %v222_v36  ;;  %225 = vst [vmem:[%s2492_s27 + $0x128] sm:$0xff] %v224_v37  ;;  %v228_v39 = vld [vmem:[%s2487_s26 + $0x268] sm:$0xff] }
  0x28   : > { %227 = vst [vmem:[%s2492_s27 + $0x130] sm:$0xff] %v226_v38  ;;  %v230_v40 = vld [vmem:[%s2487_s26 + $0x280] sm:$0xff]  ;;  %v232_v41 = vld [vmem:[%s2487_s26 + $0x288] sm:$0xff]  ;;  %229 = vst [vmem:[%s2492_s27 + $0x138] sm:$0xff] %v228_v39 }
  0x29   : > { %231 = vst [vmem:[%s2492_s27 + $0x140] sm:$0xff] %v230_v40  ;;  %233 = vst [vmem:[%s2492_s27 + $0x148] sm:$0xff] %v232_v41  ;;  %v234_v42 = vld [vmem:[%s2487_s26 + $0x2a0] sm:$0xff]  ;;  %v236_v43 = vld [vmem:[%s2487_s26 + $0x2a8] sm:$0xff] }
  0x2a   : > { %v238_v44 = vld [vmem:[%s2487_s26 + $0x2c0] sm:$0xff]  ;;  %235 = vst [vmem:[%s2492_s27 + $0x150] sm:$0xff] %v234_v42  ;;  %237 = vst [vmem:[%s2492_s27 + $0x158] sm:$0xff] %v236_v43  ;;  %v240_v45 = vld [vmem:[%s2487_s26 + $0x2c8] sm:$0xff] }
  0x2b   : > { %239 = vst [vmem:[%s2492_s27 + $0x160] sm:$0xff] %v238_v44  ;;  %v242_v46 = vld [vmem:[%s2487_s26 + $0x2e0] sm:$0xff]  ;;  %v244_v47 = vld [vmem:[%s2487_s26 + $0x2e8] sm:$0xff]  ;;  %241 = vst [vmem:[%s2492_s27 + $0x168] sm:$0xff] %v240_v45 }
  0x2c   : > { %243 = vst [vmem:[%s2492_s27 + $0x170] sm:$0xff] %v242_v46  ;;  %245 = vst [vmem:[%s2492_s27 + $0x178] sm:$0xff] %v244_v47  ;;  %v246_v48 = vld [vmem:[%s2487_s26 + $0x300] sm:$0xff]  ;;  %v248_v49 = vld [vmem:[%s2487_s26 + $0x308] sm:$0xff] }
  0x2d   : > { %v250_v50 = vld [vmem:[%s2487_s26 + $0x320] sm:$0xff]  ;;  %247 = vst [vmem:[%s2492_s27 + $0x180] sm:$0xff] %v246_v48  ;;  %249 = vst [vmem:[%s2492_s27 + $0x188] sm:$0xff] %v248_v49  ;;  %v252_v51 = vld [vmem:[%s2487_s26 + $0x328] sm:$0xff] }
  0x2e   : > { %251 = vst [vmem:[%s2492_s27 + $0x190] sm:$0xff] %v250_v50  ;;  %v254_v52 = vld [vmem:[%s2487_s26 + $0x340] sm:$0xff]  ;;  %v256_v53 = vld [vmem:[%s2487_s26 + $0x348] sm:$0xff]  ;;  %253 = vst [vmem:[%s2492_s27 + $0x198] sm:$0xff] %v252_v51 }
  0x2f   : > { %255 = vst [vmem:[%s2492_s27 + $0x1a0] sm:$0xff] %v254_v52  ;;  %257 = vst [vmem:[%s2492_s27 + $0x1a8] sm:$0xff] %v256_v53  ;;  %v258_v54 = vld [vmem:[%s2487_s26 + $0x360] sm:$0xff]  ;;  %v260_v55 = vld [vmem:[%s2487_s26 + $0x368] sm:$0xff] }
  0x30   : > { %v262_v56 = vld [vmem:[%s2487_s26 + $0x380] sm:$0xff]  ;;  %259 = vst [vmem:[%s2492_s27 + $0x1b0] sm:$0xff] %v258_v54  ;;  %261 = vst [vmem:[%s2492_s27 + $0x1b8] sm:$0xff] %v260_v55  ;;  %v264_v57 = vld [vmem:[%s2487_s26 + $0x388] sm:$0xff] }
  0x31   : > { %263 = vst [vmem:[%s2492_s27 + $0x1c0] sm:$0xff] %v262_v56  ;;  %v266_v58 = vld [vmem:[%s2487_s26 + $0x3a0] sm:$0xff]  ;;  %v268_v59 = vld [vmem:[%s2487_s26 + $0x3a8] sm:$0xff]  ;;  %265 = vst [vmem:[%s2492_s27 + $0x1c8] sm:$0xff] %v264_v57 }
  0x32   : > { %267 = vst [vmem:[%s2492_s27 + $0x1d0] sm:$0xff] %v266_v58  ;;  %269 = vst [vmem:[%s2492_s27 + $0x1d8] sm:$0xff] %v268_v59  ;;  %v270_v60 = vld [vmem:[%s2487_s26 + $0x3c0] sm:$0xff]  ;;  %v272_v61 = vld [vmem:[%s2487_s26 + $0x3c8] sm:$0xff] }
  0x33   : > { %v274_v62 = vld [vmem:[%s2487_s26 + $0x3e0] sm:$0xff]  ;;  %271 = vst [vmem:[%s2492_s27 + $0x1e0] sm:$0xff] %v270_v60  ;;  %273 = vst [vmem:[%s2492_s27 + $0x1e8] sm:$0xff] %v272_v61  ;;  %v276_v63 = vld [vmem:[%s2487_s26 + $0x3e8] sm:$0xff] }
  0x34   : > { %275 = vst [vmem:[%s2492_s27 + $0x1f0] sm:$0xff] %v274_v62  ;;  %v278_v0 = vld [vmem:[%s2487_s26 + $0x400] sm:$0xff]  ;;  %v280_v1 = vld [vmem:[%s2487_s26 + $0x408] sm:$0xff]  ;;  %277 = vst [vmem:[%s2492_s27 + $0x1f8] sm:$0xff] %v276_v63 }
  0x35   : > { %279 = vst [vmem:[%s2492_s27 + $0x200] sm:$0xff] %v278_v0  ;;  %281 = vst [vmem:[%s2492_s27 + $0x208] sm:$0xff] %v280_v1  ;;  %v282_v2 = vld [vmem:[%s2487_s26 + $0x420] sm:$0xff]  ;;  %v284_v3 = vld [vmem:[%s2487_s26 + $0x428] sm:$0xff] }
  0x36   : > { %v286_v4 = vld [vmem:[%s2487_s26 + $0x440] sm:$0xff]  ;;  %283 = vst [vmem:[%s2492_s27 + $0x210] sm:$0xff] %v282_v2  ;;  %285 = vst [vmem:[%s2492_s27 + $0x218] sm:$0xff] %v284_v3  ;;  %v288_v5 = vld [vmem:[%s2487_s26 + $0x448] sm:$0xff] }
  0x37   : > { %287 = vst [vmem:[%s2492_s27 + $0x220] sm:$0xff] %v286_v4  ;;  %v290_v6 = vld [vmem:[%s2487_s26 + $0x460] sm:$0xff]  ;;  %v292_v7 = vld [vmem:[%s2487_s26 + $0x468] sm:$0xff]  ;;  %289 = vst [vmem:[%s2492_s27 + $0x228] sm:$0xff] %v288_v5 }
  0x38   : > { %291 = vst [vmem:[%s2492_s27 + $0x230] sm:$0xff] %v290_v6  ;;  %293 = vst [vmem:[%s2492_s27 + $0x238] sm:$0xff] %v292_v7  ;;  %v294_v8 = vld [vmem:[%s2487_s26 + $0x480] sm:$0xff]  ;;  %v296_v9 = vld [vmem:[%s2487_s26 + $0x488] sm:$0xff] }
  0x39   : > { %v298_v10 = vld [vmem:[%s2487_s26 + $0x4a0] sm:$0xff]  ;;  %295 = vst [vmem:[%s2492_s27 + $0x240] sm:$0xff] %v294_v8  ;;  %297 = vst [vmem:[%s2492_s27 + $0x248] sm:$0xff] %v296_v9  ;;  %v300_v11 = vld [vmem:[%s2487_s26 + $0x4a8] sm:$0xff] }
  0x3a   : > { %299 = vst [vmem:[%s2492_s27 + $0x250] sm:$0xff] %v298_v10  ;;  %v302_v12 = vld [vmem:[%s2487_s26 + $0x4c0] sm:$0xff]  ;;  %v304_v13 = vld [vmem:[%s2487_s26 + $0x4c8] sm:$0xff]  ;;  %301 = vst [vmem:[%s2492_s27 + $0x258] sm:$0xff] %v300_v11 }
  0x3b   : > { %303 = vst [vmem:[%s2492_s27 + $0x260] sm:$0xff] %v302_v12  ;;  %305 = vst [vmem:[%s2492_s27 + $0x268] sm:$0xff] %v304_v13  ;;  %v306_v14 = vld [vmem:[%s2487_s26 + $0x4e0] sm:$0xff]  ;;  %v308_v15 = vld [vmem:[%s2487_s26 + $0x4e8] sm:$0xff] }
  0x3c   : > { %v310_v16 = vld [vmem:[%s2487_s26 + $0x500] sm:$0xff]  ;;  %307 = vst [vmem:[%s2492_s27 + $0x270] sm:$0xff] %v306_v14  ;;  %309 = vst [vmem:[%s2492_s27 + $0x278] sm:$0xff] %v308_v15  ;;  %v312_v17 = vld [vmem:[%s2487_s26 + $0x508] sm:$0xff] }
  0x3d   : > { %311 = vst [vmem:[%s2492_s27 + $0x280] sm:$0xff] %v310_v16  ;;  %v314_v18 = vld [vmem:[%s2487_s26 + $0x520] sm:$0xff]  ;;  %v316_v19 = vld [vmem:[%s2487_s26 + $0x528] sm:$0xff]  ;;  %313 = vst [vmem:[%s2492_s27 + $0x288] sm:$0xff] %v312_v17 }
  0x3e   : > { %315 = vst [vmem:[%s2492_s27 + $0x290] sm:$0xff] %v314_v18  ;;  %317 = vst [vmem:[%s2492_s27 + $0x298] sm:$0xff] %v316_v19  ;;  %v318_v20 = vld [vmem:[%s2487_s26 + $0x540] sm:$0xff]  ;;  %v320_v21 = vld [vmem:[%s2487_s26 + $0x548] sm:$0xff] }
  0x3f   : > { %v322_v22 = vld [vmem:[%s2487_s26 + $0x560] sm:$0xff]  ;;  %319 = vst [vmem:[%s2492_s27 + $0x2a0] sm:$0xff] %v318_v20  ;;  %321 = vst [vmem:[%s2492_s27 + $0x2a8] sm:$0xff] %v320_v21  ;;  %v324_v23 = vld [vmem:[%s2487_s26 + $0x568] sm:$0xff] }
  0x40   : > { %323 = vst [vmem:[%s2492_s27 + $0x2b0] sm:$0xff] %v322_v22  ;;  %v326_v24 = vld [vmem:[%s2487_s26 + $0x580] sm:$0xff]  ;;  %v328_v25 = vld [vmem:[%s2487_s26 + $0x588] sm:$0xff]  ;;  %325 = vst [vmem:[%s2492_s27 + $0x2b8] sm:$0xff] %v324_v23 }
  0x41   : > { %327 = vst [vmem:[%s2492_s27 + $0x2c0] sm:$0xff] %v326_v24  ;;  %329 = vst [vmem:[%s2492_s27 + $0x2c8] sm:$0xff] %v328_v25  ;;  %v330_v26 = vld [vmem:[%s2487_s26 + $0x5a0] sm:$0xff]  ;;  %v332_v27 = vld [vmem:[%s2487_s26 + $0x5a8] sm:$0xff] }
  0x42   : > { %v334_v28 = vld [vmem:[%s2487_s26 + $0x5c0] sm:$0xff]  ;;  %331 = vst [vmem:[%s2492_s27 + $0x2d0] sm:$0xff] %v330_v26  ;;  %333 = vst [vmem:[%s2492_s27 + $0x2d8] sm:$0xff] %v332_v27  ;;  %v336_v29 = vld [vmem:[%s2487_s26 + $0x5c8] sm:$0xff] }
  0x43   : > { %335 = vst [vmem:[%s2492_s27 + $0x2e0] sm:$0xff] %v334_v28  ;;  %v338_v30 = vld [vmem:[%s2487_s26 + $0x5e0] sm:$0xff]  ;;  %v340_v31 = vld [vmem:[%s2487_s26 + $0x5e8] sm:$0xff]  ;;  %337 = vst [vmem:[%s2492_s27 + $0x2e8] sm:$0xff] %v336_v29 }
  0x44   : > { %339 = vst [vmem:[%s2492_s27 + $0x2f0] sm:$0xff] %v338_v30  ;;  %341 = vst [vmem:[%s2492_s27 + $0x2f8] sm:$0xff] %v340_v31  ;;  %v342_v32 = vld [vmem:[%s2487_s26 + $0x600] sm:$0xff]  ;;  %v344_v33 = vld [vmem:[%s2487_s26 + $0x608] sm:$0xff] }
  0x45   : > { %v346_v34 = vld [vmem:[%s2487_s26 + $0x620] sm:$0xff]  ;;  %343 = vst [vmem:[%s2492_s27 + $0x300] sm:$0xff] %v342_v32  ;;  %345 = vst [vmem:[%s2492_s27 + $0x308] sm:$0xff] %v344_v33  ;;  %v348_v35 = vld [vmem:[%s2487_s26 + $0x628] sm:$0xff] }
  0x46   : > { %347 = vst [vmem:[%s2492_s27 + $0x310] sm:$0xff] %v346_v34  ;;  %v350_v36 = vld [vmem:[%s2487_s26 + $0x640] sm:$0xff]  ;;  %v352_v37 = vld [vmem:[%s2487_s26 + $0x648] sm:$0xff]  ;;  %349 = vst [vmem:[%s2492_s27 + $0x318] sm:$0xff] %v348_v35 }
  0x47   : > { %351 = vst [vmem:[%s2492_s27 + $0x320] sm:$0xff] %v350_v36  ;;  %353 = vst [vmem:[%s2492_s27 + $0x328] sm:$0xff] %v352_v37  ;;  %v354_v38 = vld [vmem:[%s2487_s26 + $0x660] sm:$0xff]  ;;  %v356_v39 = vld [vmem:[%s2487_s26 + $0x668] sm:$0xff] }
  0x48   : > { %v358_v40 = vld [vmem:[%s2487_s26 + $0x680] sm:$0xff]  ;;  %355 = vst [vmem:[%s2492_s27 + $0x330] sm:$0xff] %v354_v38  ;;  %357 = vst [vmem:[%s2492_s27 + $0x338] sm:$0xff] %v356_v39  ;;  %v360_v41 = vld [vmem:[%s2487_s26 + $0x688] sm:$0xff] }
  0x49   : > { %359 = vst [vmem:[%s2492_s27 + $0x340] sm:$0xff] %v358_v40  ;;  %v362_v42 = vld [vmem:[%s2487_s26 + $0x6a0] sm:$0xff]  ;;  %v364_v43 = vld [vmem:[%s2487_s26 + $0x6a8] sm:$0xff]  ;;  %361 = vst [vmem:[%s2492_s27 + $0x348] sm:$0xff] %v360_v41 }
  0x4a   : > { %363 = vst [vmem:[%s2492_s27 + $0x350] sm:$0xff] %v362_v42  ;;  %365 = vst [vmem:[%s2492_s27 + $0x358] sm:$0xff] %v364_v43  ;;  %v366_v44 = vld [vmem:[%s2487_s26 + $0x6c0] sm:$0xff]  ;;  %v368_v45 = vld [vmem:[%s2487_s26 + $0x6c8] sm:$0xff] }
  0x4b   : > { %v370_v46 = vld [vmem:[%s2487_s26 + $0x6e0] sm:$0xff]  ;;  %367 = vst [vmem:[%s2492_s27 + $0x360] sm:$0xff] %v366_v44  ;;  %369 = vst [vmem:[%s2492_s27 + $0x368] sm:$0xff] %v368_v45  ;;  %v372_v47 = vld [vmem:[%s2487_s26 + $0x6e8] sm:$0xff] }
  0x4c   : > { %371 = vst [vmem:[%s2492_s27 + $0x370] sm:$0xff] %v370_v46  ;;  %v374_v48 = vld [vmem:[%s2487_s26 + $0x700] sm:$0xff]  ;;  %v376_v49 = vld [vmem:[%s2487_s26 + $0x708] sm:$0xff]  ;;  %373 = vst [vmem:[%s2492_s27 + $0x378] sm:$0xff] %v372_v47 }
  0x4d   : > { %375 = vst [vmem:[%s2492_s27 + $0x380] sm:$0xff] %v374_v48  ;;  %377 = vst [vmem:[%s2492_s27 + $0x388] sm:$0xff] %v376_v49  ;;  %v378_v50 = vld [vmem:[%s2487_s26 + $0x720] sm:$0xff]  ;;  %v380_v51 = vld [vmem:[%s2487_s26 + $0x728] sm:$0xff] }
  0x4e   : > { %v382_v52 = vld [vmem:[%s2487_s26 + $0x740] sm:$0xff]  ;;  %379 = vst [vmem:[%s2492_s27 + $0x390] sm:$0xff] %v378_v50  ;;  %381 = vst [vmem:[%s2492_s27 + $0x398] sm:$0xff] %v380_v51  ;;  %v384_v53 = vld [vmem:[%s2487_s26 + $0x748] sm:$0xff] }
  0x4f   : > { %383 = vst [vmem:[%s2492_s27 + $0x3a0] sm:$0xff] %v382_v52  ;;  %v386_v54 = vld [vmem:[%s2487_s26 + $0x760] sm:$0xff]  ;;  %v388_v55 = vld [vmem:[%s2487_s26 + $0x768] sm:$0xff]  ;;  %385 = vst [vmem:[%s2492_s27 + $0x3a8] sm:$0xff] %v384_v53 }
  0x50   : > { %387 = vst [vmem:[%s2492_s27 + $0x3b0] sm:$0xff] %v386_v54  ;;  %389 = vst [vmem:[%s2492_s27 + $0x3b8] sm:$0xff] %v388_v55  ;;  %v390_v56 = vld [vmem:[%s2487_s26 + $0x780] sm:$0xff]  ;;  %v392_v57 = vld [vmem:[%s2487_s26 + $0x788] sm:$0xff] }
  0x51   : > { %v394_v58 = vld [vmem:[%s2487_s26 + $0x7a0] sm:$0xff]  ;;  %391 = vst [vmem:[%s2492_s27 + $0x3c0] sm:$0xff] %v390_v56  ;;  %393 = vst [vmem:[%s2492_s27 + $0x3c8] sm:$0xff] %v392_v57  ;;  %v396_v59 = vld [vmem:[%s2487_s26 + $0x7a8] sm:$0xff] }
  0x52   : > { %395 = vst [vmem:[%s2492_s27 + $0x3d0] sm:$0xff] %v394_v58  ;;  %v398_v60 = vld [vmem:[%s2487_s26 + $0x7c0] sm:$0xff]  ;;  %v400_v61 = vld [vmem:[%s2487_s26 + $0x7c8] sm:$0xff]  ;;  %397 = vst [vmem:[%s2492_s27 + $0x3d8] sm:$0xff] %v396_v59 }
  0x53   : > { %399 = vst [vmem:[%s2492_s27 + $0x3e0] sm:$0xff] %v398_v60  ;;  %401 = vst [vmem:[%s2492_s27 + $0x3e8] sm:$0xff] %v400_v61  ;;  %v402_v62 = vld [vmem:[%s2487_s26 + $0x7e0] sm:$0xff]  ;;  %v404_v63 = vld [vmem:[%s2487_s26 + $0x7e8] sm:$0xff] }
  0x54   : > { %403 = vst [vmem:[%s2492_s27 + $0x3f0] sm:$0xff] %v402_v62  ;;  %405 = vst [vmem:[%s2492_s27 + $0x3f8] sm:$0xff] %v404_v63 }
  0x55 PF: > { %p1909_p7 = scmp.ge.s32.totalorder %s2424_s14, 1  ;;  %p410_p8 = scmp.lt.s32.totalorder %s2424_s14, 3 }
  0x57   : > { %p411_p9 = pnand %p1909_p7, %p410_p8 }
  0x58   : > { %s417_s28 = sand.u32 (!%p411_p9), 1, %s2416_s12   ;;  %v2284_v0 = vld [vmem:[%s3007_s0 + $0x4] ss:$16 sps:$4 sm:$0xff] (!%p411_p9)   ;;  %v2426_v35 = vmov (!%p411_p9), 0  }
  0x59   : > { %414 = sbr.rel (%p411_p9) target bundleno = 474 (0x1da), region = 51  ;;  %s1910_s29 = sshll.u32 (!%p411_p9), %s417_s28, 10  ;;  %1385 = vmatprep.mubr.bf16.mxu0 (!%p411_p9), %v2284_v0  ;;  %1531 = vmatprep.mubr.bf16.mxu1 (!%p411_p9), %v2284_v0 }
  0x5a   : > { %s2755_s5 = scalar_lea.vmem (!%p411_p9), [#allocation2], %s1910_s29  ;;  %2184 = vset.pattern.permute.xlu0 (!%p411_p9), %v2426_v35  ;;  %2185 = vset.pattern.permute.xlu1 (!%p411_p9), %v2426_v35  ;;  %v2377_v35 = vld [vmem:[%s3007_s0 + $0x60] ss:$16 sps:$4 sm:$0xff] (!%p411_p9)   ;;  %s1911_s22 = sshll.u32 (!%p411_p9), %s417_s28, 7 }
  0x5b   : > { %v2186_v1 = vld [vmem:[%s2755_s5 + $0x4] ss:$16 sps:$4 sm:$0xff] (!%p411_p9)   ;;  %v2188_v2 = vld [vmem:[%s2755_s5 + $0xc] ss:$16 sps:$4 sm:$0xff] (!%p411_p9)   ;;  %v2190_v3 = vld [vmem:[%s2755_s5] ss:$16 sps:$4 sm:$0xff] (!%p411_p9)  }
  0x5c   : > { %1353 = vmatprep.subr.bf16.mxu0 (!%p411_p9), %v2186_v1  ;;  %v2191_v4 = vld [vmem:[%s2755_s5 + $0x8] ss:$16 sps:$4 sm:$0xff] (!%p411_p9)   ;;  %1499 = vmatprep.subr.bf16.mxu1 (!%p411_p9), %v2188_v2  ;;  %v2192_v5 = vld [vmem:[%s2755_s5 + $0x24] ss:$16 sps:$4 sm:$0xff] (!%p411_p9)   ;;  %v2194_v6 = vld [vmem:[%s2755_s5 + $0x2c] ss:$16 sps:$4 sm:$0xff] (!%p411_p9)  }
  0x5d   : > { %1354 = vmatpush1.bf16.msra.mxu0 (!%p411_p9), %v2190_v3  ;;  %1500 = vmatpush1.bf16.msra.mxu1 (!%p411_p9), %v2191_v4  ;;  %v2196_v7 = vld [vmem:[%s2755_s5 + $0x20] ss:$16 sps:$4 sm:$0xff] (!%p411_p9)   ;;  %v2197_v8 = vld [vmem:[%s2755_s5 + $0x28] ss:$16 sps:$4 sm:$0xff] (!%p411_p9)   ;;  %v2198_v9 = vld [vmem:[%s2755_s5 + $0x44] ss:$16 sps:$4 sm:$0xff] (!%p411_p9)  }
  0x5e   : > { %1355 = vmatprep.subr.bf16.mxu0 (!%p411_p9), %v2192_v5  ;;  %1501 = vmatprep.subr.bf16.mxu1 (!%p411_p9), %v2194_v6  ;;  %v2200_v10 = vld [vmem:[%s2755_s5 + $0x4c] ss:$16 sps:$4 sm:$0xff] (!%p411_p9)   ;;  %v2202_v11 = vld [vmem:[%s2755_s5 + $0x40] ss:$16 sps:$4 sm:$0xff] (!%p411_p9)   ;;  %v2203_v12 = vld [vmem:[%s2755_s5 + $0x48] ss:$16 sps:$4 sm:$0xff] (!%p411_p9)  }
  0x5f   : > { %v2204_v13 = vld [vmem:[%s2755_s5 + $0x64] ss:$16 sps:$4 sm:$0xff] (!%p411_p9)   ;;  %v2206_v14 = vld [vmem:[%s2755_s5 + $0x6c] ss:$16 sps:$4 sm:$0xff] (!%p411_p9)   ;;  %v2208_v15 = vld [vmem:[%s2755_s5 + $0x60] ss:$16 sps:$4 sm:$0xff] (!%p411_p9)  }
  0x60   : > { %v2209_v16 = vld [vmem:[%s2755_s5 + $0x68] ss:$16 sps:$4 sm:$0xff]   ;;  %v2210_v17 = vld [vmem:[%s2755_s5 + $0x84] ss:$16 sps:$4 sm:$0xff]   ;;  %v2212_v18 = vld [vmem:[%s2755_s5 + $0x8c] ss:$16 sps:$4 sm:$0xff]  }
  0x61   : > { %1356 = vmatpush1.bf16.msra.mxu0 %v2196_v7  ;;  %1502 = vmatpush1.bf16.msra.mxu1 %v2197_v8  ;;  %v2214_v19 = vld [vmem:[%s2755_s5 + $0x80] ss:$16 sps:$4 sm:$0xff]   ;;  %v2215_v20 = vld [vmem:[%s2755_s5 + $0x88] ss:$16 sps:$4 sm:$0xff]   ;;  %v2216_v21 = vld [vmem:[%s2755_s5 + $0xa4] ss:$16 sps:$4 sm:$0xff]  }
  0x62   : > { %1357 = vmatprep.subr.bf16.mxu0 %v2198_v9  ;;  %1503 = vmatprep.subr.bf16.mxu1 %v2200_v10  ;;  %v2218_v22 = vld [vmem:[%s2755_s5 + $0xac] ss:$16 sps:$4 sm:$0xff]   ;;  %v2220_v23 = vld [vmem:[%s2755_s5 + $0xa0] ss:$16 sps:$4 sm:$0xff]   ;;  %v2221_v24 = vld [vmem:[%s2755_s5 + $0xa8] ss:$16 sps:$4 sm:$0xff]  }
  0x63   : > { %v2222_v25 = vld [vmem:[%s2755_s5 + $0xc4] ss:$16 sps:$4 sm:$0xff]   ;;  %v2224_v26 = vld [vmem:[%s2755_s5 + $0xcc] ss:$16 sps:$4 sm:$0xff]   ;;  %v2226_v27 = vld [vmem:[%s2755_s5 + $0xc0] ss:$16 sps:$4 sm:$0xff]  }
  0x64   : > { %v2227_v28 = vld [vmem:[%s2755_s5 + $0xc8] ss:$16 sps:$4 sm:$0xff]   ;;  %v2228_v29 = vld [vmem:[%s2755_s5 + $0xe4] ss:$16 sps:$4 sm:$0xff]   ;;  %v2230_v30 = vld [vmem:[%s2755_s5 + $0xec] ss:$16 sps:$4 sm:$0xff]  }
  0x65   : > { %1358 = vmatpush1.bf16.msra.mxu0 %v2202_v11  ;;  %1504 = vmatpush1.bf16.msra.mxu1 %v2203_v12  ;;  %v2232_v31 = vld [vmem:[%s2755_s5 + $0xe0] ss:$16 sps:$4 sm:$0xff]   ;;  %v2233_v32 = vld [vmem:[%s2755_s5 + $0xe8] ss:$16 sps:$4 sm:$0xff]   ;;  %v2234_v33 = vld [vmem:[%s2755_s5 + $0x104] ss:$16 sps:$4 sm:$0xff]  }
  0x66   : > { %1359 = vmatprep.subr.bf16.mxu0 %v2204_v13  ;;  %1505 = vmatprep.subr.bf16.mxu1 %v2206_v14  ;;  %v2236_v34 = vld [vmem:[%s2755_s5 + $0x10c] ss:$16 sps:$4 sm:$0xff]   ;;  %v2238_v36 = vld [vmem:[%s2755_s5 + $0x100] ss:$16 sps:$4 sm:$0xff]   ;;  %v2239_v37 = vld [vmem:[%s2755_s5 + $0x108] ss:$16 sps:$4 sm:$0xff]  }
  0x67   : > { %v2240_v38 = vld [vmem:[%s2755_s5 + $0x124] ss:$16 sps:$4 sm:$0xff]   ;;  %v2242_v39 = vld [vmem:[%s2755_s5 + $0x12c] ss:$16 sps:$4 sm:$0xff]   ;;  %v2244_v40 = vld [vmem:[%s2755_s5 + $0x120] ss:$16 sps:$4 sm:$0xff]  }
  0x68   : > { %v2245_v41 = vld [vmem:[%s2755_s5 + $0x128] ss:$16 sps:$4 sm:$0xff]   ;;  %v2246_v42 = vld [vmem:[%s2755_s5 + $0x144] ss:$16 sps:$4 sm:$0xff]   ;;  %v2248_v43 = vld [vmem:[%s2755_s5 + $0x14c] ss:$16 sps:$4 sm:$0xff]  }
  0x69   : > { %1360 = vmatpush1.bf16.msra.mxu0 %v2208_v15  ;;  %1506 = vmatpush1.bf16.msra.mxu1 %v2209_v16  ;;  %v2250_v44 = vld [vmem:[%s2755_s5 + $0x140] ss:$16 sps:$4 sm:$0xff]   ;;  %v2251_v45 = vld [vmem:[%s2755_s5 + $0x148] ss:$16 sps:$4 sm:$0xff]   ;;  %v2252_v46 = vld [vmem:[%s2755_s5 + $0x164] ss:$16 sps:$4 sm:$0xff]  }
  0x6a   : > { %1361 = vmatprep.subr.bf16.mxu0 %v2210_v17  ;;  %1507 = vmatprep.subr.bf16.mxu1 %v2212_v18  ;;  %v2254_v47 = vld [vmem:[%s2755_s5 + $0x16c] ss:$16 sps:$4 sm:$0xff]   ;;  %v2256_v48 = vld [vmem:[%s2755_s5 + $0x160] ss:$16 sps:$4 sm:$0xff]   ;;  %v2257_v49 = vld [vmem:[%s2755_s5 + $0x168] ss:$16 sps:$4 sm:$0xff]  }
  0x6b   : > { %v2258_v50 = vld [vmem:[%s2755_s5 + $0x184] ss:$16 sps:$4 sm:$0xff]   ;;  %v2260_v51 = vld [vmem:[%s2755_s5 + $0x18c] ss:$16 sps:$4 sm:$0xff]   ;;  %v2262_v52 = vld [vmem:[%s2755_s5 + $0x180] ss:$16 sps:$4 sm:$0xff]  }
  0x6c   : > { %v2263_v53 = vld [vmem:[%s2755_s5 + $0x188] ss:$16 sps:$4 sm:$0xff]   ;;  %v2264_v54 = vld [vmem:[%s2755_s5 + $0x1a4] ss:$16 sps:$4 sm:$0xff]   ;;  %v2266_v55 = vld [vmem:[%s2755_s5 + $0x1ac] ss:$16 sps:$4 sm:$0xff]  }
  0x6d   : > { %1362 = vmatpush1.bf16.msra.mxu0 %v2214_v19  ;;  %1508 = vmatpush1.bf16.msra.mxu1 %v2215_v20  ;;  %v2268_v56 = vld [vmem:[%s2755_s5 + $0x1a0] ss:$16 sps:$4 sm:$0xff]   ;;  %v2269_v57 = vld [vmem:[%s2755_s5 + $0x1a8] ss:$16 sps:$4 sm:$0xff]   ;;  %v2270_v58 = vld [vmem:[%s2755_s5 + $0x1c4] ss:$16 sps:$4 sm:$0xff]  }
  0x6e   : > { %1363 = vmatprep.subr.bf16.mxu0 %v2216_v21  ;;  %1509 = vmatprep.subr.bf16.mxu1 %v2218_v22  ;;  %v2272_v59 = vld [vmem:[%s2755_s5 + $0x1cc] ss:$16 sps:$4 sm:$0xff]   ;;  %v2274_v60 = vld [vmem:[%s2755_s5 + $0x1c0] ss:$16 sps:$4 sm:$0xff]   ;;  %v2275_v61 = vld [vmem:[%s2755_s5 + $0x1c8] ss:$16 sps:$4 sm:$0xff]  }
  0x6f   : > { %v2276_v62 = vld [vmem:[%s2755_s5 + $0x1e4] ss:$16 sps:$4 sm:$0xff]   ;;  %v2278_v63 = vld [vmem:[%s2755_s5 + $0x1ec] ss:$16 sps:$4 sm:$0xff]   ;;  %v2280_v0 = vld [vmem:[%s2755_s5 + $0x1e0] ss:$16 sps:$4 sm:$0xff]  }
  0x70   : > { %v2281_v1 = vld [vmem:[%s2755_s5 + $0x1e8] ss:$16 sps:$4 sm:$0xff]   ;;  %v2287_v2 = vld [vmem:[%s2755_s5 + $0x204] ss:$16 sps:$4 sm:$0xff]   ;;  %v2290_v3 = vld [vmem:[%s2755_s5 + $0x20c] ss:$16 sps:$4 sm:$0xff]  }
  0x71   : > { %1364 = vmatpush1.bf16.msra.mxu0 %v2220_v23  ;;  %1510 = vmatpush1.bf16.msra.mxu1 %v2221_v24  ;;  %v2282_v4 = vld [vmem:[%s3007_s0] ss:$16 sps:$4 sm:$0xff]   ;;  %v2288_v6 = vld [vmem:[%s2755_s5 + $0x208] ss:$16 sps:$4 sm:$0xff]   ;;  %v2293_v7 = vld [vmem:[%s2755_s5 + $0x224] ss:$16 sps:$4 sm:$0xff]  }
  0x72   : > { %1365 = vmatprep.subr.bf16.mxu0 %v2222_v25  ;;  %1511 = vmatprep.subr.bf16.mxu1 %v2224_v26  ;;  %v2285_v5 = vld [vmem:[%s2755_s5 + $0x200] ss:$16 sps:$4 sm:$0xff]   ;;  %v2296_v8 = vld [vmem:[%s2755_s5 + $0x22c] ss:$16 sps:$4 sm:$0xff]   ;;  %v2345_v9 = vld [vmem:[%s3007_s0 + $0x24] ss:$16 sps:$4 sm:$0xff]  }
  0x73   : > { %v2291_v10 = vld [vmem:[%s2755_s5 + $0x220] ss:$16 sps:$4 sm:$0xff]   ;;  %v2294_v11 = vld [vmem:[%s2755_s5 + $0x228] ss:$16 sps:$4 sm:$0xff]   ;;  %v2299_v12 = vld [vmem:[%s2755_s5 + $0x244] ss:$16 sps:$4 sm:$0xff]  }
  0x74   : > { %v2302_v13 = vld [vmem:[%s2755_s5 + $0x24c] ss:$16 sps:$4 sm:$0xff]   ;;  %v2347_v14 = vld [vmem:[%s3007_s0 + $0x20] ss:$16 sps:$4 sm:$0xff]   ;;  %v2300_v16 = vld [vmem:[%s2755_s5 + $0x248] ss:$16 sps:$4 sm:$0xff]  }
  0x75   : > { %1366 = vmatpush1.bf16.msra.mxu0 %v2226_v27  ;;  %1512 = vmatpush1.bf16.msra.mxu1 %v2227_v28  ;;  %v2297_v15 = vld [vmem:[%s2755_s5 + $0x240] ss:$16 sps:$4 sm:$0xff]   ;;  %v2305_v17 = vld [vmem:[%s2755_s5 + $0x264] ss:$16 sps:$4 sm:$0xff]   ;;  %v2308_v18 = vld [vmem:[%s2755_s5 + $0x26c] ss:$16 sps:$4 sm:$0xff]  }
  0x76   : > { %1367 = vmatprep.subr.bf16.mxu0 %v2228_v29  ;;  %1513 = vmatprep.subr.bf16.mxu1 %v2230_v30  ;;  %v2303_v19 = vld [vmem:[%s2755_s5 + $0x260] ss:$16 sps:$4 sm:$0xff]   ;;  %v2360_v20 = vld [vmem:[%s3007_s0 + $0x44] ss:$16 sps:$4 sm:$0xff]   ;;  %v2306_v21 = vld [vmem:[%s2755_s5 + $0x268] ss:$16 sps:$4 sm:$0xff]  }
  0x77   : > { %v2311_v22 = vld [vmem:[%s2755_s5 + $0x284] ss:$16 sps:$4 sm:$0xff]   ;;  %v2314_v23 = vld [vmem:[%s2755_s5 + $0x28c] ss:$16 sps:$4 sm:$0xff]   ;;  %v2309_v24 = vld [vmem:[%s2755_s5 + $0x280] ss:$16 sps:$4 sm:$0xff]  }
  0x78   : > { %v2362_v25 = vld [vmem:[%s3007_s0 + $0x40] ss:$16 sps:$4 sm:$0xff]   ;;  %v2312_v26 = vld [vmem:[%s2755_s5 + $0x288] ss:$16 sps:$4 sm:$0xff]   ;;  %v2317_v27 = vld [vmem:[%s2755_s5 + $0x2a4] ss:$16 sps:$4 sm:$0xff]  }
  0x79   : > { %1368 = vmatpush1.bf16.msra.mxu0 %v2232_v31  ;;  %1514 = vmatpush1.bf16.msra.mxu1 %v2233_v32  ;;  %v2320_v28 = vld [vmem:[%s2755_s5 + $0x2ac] ss:$16 sps:$4 sm:$0xff]   ;;  %v2375_v29 = vld [vmem:[%s3007_s0 + $0x64] ss:$16 sps:$4 sm:$0xff]   ;;  %v2315_v30 = vld [vmem:[%s2755_s5 + $0x2a0] ss:$16 sps:$4 sm:$0xff]  }
  0x7a   : > { %1369 = vmatprep.subr.bf16.mxu0 %v2234_v33  ;;  %1515 = vmatprep.subr.bf16.mxu1 %v2236_v34  ;;  %v2318_v31 = vld [vmem:[%s2755_s5 + $0x2a8] ss:$16 sps:$4 sm:$0xff]   ;;  %v2323_v32 = vld [vmem:[%s2755_s5 + $0x2c4] ss:$16 sps:$4 sm:$0xff]   ;;  %v2326_v33 = vld [vmem:[%s2755_s5 + $0x2cc] ss:$16 sps:$4 sm:$0xff]  }
  0x7b   : > { %v2321_v34 = vld [vmem:[%s2755_s5 + $0x2c0] ss:$16 sps:$4 sm:$0xff]   ;;  %s2956_s12 = scalar_lea.vmem [#allocation3], %s1911_s22  ;;  %s2094_s28 = sshll.u32 (%p2477_p5), %s1902_s15, 4 }
  0x7c   : > { %s1798_s20 = scalar_lea.vmem (%p2477_p5), %s3010_s3, %s2094_s28 }
  0x7d   : > { %1370 = vmatpush1.bf16.msra.mxu0 %v2238_v36  ;;  %1516 = vmatpush1.bf16.msra.mxu1 %v2239_v37  ;;  %v2324_v36 = vld [vmem:[%s2755_s5 + $0x2c8] ss:$16 sps:$4 sm:$0xff]   ;;  %v2329_v37 = vld [vmem:[%s2755_s5 + $0x2e4] ss:$16 sps:$4 sm:$0xff]  }
  0x7e   : > { %1371 = vmatprep.subr.bf16.mxu0 %v2240_v38  ;;  %1517 = vmatprep.subr.bf16.mxu1 %v2242_v39  ;;  %v2332_v38 = vld [vmem:[%s2755_s5 + $0x2ec] ss:$16 sps:$4 sm:$0xff]  }
  0x7f   : > { %v2392_v39 = vld [vmem:[%s3007_s0 + $0xc] ss:$16 sps:$4 sm:$0xff]  }
  0x81   : > { %1372 = vmatpush1.bf16.msra.mxu0 %v2244_v40  ;;  %1518 = vmatpush1.bf16.msra.mxu1 %v2245_v41  ;;  %v2327_v40 = vld [vmem:[%s2755_s5 + $0x2e0] ss:$16 sps:$4 sm:$0xff]   ;;  %v2330_v41 = vld [vmem:[%s2755_s5 + $0x2e8] ss:$16 sps:$4 sm:$0xff]  }
  0x82   : > { %1373 = vmatprep.subr.bf16.mxu0 %v2246_v42  ;;  %1519 = vmatprep.subr.bf16.mxu1 %v2248_v43  ;;  %v2335_v42 = vld [vmem:[%s2755_s5 + $0x304] ss:$16 sps:$4 sm:$0xff]   ;;  %v2338_v43 = vld [vmem:[%s2755_s5 + $0x30c] ss:$16 sps:$4 sm:$0xff]  }
  0x85   : > { %1374 = vmatpush1.bf16.msra.mxu0 %v2250_v44  ;;  %1520 = vmatpush1.bf16.msra.mxu1 %v2251_v45  ;;  %v585_v44 = vld [vmem:[%s3009_s2] sm:$0xff]  ;;  %v587_v45 = vld [vmem:[%s3009_s2 + $0x10] sm:$0xff] }
  0x86   : > { %1375 = vmatprep.subr.bf16.mxu0 %v2252_v46  ;;  %1521 = vmatprep.subr.bf16.mxu1 %v2254_v47  ;;  %v2333_v46 = vld [vmem:[%s2755_s5 + $0x300] ss:$16 sps:$4 sm:$0xff]   ;;  %v2336_v47 = vld [vmem:[%s2755_s5 + $0x308] ss:$16 sps:$4 sm:$0xff]  }
  0x87   : > { %595 = vperm.xlu0 %2184, %v585_v44   ;;  %605 = vperm.xlu1 %2185, %v587_v45  }
  0x89   : > { %1376 = vmatpush1.bf16.msra.mxu0 %v2256_v48  ;;  %1522 = vmatpush1.bf16.msra.mxu1 %v2257_v49  ;;  %v586_v48 = vld [vmem:[%s3009_s2 + $0x8] sm:$0xff]  ;;  %v588_v49 = vld [vmem:[%s3009_s2 + $0x18] sm:$0xff] }
  0x8a   : > { %1377 = vmatprep.subr.bf16.mxu0 %v2258_v50  ;;  %1523 = vmatprep.subr.bf16.mxu1 %v2260_v51  ;;  %v2341_v50 = vld [vmem:[%s2755_s5 + $0x324] ss:$16 sps:$4 sm:$0xff]   ;;  %v2344_v51 = vld [vmem:[%s2755_s5 + $0x32c] ss:$16 sps:$4 sm:$0xff]  }
  0x8b   : > { %600 = vperm.xlu0 %2184, %v586_v48   ;;  %610 = vperm.xlu1 %2185, %v588_v49  }
  0x8d   : > { %1378 = vmatpush1.bf16.msra.mxu0 %v2262_v52  ;;  %1524 = vmatpush1.bf16.msra.mxu1 %v2263_v53  ;;  %v2339_v52 = vld [vmem:[%s2755_s5 + $0x320] ss:$16 sps:$4 sm:$0xff]   ;;  %v2342_v53 = vld [vmem:[%s2755_s5 + $0x328] ss:$16 sps:$4 sm:$0xff]  }
  0x8e   : > { %1379 = vmatprep.subr.bf16.mxu0 %v2264_v54  ;;  %1525 = vmatprep.subr.bf16.mxu1 %v2266_v55  ;;  %v590_v54 = vld [vmem:[%s3009_s2 + $0x28] sm:$0xff]  ;;  %v589_v55 = vld [vmem:[%s3009_s2 + $0x20] sm:$0xff] }
  0x8f   : > { %620 = vperm.xlu1 %2185, %v590_v54   ;;  %615 = vperm.xlu0 %2184, %v589_v55  }
  0x91   : > { %1380 = vmatpush1.bf16.msra.mxu0 %v2268_v56  ;;  %1526 = vmatpush1.bf16.msra.mxu1 %v2269_v57  ;;  %v2350_v56 = vld [vmem:[%s2755_s5 + $0x344] ss:$16 sps:$4 sm:$0xff]   ;;  %v2353_v57 = vld [vmem:[%s2755_s5 + $0x34c] ss:$16 sps:$4 sm:$0xff]  }
  0x92   : > { %1381 = vmatprep.subr.bf16.mxu0 %v2270_v58  ;;  %1527 = vmatprep.subr.bf16.mxu1 %v2272_v59  ;;  %v2348_v58 = vld [vmem:[%s2755_s5 + $0x340] ss:$16 sps:$4 sm:$0xff]   ;;  %v2351_v59 = vld [vmem:[%s2755_s5 + $0x348] ss:$16 sps:$4 sm:$0xff]  }
  0x95   : > { %1382 = vmatpush1.bf16.msra.mxu0 %v2274_v60  ;;  %1528 = vmatpush1.bf16.msra.mxu1 %v2275_v61  ;;  %v592_v60 = vld [vmem:[%s3009_s2 + $0x38] sm:$0xff]  ;;  %v591_v61 = vld [vmem:[%s3009_s2 + $0x30] sm:$0xff] }
  0x96   : > { %1383 = vmatprep.subr.bf16.mxu0 %v2276_v62  ;;  %1529 = vmatprep.subr.bf16.mxu1 %v2278_v63  ;;  %v2356_v62 = vld [vmem:[%s2755_s5 + $0x364] ss:$16 sps:$4 sm:$0xff]   ;;  %v2359_v63 = vld [vmem:[%s2755_s5 + $0x36c] ss:$16 sps:$4 sm:$0xff]  }
  0x97   : > { %630 = vperm.xlu1 %2185, %v592_v60   ;;  %625 = vperm.xlu0 %2184, %v591_v61  }
  0x99   : > { %1384 = vmatpush1.bf16.msra.mxu0 %v2280_v0  ;;  %1530 = vmatpush1.bf16.msra.mxu1 %v2281_v1  ;;  %v2354_v0 = vld [vmem:[%s2755_s5 + $0x360] ss:$16 sps:$4 sm:$0xff]   ;;  %v2357_v1 = vld [vmem:[%s2755_s5 + $0x368] ss:$16 sps:$4 sm:$0xff]  }
  0x9a   : > { %1426 = vmatprep.subr.bf16.mxu0 %v2287_v2  ;;  %1572 = vmatprep.subr.bf16.mxu1 %v2290_v3  ;;  %v2365_v2 = vld [vmem:[%s2755_s5 + $0x384] ss:$16 sps:$4 sm:$0xff]   ;;  %v2368_v3 = vld [vmem:[%s2755_s5 + $0x38c] ss:$16 sps:$4 sm:$0xff]  }
  0x9c   : > { %1386 = vmatmul.mubr.bf16.vlgmr.msra.gmra.mrb[0].mxu0 %v2282_v4  ;;  %1532 = vmatmul.mubr.bf16.vlgmr.msra.gmra.mrb[0].mxu1 %v2282_v4  ;;  %v2363_v4 = vld [vmem:[%s2755_s5 + $0x380] ss:$16 sps:$4 sm:$0xff]  }
  0x9d   : > { %1427 = vmatpush1.bf16.msra.mxu0 %v2285_v5  ;;  %1573 = vmatpush1.bf16.msra.mxu1 %v2288_v6  ;;  %v2366_v5 = vld [vmem:[%s2755_s5 + $0x388] ss:$16 sps:$4 sm:$0xff]   ;;  %v2371_v6 = vld [vmem:[%s2755_s5 + $0x3a4] ss:$16 sps:$4 sm:$0xff]  }
  0x9e   : > { %1428 = vmatprep.subr.bf16.mxu0 %v2293_v7  ;;  %1574 = vmatprep.subr.bf16.mxu1 %v2296_v8  ;;  %v2374_v7 = vld [vmem:[%s2755_s5 + $0x3ac] ss:$16 sps:$4 sm:$0xff]   ;;  %v2369_v8 = vld [vmem:[%s2755_s5 + $0x3a0] ss:$16 sps:$4 sm:$0xff]  }
  0x9f   : > { %1395 = vmatprep.mubr.bf16.mxu0 %v2345_v9  ;;  %1541 = vmatprep.mubr.bf16.mxu1 %v2345_v9  ;;  %v2372_v9 = vld [vmem:[%s2755_s5 + $0x3a8] ss:$16 sps:$4 sm:$0xff]  }
  0xa1   : > { %1429 = vmatpush1.bf16.msra.mxu0 %v2291_v10  ;;  %1575 = vmatpush1.bf16.msra.mxu1 %v2294_v11  ;;  %v2380_v10 = vld [vmem:[%s2755_s5 + $0x3c4] ss:$16 sps:$4 sm:$0xff]   ;;  %v2383_v11 = vld [vmem:[%s2755_s5 + $0x3cc] ss:$16 sps:$4 sm:$0xff]  }
  0xa2   : > { %1430 = vmatprep.subr.bf16.mxu0 %v2299_v12  ;;  %1576 = vmatprep.subr.bf16.mxu1 %v2302_v13  ;;  %v2378_v12 = vld [vmem:[%s2755_s5 + $0x3c0] ss:$16 sps:$4 sm:$0xff]   ;;  %v2381_v13 = vld [vmem:[%s2755_s5 + $0x3c8] ss:$16 sps:$4 sm:$0xff]  }
  0xa4   : > { %1396 = vmatmul.mubr.bf16.gmra.mrb[4].mxu0 %v2347_v14  ;;  %1542 = vmatmul.mubr.bf16.gmra.mrb[4].mxu1 %v2347_v14  ;;  %v2386_v14 = vld [vmem:[%s2755_s5 + $0x3e4] ss:$16 sps:$4 sm:$0xff]  }
  0xa5   : > { %1431 = vmatpush1.bf16.msra.mxu0 %v2297_v15  ;;  %1577 = vmatpush1.bf16.msra.mxu1 %v2300_v16  ;;  %v2389_v15 = vld [vmem:[%s2755_s5 + $0x3ec] ss:$16 sps:$4 sm:$0xff]   ;;  %v2384_v16 = vld [vmem:[%s2755_s5 + $0x3e0] ss:$16 sps:$4 sm:$0xff]  }
  0xa6   : > { %1432 = vmatprep.subr.bf16.mxu0 %v2305_v17  ;;  %1578 = vmatprep.subr.bf16.mxu1 %v2308_v18  ;;  %v2387_v17 = vld [vmem:[%s2755_s5 + $0x3e8] ss:$16 sps:$4 sm:$0xff]  }
  0xa7   : > { %1405 = vmatprep.mubr.bf16.mxu0 %v2360_v20  ;;  %1551 = vmatprep.mubr.bf16.mxu1 %v2360_v20  ;;  %v2390_v18 = vld [vmem:[%s3007_s0 + $0x8] ss:$16 sps:$4 sm:$0xff]  }
  0xa8   : > { %v2395_v20 = vld [vmem:[%s3007_s0 + $0x28] ss:$16 sps:$4 sm:$0xff]  }
  0xa9   : > { %1433 = vmatpush1.bf16.msra.mxu0 %v2303_v19  ;;  %1579 = vmatpush1.bf16.msra.mxu1 %v2306_v21  ;;  %v2393_v19 = vld [vmem:[%s3007_s0 + $0x2c] ss:$16 sps:$4 sm:$0xff]  }
  0xaa   : > { %1434 = vmatprep.subr.bf16.mxu0 %v2311_v22  ;;  %1580 = vmatprep.subr.bf16.mxu1 %v2314_v23  ;;  %v2396_v21 = vld [vmem:[%s3007_s0 + $0x4c] ss:$16 sps:$4 sm:$0xff]   ;;  %v2398_v22 = vld [vmem:[%s3007_s0 + $0x48] ss:$16 sps:$4 sm:$0xff]  }
  0xab   : > { %v2399_v23 = vld [vmem:[%s3007_s0 + $0x6c] ss:$16 sps:$4 sm:$0xff]  }
  0xac   : > { %1406 = vmatmul.mubr.bf16.gmra.mrb[8].mxu0 %v2362_v25  ;;  %1552 = vmatmul.mubr.bf16.gmra.mrb[8].mxu1 %v2362_v25 }
  0xad   : > { %1435 = vmatpush1.bf16.msra.mxu0 %v2309_v24  ;;  %1581 = vmatpush1.bf16.msra.mxu1 %v2312_v26  ;;  %v2401_v24 = vld [vmem:[%s3007_s0 + $0x68] ss:$16 sps:$4 sm:$0xff]  }
  0xae   : > { %1436 = vmatprep.subr.bf16.mxu0 %v2317_v27  ;;  %1582 = vmatprep.subr.bf16.mxu1 %v2320_v28 }
  0xaf   : > { %1415 = vmatprep.mubr.bf16.mxu0 %v2375_v29  ;;  %1561 = vmatprep.mubr.bf16.mxu1 %v2375_v29 }
  0xb1   : > { %1437 = vmatpush1.bf16.msra.mxu0 %v2315_v30  ;;  %1583 = vmatpush1.bf16.msra.mxu1 %v2318_v31 }
  0xb2   : > { %1438 = vmatprep.subr.bf16.mxu0 %v2323_v32  ;;  %1584 = vmatprep.subr.bf16.mxu1 %v2326_v33 }
  0xb4   : > { %1416 = vmatmul.mubr.bf16.gmra.mrb[12].mxu0 %v2377_v35  ;;  %1562 = vmatmul.mubr.bf16.gmra.mrb[12].mxu1 %v2377_v35 }
  0xb5   : > { %1439 = vmatpush1.bf16.msra.mxu0 %v2321_v34  ;;  %1585 = vmatpush1.bf16.msra.mxu1 %v2324_v36 }
  0xb6   : > { %1440 = vmatprep.subr.bf16.mxu0 %v2329_v37  ;;  %1586 = vmatprep.subr.bf16.mxu1 %v2332_v38 }
  0xb7   : > { %1458 = vmatprep.mubr.bf16.mxu0 %v2392_v39  ;;  %1604 = vmatprep.mubr.bf16.mxu1 %v2392_v39 }
  0xb9   : > { %1441 = vmatpush1.bf16.msra.mxu0 %v2327_v40  ;;  %1587 = vmatpush1.bf16.msra.mxu1 %v2330_v41 }
  0xba   : > { %1442 = vmatprep.subr.bf16.mxu0 %v2335_v42  ;;  %1588 = vmatprep.subr.bf16.mxu1 %v2338_v43 }
  0xbd   : > { %1443 = vmatpush1.bf16.msra.mxu0 %v2333_v46  ;;  %1589 = vmatpush1.bf16.msra.mxu1 %v2336_v47 }
  0xbe   : > { %1444 = vmatprep.subr.bf16.mxu0 %v2341_v50  ;;  %1590 = vmatprep.subr.bf16.mxu1 %v2344_v51 }
  0xc1   : > { %1445 = vmatpush1.bf16.msra.mxu0 %v2339_v52  ;;  %1591 = vmatpush1.bf16.msra.mxu1 %v2342_v53 }
  0xc2   : > { %1446 = vmatprep.subr.bf16.mxu0 %v2350_v56  ;;  %1592 = vmatprep.subr.bf16.mxu1 %v2353_v57 }
  0xc5   : > { %1447 = vmatpush1.bf16.msra.mxu0 %v2348_v58  ;;  %1593 = vmatpush1.bf16.msra.mxu1 %v2351_v59 }
  0xc6   : > { %1448 = vmatprep.subr.bf16.mxu0 %v2356_v62  ;;  %1594 = vmatprep.subr.bf16.mxu1 %v2359_v63 }
  0xc9   : > { %1449 = vmatpush1.bf16.msra.mxu0 %v2354_v0  ;;  %1595 = vmatpush1.bf16.msra.mxu1 %v2357_v1 }
  0xca   : > { %1450 = vmatprep.subr.bf16.mxu0 %v2365_v2  ;;  %1596 = vmatprep.subr.bf16.mxu1 %v2368_v3 }
  0xcd   : > { %1451 = vmatpush1.bf16.msra.mxu0 %v2363_v4  ;;  %1597 = vmatpush1.bf16.msra.mxu1 %v2366_v5 }
  0xce   : > { %1452 = vmatprep.subr.bf16.mxu0 %v2371_v6  ;;  %1598 = vmatprep.subr.bf16.mxu1 %v2374_v7 }
  0xd1   : > { %1453 = vmatpush1.bf16.msra.mxu0 %v2369_v8  ;;  %1599 = vmatpush1.bf16.msra.mxu1 %v2372_v9 }
  0xd2   : > { %1454 = vmatprep.subr.bf16.mxu0 %v2380_v10  ;;  %1600 = vmatprep.subr.bf16.mxu1 %v2383_v11 }
  0xd5   : > { %1455 = vmatpush1.bf16.msra.mxu0 %v2378_v12  ;;  %1601 = vmatpush1.bf16.msra.mxu1 %v2381_v13 }
  0xd6   : > { %1456 = vmatprep.subr.bf16.mxu0 %v2386_v14  ;;  %1602 = vmatprep.subr.bf16.mxu1 %v2389_v15 }
  0xd9   : > { %1457 = vmatpush1.bf16.msra.mxu0 %v2384_v16  ;;  %1603 = vmatpush1.bf16.msra.mxu1 %v2387_v17 }
  0xdc   : > { %1459 = vmatmul.mubr.bf16.vlgmr.msra.gmra.mrb[0].mxu0 %v2390_v18  ;;  %1605 = vmatmul.mubr.bf16.vlgmr.msra.gmra.mrb[0].mxu1 %v2390_v18 }
  0xdd   : > { %1468 = vmatprep.mubr.bf16.mxu0 %v2393_v19  ;;  %1614 = vmatprep.mubr.bf16.mxu1 %v2393_v19 }
  0xe4   : > { %1469 = vmatmul.mubr.bf16.gmra.mrb[4].mxu0 %v2395_v20  ;;  %1615 = vmatmul.mubr.bf16.gmra.mrb[4].mxu1 %v2395_v20 }
  0xe5   : > { %1478 = vmatprep.mubr.bf16.mxu0 %v2396_v21  ;;  %1624 = vmatprep.mubr.bf16.mxu1 %v2396_v21 }
  0xec   : > { %1479 = vmatmul.mubr.bf16.gmra.mrb[8].mxu0 %v2398_v22  ;;  %1625 = vmatmul.mubr.bf16.gmra.mrb[8].mxu1 %v2398_v22 }
  0xed   : > { %1488 = vmatprep.mubr.bf16.mxu0 %v2399_v23  ;;  %1634 = vmatprep.mubr.bf16.mxu1 %v2399_v23 }
  0xf4   : > { %1489 = vmatmul.mubr.bf16.gmra.mrb[12].mxu0 %v2401_v24  ;;  %1635 = vmatmul.mubr.bf16.gmra.mrb[12].mxu1 %v2401_v24 }
 0x106   : > { %v596_v25 = vpop.permute.xlu0 %595  ;;  %v606_v27 = vpop.permute.xlu1 %605 }
 0x10a   : > { %v601_v26 = vpop.permute.xlu0 %600  ;;  %v611_v54 = vpop.permute.xlu1 %610 }
 0x10e   : > { %v621_v19 = vpop.permute.xlu1 %620  ;;  %v616_v20 = vpop.permute.xlu0 %615 }
 0x1af   : > { %v1460_v28 = vpop.f32.mrb[0].mxu0  ;;  %v1606_v29 = vpop.f32.mrb[0].mxu1 }
 0x1b0   : > { %v2095_v30 = vadd.f32 %v1460_v28, %v596_v25  ;;  %v2111_v31 = vadd.f32 %v1606_v29, %v596_v25  ;;  %v1462_v32 = vpop.f32.mrb[1].mxu0  ;;  %v1608_v33 = vpop.f32.mrb[1].mxu1 }
 0x1b1   : > { %v2096_v34 = vadd.f32 %v1462_v32, %v596_v25  ;;  %v2112_v35 = vadd.f32 %v1608_v33, %v596_v25  ;;  %v1464_v36 = vpop.f32.mrb[2].mxu0  ;;  %v1610_v37 = vpop.f32.mrb[2].mxu1 }
 0x1b2   : > { %v1645_v38 = vmax.f32 %v2095_v30, 0.0  ;;  %v1647_v39 = vmax.f32 %v2111_v31, 0.0  ;;  %v2097_v40 = vadd.f32 %v1464_v36, %v601_v26  ;;  %v2113_v41 = vadd.f32 %v1610_v37, %v601_v26  ;;  %v1466_v42 = vpop.f32.mrb[3].mxu0  ;;  %v1612_v43 = vpop.f32.mrb[3].mxu1 }
 0x1b3   : > { %v1646_v44 = vmax.f32 %v2096_v34, 0.0  ;;  %v1648_v45 = vmax.f32 %v2112_v35, 0.0  ;;  %v2098_v46 = vadd.f32 %v1466_v42, %v601_v26  ;;  %v2114_v47 = vadd.f32 %v1612_v43, %v601_v26 }
 0x1b4   : > { %v1649_v48 = vmax.f32 %v2097_v40, 0.0  ;;  %v1651_v49 = vmax.f32 %v2113_v41, 0.0 }
 0x1b5   : > { %v2078_v50 = vpack.c.bf16 %v1646_v44, %v1645_v38  ;;  %v2079_v51 = vpack.c.bf16 %v1648_v45, %v1647_v39  ;;  %v1650_v52 = vmax.f32 %v2098_v46, 0.0  ;;  %v1652_v53 = vmax.f32 %v2114_v47, 0.0 }
 0x1b7   : > { %1773 = vst [vmem:[%s2956_s12] sm:$0xff] %v2078_v50  ;;  %1774 = vst [vmem:[%s2956_s12 + $0x8] sm:$0xff] %v2079_v51  ;;  %v2080_v55 = vpack.c.bf16 %v1650_v52, %v1649_v48  ;;  %v2081_v56 = vpack.c.bf16 %v1652_v53, %v1651_v49  ;;  %v1470_v57 = vpop.f32.mrb[4].mxu0  ;;  %v1616_v58 = vpop.f32.mrb[4].mxu1 }
 0x1b8   : > { %v2099_v59 = vadd.f32 %v1470_v57, %v606_v27  ;;  %v2115_v60 = vadd.f32 %v1616_v58, %v606_v27  ;;  %v1472_v61 = vpop.f32.mrb[5].mxu0  ;;  %v1618_v62 = vpop.f32.mrb[5].mxu1 }
 0x1b9   : > { %1775 = vst [vmem:[%s2956_s12 + $0x10] sm:$0xff] %v2080_v55  ;;  %1776 = vst [vmem:[%s2956_s12 + $0x18] sm:$0xff] %v2081_v56  ;;  %v2100_v63 = vadd.f32 %v1472_v61, %v606_v27  ;;  %v2116_v0 = vadd.f32 %v1618_v62, %v606_v27  ;;  %v1474_v1 = vpop.f32.mrb[6].mxu0  ;;  %v1620_v2 = vpop.f32.mrb[6].mxu1 }
 0x1ba   : > { %v1653_v3 = vmax.f32 %v2099_v59, 0.0  ;;  %v1655_v4 = vmax.f32 %v2115_v60, 0.0  ;;  %v2101_v5 = vadd.f32 %v1474_v1, %v611_v54  ;;  %v2117_v6 = vadd.f32 %v1620_v2, %v611_v54  ;;  %v1476_v7 = vpop.f32.mrb[7].mxu0  ;;  %v1622_v8 = vpop.f32.mrb[7].mxu1 }
 0x1bb   : > { %v1654_v9 = vmax.f32 %v2100_v63, 0.0  ;;  %v1656_v10 = vmax.f32 %v2116_v0, 0.0  ;;  %v2102_v11 = vadd.f32 %v1476_v7, %v611_v54  ;;  %v2118_v12 = vadd.f32 %v1622_v8, %v611_v54  ;;  %v631_v49 = vpop.permute.xlu1 %630  ;;  %v626_v50 = vpop.permute.xlu0 %625 }
 0x1bc   : > { %v1657_v13 = vmax.f32 %v2101_v5, 0.0  ;;  %v1659_v14 = vmax.f32 %v2117_v6, 0.0 }
 0x1bd   : > { %v2082_v15 = vpack.c.bf16 %v1654_v9, %v1653_v3  ;;  %v2083_v16 = vpack.c.bf16 %v1656_v10, %v1655_v4  ;;  %v1658_v17 = vmax.f32 %v2102_v11, 0.0  ;;  %v1660_v18 = vmax.f32 %v2118_v12, 0.0 }
 0x1bf   : > { %1777 = vst [vmem:[%s2956_s12 + $0x20] sm:$0xff] %v2082_v15  ;;  %1778 = vst [vmem:[%s2956_s12 + $0x28] sm:$0xff] %v2083_v16  ;;  %v2084_v21 = vpack.c.bf16 %v1658_v17, %v1657_v13  ;;  %v2085_v22 = vpack.c.bf16 %v1660_v18, %v1659_v14  ;;  %v1480_v23 = vpop.f32.mrb[8].mxu0  ;;  %v1626_v24 = vpop.f32.mrb[8].mxu1  ;;  %v1811_v17 = vld [vmem:[%s2956_s12] sm:$0xff] (%p2477_p5)  ;;  %v1813_v18 = vld [vmem:[%s2956_s12 + $0x8] sm:$0xff] (%p2477_p5) }
 0x1c0   : > { %v2103_v25 = vadd.f32 %v1480_v23, %v616_v20  ;;  %v2119_v26 = vadd.f32 %v1626_v24, %v616_v20  ;;  %v1482_v27 = vpop.f32.mrb[9].mxu0  ;;  %v1628_v28 = vpop.f32.mrb[9].mxu1  ;;  %1812 = vst [vmem:[%s1798_s20] sm:$0xff] (%p2477_p5), %v1811_v17  ;;  %1814 = vst [vmem:[%s1798_s20 + $0x8] sm:$0xff] (%p2477_p5), %v1813_v18 }
 0x1c1   : > { %1779 = vst [vmem:[%s2956_s12 + $0x30] sm:$0xff] %v2084_v21  ;;  %1780 = vst [vmem:[%s2956_s12 + $0x38] sm:$0xff] %v2085_v22  ;;  %v2104_v29 = vadd.f32 %v1482_v27, %v616_v20  ;;  %v2120_v30 = vadd.f32 %v1628_v28, %v616_v20  ;;  %v1484_v31 = vpop.f32.mrb[10].mxu0  ;;  %v1630_v32 = vpop.f32.mrb[10].mxu1  ;;  %v1817_v20 = vld [vmem:[%s2956_s12 + $0x18] sm:$0xff] (%p2477_p5) }
 0x1c2   : > { %v1661_v33 = vmax.f32 %v2103_v25, 0.0  ;;  %v1663_v34 = vmax.f32 %v2119_v26, 0.0  ;;  %v2105_v35 = vadd.f32 %v1484_v31, %v621_v19  ;;  %v2121_v36 = vadd.f32 %v1630_v32, %v621_v19  ;;  %v1486_v37 = vpop.f32.mrb[11].mxu0  ;;  %v1632_v38 = vpop.f32.mrb[11].mxu1  ;;  %1818 = vst [vmem:[%s1798_s20 + $0x28] sm:$0xff] (%p2477_p5), %v1817_v20 }
 0x1c3   : > { %v1662_v39 = vmax.f32 %v2104_v29, 0.0  ;;  %v1664_v40 = vmax.f32 %v2120_v30, 0.0  ;;  %v2106_v41 = vadd.f32 %v1486_v37, %v621_v19  ;;  %v2122_v42 = vadd.f32 %v1632_v38, %v621_v19  ;;  %v1815_v19 = vld [vmem:[%s2956_s12 + $0x10] sm:$0xff] (%p2477_p5) }
 0x1c4   : > { %v1665_v43 = vmax.f32 %v2105_v35, 0.0  ;;  %v1667_v44 = vmax.f32 %v2121_v36, 0.0  ;;  %1816 = vst [vmem:[%s1798_s20 + $0x20] sm:$0xff] (%p2477_p5), %v1815_v19 }
 0x1c5   : > { %v2086_v45 = vpack.c.bf16 %v1662_v39, %v1661_v33  ;;  %v2087_v46 = vpack.c.bf16 %v1664_v40, %v1663_v34  ;;  %v1666_v47 = vmax.f32 %v2106_v41, 0.0  ;;  %v1668_v48 = vmax.f32 %v2122_v42, 0.0 }
 0x1c6   : > { %v1819_v21 = vld [vmem:[%s2956_s12 + $0x20] sm:$0xff] (%p2477_p5)  ;;  %v1821_v22 = vld [vmem:[%s2956_s12 + $0x28] sm:$0xff] (%p2477_p5) }
 0x1c7   : > { %1781 = vst [vmem:[%s2956_s12 + $0x40] sm:$0xff] %v2086_v45  ;;  %1782 = vst [vmem:[%s2956_s12 + $0x48] sm:$0xff] %v2087_v46  ;;  %v2088_v51 = vpack.c.bf16 %v1666_v47, %v1665_v43  ;;  %v2089_v52 = vpack.c.bf16 %v1668_v48, %v1667_v44  ;;  %v1490_v53 = vpop.f32.mrb[12].mxu0  ;;  %v1636_v54 = vpop.f32.mrb[12].mxu1 }
 0x1c8   : > { %v2107_v55 = vadd.f32 %v1490_v53, %v626_v50  ;;  %v2123_v56 = vadd.f32 %v1636_v54, %v626_v50  ;;  %v1492_v57 = vpop.f32.mrb[13].mxu0  ;;  %v1638_v58 = vpop.f32.mrb[13].mxu1  ;;  %1820 = vst [vmem:[%s1798_s20 + $0x40] sm:$0xff] (%p2477_p5), %v1819_v21  ;;  %1822 = vst [vmem:[%s1798_s20 + $0x48] sm:$0xff] (%p2477_p5), %v1821_v22  ;;  %v1823_v23 = vld [vmem:[%s2956_s12 + $0x30] sm:$0xff] (%p2477_p5)  ;;  %v1825_v24 = vld [vmem:[%s2956_s12 + $0x38] sm:$0xff] (%p2477_p5) }
 0x1c9   : > { %1783 = vst [vmem:[%s2956_s12 + $0x50] sm:$0xff] %v2088_v51  ;;  %1784 = vst [vmem:[%s2956_s12 + $0x58] sm:$0xff] %v2089_v52  ;;  %v2108_v59 = vadd.f32 %v1492_v57, %v626_v50  ;;  %v2124_v60 = vadd.f32 %v1638_v58, %v626_v50  ;;  %v1494_v61 = vpop.f32.mrb[14].mxu0  ;;  %v1640_v62 = vpop.f32.mrb[14].mxu1 }
 0x1ca   : > { %v1669_v63 = vmax.f32 %v2107_v55, 0.0  ;;  %v1671_v0 = vmax.f32 %v2123_v56, 0.0  ;;  %v2109_v1 = vadd.f32 %v1494_v61, %v631_v49  ;;  %v2125_v2 = vadd.f32 %v1640_v62, %v631_v49  ;;  %v1496_v3 = vpop.f32.mrb[15].mxu0  ;;  %v1642_v4 = vpop.f32.mrb[15].mxu1  ;;  %1824 = vst [vmem:[%s1798_s20 + $0x60] sm:$0xff] (%p2477_p5), %v1823_v23  ;;  %1826 = vst [vmem:[%s1798_s20 + $0x68] sm:$0xff] (%p2477_p5), %v1825_v24 }
 0x1cb   : > { %v1670_v5 = vmax.f32 %v2108_v59, 0.0  ;;  %v1672_v6 = vmax.f32 %v2124_v60, 0.0  ;;  %v2110_v7 = vadd.f32 %v1496_v3, %v631_v49  ;;  %v2126_v8 = vadd.f32 %v1642_v4, %v631_v49  ;;  %1795 = sbr.rel (!%p2477_p5) target bundleno = 474 (0x1da), region = 59 }
 0x1cc   : > { %v1673_v9 = vmax.f32 %v2109_v1, 0.0  ;;  %v1675_v10 = vmax.f32 %v2125_v2, 0.0 }
 0x1cd   : > { %v2090_v11 = vpack.c.bf16 %v1670_v5, %v1669_v63  ;;  %v2091_v12 = vpack.c.bf16 %v1672_v6, %v1671_v0  ;;  %v1674_v13 = vmax.f32 %v2110_v7, 0.0  ;;  %v1676_v14 = vmax.f32 %v2126_v8, 0.0 }
 0x1ce   : > { %v1827_v25 = vld [vmem:[%s2956_s12 + $0x40] sm:$0xff] (%p2477_p5)  ;;  %v1829_v26 = vld [vmem:[%s2956_s12 + $0x48] sm:$0xff] (%p2477_p5) }
 0x1cf   : > { %1785 = vst [vmem:[%s2956_s12 + $0x60] sm:$0xff] %v2090_v11  ;;  %1786 = vst [vmem:[%s2956_s12 + $0x68] sm:$0xff] %v2091_v12  ;;  %v2092_v15 = vpack.c.bf16 %v1674_v13, %v1673_v9  ;;  %v2093_v16 = vpack.c.bf16 %v1676_v14, %v1675_v10 }
 0x1d0   : > { %1828 = vst [vmem:[%s1798_s20 + $0x80] sm:$0xff] (%p2477_p5), %v1827_v25  ;;  %v1831_v27 = vld [vmem:[%s2956_s12 + $0x50] sm:$0xff] (%p2477_p5)  ;;  %v1833_v28 = vld [vmem:[%s2956_s12 + $0x58] sm:$0xff] (%p2477_p5)  ;;  %1830 = vst [vmem:[%s1798_s20 + $0x88] sm:$0xff] (%p2477_p5), %v1829_v26 }
 0x1d1   : > { %1787 = vst [vmem:[%s2956_s12 + $0x70] sm:$0xff] %v2092_v15  ;;  %1788 = vst [vmem:[%s2956_s12 + $0x78] sm:$0xff] %v2093_v16 }
 0x1d2   : > { %1832 = vst [vmem:[%s1798_s20 + $0xa0] sm:$0xff] %v1831_v27  ;;  %1834 = vst [vmem:[%s1798_s20 + $0xa8] sm:$0xff] %v1833_v28 }
 0x1d6   : > { %v1835_v29 = vld [vmem:[%s2956_s12 + $0x60] sm:$0xff]  ;;  %v1837_v30 = vld [vmem:[%s2956_s12 + $0x68] sm:$0xff] }
 0x1d7   : > { %1836 = vst [vmem:[%s1798_s20 + $0xc0] sm:$0xff] %v1835_v29  ;;  %1838 = vst [vmem:[%s1798_s20 + $0xc8] sm:$0xff] %v1837_v30 }
 0x1d8   : > { %v1839_v31 = vld [vmem:[%s2956_s12 + $0x70] sm:$0xff]  ;;  %v1841_v32 = vld [vmem:[%s2956_s12 + $0x78] sm:$0xff] }
 0x1d9   : > { %1840 = vst [vmem:[%s1798_s20 + $0xe0] sm:$0xff] %v1839_v31  ;;  %1842 = vst [vmem:[%s1798_s20 + $0xe8] sm:$0xff] %v1841_v32 }
 0x1da PF: > { %p10_p10 = scmp.ge.s32.totalorder %s2464_s16, 4   ;;  %s3012_s12 = smov %s2420_s13 }
 0x1db   : > { %s3013_s13 = smov %s2475_s19  ;;  %s3014_s14 = smov %s2464_s16 }
 0x1dc   :  { %12 = sbr.rel (!%p10_p10) target bundleno = 2 (0x2), region = 113 }

// kernel: forward.6
= control target key start
LH: loop header
LB: loop body
LE: loop exit
PB: predicated region body
PF: predicated region fallthrough
CT: control target
= control target key end

     0   :  { %s2851_s12 = smov 0   ;;  %s2853_s13 = smov 0   ;;  %s3489_s0 = inlined_call_operand.vmem [shape: bf16[64,576], index: 0, kind: input, shape index: {}]   ;;  %s3490_s1 = inlined_call_operand.vmem [shape: bf16[576,1024], index: 1, kind: input, shape index: {}]   ;;  %s3491_s2 = inlined_call_operand.vmem [shape: f32[64,1], index: 2, kind: input, shape index: {}]   ;;  %s3492_s3 = inlined_call_operand.vmem [shape: bf16[64,1024], index: 3, kind: output, shape index: {}]  }
   0x1   :  { %s2855_s14 = smov 0  }
   0x2 LB: > { %s2218_s15 = sadd.s32 4294967295, %s2828_s14   ;;  %s2868_s16 = sadd.s32 1, %s2828_s14   ;;  %s2828_s14 = sphi %s2855_s14, %s3496_s14   ;;  %s2824_s13 = sphi %s2853_s13, %s3495_s13   ;;  %s2820_s12 = sphi %s2851_s12, %s3494_s12  }
   0x3   : > { %s38_s17 = ssub.s32 %s2828_s14, %s2868_s16  ;;  %s41_s18 = sadd.s32 1, %s2824_s13 }
   0x4   : > { %p39_p0 = scmp.eq.s32.totalorder %s38_s17, 0  ;;  %p48_p1 = scmp.ne.s32.totalorder %s2824_s13, %s2820_s12 }
   0x5   : > { %p49_p2 = scmp.eq.s32.totalorder %s2828_s14, 0  ;;  %p99_p3 = scmp.eq.s32.totalorder %s2218_s15, 1 }
   0x6   : > { %s2879_s19 = scalar_select %p39_p0, %s2824_s13, %s41_s18  }
   0x7   : > { %p50_p4 = por %p49_p2, %p48_p1  ;;  %p2881_p5 = por %p99_p3, %p48_p1 }
   0x8   : > { %p2221_p6 = scmp.ge.s32.totalorder %s2828_s14, 2 }
   0xa   : > { %127 = sbr.rel (%p2221_p6) target bundleno = 93 (0x5d), region = 24 }
  0x11   : > { %130 = sbr.rel (!%p50_p4) target bundleno = 93 (0x5d), region = 28  ;;  %s132_s21 = sand.u32 (%p50_p4), 1, %s2824_s13  }
  0x12   : > { %s2419_s22 = sshll.u32 (%p50_p4), %s2828_s14, 4  ;;  %s2533_s23 = smul.u32 (%p50_p4), 1152, %s132_s21 }
  0x13   : > { %s2891_s26 = scalar_lea.vmem (%p50_p4), %s3490_s1, %s2419_s22 }
  0x14   : > { %v150_v0 = vld [vmem:[%s2891_s26] sm:$0xff] (%p50_p4)  ;;  %v152_v1 = vld [vmem:[%s2891_s26 + $0x8] sm:$0xff] (%p50_p4)  ;;  %s2899_s27 = scalar_lea.vmem (%p50_p4), [#allocation2], %s2533_s23 }
  0x15   : > { %v154_v2 = vld [vmem:[%s2891_s26 + $0x20] sm:$0xff] (%p50_p4)  ;;  %v156_v3 = vld [vmem:[%s2891_s26 + $0x28] sm:$0xff] (%p50_p4)  ;;  %151 = vst [vmem:[%s2899_s27] sm:$0xff] (%p50_p4), %v150_v0  ;;  %153 = vst [vmem:[%s2899_s27 + $0x8] sm:$0xff] (%p50_p4), %v152_v1 }
  0x16   : > { %v158_v4 = vld [vmem:[%s2891_s26 + $0x40] sm:$0xff] (%p50_p4)  ;;  %v160_v5 = vld [vmem:[%s2891_s26 + $0x48] sm:$0xff] (%p50_p4)  ;;  %155 = vst [vmem:[%s2899_s27 + $0x10] sm:$0xff] (%p50_p4), %v154_v2  ;;  %157 = vst [vmem:[%s2899_s27 + $0x18] sm:$0xff] (%p50_p4), %v156_v3 }
  0x17   : > { %159 = vst [vmem:[%s2899_s27 + $0x20] sm:$0xff] (%p50_p4), %v158_v4  ;;  %161 = vst [vmem:[%s2899_s27 + $0x28] sm:$0xff] (%p50_p4), %v160_v5  ;;  %v162_v6 = vld [vmem:[%s2891_s26 + $0x60] sm:$0xff] (%p50_p4)  ;;  %v164_v7 = vld [vmem:[%s2891_s26 + $0x68] sm:$0xff] (%p50_p4) }
  0x18   : > { %v166_v8 = vld [vmem:[%s2891_s26 + $0x80] sm:$0xff]  ;;  %163 = vst [vmem:[%s2899_s27 + $0x30] sm:$0xff] %v162_v6  ;;  %165 = vst [vmem:[%s2899_s27 + $0x38] sm:$0xff] %v164_v7  ;;  %v168_v9 = vld [vmem:[%s2891_s26 + $0x88] sm:$0xff] }
  0x19   : > { %167 = vst [vmem:[%s2899_s27 + $0x40] sm:$0xff] %v166_v8  ;;  %v170_v10 = vld [vmem:[%s2891_s26 + $0xa0] sm:$0xff]  ;;  %v172_v11 = vld [vmem:[%s2891_s26 + $0xa8] sm:$0xff]  ;;  %169 = vst [vmem:[%s2899_s27 + $0x48] sm:$0xff] %v168_v9 }
  0x1a   : > { %171 = vst [vmem:[%s2899_s27 + $0x50] sm:$0xff] %v170_v10  ;;  %173 = vst [vmem:[%s2899_s27 + $0x58] sm:$0xff] %v172_v11  ;;  %v174_v12 = vld [vmem:[%s2891_s26 + $0xc0] sm:$0xff]  ;;  %v176_v13 = vld [vmem:[%s2891_s26 + $0xc8] sm:$0xff] }
  0x1b   : > { %v178_v14 = vld [vmem:[%s2891_s26 + $0xe0] sm:$0xff]  ;;  %175 = vst [vmem:[%s2899_s27 + $0x60] sm:$0xff] %v174_v12  ;;  %177 = vst [vmem:[%s2899_s27 + $0x68] sm:$0xff] %v176_v13  ;;  %v180_v15 = vld [vmem:[%s2891_s26 + $0xe8] sm:$0xff] }
  0x1c   : > { %179 = vst [vmem:[%s2899_s27 + $0x70] sm:$0xff] %v178_v14  ;;  %v182_v16 = vld [vmem:[%s2891_s26 + $0x100] sm:$0xff]  ;;  %v184_v17 = vld [vmem:[%s2891_s26 + $0x108] sm:$0xff]  ;;  %181 = vst [vmem:[%s2899_s27 + $0x78] sm:$0xff] %v180_v15 }
  0x1d   : > { %183 = vst [vmem:[%s2899_s27 + $0x80] sm:$0xff] %v182_v16  ;;  %185 = vst [vmem:[%s2899_s27 + $0x88] sm:$0xff] %v184_v17  ;;  %v186_v18 = vld [vmem:[%s2891_s26 + $0x120] sm:$0xff]  ;;  %v188_v19 = vld [vmem:[%s2891_s26 + $0x128] sm:$0xff] }
  0x1e   : > { %v190_v20 = vld [vmem:[%s2891_s26 + $0x140] sm:$0xff]  ;;  %187 = vst [vmem:[%s2899_s27 + $0x90] sm:$0xff] %v186_v18  ;;  %189 = vst [vmem:[%s2899_s27 + $0x98] sm:$0xff] %v188_v19  ;;  %v192_v21 = vld [vmem:[%s2891_s26 + $0x148] sm:$0xff] }
  0x1f   : > { %191 = vst [vmem:[%s2899_s27 + $0xa0] sm:$0xff] %v190_v20  ;;  %v194_v22 = vld [vmem:[%s2891_s26 + $0x160] sm:$0xff]  ;;  %v196_v23 = vld [vmem:[%s2891_s26 + $0x168] sm:$0xff]  ;;  %193 = vst [vmem:[%s2899_s27 + $0xa8] sm:$0xff] %v192_v21 }
  0x20   : > { %195 = vst [vmem:[%s2899_s27 + $0xb0] sm:$0xff] %v194_v22  ;;  %197 = vst [vmem:[%s2899_s27 + $0xb8] sm:$0xff] %v196_v23  ;;  %v198_v24 = vld [vmem:[%s2891_s26 + $0x180] sm:$0xff]  ;;  %v200_v25 = vld [vmem:[%s2891_s26 + $0x188] sm:$0xff] }
  0x21   : > { %v202_v26 = vld [vmem:[%s2891_s26 + $0x1a0] sm:$0xff]  ;;  %199 = vst [vmem:[%s2899_s27 + $0xc0] sm:$0xff] %v198_v24  ;;  %201 = vst [vmem:[%s2899_s27 + $0xc8] sm:$0xff] %v200_v25  ;;  %v204_v27 = vld [vmem:[%s2891_s26 + $0x1a8] sm:$0xff] }
  0x22   : > { %203 = vst [vmem:[%s2899_s27 + $0xd0] sm:$0xff] %v202_v26  ;;  %v206_v28 = vld [vmem:[%s2891_s26 + $0x1c0] sm:$0xff]  ;;  %v208_v29 = vld [vmem:[%s2891_s26 + $0x1c8] sm:$0xff]  ;;  %205 = vst [vmem:[%s2899_s27 + $0xd8] sm:$0xff] %v204_v27 }
  0x23   : > { %207 = vst [vmem:[%s2899_s27 + $0xe0] sm:$0xff] %v206_v28  ;;  %209 = vst [vmem:[%s2899_s27 + $0xe8] sm:$0xff] %v208_v29  ;;  %v210_v30 = vld [vmem:[%s2891_s26 + $0x1e0] sm:$0xff]  ;;  %v212_v31 = vld [vmem:[%s2891_s26 + $0x1e8] sm:$0xff] }
  0x24   : > { %v214_v32 = vld [vmem:[%s2891_s26 + $0x200] sm:$0xff]  ;;  %211 = vst [vmem:[%s2899_s27 + $0xf0] sm:$0xff] %v210_v30  ;;  %213 = vst [vmem:[%s2899_s27 + $0xf8] sm:$0xff] %v212_v31  ;;  %v216_v33 = vld [vmem:[%s2891_s26 + $0x208] sm:$0xff] }
  0x25   : > { %215 = vst [vmem:[%s2899_s27 + $0x100] sm:$0xff] %v214_v32  ;;  %v218_v34 = vld [vmem:[%s2891_s26 + $0x220] sm:$0xff]  ;;  %v220_v35 = vld [vmem:[%s2891_s26 + $0x228] sm:$0xff]  ;;  %217 = vst [vmem:[%s2899_s27 + $0x108] sm:$0xff] %v216_v33 }
  0x26   : > { %219 = vst [vmem:[%s2899_s27 + $0x110] sm:$0xff] %v218_v34  ;;  %221 = vst [vmem:[%s2899_s27 + $0x118] sm:$0xff] %v220_v35  ;;  %v222_v36 = vld [vmem:[%s2891_s26 + $0x240] sm:$0xff]  ;;  %v224_v37 = vld [vmem:[%s2891_s26 + $0x248] sm:$0xff] }
  0x27   : > { %v226_v38 = vld [vmem:[%s2891_s26 + $0x260] sm:$0xff]  ;;  %223 = vst [vmem:[%s2899_s27 + $0x120] sm:$0xff] %v222_v36  ;;  %225 = vst [vmem:[%s2899_s27 + $0x128] sm:$0xff] %v224_v37  ;;  %v228_v39 = vld [vmem:[%s2891_s26 + $0x268] sm:$0xff] }
  0x28   : > { %227 = vst [vmem:[%s2899_s27 + $0x130] sm:$0xff] %v226_v38  ;;  %v230_v40 = vld [vmem:[%s2891_s26 + $0x280] sm:$0xff]  ;;  %v232_v41 = vld [vmem:[%s2891_s26 + $0x288] sm:$0xff]  ;;  %229 = vst [vmem:[%s2899_s27 + $0x138] sm:$0xff] %v228_v39 }
  0x29   : > { %231 = vst [vmem:[%s2899_s27 + $0x140] sm:$0xff] %v230_v40  ;;  %233 = vst [vmem:[%s2899_s27 + $0x148] sm:$0xff] %v232_v41  ;;  %v234_v42 = vld [vmem:[%s2891_s26 + $0x2a0] sm:$0xff]  ;;  %v236_v43 = vld [vmem:[%s2891_s26 + $0x2a8] sm:$0xff] }
  0x2a   : > { %v238_v44 = vld [vmem:[%s2891_s26 + $0x2c0] sm:$0xff]  ;;  %235 = vst [vmem:[%s2899_s27 + $0x150] sm:$0xff] %v234_v42  ;;  %237 = vst [vmem:[%s2899_s27 + $0x158] sm:$0xff] %v236_v43  ;;  %v240_v45 = vld [vmem:[%s2891_s26 + $0x2c8] sm:$0xff] }
  0x2b   : > { %239 = vst [vmem:[%s2899_s27 + $0x160] sm:$0xff] %v238_v44  ;;  %v242_v46 = vld [vmem:[%s2891_s26 + $0x2e0] sm:$0xff]  ;;  %v244_v47 = vld [vmem:[%s2891_s26 + $0x2e8] sm:$0xff]  ;;  %241 = vst [vmem:[%s2899_s27 + $0x168] sm:$0xff] %v240_v45 }
  0x2c   : > { %243 = vst [vmem:[%s2899_s27 + $0x170] sm:$0xff] %v242_v46  ;;  %245 = vst [vmem:[%s2899_s27 + $0x178] sm:$0xff] %v244_v47  ;;  %v246_v48 = vld [vmem:[%s2891_s26 + $0x300] sm:$0xff]  ;;  %v248_v49 = vld [vmem:[%s2891_s26 + $0x308] sm:$0xff] }
  0x2d   : > { %v250_v50 = vld [vmem:[%s2891_s26 + $0x320] sm:$0xff]  ;;  %247 = vst [vmem:[%s2899_s27 + $0x180] sm:$0xff] %v246_v48  ;;  %249 = vst [vmem:[%s2899_s27 + $0x188] sm:$0xff] %v248_v49  ;;  %v252_v51 = vld [vmem:[%s2891_s26 + $0x328] sm:$0xff] }
  0x2e   : > { %251 = vst [vmem:[%s2899_s27 + $0x190] sm:$0xff] %v250_v50  ;;  %v254_v52 = vld [vmem:[%s2891_s26 + $0x340] sm:$0xff]  ;;  %v256_v53 = vld [vmem:[%s2891_s26 + $0x348] sm:$0xff]  ;;  %253 = vst [vmem:[%s2899_s27 + $0x198] sm:$0xff] %v252_v51 }
  0x2f   : > { %255 = vst [vmem:[%s2899_s27 + $0x1a0] sm:$0xff] %v254_v52  ;;  %257 = vst [vmem:[%s2899_s27 + $0x1a8] sm:$0xff] %v256_v53  ;;  %v258_v54 = vld [vmem:[%s2891_s26 + $0x360] sm:$0xff]  ;;  %v260_v55 = vld [vmem:[%s2891_s26 + $0x368] sm:$0xff] }
  0x30   : > { %v262_v56 = vld [vmem:[%s2891_s26 + $0x380] sm:$0xff]  ;;  %259 = vst [vmem:[%s2899_s27 + $0x1b0] sm:$0xff] %v258_v54  ;;  %261 = vst [vmem:[%s2899_s27 + $0x1b8] sm:$0xff] %v260_v55  ;;  %v264_v57 = vld [vmem:[%s2891_s26 + $0x388] sm:$0xff] }
  0x31   : > { %263 = vst [vmem:[%s2899_s27 + $0x1c0] sm:$0xff] %v262_v56  ;;  %v266_v58 = vld [vmem:[%s2891_s26 + $0x3a0] sm:$0xff]  ;;  %v268_v59 = vld [vmem:[%s2891_s26 + $0x3a8] sm:$0xff]  ;;  %265 = vst [vmem:[%s2899_s27 + $0x1c8] sm:$0xff] %v264_v57 }
  0x32   : > { %267 = vst [vmem:[%s2899_s27 + $0x1d0] sm:$0xff] %v266_v58  ;;  %269 = vst [vmem:[%s2899_s27 + $0x1d8] sm:$0xff] %v268_v59  ;;  %v270_v60 = vld [vmem:[%s2891_s26 + $0x3c0] sm:$0xff]  ;;  %v272_v61 = vld [vmem:[%s2891_s26 + $0x3c8] sm:$0xff] }
  0x33   : > { %v274_v62 = vld [vmem:[%s2891_s26 + $0x3e0] sm:$0xff]  ;;  %271 = vst [vmem:[%s2899_s27 + $0x1e0] sm:$0xff] %v270_v60  ;;  %273 = vst [vmem:[%s2899_s27 + $0x1e8] sm:$0xff] %v272_v61  ;;  %v276_v63 = vld [vmem:[%s2891_s26 + $0x3e8] sm:$0xff] }
  0x34   : > { %275 = vst [vmem:[%s2899_s27 + $0x1f0] sm:$0xff] %v274_v62  ;;  %v278_v0 = vld [vmem:[%s2891_s26 + $0x400] sm:$0xff]  ;;  %v280_v1 = vld [vmem:[%s2891_s26 + $0x408] sm:$0xff]  ;;  %277 = vst [vmem:[%s2899_s27 + $0x1f8] sm:$0xff] %v276_v63 }
  0x35   : > { %279 = vst [vmem:[%s2899_s27 + $0x200] sm:$0xff] %v278_v0  ;;  %281 = vst [vmem:[%s2899_s27 + $0x208] sm:$0xff] %v280_v1  ;;  %v282_v2 = vld [vmem:[%s2891_s26 + $0x420] sm:$0xff]  ;;  %v284_v3 = vld [vmem:[%s2891_s26 + $0x428] sm:$0xff] }
  0x36   : > { %v286_v4 = vld [vmem:[%s2891_s26 + $0x440] sm:$0xff]  ;;  %283 = vst [vmem:[%s2899_s27 + $0x210] sm:$0xff] %v282_v2  ;;  %285 = vst [vmem:[%s2899_s27 + $0x218] sm:$0xff] %v284_v3  ;;  %v288_v5 = vld [vmem:[%s2891_s26 + $0x448] sm:$0xff] }
  0x37   : > { %287 = vst [vmem:[%s2899_s27 + $0x220] sm:$0xff] %v286_v4  ;;  %v290_v6 = vld [vmem:[%s2891_s26 + $0x460] sm:$0xff]  ;;  %v292_v7 = vld [vmem:[%s2891_s26 + $0x468] sm:$0xff]  ;;  %289 = vst [vmem:[%s2899_s27 + $0x228] sm:$0xff] %v288_v5 }
  0x38   : > { %291 = vst [vmem:[%s2899_s27 + $0x230] sm:$0xff] %v290_v6  ;;  %293 = vst [vmem:[%s2899_s27 + $0x238] sm:$0xff] %v292_v7  ;;  %v294_v8 = vld [vmem:[%s2891_s26 + $0x480] sm:$0xff]  ;;  %v296_v9 = vld [vmem:[%s2891_s26 + $0x488] sm:$0xff] }
  0x39   : > { %v298_v10 = vld [vmem:[%s2891_s26 + $0x4a0] sm:$0xff]  ;;  %295 = vst [vmem:[%s2899_s27 + $0x240] sm:$0xff] %v294_v8  ;;  %297 = vst [vmem:[%s2899_s27 + $0x248] sm:$0xff] %v296_v9  ;;  %v300_v11 = vld [vmem:[%s2891_s26 + $0x4a8] sm:$0xff] }
  0x3a   : > { %299 = vst [vmem:[%s2899_s27 + $0x250] sm:$0xff] %v298_v10  ;;  %v302_v12 = vld [vmem:[%s2891_s26 + $0x4c0] sm:$0xff]  ;;  %v304_v13 = vld [vmem:[%s2891_s26 + $0x4c8] sm:$0xff]  ;;  %301 = vst [vmem:[%s2899_s27 + $0x258] sm:$0xff] %v300_v11 }
  0x3b   : > { %303 = vst [vmem:[%s2899_s27 + $0x260] sm:$0xff] %v302_v12  ;;  %305 = vst [vmem:[%s2899_s27 + $0x268] sm:$0xff] %v304_v13  ;;  %v306_v14 = vld [vmem:[%s2891_s26 + $0x4e0] sm:$0xff]  ;;  %v308_v15 = vld [vmem:[%s2891_s26 + $0x4e8] sm:$0xff] }
  0x3c   : > { %v310_v16 = vld [vmem:[%s2891_s26 + $0x500] sm:$0xff]  ;;  %307 = vst [vmem:[%s2899_s27 + $0x270] sm:$0xff] %v306_v14  ;;  %309 = vst [vmem:[%s2899_s27 + $0x278] sm:$0xff] %v308_v15  ;;  %v312_v17 = vld [vmem:[%s2891_s26 + $0x508] sm:$0xff] }
  0x3d   : > { %311 = vst [vmem:[%s2899_s27 + $0x280] sm:$0xff] %v310_v16  ;;  %v314_v18 = vld [vmem:[%s2891_s26 + $0x520] sm:$0xff]  ;;  %v316_v19 = vld [vmem:[%s2891_s26 + $0x528] sm:$0xff]  ;;  %313 = vst [vmem:[%s2899_s27 + $0x288] sm:$0xff] %v312_v17 }
  0x3e   : > { %315 = vst [vmem:[%s2899_s27 + $0x290] sm:$0xff] %v314_v18  ;;  %317 = vst [vmem:[%s2899_s27 + $0x298] sm:$0xff] %v316_v19  ;;  %v318_v20 = vld [vmem:[%s2891_s26 + $0x540] sm:$0xff]  ;;  %v320_v21 = vld [vmem:[%s2891_s26 + $0x548] sm:$0xff] }
  0x3f   : > { %v322_v22 = vld [vmem:[%s2891_s26 + $0x560] sm:$0xff]  ;;  %319 = vst [vmem:[%s2899_s27 + $0x2a0] sm:$0xff] %v318_v20  ;;  %321 = vst [vmem:[%s2899_s27 + $0x2a8] sm:$0xff] %v320_v21  ;;  %v324_v23 = vld [vmem:[%s2891_s26 + $0x568] sm:$0xff] }
  0x40   : > { %323 = vst [vmem:[%s2899_s27 + $0x2b0] sm:$0xff] %v322_v22  ;;  %v326_v24 = vld [vmem:[%s2891_s26 + $0x580] sm:$0xff]  ;;  %v328_v25 = vld [vmem:[%s2891_s26 + $0x588] sm:$0xff]  ;;  %325 = vst [vmem:[%s2899_s27 + $0x2b8] sm:$0xff] %v324_v23 }
  0x41   : > { %327 = vst [vmem:[%s2899_s27 + $0x2c0] sm:$0xff] %v326_v24  ;;  %329 = vst [vmem:[%s2899_s27 + $0x2c8] sm:$0xff] %v328_v25  ;;  %v330_v26 = vld [vmem:[%s2891_s26 + $0x5a0] sm:$0xff]  ;;  %v332_v27 = vld [vmem:[%s2891_s26 + $0x5a8] sm:$0xff] }
  0x42   : > { %v334_v28 = vld [vmem:[%s2891_s26 + $0x5c0] sm:$0xff]  ;;  %331 = vst [vmem:[%s2899_s27 + $0x2d0] sm:$0xff] %v330_v26  ;;  %333 = vst [vmem:[%s2899_s27 + $0x2d8] sm:$0xff] %v332_v27  ;;  %v336_v29 = vld [vmem:[%s2891_s26 + $0x5c8] sm:$0xff] }
  0x43   : > { %335 = vst [vmem:[%s2899_s27 + $0x2e0] sm:$0xff] %v334_v28  ;;  %v338_v30 = vld [vmem:[%s2891_s26 + $0x5e0] sm:$0xff]  ;;  %v340_v31 = vld [vmem:[%s2891_s26 + $0x5e8] sm:$0xff]  ;;  %337 = vst [vmem:[%s2899_s27 + $0x2e8] sm:$0xff] %v336_v29 }
  0x44   : > { %339 = vst [vmem:[%s2899_s27 + $0x2f0] sm:$0xff] %v338_v30  ;;  %341 = vst [vmem:[%s2899_s27 + $0x2f8] sm:$0xff] %v340_v31  ;;  %v342_v32 = vld [vmem:[%s2891_s26 + $0x600] sm:$0xff]  ;;  %v344_v33 = vld [vmem:[%s2891_s26 + $0x608] sm:$0xff] }
  0x45   : > { %v346_v34 = vld [vmem:[%s2891_s26 + $0x620] sm:$0xff]  ;;  %343 = vst [vmem:[%s2899_s27 + $0x300] sm:$0xff] %v342_v32  ;;  %345 = vst [vmem:[%s2899_s27 + $0x308] sm:$0xff] %v344_v33  ;;  %v348_v35 = vld [vmem:[%s2891_s26 + $0x628] sm:$0xff] }
  0x46   : > { %347 = vst [vmem:[%s2899_s27 + $0x310] sm:$0xff] %v346_v34  ;;  %v350_v36 = vld [vmem:[%s2891_s26 + $0x640] sm:$0xff]  ;;  %v352_v37 = vld [vmem:[%s2891_s26 + $0x648] sm:$0xff]  ;;  %349 = vst [vmem:[%s2899_s27 + $0x318] sm:$0xff] %v348_v35 }
  0x47   : > { %351 = vst [vmem:[%s2899_s27 + $0x320] sm:$0xff] %v350_v36  ;;  %353 = vst [vmem:[%s2899_s27 + $0x328] sm:$0xff] %v352_v37  ;;  %v354_v38 = vld [vmem:[%s2891_s26 + $0x660] sm:$0xff]  ;;  %v356_v39 = vld [vmem:[%s2891_s26 + $0x668] sm:$0xff] }
  0x48   : > { %v358_v40 = vld [vmem:[%s2891_s26 + $0x680] sm:$0xff]  ;;  %355 = vst [vmem:[%s2899_s27 + $0x330] sm:$0xff] %v354_v38  ;;  %357 = vst [vmem:[%s2899_s27 + $0x338] sm:$0xff] %v356_v39  ;;  %v360_v41 = vld [vmem:[%s2891_s26 + $0x688] sm:$0xff] }
  0x49   : > { %359 = vst [vmem:[%s2899_s27 + $0x340] sm:$0xff] %v358_v40  ;;  %v362_v42 = vld [vmem:[%s2891_s26 + $0x6a0] sm:$0xff]  ;;  %v364_v43 = vld [vmem:[%s2891_s26 + $0x6a8] sm:$0xff]  ;;  %361 = vst [vmem:[%s2899_s27 + $0x348] sm:$0xff] %v360_v41 }
  0x4a   : > { %363 = vst [vmem:[%s2899_s27 + $0x350] sm:$0xff] %v362_v42  ;;  %365 = vst [vmem:[%s2899_s27 + $0x358] sm:$0xff] %v364_v43  ;;  %v366_v44 = vld [vmem:[%s2891_s26 + $0x6c0] sm:$0xff]  ;;  %v368_v45 = vld [vmem:[%s2891_s26 + $0x6c8] sm:$0xff] }
  0x4b   : > { %v370_v46 = vld [vmem:[%s2891_s26 + $0x6e0] sm:$0xff]  ;;  %367 = vst [vmem:[%s2899_s27 + $0x360] sm:$0xff] %v366_v44  ;;  %369 = vst [vmem:[%s2899_s27 + $0x368] sm:$0xff] %v368_v45  ;;  %v372_v47 = vld [vmem:[%s2891_s26 + $0x6e8] sm:$0xff] }
  0x4c   : > { %371 = vst [vmem:[%s2899_s27 + $0x370] sm:$0xff] %v370_v46  ;;  %v374_v48 = vld [vmem:[%s2891_s26 + $0x700] sm:$0xff]  ;;  %v376_v49 = vld [vmem:[%s2891_s26 + $0x708] sm:$0xff]  ;;  %373 = vst [vmem:[%s2899_s27 + $0x378] sm:$0xff] %v372_v47 }
  0x4d   : > { %375 = vst [vmem:[%s2899_s27 + $0x380] sm:$0xff] %v374_v48  ;;  %377 = vst [vmem:[%s2899_s27 + $0x388] sm:$0xff] %v376_v49  ;;  %v378_v50 = vld [vmem:[%s2891_s26 + $0x720] sm:$0xff]  ;;  %v380_v51 = vld [vmem:[%s2891_s26 + $0x728] sm:$0xff] }
  0x4e   : > { %v382_v52 = vld [vmem:[%s2891_s26 + $0x740] sm:$0xff]  ;;  %379 = vst [vmem:[%s2899_s27 + $0x390] sm:$0xff] %v378_v50  ;;  %381 = vst [vmem:[%s2899_s27 + $0x398] sm:$0xff] %v380_v51  ;;  %v384_v53 = vld [vmem:[%s2891_s26 + $0x748] sm:$0xff] }
  0x4f   : > { %383 = vst [vmem:[%s2899_s27 + $0x3a0] sm:$0xff] %v382_v52  ;;  %v386_v54 = vld [vmem:[%s2891_s26 + $0x760] sm:$0xff]  ;;  %v388_v55 = vld [vmem:[%s2891_s26 + $0x768] sm:$0xff]  ;;  %385 = vst [vmem:[%s2899_s27 + $0x3a8] sm:$0xff] %v384_v53 }
  0x50   : > { %387 = vst [vmem:[%s2899_s27 + $0x3b0] sm:$0xff] %v386_v54  ;;  %389 = vst [vmem:[%s2899_s27 + $0x3b8] sm:$0xff] %v388_v55  ;;  %v390_v56 = vld [vmem:[%s2891_s26 + $0x780] sm:$0xff]  ;;  %v392_v57 = vld [vmem:[%s2891_s26 + $0x788] sm:$0xff] }
  0x51   : > { %v394_v58 = vld [vmem:[%s2891_s26 + $0x7a0] sm:$0xff]  ;;  %391 = vst [vmem:[%s2899_s27 + $0x3c0] sm:$0xff] %v390_v56  ;;  %393 = vst [vmem:[%s2899_s27 + $0x3c8] sm:$0xff] %v392_v57  ;;  %v396_v59 = vld [vmem:[%s2891_s26 + $0x7a8] sm:$0xff] }
  0x52   : > { %395 = vst [vmem:[%s2899_s27 + $0x3d0] sm:$0xff] %v394_v58  ;;  %v398_v60 = vld [vmem:[%s2891_s26 + $0x7c0] sm:$0xff]  ;;  %v400_v61 = vld [vmem:[%s2891_s26 + $0x7c8] sm:$0xff]  ;;  %397 = vst [vmem:[%s2899_s27 + $0x3d8] sm:$0xff] %v396_v59 }
  0x53   : > { %399 = vst [vmem:[%s2899_s27 + $0x3e0] sm:$0xff] %v398_v60  ;;  %401 = vst [vmem:[%s2899_s27 + $0x3e8] sm:$0xff] %v400_v61  ;;  %v402_v62 = vld [vmem:[%s2891_s26 + $0x7e0] sm:$0xff]  ;;  %v404_v63 = vld [vmem:[%s2891_s26 + $0x7e8] sm:$0xff] }
  0x54   : > { %v406_v0 = vld [vmem:[%s2891_s26 + $0x800] sm:$0xff]  ;;  %403 = vst [vmem:[%s2899_s27 + $0x3f0] sm:$0xff] %v402_v62  ;;  %405 = vst [vmem:[%s2899_s27 + $0x3f8] sm:$0xff] %v404_v63  ;;  %v408_v1 = vld [vmem:[%s2891_s26 + $0x808] sm:$0xff] }
  0x55   : > { %407 = vst [vmem:[%s2899_s27 + $0x400] sm:$0xff] %v406_v0  ;;  %v410_v2 = vld [vmem:[%s2891_s26 + $0x820] sm:$0xff]  ;;  %v412_v3 = vld [vmem:[%s2891_s26 + $0x828] sm:$0xff]  ;;  %409 = vst [vmem:[%s2899_s27 + $0x408] sm:$0xff] %v408_v1 }
  0x56   : > { %411 = vst [vmem:[%s2899_s27 + $0x410] sm:$0xff] %v410_v2  ;;  %413 = vst [vmem:[%s2899_s27 + $0x418] sm:$0xff] %v412_v3  ;;  %v414_v4 = vld [vmem:[%s2891_s26 + $0x840] sm:$0xff]  ;;  %v416_v5 = vld [vmem:[%s2891_s26 + $0x848] sm:$0xff] }
  0x57   : > { %v418_v6 = vld [vmem:[%s2891_s26 + $0x860] sm:$0xff]  ;;  %415 = vst [vmem:[%s2899_s27 + $0x420] sm:$0xff] %v414_v4  ;;  %417 = vst [vmem:[%s2899_s27 + $0x428] sm:$0xff] %v416_v5  ;;  %v420_v7 = vld [vmem:[%s2891_s26 + $0x868] sm:$0xff] }
  0x58   : > { %419 = vst [vmem:[%s2899_s27 + $0x430] sm:$0xff] %v418_v6  ;;  %v422_v8 = vld [vmem:[%s2891_s26 + $0x880] sm:$0xff]  ;;  %v424_v9 = vld [vmem:[%s2891_s26 + $0x888] sm:$0xff]  ;;  %421 = vst [vmem:[%s2899_s27 + $0x438] sm:$0xff] %v420_v7 }
  0x59   : > { %423 = vst [vmem:[%s2899_s27 + $0x440] sm:$0xff] %v422_v8  ;;  %425 = vst [vmem:[%s2899_s27 + $0x448] sm:$0xff] %v424_v9  ;;  %v426_v10 = vld [vmem:[%s2891_s26 + $0x8a0] sm:$0xff]  ;;  %v428_v11 = vld [vmem:[%s2891_s26 + $0x8a8] sm:$0xff] }
  0x5a   : > { %v430_v12 = vld [vmem:[%s2891_s26 + $0x8c0] sm:$0xff]  ;;  %427 = vst [vmem:[%s2899_s27 + $0x450] sm:$0xff] %v426_v10  ;;  %429 = vst [vmem:[%s2899_s27 + $0x458] sm:$0xff] %v428_v11  ;;  %v432_v13 = vld [vmem:[%s2891_s26 + $0x8c8] sm:$0xff] }
  0x5b   : > { %431 = vst [vmem:[%s2899_s27 + $0x460] sm:$0xff] %v430_v12  ;;  %v434_v14 = vld [vmem:[%s2891_s26 + $0x8e0] sm:$0xff]  ;;  %v436_v15 = vld [vmem:[%s2891_s26 + $0x8e8] sm:$0xff]  ;;  %433 = vst [vmem:[%s2899_s27 + $0x468] sm:$0xff] %v432_v13 }
  0x5c   : > { %435 = vst [vmem:[%s2899_s27 + $0x470] sm:$0xff] %v434_v14  ;;  %437 = vst [vmem:[%s2899_s27 + $0x478] sm:$0xff] %v436_v15 }
  0x5d PF: > { %p2224_p7 = scmp.ge.s32.totalorder %s2828_s14, 1  ;;  %p442_p8 = scmp.lt.s32.totalorder %s2828_s14, 3 }
  0x5f   : > { %p443_p9 = pnand %p2224_p7, %p442_p8 }
  0x60   : > { %s449_s28 = sand.u32 (!%p443_p9), 1, %s2820_s12   ;;  %v2660_v16 = vld [vmem:[%s3489_s0 + $0x4] ss:$20 sps:$4 sm:$0xff] (!%p443_p9)   ;;  %v2830_v51 = vmov (!%p443_p9), 0   ;;  %vm1510_vm0 = vcmask (!%p443_p9), 523264  }
  0x61   : > { %446 = sbr.rel (%p443_p9) target bundleno = 516 (0x204), region = 51  ;;  %1555 = vmatprep.mubr.bf16.mxu0 (!%p443_p9), %v2660_v16  ;;  %1774 = vmatprep.mubr.bf16.mxu1 (!%p443_p9), %v2660_v16  ;;  %s2225_s4 = sshll.u32 (!%p443_p9), %s449_s28, 7 }
  0x62   : > { %s2534_s29 = smul.u32 (!%p443_p9), 1152, %s449_s28  ;;  %2560 = vset.pattern.permute.xlu0 (!%p443_p9), %v2830_v51  ;;  %2561 = vset.pattern.permute.xlu1 (!%p443_p9), %v2830_v51  ;;  %s3438_s12 = scalar_lea.vmem (!%p443_p9), [#allocation3], %s2225_s4 }
  0x64   : > { %s3191_s5 = scalar_lea.vmem (!%p443_p9), [#allocation2], %s2534_s29 }
  0x65   : > { %v2562_v17 = vld [vmem:[%s3191_s5 + $0x4] ss:$16 sps:$4 sm:$0xff] (!%p443_p9)   ;;  %v2564_v18 = vld [vmem:[%s3191_s5 + $0xc] ss:$16 sps:$4 sm:$0xff] (!%p443_p9)   ;;  %v2566_v19 = vld [vmem:[%s3191_s5] ss:$16 sps:$4 sm:$0xff] (!%p443_p9)  }
  0x66   : > { %1523 = vmatprep.subr.bf16.mxu0 (!%p443_p9), %v2562_v17  ;;  %v2567_v20 = vld [vmem:[%s3191_s5 + $0x8] ss:$16 sps:$4 sm:$0xff] (!%p443_p9)   ;;  %1742 = vmatprep.subr.bf16.mxu1 (!%p443_p9), %v2564_v18  ;;  %v2568_v21 = vld [vmem:[%s3191_s5 + $0x24] ss:$16 sps:$4 sm:$0xff] (!%p443_p9)   ;;  %v2570_v22 = vld [vmem:[%s3191_s5 + $0x2c] ss:$16 sps:$4 sm:$0xff] (!%p443_p9)  }
  0x67   : > { %1524 = vmatpush1.bf16.msra.mxu0 (!%p443_p9), %v2566_v19  ;;  %1743 = vmatpush1.bf16.msra.mxu1 (!%p443_p9), %v2567_v20  ;;  %v2572_v23 = vld [vmem:[%s3191_s5 + $0x20] ss:$16 sps:$4 sm:$0xff] (!%p443_p9)   ;;  %v2573_v24 = vld [vmem:[%s3191_s5 + $0x28] ss:$16 sps:$4 sm:$0xff] (!%p443_p9)   ;;  %v2574_v25 = vld [vmem:[%s3191_s5 + $0x44] ss:$16 sps:$4 sm:$0xff] (!%p443_p9)  }
  0x68   : > { %1525 = vmatprep.subr.bf16.mxu0 %v2568_v21  ;;  %1744 = vmatprep.subr.bf16.mxu1 %v2570_v22  ;;  %v2576_v26 = vld [vmem:[%s3191_s5 + $0x4c] ss:$16 sps:$4 sm:$0xff]   ;;  %v2578_v27 = vld [vmem:[%s3191_s5 + $0x40] ss:$16 sps:$4 sm:$0xff]   ;;  %v2579_v28 = vld [vmem:[%s3191_s5 + $0x48] ss:$16 sps:$4 sm:$0xff]  }
  0x69   : > { %v2580_v29 = vld [vmem:[%s3191_s5 + $0x64] ss:$16 sps:$4 sm:$0xff]   ;;  %v2582_v30 = vld [vmem:[%s3191_s5 + $0x6c] ss:$16 sps:$4 sm:$0xff]   ;;  %v2584_v31 = vld [vmem:[%s3191_s5 + $0x60] ss:$16 sps:$4 sm:$0xff]  }
  0x6a   : > { %v2585_v32 = vld [vmem:[%s3191_s5 + $0x68] ss:$16 sps:$4 sm:$0xff]   ;;  %v2586_v33 = vld [vmem:[%s3191_s5 + $0x84] ss:$16 sps:$4 sm:$0xff]   ;;  %v2588_v34 = vld [vmem:[%s3191_s5 + $0x8c] ss:$16 sps:$4 sm:$0xff]  }
  0x6b   : > { %1526 = vmatpush1.bf16.msra.mxu0 %v2572_v23  ;;  %1745 = vmatpush1.bf16.msra.mxu1 %v2573_v24  ;;  %v2590_v35 = vld [vmem:[%s3191_s5 + $0x80] ss:$16 sps:$4 sm:$0xff]   ;;  %v2591_v36 = vld [vmem:[%s3191_s5 + $0x88] ss:$16 sps:$4 sm:$0xff]   ;;  %v2592_v37 = vld [vmem:[%s3191_s5 + $0xa4] ss:$16 sps:$4 sm:$0xff]  }
  0x6c   : > { %1527 = vmatprep.subr.bf16.mxu0 %v2574_v25  ;;  %1746 = vmatprep.subr.bf16.mxu1 %v2576_v26  ;;  %v2594_v38 = vld [vmem:[%s3191_s5 + $0xac] ss:$16 sps:$4 sm:$0xff]   ;;  %v2596_v39 = vld [vmem:[%s3191_s5 + $0xa0] ss:$16 sps:$4 sm:$0xff]   ;;  %v2597_v40 = vld [vmem:[%s3191_s5 + $0xa8] ss:$16 sps:$4 sm:$0xff]  }
  0x6d   : > { %v2598_v41 = vld [vmem:[%s3191_s5 + $0xc4] ss:$16 sps:$4 sm:$0xff]   ;;  %v2600_v42 = vld [vmem:[%s3191_s5 + $0xcc] ss:$16 sps:$4 sm:$0xff]   ;;  %v2602_v43 = vld [vmem:[%s3191_s5 + $0xc0] ss:$16 sps:$4 sm:$0xff]  }
  0x6e   : > { %v2603_v44 = vld [vmem:[%s3191_s5 + $0xc8] ss:$16 sps:$4 sm:$0xff]   ;;  %v2604_v45 = vld [vmem:[%s3191_s5 + $0xe4] ss:$16 sps:$4 sm:$0xff]   ;;  %v2606_v46 = vld [vmem:[%s3191_s5 + $0xec] ss:$16 sps:$4 sm:$0xff]  }
  0x6f   : > { %1528 = vmatpush1.bf16.msra.mxu0 %v2578_v27  ;;  %1747 = vmatpush1.bf16.msra.mxu1 %v2579_v28  ;;  %v2608_v47 = vld [vmem:[%s3191_s5 + $0xe0] ss:$16 sps:$4 sm:$0xff]   ;;  %v2609_v48 = vld [vmem:[%s3191_s5 + $0xe8] ss:$16 sps:$4 sm:$0xff]   ;;  %v2610_v49 = vld [vmem:[%s3191_s5 + $0x104] ss:$16 sps:$4 sm:$0xff]  }
  0x70   : > { %1529 = vmatprep.subr.bf16.mxu0 %v2580_v29  ;;  %1748 = vmatprep.subr.bf16.mxu1 %v2582_v30  ;;  %v2612_v50 = vld [vmem:[%s3191_s5 + $0x10c] ss:$16 sps:$4 sm:$0xff]   ;;  %v2614_v52 = vld [vmem:[%s3191_s5 + $0x100] ss:$16 sps:$4 sm:$0xff]   ;;  %v2615_v53 = vld [vmem:[%s3191_s5 + $0x108] ss:$16 sps:$4 sm:$0xff]  }
  0x71   : > { %v2616_v54 = vld [vmem:[%s3191_s5 + $0x124] ss:$16 sps:$4 sm:$0xff]   ;;  %v2618_v55 = vld [vmem:[%s3191_s5 + $0x12c] ss:$16 sps:$4 sm:$0xff]   ;;  %v2620_v56 = vld [vmem:[%s3191_s5 + $0x120] ss:$16 sps:$4 sm:$0xff]  }
  0x72   : > { %v2621_v57 = vld [vmem:[%s3191_s5 + $0x128] ss:$16 sps:$4 sm:$0xff]   ;;  %v2622_v58 = vld [vmem:[%s3191_s5 + $0x144] ss:$16 sps:$4 sm:$0xff]   ;;  %v2624_v59 = vld [vmem:[%s3191_s5 + $0x14c] ss:$16 sps:$4 sm:$0xff]  }
  0x73   : > { %1530 = vmatpush1.bf16.msra.mxu0 %v2584_v31  ;;  %1749 = vmatpush1.bf16.msra.mxu1 %v2585_v32  ;;  %v2626_v60 = vld [vmem:[%s3191_s5 + $0x140] ss:$16 sps:$4 sm:$0xff]   ;;  %v2627_v61 = vld [vmem:[%s3191_s5 + $0x148] ss:$16 sps:$4 sm:$0xff]   ;;  %v2628_v62 = vld [vmem:[%s3191_s5 + $0x164] ss:$16 sps:$4 sm:$0xff]  }
  0x74   : > { %1531 = vmatprep.subr.bf16.mxu0 %v2586_v33  ;;  %1750 = vmatprep.subr.bf16.mxu1 %v2588_v34  ;;  %v2630_v63 = vld [vmem:[%s3191_s5 + $0x16c] ss:$16 sps:$4 sm:$0xff]   ;;  %v2632_v0 = vld [vmem:[%s3191_s5 + $0x160] ss:$16 sps:$4 sm:$0xff]   ;;  %v2633_v1 = vld [vmem:[%s3191_s5 + $0x168] ss:$16 sps:$4 sm:$0xff]  }
  0x75   : > { %v2634_v2 = vld [vmem:[%s3191_s5 + $0x184] ss:$16 sps:$4 sm:$0xff]   ;;  %v2636_v3 = vld [vmem:[%s3191_s5 + $0x18c] ss:$16 sps:$4 sm:$0xff]   ;;  %v2638_v4 = vld [vmem:[%s3191_s5 + $0x180] ss:$16 sps:$4 sm:$0xff]  }
  0x76   : > { %v2639_v5 = vld [vmem:[%s3191_s5 + $0x188] ss:$16 sps:$4 sm:$0xff]   ;;  %v2640_v6 = vld [vmem:[%s3191_s5 + $0x1a4] ss:$16 sps:$4 sm:$0xff]   ;;  %v2642_v7 = vld [vmem:[%s3191_s5 + $0x1ac] ss:$16 sps:$4 sm:$0xff]  }
  0x77   : > { %1532 = vmatpush1.bf16.msra.mxu0 %v2590_v35  ;;  %1751 = vmatpush1.bf16.msra.mxu1 %v2591_v36  ;;  %v2644_v8 = vld [vmem:[%s3191_s5 + $0x1a0] ss:$16 sps:$4 sm:$0xff]   ;;  %v2645_v9 = vld [vmem:[%s3191_s5 + $0x1a8] ss:$16 sps:$4 sm:$0xff]   ;;  %v2646_v10 = vld [vmem:[%s3191_s5 + $0x1c4] ss:$16 sps:$4 sm:$0xff]  }
  0x78   : > { %1533 = vmatprep.subr.bf16.mxu0 %v2592_v37  ;;  %1752 = vmatprep.subr.bf16.mxu1 %v2594_v38  ;;  %v2648_v11 = vld [vmem:[%s3191_s5 + $0x1cc] ss:$16 sps:$4 sm:$0xff]   ;;  %v2650_v12 = vld [vmem:[%s3191_s5 + $0x1c0] ss:$16 sps:$4 sm:$0xff]   ;;  %v2651_v13 = vld [vmem:[%s3191_s5 + $0x1c8] ss:$16 sps:$4 sm:$0xff]  }
  0x79   : > { %v2652_v14 = vld [vmem:[%s3191_s5 + $0x1e4] ss:$16 sps:$4 sm:$0xff]   ;;  %v2654_v15 = vld [vmem:[%s3191_s5 + $0x1ec] ss:$16 sps:$4 sm:$0xff]   ;;  %v2656_v16 = vld [vmem:[%s3191_s5 + $0x1e0] ss:$16 sps:$4 sm:$0xff]  }
  0x7a   : > { %v2657_v17 = vld [vmem:[%s3191_s5 + $0x1e8] ss:$16 sps:$4 sm:$0xff]   ;;  %v2663_v18 = vld [vmem:[%s3191_s5 + $0x204] ss:$16 sps:$4 sm:$0xff]   ;;  %v2666_v19 = vld [vmem:[%s3191_s5 + $0x20c] ss:$16 sps:$4 sm:$0xff]  }
  0x7b   : > { %1534 = vmatpush1.bf16.msra.mxu0 %v2596_v39  ;;  %1753 = vmatpush1.bf16.msra.mxu1 %v2597_v40  ;;  %v2658_v20 = vld [vmem:[%s3489_s0] ss:$20 sps:$4 sm:$0xff]   ;;  %v2664_v22 = vld [vmem:[%s3191_s5 + $0x208] ss:$16 sps:$4 sm:$0xff]   ;;  %v2672_v24 = vld [vmem:[%s3191_s5 + $0x22c] ss:$16 sps:$4 sm:$0xff]  }
  0x7c   : > { %1535 = vmatprep.subr.bf16.mxu0 %v2598_v41  ;;  %1754 = vmatprep.subr.bf16.mxu1 %v2600_v42  ;;  %v2661_v21 = vld [vmem:[%s3191_s5 + $0x200] ss:$16 sps:$4 sm:$0xff]   ;;  %v2669_v23 = vld [vmem:[%s3191_s5 + $0x224] ss:$16 sps:$4 sm:$0xff]   ;;  %v2670_v27 = vld [vmem:[%s3191_s5 + $0x228] ss:$16 sps:$4 sm:$0xff]  }
  0x7d   : > { %v2721_v25 = vld [vmem:[%s3489_s0 + $0x2c] ss:$20 sps:$4 sm:$0xff]   ;;  %v2675_v28 = vld [vmem:[%s3191_s5 + $0x244] ss:$16 sps:$4 sm:$0xff]   ;;  %v2723_v30 = vld [vmem:[%s3489_s0 + $0x28] ss:$20 sps:$4 sm:$0xff]  }
  0x7e   : > { %v2667_v26 = vld [vmem:[%s3191_s5 + $0x220] ss:$16 sps:$4 sm:$0xff]   ;;  %v2678_v29 = vld [vmem:[%s3191_s5 + $0x24c] ss:$16 sps:$4 sm:$0xff]   ;;  %v2676_v32 = vld [vmem:[%s3191_s5 + $0x248] ss:$16 sps:$4 sm:$0xff]  }
  0x7f   : > { %1536 = vmatpush1.bf16.msra.mxu0 %v2602_v43  ;;  %1755 = vmatpush1.bf16.msra.mxu1 %v2603_v44  ;;  %v2673_v31 = vld [vmem:[%s3191_s5 + $0x240] ss:$16 sps:$4 sm:$0xff]   ;;  %v2681_v33 = vld [vmem:[%s3191_s5 + $0x264] ss:$16 sps:$4 sm:$0xff]   ;;  %v2684_v34 = vld [vmem:[%s3191_s5 + $0x26c] ss:$16 sps:$4 sm:$0xff]  }
  0x80   : > { %1537 = vmatprep.subr.bf16.mxu0 %v2604_v45  ;;  %1756 = vmatprep.subr.bf16.mxu1 %v2606_v46  ;;  %v2736_v35 = vld [vmem:[%s3489_s0 + $0x54] ss:$20 sps:$4 sm:$0xff]   ;;  %v2679_v36 = vld [vmem:[%s3191_s5 + $0x260] ss:$16 sps:$4 sm:$0xff]   ;;  %v2690_v39 = vld [vmem:[%s3191_s5 + $0x28c] ss:$16 sps:$4 sm:$0xff]  }
  0x81   : > { %v2682_v37 = vld [vmem:[%s3191_s5 + $0x268] ss:$16 sps:$4 sm:$0xff]   ;;  %v2687_v38 = vld [vmem:[%s3191_s5 + $0x284] ss:$16 sps:$4 sm:$0xff]   ;;  %v2685_v41 = vld [vmem:[%s3191_s5 + $0x280] ss:$16 sps:$4 sm:$0xff]  }
  0x82   : > { %v2738_v40 = vld [vmem:[%s3489_s0 + $0x50] ss:$20 sps:$4 sm:$0xff]   ;;  %v2688_v42 = vld [vmem:[%s3191_s5 + $0x288] ss:$16 sps:$4 sm:$0xff]   ;;  %v2696_v44 = vld [vmem:[%s3191_s5 + $0x2ac] ss:$16 sps:$4 sm:$0xff]  }
  0x83   : > { %1538 = vmatpush1.bf16.msra.mxu0 %v2608_v47  ;;  %1757 = vmatpush1.bf16.msra.mxu1 %v2609_v48  ;;  %v2693_v43 = vld [vmem:[%s3191_s5 + $0x2a4] ss:$16 sps:$4 sm:$0xff]   ;;  %v2751_v45 = vld [vmem:[%s3489_s0 + $0x7c] ss:$20 sps:$4 sm:$0xff]   ;;  %v2694_v47 = vld [vmem:[%s3191_s5 + $0x2a8] ss:$16 sps:$4 sm:$0xff]  }
  0x84   : > { %1539 = vmatprep.subr.bf16.mxu0 %v2610_v49  ;;  %1758 = vmatprep.subr.bf16.mxu1 %v2612_v50  ;;  %v2691_v46 = vld [vmem:[%s3191_s5 + $0x2a0] ss:$16 sps:$4 sm:$0xff]   ;;  %v2699_v48 = vld [vmem:[%s3191_s5 + $0x2c4] ss:$16 sps:$4 sm:$0xff]   ;;  %v2702_v49 = vld [vmem:[%s3191_s5 + $0x2cc] ss:$16 sps:$4 sm:$0xff]  }
  0x85   : > { %v2697_v50 = vld [vmem:[%s3191_s5 + $0x2c0] ss:$16 sps:$4 sm:$0xff]   ;;  %s2436_s28 = sshll.u32 (%p2881_p5), %s2218_s15, 4 }
  0x86   : > { %s2114_s20 = scalar_lea.vmem (%p2881_p5), %s3492_s3, %s2436_s28 }
  0x87   : > { %1540 = vmatpush1.bf16.msra.mxu0 %v2614_v52  ;;  %1759 = vmatpush1.bf16.msra.mxu1 %v2615_v53  ;;  %v2700_v52 = vld [vmem:[%s3191_s5 + $0x2c8] ss:$16 sps:$4 sm:$0xff]  }
  0x88   : > { %1541 = vmatprep.subr.bf16.mxu0 %v2616_v54  ;;  %1760 = vmatprep.subr.bf16.mxu1 %v2618_v55  ;;  %v2753_v53 = vld [vmem:[%s3489_s0 + $0x78] ss:$20 sps:$4 sm:$0xff]   ;;  %v2705_v54 = vld [vmem:[%s3191_s5 + $0x2e4] ss:$16 sps:$4 sm:$0xff]  }
  0x89   : > { %v2708_v55 = vld [vmem:[%s3191_s5 + $0x2ec] ss:$16 sps:$4 sm:$0xff]  }
  0x8b   : > { %1542 = vmatpush1.bf16.msra.mxu0 %v2620_v56  ;;  %1761 = vmatpush1.bf16.msra.mxu1 %v2621_v57  ;;  %v2768_v56 = vld [vmem:[%s3489_s0 + $0xc] ss:$20 sps:$4 sm:$0xff]  }
  0x8c   : > { %1543 = vmatprep.subr.bf16.mxu0 %v2622_v58  ;;  %1762 = vmatprep.subr.bf16.mxu1 %v2624_v59  ;;  %v2703_v57 = vld [vmem:[%s3191_s5 + $0x2e0] ss:$16 sps:$4 sm:$0xff]   ;;  %v2706_v58 = vld [vmem:[%s3191_s5 + $0x2e8] ss:$16 sps:$4 sm:$0xff]   ;;  %v2711_v59 = vld [vmem:[%s3191_s5 + $0x304] ss:$16 sps:$4 sm:$0xff]  }
  0x8f   : > { %1544 = vmatpush1.bf16.msra.mxu0 %v2626_v60  ;;  %1763 = vmatpush1.bf16.msra.mxu1 %v2627_v61  ;;  %v2714_v60 = vld [vmem:[%s3191_s5 + $0x30c] ss:$16 sps:$4 sm:$0xff]   ;;  %v2709_v61 = vld [vmem:[%s3191_s5 + $0x300] ss:$16 sps:$4 sm:$0xff]  }
  0x90   : > { %1545 = vmatprep.subr.bf16.mxu0 %v2628_v62  ;;  %1764 = vmatprep.subr.bf16.mxu1 %v2630_v63  ;;  %v2712_v62 = vld [vmem:[%s3191_s5 + $0x308] ss:$16 sps:$4 sm:$0xff]   ;;  %v2717_v63 = vld [vmem:[%s3191_s5 + $0x324] ss:$16 sps:$4 sm:$0xff]  }
  0x93   : > { %1546 = vmatpush1.bf16.msra.mxu0 %v2632_v0  ;;  %1765 = vmatpush1.bf16.msra.mxu1 %v2633_v1  ;;  %v2720_v0 = vld [vmem:[%s3191_s5 + $0x32c] ss:$16 sps:$4 sm:$0xff]   ;;  %v2715_v1 = vld [vmem:[%s3191_s5 + $0x320] ss:$16 sps:$4 sm:$0xff]  }
  0x94   : > { %1547 = vmatprep.subr.bf16.mxu0 %v2634_v2  ;;  %1766 = vmatprep.subr.bf16.mxu1 %v2636_v3  ;;  %v2718_v2 = vld [vmem:[%s3191_s5 + $0x328] ss:$16 sps:$4 sm:$0xff]   ;;  %v2726_v3 = vld [vmem:[%s3191_s5 + $0x344] ss:$16 sps:$4 sm:$0xff]  }
  0x97   : > { %1548 = vmatpush1.bf16.msra.mxu0 %v2638_v4  ;;  %1767 = vmatpush1.bf16.msra.mxu1 %v2639_v5  ;;  %v2729_v4 = vld [vmem:[%s3191_s5 + $0x34c] ss:$16 sps:$4 sm:$0xff]   ;;  %v2724_v5 = vld [vmem:[%s3191_s5 + $0x340] ss:$16 sps:$4 sm:$0xff]  }
  0x98   : > { %1549 = vmatprep.subr.bf16.mxu0 %v2640_v6  ;;  %1768 = vmatprep.subr.bf16.mxu1 %v2642_v7  ;;  %v2727_v6 = vld [vmem:[%s3191_s5 + $0x348] ss:$16 sps:$4 sm:$0xff]   ;;  %v2732_v7 = vld [vmem:[%s3191_s5 + $0x364] ss:$16 sps:$4 sm:$0xff]  }
  0x9b   : > { %1550 = vmatpush1.bf16.msra.mxu0 %v2644_v8  ;;  %1769 = vmatpush1.bf16.msra.mxu1 %v2645_v9  ;;  %v2735_v8 = vld [vmem:[%s3191_s5 + $0x36c] ss:$16 sps:$4 sm:$0xff]   ;;  %v642_v9 = vld [vmem:[%s3491_s2] sm:$0xff] }
  0x9c   : > { %1551 = vmatprep.subr.bf16.mxu0 %v2646_v10  ;;  %1770 = vmatprep.subr.bf16.mxu1 %v2648_v11  ;;  %v644_v10 = vld [vmem:[%s3491_s2 + $0x10] sm:$0xff] }
  0x9d   : > { %652 = vperm.xlu0 %2560, %v642_v9   ;;  %v2730_v11 = vld [vmem:[%s3191_s5 + $0x360] ss:$16 sps:$4 sm:$0xff]   ;;  %662 = vperm.xlu1 %2561, %v644_v10  }
  0x9f   : > { %1552 = vmatpush1.bf16.msra.mxu0 %v2650_v12  ;;  %1771 = vmatpush1.bf16.msra.mxu1 %v2651_v13  ;;  %v2733_v12 = vld [vmem:[%s3191_s5 + $0x368] ss:$16 sps:$4 sm:$0xff]  }
  0xa0   : > { %1553 = vmatprep.subr.bf16.mxu0 %v2652_v14  ;;  %1772 = vmatprep.subr.bf16.mxu1 %v2654_v15  ;;  %v643_v13 = vld [vmem:[%s3491_s2 + $0x8] sm:$0xff]  ;;  %v2741_v14 = vld [vmem:[%s3191_s5 + $0x384] ss:$16 sps:$4 sm:$0xff]  }
  0xa1   : > { %v2744_v15 = vld [vmem:[%s3191_s5 + $0x38c] ss:$16 sps:$4 sm:$0xff]   ;;  %657 = vperm.xlu0 %2560, %v643_v13  }
  0xa3   : > { %1554 = vmatpush1.bf16.msra.mxu0 %v2656_v16  ;;  %1773 = vmatpush1.bf16.msra.mxu1 %v2657_v17  ;;  %v645_v16 = vld [vmem:[%s3491_s2 + $0x18] sm:$0xff]  ;;  %v2739_v17 = vld [vmem:[%s3191_s5 + $0x380] ss:$16 sps:$4 sm:$0xff]  }
  0xa4   : > { %1596 = vmatprep.subr.bf16.mxu0 %v2663_v18  ;;  %1815 = vmatprep.subr.bf16.mxu1 %v2666_v19  ;;  %v2742_v18 = vld [vmem:[%s3191_s5 + $0x388] ss:$16 sps:$4 sm:$0xff]   ;;  %v646_v19 = vld [vmem:[%s3491_s2 + $0x20] sm:$0xff] }
  0xa5   : > { %667 = vperm.xlu1 %2561, %v645_v16   ;;  %672 = vperm.xlu0 %2560, %v646_v19  }
  0xa6   : > { %1556 = vmatmul.mubr.bf16.vlgmr.msra.gmra.mrb[0].mxu0 %v2658_v20  ;;  %1775 = vmatmul.mubr.bf16.vlgmr.msra.gmra.mrb[0].mxu1 %v2658_v20  ;;  %v2747_v20 = vld [vmem:[%s3191_s5 + $0x3a4] ss:$16 sps:$4 sm:$0xff]  }
  0xa7   : > { %1597 = vmatpush1.bf16.msra.mxu0 %v2661_v21  ;;  %1816 = vmatpush1.bf16.msra.mxu1 %v2664_v22  ;;  %v2750_v21 = vld [vmem:[%s3191_s5 + $0x3ac] ss:$16 sps:$4 sm:$0xff]  }
  0xa8   : > { %1598 = vmatprep.subr.bf16.mxu0 %v2669_v23  ;;  %1817 = vmatprep.subr.bf16.mxu1 %v2672_v24  ;;  %v647_v22 = vld [vmem:[%s3491_s2 + $0x28] sm:$0xff]  ;;  %v2745_v23 = vld [vmem:[%s3191_s5 + $0x3a0] ss:$16 sps:$4 sm:$0xff]  }
  0xa9   : > { %1565 = vmatprep.mubr.bf16.mxu0 %v2721_v25  ;;  %1784 = vmatprep.mubr.bf16.mxu1 %v2721_v25  ;;  %v2748_v24 = vld [vmem:[%s3191_s5 + $0x3a8] ss:$16 sps:$4 sm:$0xff]   ;;  %v648_v25 = vld [vmem:[%s3491_s2 + $0x30] sm:$0xff] }
  0xaa   : > { %677 = vperm.xlu1 %2561, %v647_v22   ;;  %682 = vperm.xlu0 %2560, %v648_v25  }
  0xab   : > { %1599 = vmatpush1.bf16.msra.mxu0 %v2667_v26  ;;  %1818 = vmatpush1.bf16.msra.mxu1 %v2670_v27  ;;  %v2756_v26 = vld [vmem:[%s3191_s5 + $0x3c4] ss:$16 sps:$4 sm:$0xff]   ;;  %v2759_v27 = vld [vmem:[%s3191_s5 + $0x3cc] ss:$16 sps:$4 sm:$0xff]  }
  0xac   : > { %1600 = vmatprep.subr.bf16.mxu0 %v2675_v28  ;;  %1819 = vmatprep.subr.bf16.mxu1 %v2678_v29  ;;  %v649_v28 = vld [vmem:[%s3491_s2 + $0x38] sm:$0xff]  ;;  %v2754_v29 = vld [vmem:[%s3191_s5 + $0x3c0] ss:$16 sps:$4 sm:$0xff]  }
  0xae   : > { %1566 = vmatmul.mubr.bf16.gmra.mrb[4].mxu0 %v2723_v30  ;;  %1785 = vmatmul.mubr.bf16.gmra.mrb[4].mxu1 %v2723_v30  ;;  %v2757_v30 = vld [vmem:[%s3191_s5 + $0x3c8] ss:$16 sps:$4 sm:$0xff]  }
  0xaf   : > { %1601 = vmatpush1.bf16.msra.mxu0 %v2673_v31  ;;  %1820 = vmatpush1.bf16.msra.mxu1 %v2676_v32  ;;  %v2762_v31 = vld [vmem:[%s3191_s5 + $0x3e4] ss:$16 sps:$4 sm:$0xff]   ;;  %v2765_v32 = vld [vmem:[%s3191_s5 + $0x3ec] ss:$16 sps:$4 sm:$0xff]  }
  0xb0   : > { %1602 = vmatprep.subr.bf16.mxu0 %v2681_v33  ;;  %1821 = vmatprep.subr.bf16.mxu1 %v2684_v34  ;;  %v2760_v33 = vld [vmem:[%s3191_s5 + $0x3e0] ss:$16 sps:$4 sm:$0xff]   ;;  %v2763_v34 = vld [vmem:[%s3191_s5 + $0x3e8] ss:$16 sps:$4 sm:$0xff]  }
  0xb1   : > { %1575 = vmatprep.mubr.bf16.mxu0 %v2736_v35  ;;  %1794 = vmatprep.mubr.bf16.mxu1 %v2736_v35  ;;  %v2771_v35 = vld [vmem:[%s3191_s5 + $0x404] ss:$16 sps:$4 sm:$0xff]  }
  0xb2   : > { %687 = vperm.xlu1 %2561, %v649_v28  }
  0xb3   : > { %1603 = vmatpush1.bf16.msra.mxu0 %v2679_v36  ;;  %1822 = vmatpush1.bf16.msra.mxu1 %v2682_v37  ;;  %v2774_v36 = vld [vmem:[%s3191_s5 + $0x40c] ss:$16 sps:$4 sm:$0xff]  }
  0xb4   : > { %1604 = vmatprep.subr.bf16.mxu0 %v2687_v38  ;;  %1823 = vmatprep.subr.bf16.mxu1 %v2690_v39  ;;  %v2766_v37 = vld [vmem:[%s3489_s0 + $0x8] ss:$20 sps:$4 sm:$0xff]   ;;  %v2769_v38 = vld [vmem:[%s3191_s5 + $0x400] ss:$16 sps:$4 sm:$0xff]  }
  0xb5   : > { %v2772_v39 = vld [vmem:[%s3191_s5 + $0x408] ss:$16 sps:$4 sm:$0xff]  }
  0xb6   : > { %1576 = vmatmul.mubr.bf16.gmra.mrb[8].mxu0 %v2738_v40  ;;  %1795 = vmatmul.mubr.bf16.gmra.mrb[8].mxu1 %v2738_v40  ;;  %v2775_v40 = vld [vmem:[%s3489_s0 + $0x34] ss:$20 sps:$4 sm:$0xff]  }
  0xb7   : > { %1605 = vmatpush1.bf16.msra.mxu0 %v2685_v41  ;;  %1824 = vmatpush1.bf16.msra.mxu1 %v2688_v42  ;;  %v2780_v41 = vld [vmem:[%s3191_s5 + $0x424] ss:$16 sps:$4 sm:$0xff]   ;;  %v2783_v42 = vld [vmem:[%s3191_s5 + $0x42c] ss:$16 sps:$4 sm:$0xff]  }
  0xb8   : > { %1606 = vmatprep.subr.bf16.mxu0 %v2693_v43  ;;  %1825 = vmatprep.subr.bf16.mxu1 %v2696_v44  ;;  %v2778_v43 = vld [vmem:[%s3191_s5 + $0x420] ss:$16 sps:$4 sm:$0xff]   ;;  %v2781_v44 = vld [vmem:[%s3191_s5 + $0x428] ss:$16 sps:$4 sm:$0xff]  }
  0xb9   : > { %1585 = vmatprep.mubr.bf16.mxu0 %v2751_v45  ;;  %1804 = vmatprep.mubr.bf16.mxu1 %v2751_v45  ;;  %v2789_v45 = vld [vmem:[%s3191_s5 + $0x444] ss:$16 sps:$4 sm:$0xff]  }
  0xbb   : > { %1607 = vmatpush1.bf16.msra.mxu0 %v2691_v46  ;;  %1826 = vmatpush1.bf16.msra.mxu1 %v2694_v47  ;;  %v2792_v46 = vld [vmem:[%s3191_s5 + $0x44c] ss:$16 sps:$4 sm:$0xff]   ;;  %v2777_v47 = vld [vmem:[%s3489_s0 + $0x30] ss:$20 sps:$4 sm:$0xff]  }
  0xbc   : > { %1608 = vmatprep.subr.bf16.mxu0 %v2699_v48  ;;  %1827 = vmatprep.subr.bf16.mxu1 %v2702_v49  ;;  %v2784_v48 = vld [vmem:[%s3489_s0 + $0x5c] ss:$20 sps:$4 sm:$0xff]  }
  0xbd   : > { %v2787_v49 = vld [vmem:[%s3191_s5 + $0x440] ss:$16 sps:$4 sm:$0xff]  }
  0xbe   : > { %1586 = vmatmul.mubr.bf16.gmra.mrb[12].mxu0 %v2753_v53  ;;  %1805 = vmatmul.mubr.bf16.gmra.mrb[12].mxu1 %v2753_v53  ;;  %v2801_v53 = vld [vmem:[%s3191_s5 + $0x46c] ss:$16 sps:$4 sm:$0xff]  }
  0xbf   : > { %1609 = vmatpush1.bf16.msra.mxu0 %v2697_v50  ;;  %1828 = vmatpush1.bf16.msra.mxu1 %v2700_v52  ;;  %v2790_v50 = vld [vmem:[%s3191_s5 + $0x448] ss:$16 sps:$4 sm:$0xff]   ;;  %v2798_v52 = vld [vmem:[%s3191_s5 + $0x464] ss:$16 sps:$4 sm:$0xff]  }
  0xc0   : > { %1610 = vmatprep.subr.bf16.mxu0 %v2705_v54  ;;  %1829 = vmatprep.subr.bf16.mxu1 %v2708_v55  ;;  %v2796_v54 = vld [vmem:[%s3191_s5 + $0x460] ss:$16 sps:$4 sm:$0xff]   ;;  %v2799_v55 = vld [vmem:[%s3191_s5 + $0x468] ss:$16 sps:$4 sm:$0xff]  }
  0xc1   : > { %1628 = vmatprep.mubr.bf16.mxu0 %v2768_v56  ;;  %1847 = vmatprep.mubr.bf16.mxu1 %v2768_v56  ;;  %v2786_v56 = vld [vmem:[%s3489_s0 + $0x58] ss:$20 sps:$4 sm:$0xff]  }
  0xc3   : > { %1611 = vmatpush1.bf16.msra.mxu0 %v2703_v57  ;;  %1830 = vmatpush1.bf16.msra.mxu1 %v2706_v58  ;;  %v2793_v57 = vld [vmem:[%s3489_s0 + $0x84] ss:$20 sps:$4 sm:$0xff]   ;;  %v2795_v58 = vld [vmem:[%s3489_s0 + $0x80] ss:$20 sps:$4 sm:$0xff]  }
  0xc4   : > { %1612 = vmatprep.subr.bf16.mxu0 %v2711_v59  ;;  %1831 = vmatprep.subr.bf16.mxu1 %v2714_v60  ;;  %v2802_v59 = vld [vmem:[%s3489_s0 + $0x10] ss:$20 sps:$4 sm:$0xff]   ;;  %v2803_v60 = vld [vmem:[%s3489_s0 + $0x38] ss:$20 sps:$4 sm:$0xff]  }
  0xc7   : > { %1613 = vmatpush1.bf16.msra.mxu0 %v2709_v61  ;;  %1832 = vmatpush1.bf16.msra.mxu1 %v2712_v62  ;;  %v2804_v61 = vld [vmem:[%s3489_s0 + $0x60] ss:$20 sps:$4 sm:$0xff]   ;;  %v2805_v62 = vld [vmem:[%s3489_s0 + $0x88] ss:$20 sps:$4 sm:$0xff]  }
  0xc8   : > { %1614 = vmatprep.subr.bf16.mxu0 %v2717_v63  ;;  %1833 = vmatprep.subr.bf16.mxu1 %v2720_v0 }
  0xcb   : > { %1615 = vmatpush1.bf16.msra.mxu0 %v2715_v1  ;;  %1834 = vmatpush1.bf16.msra.mxu1 %v2718_v2 }
  0xcc   : > { %1616 = vmatprep.subr.bf16.mxu0 %v2726_v3  ;;  %1835 = vmatprep.subr.bf16.mxu1 %v2729_v4 }
  0xcf   : > { %1617 = vmatpush1.bf16.msra.mxu0 %v2724_v5  ;;  %1836 = vmatpush1.bf16.msra.mxu1 %v2727_v6 }
  0xd0   : > { %1618 = vmatprep.subr.bf16.mxu0 %v2732_v7  ;;  %1837 = vmatprep.subr.bf16.mxu1 %v2735_v8 }
  0xd3   : > { %1619 = vmatpush1.bf16.msra.mxu0 %v2730_v11  ;;  %1838 = vmatpush1.bf16.msra.mxu1 %v2733_v12 }
  0xd4   : > { %1620 = vmatprep.subr.bf16.mxu0 %v2741_v14  ;;  %1839 = vmatprep.subr.bf16.mxu1 %v2744_v15 }
  0xd7   : > { %1621 = vmatpush1.bf16.msra.mxu0 %v2739_v17  ;;  %1840 = vmatpush1.bf16.msra.mxu1 %v2742_v18 }
  0xd8   : > { %1622 = vmatprep.subr.bf16.mxu0 %v2747_v20  ;;  %1841 = vmatprep.subr.bf16.mxu1 %v2750_v21 }
  0xdb   : > { %1623 = vmatpush1.bf16.msra.mxu0 %v2745_v23  ;;  %1842 = vmatpush1.bf16.msra.mxu1 %v2748_v24 }
  0xdc   : > { %1624 = vmatprep.subr.bf16.mxu0 %v2756_v26  ;;  %1843 = vmatprep.subr.bf16.mxu1 %v2759_v27 }
  0xdf   : > { %1625 = vmatpush1.bf16.msra.mxu0 %v2754_v29  ;;  %1844 = vmatpush1.bf16.msra.mxu1 %v2757_v30 }
  0xe0   : > { %1626 = vmatprep.subr.bf16.mxu0 %v2762_v31  ;;  %1845 = vmatprep.subr.bf16.mxu1 %v2765_v32 }
  0xe3   : > { %1627 = vmatpush1.bf16.msra.mxu0 %v2760_v33  ;;  %1846 = vmatpush1.bf16.msra.mxu1 %v2763_v34 }
  0xe4   : > { %1669 = vmatprep.subr.bf16.mxu0 %v2771_v35  ;;  %1888 = vmatprep.subr.bf16.mxu1 %v2774_v36 }
  0xe6   : > { %1629 = vmatmul.mubr.bf16.vlgmr.msra.gmra.mrb[0].mxu0 %v2766_v37  ;;  %1848 = vmatmul.mubr.bf16.vlgmr.msra.gmra.mrb[0].mxu1 %v2766_v37 }
  0xe7   : > { %1670 = vmatpush1.bf16.msra.mxu0 %v2769_v38  ;;  %1889 = vmatpush1.bf16.msra.mxu1 %v2772_v39 }
  0xe8   : > { %1638 = vmatprep.mubr.bf16.mxu0 %v2775_v40  ;;  %1857 = vmatprep.mubr.bf16.mxu1 %v2775_v40 }
  0xe9   : > { %1671 = vmatprep.subr.bf16.mxu0 %v2780_v41  ;;  %1890 = vmatprep.subr.bf16.mxu1 %v2783_v42 }
  0xeb   : > { %1672 = vmatpush1.bf16.msra.mxu0 %v2778_v43  ;;  %1891 = vmatpush1.bf16.msra.mxu1 %v2781_v44 }
  0xec   : > { %1673 = vmatprep.subr.bf16.mxu0 %v2789_v45  ;;  %1892 = vmatprep.subr.bf16.mxu1 %v2792_v46 }
  0xee   : > { %1639 = vmatmul.mubr.bf16.gmra.mrb[4].mxu0 %v2777_v47  ;;  %1858 = vmatmul.mubr.bf16.gmra.mrb[4].mxu1 %v2777_v47 }
  0xef   : > { %1648 = vmatprep.mubr.bf16.mxu0 %v2784_v48  ;;  %1867 = vmatprep.mubr.bf16.mxu1 %v2784_v48 }
  0xf0   : > { %1674 = vmatpush1.bf16.msra.mxu0 %v2787_v49  ;;  %1893 = vmatpush1.bf16.msra.mxu1 %v2790_v50 }
  0xf1   : > { %1675 = vmatprep.subr.bf16.mxu0 %v2798_v52  ;;  %1894 = vmatprep.subr.bf16.mxu1 %v2801_v53 }
  0xf4   : > { %1676 = vmatpush1.bf16.msra.mxu0 %v2796_v54  ;;  %1895 = vmatpush1.bf16.msra.mxu1 %v2799_v55 }
  0xf6   : > { %1649 = vmatmul.mubr.bf16.gmra.mrb[8].mxu0 %v2786_v56  ;;  %1868 = vmatmul.mubr.bf16.gmra.mrb[8].mxu1 %v2786_v56 }
  0xf7   : > { %1658 = vmatprep.mubr.bf16.mxu0 %v2793_v57  ;;  %1877 = vmatprep.mubr.bf16.mxu1 %v2793_v57 }
  0xfe   : > { %1659 = vmatmul.mubr.bf16.gmra.mrb[12].mxu0 %v2795_v58  ;;  %1878 = vmatmul.mubr.bf16.gmra.mrb[12].mxu1 %v2795_v58 }
  0xff   : > { %1701 = vmatprep.mubr.bf16.mxu0 %v2830_v51  ;;  %1920 = vmatprep.mubr.bf16.mxu1 %v2830_v51 }
 0x106   : > { %2390 = vmatmul.mubr.msk.bf16.vlgmr.msra.gmra.mrb[0].mxu0 %vm1510_vm0, %v2802_v59  ;;  %2394 = vmatmul.mubr.msk.bf16.vlgmr.msra.gmra.mrb[0].mxu1 %vm1510_vm0, %v2802_v59 }
 0x107   : > { %1711 = vmatprep.mubr.bf16.mxu0 %v2830_v51  ;;  %1930 = vmatprep.mubr.bf16.mxu1 %v2830_v51 }
 0x10e   : > { %2391 = vmatmul.mubr.msk.bf16.gmra.mrb[4].mxu0 %vm1510_vm0, %v2803_v60  ;;  %2395 = vmatmul.mubr.msk.bf16.gmra.mrb[4].mxu1 %vm1510_vm0, %v2803_v60 }
 0x10f   : > { %1721 = vmatprep.mubr.bf16.mxu0 %v2830_v51  ;;  %1940 = vmatprep.mubr.bf16.mxu1 %v2830_v51 }
 0x116   : > { %2392 = vmatmul.mubr.msk.bf16.gmra.mrb[8].mxu0 %vm1510_vm0, %v2804_v61  ;;  %2396 = vmatmul.mubr.msk.bf16.gmra.mrb[8].mxu1 %vm1510_vm0, %v2804_v61 }
 0x117   : > { %1731 = vmatprep.mubr.bf16.mxu0 %v2830_v51  ;;  %1950 = vmatprep.mubr.bf16.mxu1 %v2830_v51 }
 0x11c   : > { %v653_v63 = vpop.permute.xlu0 %652  ;;  %v663_v1 = vpop.permute.xlu1 %662 }
 0x11e   : > { %2393 = vmatmul.mubr.msk.bf16.gmra.mrb[12].mxu0 %vm1510_vm0, %v2805_v62  ;;  %2397 = vmatmul.mubr.msk.bf16.gmra.mrb[12].mxu1 %vm1510_vm0, %v2805_v62 }
 0x120   : > { %v658_v0 = vpop.permute.xlu0 %657 }
 0x124   : > { %v668_v27 = vpop.permute.xlu1 %667  ;;  %v673_v58 = vpop.permute.xlu0 %672 }
 0x129   : > { %v678_v57 = vpop.permute.xlu1 %677 }
 0x1d9   : > { %v1703_v2 = vpop.f32.mrb[0].mxu0  ;;  %v1922_v3 = vpop.f32.mrb[0].mxu1 }
 0x1da   : > { %v2437_v4 = vadd.f32 %v1703_v2, %v653_v63  ;;  %v2453_v5 = vadd.f32 %v1922_v3, %v653_v63  ;;  %v1705_v6 = vpop.f32.mrb[1].mxu0  ;;  %v1924_v7 = vpop.f32.mrb[1].mxu1 }
 0x1db   : > { %v2438_v51 = vadd.f32 %v1705_v6, %v653_v63  ;;  %v2454_v8 = vadd.f32 %v1924_v7, %v653_v63  ;;  %v1707_v9 = vpop.f32.mrb[2].mxu0  ;;  %v1926_v10 = vpop.f32.mrb[2].mxu1 }
 0x1dc   : > { %v1961_v11 = vmax.f32 %v2437_v4, 0.0  ;;  %v1963_v12 = vmax.f32 %v2453_v5, 0.0  ;;  %v2439_v13 = vadd.f32 %v1707_v9, %v658_v0  ;;  %v2455_v14 = vadd.f32 %v1926_v10, %v658_v0  ;;  %v1709_v15 = vpop.f32.mrb[3].mxu0  ;;  %v1928_v16 = vpop.f32.mrb[3].mxu1 }
 0x1dd   : > { %v1962_v17 = vmax.f32 %v2438_v51, 0.0  ;;  %v1964_v18 = vmax.f32 %v2454_v8, 0.0  ;;  %v2440_v19 = vadd.f32 %v1709_v15, %v658_v0  ;;  %v2456_v20 = vadd.f32 %v1928_v16, %v658_v0 }
 0x1de   : > { %v1965_v21 = vmax.f32 %v2439_v13, 0.0  ;;  %v1967_v22 = vmax.f32 %v2455_v14, 0.0 }
 0x1df   : > { %v2420_v23 = vpack.c.bf16 %v1962_v17, %v1961_v11  ;;  %v2421_v24 = vpack.c.bf16 %v1964_v18, %v1963_v12  ;;  %v1966_v25 = vmax.f32 %v2440_v19, 0.0  ;;  %v1968_v26 = vmax.f32 %v2456_v20, 0.0 }
 0x1e1   : > { %2089 = vst [vmem:[%s3438_s12] sm:$0xff] %v2420_v23  ;;  %2090 = vst [vmem:[%s3438_s12 + $0x8] sm:$0xff] %v2421_v24  ;;  %v2422_v28 = vpack.c.bf16 %v1966_v25, %v1965_v21  ;;  %v2423_v29 = vpack.c.bf16 %v1968_v26, %v1967_v22  ;;  %v1713_v30 = vpop.f32.mrb[4].mxu0  ;;  %v1932_v31 = vpop.f32.mrb[4].mxu1 }
 0x1e2   : > { %v2441_v32 = vadd.f32 %v1713_v30, %v663_v1  ;;  %v2457_v33 = vadd.f32 %v1932_v31, %v663_v1  ;;  %v1715_v34 = vpop.f32.mrb[5].mxu0  ;;  %v1934_v35 = vpop.f32.mrb[5].mxu1 }
 0x1e3   : > { %2091 = vst [vmem:[%s3438_s12 + $0x10] sm:$0xff] %v2422_v28  ;;  %2092 = vst [vmem:[%s3438_s12 + $0x18] sm:$0xff] %v2423_v29  ;;  %v2442_v36 = vadd.f32 %v1715_v34, %v663_v1  ;;  %v2458_v37 = vadd.f32 %v1934_v35, %v663_v1  ;;  %v1717_v38 = vpop.f32.mrb[6].mxu0  ;;  %v1936_v39 = vpop.f32.mrb[6].mxu1 }
 0x1e4   : > { %v1969_v40 = vmax.f32 %v2441_v32, 0.0  ;;  %v1971_v41 = vmax.f32 %v2457_v33, 0.0  ;;  %v2443_v42 = vadd.f32 %v1717_v38, %v668_v27  ;;  %v2459_v43 = vadd.f32 %v1936_v39, %v668_v27  ;;  %v1719_v44 = vpop.f32.mrb[7].mxu0  ;;  %v1938_v45 = vpop.f32.mrb[7].mxu1 }
 0x1e5   : > { %v1970_v46 = vmax.f32 %v2442_v36, 0.0  ;;  %v1972_v47 = vmax.f32 %v2458_v37, 0.0  ;;  %v2444_v48 = vadd.f32 %v1719_v44, %v668_v27  ;;  %v2460_v49 = vadd.f32 %v1938_v45, %v668_v27  ;;  %v688_v22 = vpop.permute.xlu1 %687  ;;  %v683_v23 = vpop.permute.xlu0 %682 }
 0x1e6   : > { %v1973_v50 = vmax.f32 %v2443_v42, 0.0  ;;  %v1975_v52 = vmax.f32 %v2459_v43, 0.0 }
 0x1e7   : > { %v2424_v53 = vpack.c.bf16 %v1970_v46, %v1969_v40  ;;  %v2425_v54 = vpack.c.bf16 %v1972_v47, %v1971_v41  ;;  %v1974_v55 = vmax.f32 %v2444_v48, 0.0  ;;  %v1976_v56 = vmax.f32 %v2460_v49, 0.0 }
 0x1e9   : > { %2093 = vst [vmem:[%s3438_s12 + $0x20] sm:$0xff] %v2424_v53  ;;  %2094 = vst [vmem:[%s3438_s12 + $0x28] sm:$0xff] %v2425_v54  ;;  %v2426_v59 = vpack.c.bf16 %v1974_v55, %v1973_v50  ;;  %v2427_v60 = vpack.c.bf16 %v1976_v56, %v1975_v52  ;;  %v1723_v61 = vpop.f32.mrb[8].mxu0  ;;  %v1942_v62 = vpop.f32.mrb[8].mxu1  ;;  %v2127_v55 = vld [vmem:[%s3438_s12] sm:$0xff] (%p2881_p5)  ;;  %v2129_v56 = vld [vmem:[%s3438_s12 + $0x8] sm:$0xff] (%p2881_p5) }
 0x1ea   : > { %v2445_v63 = vadd.f32 %v1723_v61, %v673_v58  ;;  %v2461_v0 = vadd.f32 %v1942_v62, %v673_v58  ;;  %v1725_v1 = vpop.f32.mrb[9].mxu0  ;;  %v1944_v2 = vpop.f32.mrb[9].mxu1  ;;  %2128 = vst [vmem:[%s2114_s20] sm:$0xff] (%p2881_p5), %v2127_v55  ;;  %2130 = vst [vmem:[%s2114_s20 + $0x8] sm:$0xff] (%p2881_p5), %v2129_v56 }
 0x1eb   : > { %2095 = vst [vmem:[%s3438_s12 + $0x30] sm:$0xff] %v2426_v59  ;;  %2096 = vst [vmem:[%s3438_s12 + $0x38] sm:$0xff] %v2427_v60  ;;  %v2446_v3 = vadd.f32 %v1725_v1, %v673_v58  ;;  %v2462_v4 = vadd.f32 %v1944_v2, %v673_v58  ;;  %v1727_v5 = vpop.f32.mrb[10].mxu0  ;;  %v1946_v6 = vpop.f32.mrb[10].mxu1  ;;  %v2133_v58 = vld [vmem:[%s3438_s12 + $0x18] sm:$0xff] (%p2881_p5) }
 0x1ec   : > { %v1977_v7 = vmax.f32 %v2445_v63, 0.0  ;;  %v1979_v51 = vmax.f32 %v2461_v0, 0.0  ;;  %v2447_v8 = vadd.f32 %v1727_v5, %v678_v57  ;;  %v2463_v9 = vadd.f32 %v1946_v6, %v678_v57  ;;  %v1729_v10 = vpop.f32.mrb[11].mxu0  ;;  %v1948_v11 = vpop.f32.mrb[11].mxu1  ;;  %2134 = vst [vmem:[%s2114_s20 + $0x28] sm:$0xff] (%p2881_p5), %v2133_v58 }
 0x1ed   : > { %v1978_v12 = vmax.f32 %v2446_v3, 0.0  ;;  %v1980_v13 = vmax.f32 %v2462_v4, 0.0  ;;  %v2448_v14 = vadd.f32 %v1729_v10, %v678_v57  ;;  %v2464_v15 = vadd.f32 %v1948_v11, %v678_v57  ;;  %v2131_v57 = vld [vmem:[%s3438_s12 + $0x10] sm:$0xff] (%p2881_p5) }
 0x1ee   : > { %v1981_v16 = vmax.f32 %v2447_v8, 0.0  ;;  %v1983_v17 = vmax.f32 %v2463_v9, 0.0  ;;  %2132 = vst [vmem:[%s2114_s20 + $0x20] sm:$0xff] (%p2881_p5), %v2131_v57 }
 0x1ef   : > { %v2428_v18 = vpack.c.bf16 %v1978_v12, %v1977_v7  ;;  %v2429_v19 = vpack.c.bf16 %v1980_v13, %v1979_v51  ;;  %v1982_v20 = vmax.f32 %v2448_v14, 0.0  ;;  %v1984_v21 = vmax.f32 %v2464_v15, 0.0 }
 0x1f0   : > { %v2135_v59 = vld [vmem:[%s3438_s12 + $0x20] sm:$0xff] (%p2881_p5)  ;;  %v2137_v60 = vld [vmem:[%s3438_s12 + $0x28] sm:$0xff] (%p2881_p5) }
 0x1f1   : > { %2097 = vst [vmem:[%s3438_s12 + $0x40] sm:$0xff] %v2428_v18  ;;  %2098 = vst [vmem:[%s3438_s12 + $0x48] sm:$0xff] %v2429_v19  ;;  %v2430_v24 = vpack.c.bf16 %v1982_v20, %v1981_v16  ;;  %v2431_v25 = vpack.c.bf16 %v1984_v21, %v1983_v17  ;;  %v1733_v26 = vpop.f32.mrb[12].mxu0  ;;  %v1952_v27 = vpop.f32.mrb[12].mxu1 }
 0x1f2   : > { %v2449_v28 = vadd.f32 %v1733_v26, %v683_v23  ;;  %v2465_v29 = vadd.f32 %v1952_v27, %v683_v23  ;;  %v1735_v30 = vpop.f32.mrb[13].mxu0  ;;  %v1954_v31 = vpop.f32.mrb[13].mxu1  ;;  %2136 = vst [vmem:[%s2114_s20 + $0x40] sm:$0xff] (%p2881_p5), %v2135_v59  ;;  %2138 = vst [vmem:[%s2114_s20 + $0x48] sm:$0xff] (%p2881_p5), %v2137_v60  ;;  %v2139_v61 = vld [vmem:[%s3438_s12 + $0x30] sm:$0xff] (%p2881_p5)  ;;  %v2141_v62 = vld [vmem:[%s3438_s12 + $0x38] sm:$0xff] (%p2881_p5) }
 0x1f3   : > { %2099 = vst [vmem:[%s3438_s12 + $0x50] sm:$0xff] %v2430_v24  ;;  %2100 = vst [vmem:[%s3438_s12 + $0x58] sm:$0xff] %v2431_v25  ;;  %v2450_v32 = vadd.f32 %v1735_v30, %v683_v23  ;;  %v2466_v33 = vadd.f32 %v1954_v31, %v683_v23  ;;  %v1737_v34 = vpop.f32.mrb[14].mxu0  ;;  %v1956_v35 = vpop.f32.mrb[14].mxu1 }
 0x1f4   : > { %v1985_v36 = vmax.f32 %v2449_v28, 0.0  ;;  %v1987_v37 = vmax.f32 %v2465_v29, 0.0  ;;  %v2451_v38 = vadd.f32 %v1737_v34, %v688_v22  ;;  %v2467_v39 = vadd.f32 %v1956_v35, %v688_v22  ;;  %v1739_v40 = vpop.f32.mrb[15].mxu0  ;;  %v1958_v41 = vpop.f32.mrb[15].mxu1  ;;  %2140 = vst [vmem:[%s2114_s20 + $0x60] sm:$0xff] (%p2881_p5), %v2139_v61  ;;  %2142 = vst [vmem:[%s2114_s20 + $0x68] sm:$0xff] (%p2881_p5), %v2141_v62 }
 0x1f5   : > { %v1986_v42 = vmax.f32 %v2450_v32, 0.0  ;;  %v1988_v43 = vmax.f32 %v2466_v33, 0.0  ;;  %v2452_v44 = vadd.f32 %v1739_v40, %v688_v22  ;;  %v2468_v45 = vadd.f32 %v1958_v41, %v688_v22  ;;  %2111 = sbr.rel (!%p2881_p5) target bundleno = 516 (0x204), region = 59 }
 0x1f6   : > { %v1989_v46 = vmax.f32 %v2451_v38, 0.0  ;;  %v1991_v47 = vmax.f32 %v2467_v39, 0.0 }
 0x1f7   : > { %v2432_v48 = vpack.c.bf16 %v1986_v42, %v1985_v36  ;;  %v2433_v49 = vpack.c.bf16 %v1988_v43, %v1987_v37  ;;  %v1990_v50 = vmax.f32 %v2452_v44, 0.0  ;;  %v1992_v52 = vmax.f32 %v2468_v45, 0.0 }
 0x1f8   : > { %v2143_v63 = vld [vmem:[%s3438_s12 + $0x40] sm:$0xff] (%p2881_p5)  ;;  %v2145_v0 = vld [vmem:[%s3438_s12 + $0x48] sm:$0xff] (%p2881_p5) }
 0x1f9   : > { %2101 = vst [vmem:[%s3438_s12 + $0x60] sm:$0xff] %v2432_v48  ;;  %2102 = vst [vmem:[%s3438_s12 + $0x68] sm:$0xff] %v2433_v49  ;;  %v2434_v53 = vpack.c.bf16 %v1990_v50, %v1989_v46  ;;  %v2435_v54 = vpack.c.bf16 %v1992_v52, %v1991_v47 }
 0x1fa   : > { %2144 = vst [vmem:[%s2114_s20 + $0x80] sm:$0xff] (%p2881_p5), %v2143_v63  ;;  %v2147_v1 = vld [vmem:[%s3438_s12 + $0x50] sm:$0xff] (%p2881_p5)  ;;  %v2149_v2 = vld [vmem:[%s3438_s12 + $0x58] sm:$0xff] (%p2881_p5)  ;;  %2146 = vst [vmem:[%s2114_s20 + $0x88] sm:$0xff] (%p2881_p5), %v2145_v0 }
 0x1fb   : > { %2103 = vst [vmem:[%s3438_s12 + $0x70] sm:$0xff] %v2434_v53  ;;  %2104 = vst [vmem:[%s3438_s12 + $0x78] sm:$0xff] %v2435_v54 }
 0x1fc   : > { %2148 = vst [vmem:[%s2114_s20 + $0xa0] sm:$0xff] %v2147_v1  ;;  %2150 = vst [vmem:[%s2114_s20 + $0xa8] sm:$0xff] %v2149_v2 }
 0x200   : > { %v2151_v3 = vld [vmem:[%s3438_s12 + $0x60] sm:$0xff]  ;;  %v2153_v4 = vld [vmem:[%s3438_s12 + $0x68] sm:$0xff] }
 0x201   : > { %2152 = vst [vmem:[%s2114_s20 + $0xc0] sm:$0xff] %v2151_v3  ;;  %2154 = vst [vmem:[%s2114_s20 + $0xc8] sm:$0xff] %v2153_v4 }
 0x202   : > { %v2155_v5 = vld [vmem:[%s3438_s12 + $0x70] sm:$0xff]  ;;  %v2157_v6 = vld [vmem:[%s3438_s12 + $0x78] sm:$0xff] }
 0x203   : > { %2156 = vst [vmem:[%s2114_s20 + $0xe0] sm:$0xff] %v2155_v5  ;;  %2158 = vst [vmem:[%s2114_s20 + $0xe8] sm:$0xff] %v2157_v6 }
 0x204 PF: > { %p10_p10 = scmp.ge.s32.totalorder %s2868_s16, 4   ;;  %s3494_s12 = smov %s2824_s13 }
 0x205   : > { %s3495_s13 = smov %s2879_s19  ;;  %s3496_s14 = smov %s2868_s16 }
 0x206   :  { %12 = sbr.rel (!%p10_p10) target bundleno = 2 (0x2), region = 113 }

// kernel: forward.7
= control target key start
LH: loop header
LB: loop body
LE: loop exit
PB: predicated region body
PF: predicated region fallthrough
CT: control target
= control target key end

     0   :  { %9 = vsyncpa [#allocation4], 0  ;;  %s13034_s0 = inlined_call_operand.vmem [shape: bf16[2,32768], index: 0, kind: input, shape index: {}]   ;;  %s13035_s1 = inlined_call_operand.hbm [shape: bf16[32768,512], index: 1, kind: input, shape index: {}]   ;;  %s13036_s2 = inlined_call_operand.vmem [shape: f32[1,512], index: 2, kind: input, shape index: {}]   ;;  %s13037_s3 = inlined_call_operand.vmem [shape: f32[512,128], index: 3, kind: input, shape index: {}]   ;;  %s13038_s4 = inlined_call_operand.vmem [shape: f32[2,2,128], index: 4, kind: output, shape index: {}]  }
   0x1   :  { %11 = vsyncpa [#allocation4 + $0x1], 0  ;;  %s11479_s15 = smov 0   ;;  %s11481_s16 = smov 0  }
   0x2   :  { %s11483_s17 = smov 0   ;;  %s11485_s18 = smov 0  }
   0x3   :  { %s11487_s19 = smov 0   ;;  %s11489_s20 = smov 0  }
   0x4   :  { %s11491_s21 = smov 0   ;;  %s11493_s22 = smov 0  }
   0x5 LB: > { %s8490_s23 = sadd.s32 4294967295, %s11445_s22   ;;  %s26_s24 = sadd.s32 1, %s11437_s20  ;;  %s11445_s22 = sphi %s11493_s22, %s17_s22   ;;  %s11441_s21 = sphi %s11491_s21, %s13051_s21   ;;  %s11437_s20 = sphi %s11489_s20, %s13050_s20   ;;  %s11433_s19 = sphi %s11487_s19, %s13049_s19   ;;  %s11429_s18 = sphi %s11485_s18, %s13048_s18   ;;  %s11425_s17 = sphi %s11483_s17, %s13047_s17   ;;  %s11421_s16 = sphi %s11481_s16, %s13046_s16   ;;  %s11417_s15 = sphi %s11479_s15, %s13045_s15  }
   0x6   : > { %p27_p0 = scmp.ge.s32.totalorder %s26_s24, 4  ;;  %s29_s25 = sadd.s32 1, %s11441_s21 }
   0x7   : > { %s64_s26 = sadd.s32 1, %s11425_s17  ;;  %p71_p1 = scmp.ne.s32.totalorder %s11425_s17, %s11421_s16 }
   0x8   : > { %s13053_s24 = smov (%p27_p0, %s26_s24), 0  ;;  %s13055_s25 = smov (!%p27_p0, %s29_s25), %s11441_s21 }
   0x9   : > { %13040 = sst [smem:[#allocation6_spill]] %s13053_s24  ;;  %s59_s27 = ssub.s32 %s11437_s20, %s13053_s24 }
   0xa   : > { %p72_p2 = scmp.eq.s32.totalorder %s11445_s22, 0  ;;  %p31_p3 = scmp.ge.s32.totalorder %s13055_s25, 2 }
   0xb   : > { %p77_p4 = scmp.ne.s32.totalorder %s11421_s16, %s11417_s15  ;;  %p78_p6 = scmp.eq.s32.totalorder %s8490_s23, 0 }
   0xc   : > { %p11530_p5 = por %p72_p2, %p71_p1  ;;  %s13057_s25 = smov (%p31_p3, %s13055_s25), 0 }
   0xd   : > { %p11536_p7 = por %p78_p6, %p77_p4  ;;  %s60_s30 = ssub.s32 %s11441_s21, %s13057_s25 }
   0xe   : > { %p9730_p8 = scmp.lt.s32.totalorder %s11445_s22, 8  ;;  %s61_s5 = sor.u32 %s60_s30, %s59_s27 }
   0xf   : > { %s187_s6 = sand.u32 1, %s11425_s17   ;;  %p62_p9 = scmp.eq.s32.totalorder %s61_s5, 0 }
  0x10   : > { %s8494_s7 = sshll.u32 %s187_s6, 13  ;;  %s8496_s8 = sshll.u32 %s11441_s21, 1 }
  0x11   : > { %s11546_s9 = scalar_select %p62_p9, %s11425_s17, %s64_s26  }
  0x12   : > { %s9534_s10 = sshll.u32 %s11437_s20, 12  ;;  %s191_s12 = scalar_lea.vmem [#allocation3], %s8494_s7 }
  0x13   : > { %s198_s11 = sadd.s32 %s9534_s10, %s8496_s8  ;;  %s201_s13 = sshll.u32 %s191_s12, 4  ;;  %s11549_s13 = int_to_ptr.vmem [resolvable:$true] %s201_s13 }
  0x14   : > { %s8498_s14 = sshll.u32 %s198_s11, 6  ;;  %p11560_p10 = pnand %p9730_p8, %p11530_p5 }
  0x15   : > { %s11554_s24 = scalar_lea.hbm %s13035_s1, %s8498_s14  ;;  %s11564_s27 = scalar_lea.sflag [#allocation4], %s187_s6 }
  0x16   : > { %s11349_s30 = scalar_lea.hbm %s11554_s24, 131072  ;;  %p11351_p12 = pneg %p11560_p10 }
  0x17   : > { %p11350_p11 = scmp.ne.s32.totalorder %s11554_s24, %s11349_s30  ;;  %s11354_s7 = scalar_lea.hbm %s13035_s1, 1048576 }
  0x18   : > { %p11355_p1 = scmp.lt.u32.totalorder %s11554_s24, %s13035_s1  ;;  %p11356_p2 = scmp.lt.u32.totalorder %s11354_s7, %s11349_s30 }
  0x19   : > { %p11352_p13 = pnand %p11351_p12, %p11350_p11  ;;  %p11358_p4 = scmp.lt.u32.totalorder %s11349_s30, %s11554_s24 }
  0x1a   : > { %p11357_p3 = por %p11356_p2, %p11355_p1 }
  0x1b   : > { %p11353_p0 = pneg %p11352_p13 }
  0x1c   : > { %p11359_p5 = por %p11358_p4, %p11357_p3 }
  0x1e   : > { %p11360_p6 = pnand %p11359_p5, %p11353_p0 }
  0x20   : > { %11363 = shalt.err (!%p11360_p6)
}
  0x21   : > { %s11364_s6 = scalar_lea.vmem %s11549_s13, 131072  ;;  %s11447_s11 = smov [#allocation3]  }
  0x22   : > { %p11365_p8 = scmp.ne.s32.totalorder %s11549_s13, %s11364_s6  ;;  %s11369_s12 = sshll.u32 %s11447_s11, 4  ;;  %s11370_s12 = int_to_ptr.vmem [resolvable:$false] %s11369_s12 }
  0x23   : > { %s11371_s14 = scalar_lea.vmem %s11370_s12, 262144  ;;  %p11372_p13 = scmp.lt.s32.totalorder %s11549_s13, %s11370_s12 }
  0x24   : > { %p11367_p9 = pnand %p11365_p8, %p11351_p12  ;;  %p11373_p1 = scmp.lt.s32.totalorder %s11371_s14, %s11364_s6 }
  0x26   : > { %p11368_p11 = pneg %p11367_p9  ;;  %p11374_p2 = por %p11373_p1, %p11372_p13 }
  0x28   : > { %p11375_p3 = pnand %p11374_p2, %p11368_p11 }
  0x2a   : > { %11378 = shalt.err (!%p11375_p3)
}
  0x2b   : > { %s11448_s15 = smov 256   ;;  %s11449_s23 = smov 128  }
  0x2c   : > { %s11450_s30 = smov 8   ;;  %p8499_p12 = scmp.ge.s32.totalorder %s11445_s22, 1 }
  0x2d   : > { %9729 = dma.hbm_to_vmem [thread:$0]  (!%p11560_p10), %s11554_s24, 131072, %s11549_s13, %s11564_s27, %s11448_s15, %s11449_s23, %s11450_s30  }
  0x2e   : > { %p226_p0 = scmp.lt.s32.totalorder %s11445_s22, 9 }
  0x30   : > { %p227_p4 = pnand %p8499_p12, %p226_p0 }
  0x31   : > { %s232_s28 = sand.u32 (!%p227_p4), 1, %s11421_s16  }
  0x32   : > { %230 = sbr.rel (%p227_p4) target bundleno = 1553 (0x611), region = 36  ;;  %s8500_s5 = sshll.u32 (!%p227_p4), %s232_s28, 13 }
  0x33   : > { %s233_s7 = scalar_lea.sflag (!%p227_p4), [#allocation4], %s232_s28  ;;  %s11595_s8 = scalar_lea.vmem (!%p227_p4), [#allocation3], %s8500_s5 }
  0x39   : > { %11412 = dma.done.wait (%p11536_p7), %s233_s7, 131072  }
  0x3a   : > { %11414 = vsyncadd (%p11536_p7), %s233_s7, 4294836224  ;;  %s8501_s24 = sshll.u32 %s11429_s18, 6  ;;  %s8502_s13 = sshll.u32 %s11433_s19, 1 }
  0x3b   : > { %p274_p10 = scmp.lt.s32.totalorder %s8501_s24, 255  ;;  %p281_p5 = scmp.lt.s32.totalorder %s8502_s13, 3 }
  0x3c   : > { %s8503_s26 = sshll.u32 %s11433_s19, 5  ;;  %p291_p6 = scmp.lt.s32.totalorder %s11433_s19, 1 }
  0x3d   : > { %s13059_s24 = smov (!%p274_p10, %s8501_s24), 255  ;;  %s13061_s13 = smov (!%p281_p5, %s8502_s13), 3 }
  0x3e   : > { %s11610_s29 = scalar_lea.vmem %s13034_s0, %s13059_s24  ;;  %p286_p7 = scmp.lt.s32.totalorder %s8503_s26, 63 }
  0x3f   : > { %s283_s12 = scalar_lea.vmem %s13036_s2, %s13061_s13  ;;  %s13065_s19 = smov (!%p291_p6, %s11433_s19), 1 }
  0x40   : > { %s13063_s26 = smov (!%p286_p7, %s8503_s26), 63  ;;  %s8505_s28 = sshll.u32 %s13065_s19, 1 }
  0x41   : > { %s8504_s14 = sshll.u32 %s13063_s26, 3  ;;  %s11625_s27 = scalar_lea.vmem %s13038_s4, %s8505_s28 }
  0x42   : > { %s11620_s30 = scalar_lea.vmem %s13037_s3, %s8504_s14  ;;  %p8506_p8 = scmp.ne.s32.totalorder %s11429_s18, 0 }
  0x43   : > { %v11451_v0 = vmov (!%p8506_p8), 0.0  }
  0x44   : > { %298 = sbr.rel (%p8506_p8) target bundleno = 75 (0x4b), region = 44  ;;  %299 = vst [vmem:[#allocation2] sm:$0xf] (!%p8506_p8), %v11451_v0 }
  0x4b PF: > { %v9801_v1 = vld [vmem:[%s11595_s8 + $0x4] ss:$8 sps:$4 sm:$0xff]   ;;  %v9805_v3 = vld [vmem:[%s11595_s8] ss:$8 sps:$4 sm:$0xff]   ;;  %v9807_v5 = vld [vmem:[%s11595_s8 + $0x14] ss:$8 sps:$4 sm:$0xff]   ;;  %v1345_v39 = vlaneseq }
  0x4c   : > { %v9803_v2 = vld [vmem:[%s11595_s8 + $0x1004] ss:$8 sps:$4 sm:$0xff]   ;;  %6917 = vmatprep.subr.bf16.mxu1 %v9801_v1  ;;  %v9806_v4 = vld [vmem:[%s11595_s8 + $0x1000] ss:$8 sps:$4 sm:$0xff]   ;;  %v9809_v6 = vld [vmem:[%s11595_s8 + $0x1014] ss:$8 sps:$4 sm:$0xff]  }
  0x4d   : > { %7573 = vmatprep.subr.bf16.mxu0 %v9803_v2  ;;  %6918 = vmatpush1.bf16.msra.mxu1 %v9805_v3  ;;  %v9811_v7 = vld [vmem:[%s11595_s8 + $0x10] ss:$8 sps:$4 sm:$0xff]   ;;  %v9813_v9 = vld [vmem:[%s11595_s8 + $0x24] ss:$8 sps:$4 sm:$0xff]   ;;  %v9817_v11 = vld [vmem:[%s11595_s8 + $0x20] ss:$8 sps:$4 sm:$0xff]  }
  0x4e   : > { %7574 = vmatpush1.bf16.msra.mxu0 %v9806_v4  ;;  %6919 = vmatprep.subr.bf16.mxu1 %v9807_v5  ;;  %v9812_v8 = vld [vmem:[%s11595_s8 + $0x1010] ss:$8 sps:$4 sm:$0xff]   ;;  %v9815_v10 = vld [vmem:[%s11595_s8 + $0x1024] ss:$8 sps:$4 sm:$0xff]   ;;  %v9818_v12 = vld [vmem:[%s11595_s8 + $0x1020] ss:$8 sps:$4 sm:$0xff]  }
  0x4f   : > { %7575 = vmatprep.subr.bf16.mxu0 %v9809_v6  ;;  %v9819_v13 = vld [vmem:[%s11595_s8 + $0x34] ss:$8 sps:$4 sm:$0xff]   ;;  %v9823_v15 = vld [vmem:[%s11595_s8 + $0x30] ss:$8 sps:$4 sm:$0xff]   ;;  %v9825_v17 = vld [vmem:[%s11595_s8 + $0x44] ss:$8 sps:$4 sm:$0xff]  }
  0x50   : > { %v9821_v14 = vld [vmem:[%s11595_s8 + $0x1034] ss:$8 sps:$4 sm:$0xff]   ;;  %v9824_v16 = vld [vmem:[%s11595_s8 + $0x1030] ss:$8 sps:$4 sm:$0xff]   ;;  %v9827_v18 = vld [vmem:[%s11595_s8 + $0x1044] ss:$8 sps:$4 sm:$0xff]  }
  0x51   : > { %6920 = vmatpush1.bf16.msra.mxu1 %v9811_v7  ;;  %v9829_v19 = vld [vmem:[%s11595_s8 + $0x40] ss:$8 sps:$4 sm:$0xff]   ;;  %v9831_v21 = vld [vmem:[%s11595_s8 + $0x54] ss:$8 sps:$4 sm:$0xff]   ;;  %v9835_v23 = vld [vmem:[%s11595_s8 + $0x50] ss:$8 sps:$4 sm:$0xff]  }
  0x52   : > { %7576 = vmatpush1.bf16.msra.mxu0 %v9812_v8  ;;  %6921 = vmatprep.subr.bf16.mxu1 %v9813_v9  ;;  %v9830_v20 = vld [vmem:[%s11595_s8 + $0x1040] ss:$8 sps:$4 sm:$0xff]   ;;  %v9833_v22 = vld [vmem:[%s11595_s8 + $0x1054] ss:$8 sps:$4 sm:$0xff]   ;;  %v9836_v24 = vld [vmem:[%s11595_s8 + $0x1050] ss:$8 sps:$4 sm:$0xff]  }
  0x53   : > { %7577 = vmatprep.subr.bf16.mxu0 %v9815_v10  ;;  %v9837_v25 = vld [vmem:[%s11595_s8 + $0x64] ss:$8 sps:$4 sm:$0xff]   ;;  %v9841_v27 = vld [vmem:[%s11595_s8 + $0x60] ss:$8 sps:$4 sm:$0xff]   ;;  %v9843_v29 = vld [vmem:[%s11595_s8 + $0x74] ss:$8 sps:$4 sm:$0xff]  }
  0x54   : > { %v9839_v26 = vld [vmem:[%s11595_s8 + $0x1064] ss:$8 sps:$4 sm:$0xff]   ;;  %v9842_v28 = vld [vmem:[%s11595_s8 + $0x1060] ss:$8 sps:$4 sm:$0xff]   ;;  %v9845_v30 = vld [vmem:[%s11595_s8 + $0x1074] ss:$8 sps:$4 sm:$0xff]  }
  0x55   : > { %6922 = vmatpush1.bf16.msra.mxu1 %v9817_v11  ;;  %v9847_v31 = vld [vmem:[%s11595_s8 + $0x70] ss:$8 sps:$4 sm:$0xff]   ;;  %v9849_v33 = vld [vmem:[%s11595_s8 + $0x84] ss:$8 sps:$4 sm:$0xff]   ;;  %v9853_v35 = vld [vmem:[%s11595_s8 + $0x80] ss:$8 sps:$4 sm:$0xff]  }
  0x56   : > { %7578 = vmatpush1.bf16.msra.mxu0 %v9818_v12  ;;  %6923 = vmatprep.subr.bf16.mxu1 %v9819_v13  ;;  %v9848_v32 = vld [vmem:[%s11595_s8 + $0x1070] ss:$8 sps:$4 sm:$0xff]   ;;  %v9851_v34 = vld [vmem:[%s11595_s8 + $0x1084] ss:$8 sps:$4 sm:$0xff]   ;;  %v9854_v36 = vld [vmem:[%s11595_s8 + $0x1080] ss:$8 sps:$4 sm:$0xff]  }
  0x57   : > { %7579 = vmatprep.subr.bf16.mxu0 %v9821_v14  ;;  %v11452_v37 = vmov 1966171168   ;;  %v9855_v40 = vld [vmem:[%s11595_s8 + $0x94] ss:$8 sps:$4 sm:$0xff]   ;;  %v9859_v42 = vld [vmem:[%s11595_s8 + $0x90] ss:$8 sps:$4 sm:$0xff]  }
  0x58   : > { %v1343_v38 = vunpack.c.l.s4 %v11452_v37  ;;  %v9857_v41 = vld [vmem:[%s11595_s8 + $0x1094] ss:$8 sps:$4 sm:$0xff]   ;;  %v11667_v44 = vshrl.u32 %v1345_v39, 7  ;;  %v9860_v45 = vld [vmem:[%s11595_s8 + $0x1090] ss:$8 sps:$4 sm:$0xff]   ;;  %p9531_p9 = scmp.ne.s32.totalorder %s11429_s18, 3 }
  0x59   : > { %6924 = vmatpush1.bf16.msra.mxu1 %v9823_v15  ;;  %v9861_v46 = vld [vmem:[%s11595_s8 + $0xa4] ss:$8 sps:$4 sm:$0xff]   ;;  %v9865_v48 = vld [vmem:[%s11595_s8 + $0xa0] ss:$8 sps:$4 sm:$0xff]   ;;  %v9867_v51 = vld [vmem:[%s11595_s8 + $0xb4] ss:$8 sps:$4 sm:$0xff]  }
  0x5a   : > { %7580 = vmatpush1.bf16.msra.mxu0 %v9824_v16  ;;  %6925 = vmatprep.subr.bf16.mxu1 %v9825_v17  ;;  %v1344_v43 = vunpack.c.0.s8 %v1343_v38  ;;  %v9863_v47 = vld [vmem:[%s11595_s8 + $0x10a4] ss:$8 sps:$4 sm:$0xff]   ;;  %v9866_v49 = vld [vmem:[%s11595_s8 + $0x10a0] ss:$8 sps:$4 sm:$0xff]   ;;  %v9869_v52 = vld [vmem:[%s11595_s8 + $0x10b4] ss:$8 sps:$4 sm:$0xff]  }
  0x5b   : > { %7581 = vmatprep.subr.bf16.mxu0 %v9827_v18  ;;  %v11680_v53 = vld [vmem:[%s11610_s29] sm:$0xff]  ;;  %v9871_v54 = vld [vmem:[%s11595_s8 + $0xb0] ss:$8 sps:$4 sm:$0xff]   ;;  %v9873_v58 = vld [vmem:[%s11595_s8 + $0xc4] ss:$8 sps:$4 sm:$0xff]  }
  0x5c   : > { %v11675_v50 = vsub.s32 %v1344_v43, %v11667_v44  ;;  %v9872_v56 = vld [vmem:[%s11595_s8 + $0x10b0] ss:$8 sps:$4 sm:$0xff]   ;;  %v11687_v57 = vld [vmem:[%s11610_s29 + $0x20] sm:$0xff]  ;;  %v9875_v59 = vld [vmem:[%s11595_s8 + $0x10c4] ss:$8 sps:$4 sm:$0xff]  }
  0x5d   : > { %6926 = vmatpush1.bf16.msra.mxu1 %v9829_v19  ;;  %v9877_v0 = vld [vmem:[%s11595_s8 + $0xc0] ss:$8 sps:$4 sm:$0xff]   ;;  %v9879_v2 = vld [vmem:[%s11595_s8 + $0xd4] ss:$8 sps:$4 sm:$0xff]   ;;  %v9883_v5 = vld [vmem:[%s11595_s8 + $0xd0] ss:$8 sps:$4 sm:$0xff]  }
  0x5e   : > { %7582 = vmatpush1.bf16.msra.mxu0 %v9830_v20  ;;  %6927 = vmatprep.subr.bf16.mxu1 %v9831_v21  ;;  %v1348_v55 = vrot.slane %v11680_v53, %v11675_v50  ;;  %v1544_v61 = vrot.slane %v11687_v57, %v11675_v50  ;;  %v9878_v1 = vld [vmem:[%s11595_s8 + $0x10c0] ss:$8 sps:$4 sm:$0xff]   ;;  %v9881_v3 = vld [vmem:[%s11595_s8 + $0x10d4] ss:$8 sps:$4 sm:$0xff]   ;;  %v9884_v6 = vld [vmem:[%s11595_s8 + $0x10d0] ss:$8 sps:$4 sm:$0xff]  }
  0x5f   : > { %7583 = vmatprep.subr.bf16.mxu0 %v9833_v22  ;;  %v9885_v7 = vld [vmem:[%s11595_s8 + $0xe4] ss:$8 sps:$4 sm:$0xff]   ;;  %v9889_v9 = vld [vmem:[%s11595_s8 + $0xe0] ss:$8 sps:$4 sm:$0xff]   ;;  %v9891_v11 = vld [vmem:[%s11595_s8 + $0xf4] ss:$8 sps:$4 sm:$0xff]  }
  0x60   : > { %v1356_v60 = vcombine.high %v1348_v55, %v1348_v55  ;;  %v1552_v63 = vcombine.high %v1544_v61, %v1544_v61  ;;  %v9887_v8 = vld [vmem:[%s11595_s8 + $0x10e4] ss:$8 sps:$4 sm:$0xff]   ;;  %v9890_v10 = vld [vmem:[%s11595_s8 + $0x10e0] ss:$8 sps:$4 sm:$0xff]   ;;  %v9893_v12 = vld [vmem:[%s11595_s8 + $0x10f4] ss:$8 sps:$4 sm:$0xff]   ;;  %v11712_v17 = vrot.slane %v1348_v55, %v11675_v50  ;;  %v11715_v18 = vrot.slane %v1544_v61, %v11675_v50 }
  0x61   : > { %6928 = vmatpush1.bf16.msra.mxu1 %v9835_v23  ;;  %v9895_v13 = vld [vmem:[%s11595_s8 + $0xf0] ss:$8 sps:$4 sm:$0xff]   ;;  %v9900_v15 = vld [vmem:[%s11595_s8 + $0x104] ss:$8 sps:$4 sm:$0xff]   ;;  %v9898_v19 = vld [vmem:[%s11595_s8 + $0x100] ss:$8 sps:$4 sm:$0xff]  }
  0x62   : > { %7584 = vmatpush1.bf16.msra.mxu0 %v9836_v24  ;;  %6929 = vmatprep.subr.bf16.mxu1 %v9837_v25  ;;  %v1378_v62 = vrot.slane %v1356_v60, %v11675_v50  ;;  %v1574_v4 = vrot.slane %v1552_v63, %v11675_v50  ;;  %v9896_v14 = vld [vmem:[%s11595_s8 + $0x10f0] ss:$8 sps:$4 sm:$0xff]   ;;  %v9904_v16 = vld [vmem:[%s11595_s8 + $0x1104] ss:$8 sps:$4 sm:$0xff]   ;;  %v9902_v20 = vld [vmem:[%s11595_s8 + $0x1100] ss:$8 sps:$4 sm:$0xff]  }
  0x63   : > { %7585 = vmatprep.subr.bf16.mxu0 %v9839_v26  ;;  %v9907_v21 = vld [vmem:[%s11595_s8 + $0x114] ss:$8 sps:$4 sm:$0xff]   ;;  %v9905_v25 = vld [vmem:[%s11595_s8 + $0x110] ss:$8 sps:$4 sm:$0xff]   ;;  %v9923_v37 = vld [vmem:[%s11595_s8 + $0x140] ss:$8 sps:$4 sm:$0xff]  }
  0x64   : > { %6949 = vmatprep.mubr.bf16.mxu1 %v1378_v62  ;;  %7605 = vmatprep.mubr.bf16.mxu0 %v1574_v4  ;;  %v9910_v22 = vld [vmem:[%s11595_s8 + $0x1114] ss:$8 sps:$4 sm:$0xff]   ;;  %v1388_v23 = vcombine.high %v1378_v62, %v1378_v62  ;;  %v1584_v24 = vcombine.high %v1574_v4, %v1574_v4  ;;  %v9908_v26 = vld [vmem:[%s11595_s8 + $0x1110] ss:$8 sps:$4 sm:$0xff]   ;;  %v9926_v38 = vld [vmem:[%s11595_s8 + $0x1140] ss:$8 sps:$4 sm:$0xff]  }
  0x65   : > { %6930 = vmatpush1.bf16.msra.mxu1 %v9841_v27  ;;  %v9913_v27 = vld [vmem:[%s11595_s8 + $0x124] ss:$8 sps:$4 sm:$0xff]   ;;  %v9931_v39 = vld [vmem:[%s11595_s8 + $0x154] ss:$8 sps:$4 sm:$0xff]   ;;  %v9953_v61 = vld [vmem:[%s11595_s8 + $0x190] ss:$8 sps:$4 sm:$0xff]  }
  0x66   : > { %7586 = vmatpush1.bf16.msra.mxu0 %v9842_v28  ;;  %6931 = vmatprep.subr.bf16.mxu1 %v9843_v29  ;;  %v9916_v28 = vld [vmem:[%s11595_s8 + $0x1124] ss:$8 sps:$4 sm:$0xff]   ;;  %v9911_v29 = vld [vmem:[%s11595_s8 + $0x120] ss:$8 sps:$4 sm:$0xff]   ;;  %v9958_v60 = vld [vmem:[%s11595_s8 + $0x1194] ss:$8 sps:$4 sm:$0xff]  }
  0x67   : > { %7587 = vmatprep.subr.bf16.mxu0 %v9845_v30  ;;  %v9914_v30 = vld [vmem:[%s11595_s8 + $0x1120] ss:$8 sps:$4 sm:$0xff]   ;;  %v9937_v43 = vld [vmem:[%s11595_s8 + $0x164] ss:$8 sps:$4 sm:$0xff]   ;;  %v9956_v62 = vld [vmem:[%s11595_s8 + $0x1190] ss:$8 sps:$4 sm:$0xff]  }
  0x68   : > { %v9952_v55 = vld [vmem:[%s11595_s8 + $0x1184] ss:$8 sps:$4 sm:$0xff]   ;;  %v9970_v4 = vld [vmem:[%s11595_s8 + $0x11b4] ss:$8 sps:$4 sm:$0xff]  }
  0x69   : > { %6932 = vmatpush1.bf16.msra.mxu1 %v9847_v31  ;;  %v9919_v31 = vld [vmem:[%s11595_s8 + $0x134] ss:$8 sps:$4 sm:$0xff]   ;;  %v9961_v63 = vld [vmem:[%s11595_s8 + $0x1a4] ss:$8 sps:$4 sm:$0xff]  }
  0x6a   : > { %7588 = vmatpush1.bf16.msra.mxu0 %v9848_v32  ;;  %6933 = vmatprep.subr.bf16.mxu1 %v9849_v33  ;;  %v9922_v32 = vld [vmem:[%s11595_s8 + $0x1134] ss:$8 sps:$4 sm:$0xff]   ;;  %v9917_v33 = vld [vmem:[%s11595_s8 + $0x130] ss:$8 sps:$4 sm:$0xff]  }
  0x6b   : > { %7589 = vmatprep.subr.bf16.mxu0 %v9851_v34  ;;  %v9920_v34 = vld [vmem:[%s11595_s8 + $0x1130] ss:$8 sps:$4 sm:$0xff]  }
  0x6d   : > { %6934 = vmatpush1.bf16.msra.mxu1 %v9853_v35  ;;  %v9925_v35 = vld [vmem:[%s11595_s8 + $0x144] ss:$8 sps:$4 sm:$0xff]  }
  0x6e   : > { %7590 = vmatpush1.bf16.msra.mxu0 %v9854_v36  ;;  %6935 = vmatprep.subr.bf16.mxu1 %v9855_v40  ;;  %v9928_v36 = vld [vmem:[%s11595_s8 + $0x1144] ss:$8 sps:$4 sm:$0xff]   ;;  %v9934_v40 = vld [vmem:[%s11595_s8 + $0x1154] ss:$8 sps:$4 sm:$0xff]  }
  0x6f   : > { %7591 = vmatprep.subr.bf16.mxu0 %v9857_v41  ;;  %v9929_v41 = vld [vmem:[%s11595_s8 + $0x150] ss:$8 sps:$4 sm:$0xff]  }
  0x71   : > { %6936 = vmatpush1.bf16.msra.mxu1 %v9859_v42  ;;  %v9932_v42 = vld [vmem:[%s11595_s8 + $0x1150] ss:$8 sps:$4 sm:$0xff]  }
  0x72   : > { %7592 = vmatpush1.bf16.msra.mxu0 %v9860_v45  ;;  %6937 = vmatprep.subr.bf16.mxu1 %v9861_v46  ;;  %v9940_v45 = vld [vmem:[%s11595_s8 + $0x1164] ss:$8 sps:$4 sm:$0xff]   ;;  %v9935_v46 = vld [vmem:[%s11595_s8 + $0x160] ss:$8 sps:$4 sm:$0xff]  }
  0x73   : > { %7593 = vmatprep.subr.bf16.mxu0 %v9863_v47  ;;  %v9938_v47 = vld [vmem:[%s11595_s8 + $0x1160] ss:$8 sps:$4 sm:$0xff]  }
  0x75   : > { %6938 = vmatpush1.bf16.msra.mxu1 %v9865_v48  ;;  %v9943_v48 = vld [vmem:[%s11595_s8 + $0x174] ss:$8 sps:$4 sm:$0xff]  }
  0x76   : > { %7594 = vmatpush1.bf16.msra.mxu0 %v9866_v49  ;;  %6939 = vmatprep.subr.bf16.mxu1 %v9867_v51  ;;  %v9946_v49 = vld [vmem:[%s11595_s8 + $0x1174] ss:$8 sps:$4 sm:$0xff]   ;;  %v9941_v51 = vld [vmem:[%s11595_s8 + $0x170] ss:$8 sps:$4 sm:$0xff]  }
  0x77   : > { %7595 = vmatprep.subr.bf16.mxu0 %v9869_v52  ;;  %v9944_v52 = vld [vmem:[%s11595_s8 + $0x1170] ss:$8 sps:$4 sm:$0xff]  }
  0x79   : > { %6940 = vmatpush1.bf16.msra.mxu1 %v9871_v54  ;;  %v9949_v54 = vld [vmem:[%s11595_s8 + $0x184] ss:$8 sps:$4 sm:$0xff]  }
  0x7a   : > { %7596 = vmatpush1.bf16.msra.mxu0 %v9872_v56  ;;  %6941 = vmatprep.subr.bf16.mxu1 %v9873_v58  ;;  %v9947_v56 = vld [vmem:[%s11595_s8 + $0x180] ss:$8 sps:$4 sm:$0xff]  }
  0x7b   : > { %7597 = vmatprep.subr.bf16.mxu0 %v9875_v59  ;;  %v9950_v58 = vld [vmem:[%s11595_s8 + $0x1180] ss:$8 sps:$4 sm:$0xff]   ;;  %v9955_v59 = vld [vmem:[%s11595_s8 + $0x194] ss:$8 sps:$4 sm:$0xff]  }
  0x7d   : > { %6942 = vmatpush1.bf16.msra.mxu1 %v9877_v0  ;;  %v9964_v0 = vld [vmem:[%s11595_s8 + $0x11a4] ss:$8 sps:$4 sm:$0xff]  }
  0x7e   : > { %7598 = vmatpush1.bf16.msra.mxu0 %v9878_v1  ;;  %6943 = vmatprep.subr.bf16.mxu1 %v9879_v2  ;;  %v9959_v1 = vld [vmem:[%s11595_s8 + $0x1a0] ss:$8 sps:$4 sm:$0xff]  }
  0x7f   : > { %7599 = vmatprep.subr.bf16.mxu0 %v9881_v3  ;;  %v9962_v2 = vld [vmem:[%s11595_s8 + $0x11a0] ss:$8 sps:$4 sm:$0xff]   ;;  %v9967_v3 = vld [vmem:[%s11595_s8 + $0x1b4] ss:$8 sps:$4 sm:$0xff]  }
  0x81   : > { %6944 = vmatpush1.bf16.msra.mxu1 %v9883_v5  ;;  %v9965_v5 = vld [vmem:[%s11595_s8 + $0x1b0] ss:$8 sps:$4 sm:$0xff]  }
  0x82   : > { %7600 = vmatpush1.bf16.msra.mxu0 %v9884_v6  ;;  %6945 = vmatprep.subr.bf16.mxu1 %v9885_v7  ;;  %v9968_v6 = vld [vmem:[%s11595_s8 + $0x11b0] ss:$8 sps:$4 sm:$0xff]   ;;  %v9973_v7 = vld [vmem:[%s11595_s8 + $0x1c4] ss:$8 sps:$4 sm:$0xff]  }
  0x83   : > { %7601 = vmatprep.subr.bf16.mxu0 %v9887_v8  ;;  %v9976_v8 = vld [vmem:[%s11595_s8 + $0x11c4] ss:$8 sps:$4 sm:$0xff]  }
  0x85   : > { %6946 = vmatpush1.bf16.msra.mxu1 %v9889_v9  ;;  %v9971_v9 = vld [vmem:[%s11595_s8 + $0x1c0] ss:$8 sps:$4 sm:$0xff]  }
  0x86   : > { %7602 = vmatpush1.bf16.msra.mxu0 %v9890_v10  ;;  %6947 = vmatprep.subr.bf16.mxu1 %v9891_v11  ;;  %v9974_v10 = vld [vmem:[%s11595_s8 + $0x11c0] ss:$8 sps:$4 sm:$0xff]   ;;  %v9979_v11 = vld [vmem:[%s11595_s8 + $0x1d4] ss:$8 sps:$4 sm:$0xff]  }
  0x87   : > { %7603 = vmatprep.subr.bf16.mxu0 %v9893_v12  ;;  %v9982_v12 = vld [vmem:[%s11595_s8 + $0x11d4] ss:$8 sps:$4 sm:$0xff]  }
  0x89   : > { %6948 = vmatpush1.bf16.msra.mxu1 %v9895_v13  ;;  %v9977_v13 = vld [vmem:[%s11595_s8 + $0x1d0] ss:$8 sps:$4 sm:$0xff]  }
  0x8a   : > { %7604 = vmatpush1.bf16.msra.mxu0 %v9896_v14  ;;  %6958 = vmatprep.subr.bf16.mxu1 %v9900_v15  ;;  %v9980_v14 = vld [vmem:[%s11595_s8 + $0x11d0] ss:$8 sps:$4 sm:$0xff]   ;;  %v9985_v15 = vld [vmem:[%s11595_s8 + $0x1e4] ss:$8 sps:$4 sm:$0xff]  }
  0x8b   : > { %7614 = vmatprep.subr.bf16.mxu0 %v9904_v16  ;;  %v9988_v16 = vld [vmem:[%s11595_s8 + $0x11e4] ss:$8 sps:$4 sm:$0xff]  }
  0x8c   : > { %6950 = vmatmul.mubr.bf16.vlgmr.msra.gmra.mrb[0].mxu1 %v11712_v17 }
  0x8d   : > { %7606 = vmatmul.mubr.bf16.vlgmr.msra.gmra.mrb[0].mxu0 %v11715_v18  ;;  %6959 = vmatpush1.bf16.msra.mxu1 %v9898_v19  ;;  %v1341_v19 = vcombine.high %v11680_v53, %v11680_v53  ;;  %v9989_v53 = vld [vmem:[%s11595_s8 + $0x1f0] ss:$8 sps:$4 sm:$0xff]  }
  0x8e   : > { %7615 = vmatpush1.bf16.msra.mxu0 %v9902_v20  ;;  %6960 = vmatprep.subr.bf16.mxu1 %v9907_v21  ;;  %v1537_v20 = vcombine.high %v11687_v57, %v11687_v57  ;;  %v9983_v21 = vld [vmem:[%s11595_s8 + $0x1e0] ss:$8 sps:$4 sm:$0xff]   ;;  %v9992_v57 = vld [vmem:[%s11595_s8 + $0x11f0] ss:$8 sps:$4 sm:$0xff]  }
  0x8f   : > { %7616 = vmatprep.subr.bf16.mxu0 %v9910_v22  ;;  %6990 = vmatprep.mubr.bf16.mxu1 %v1388_v23  ;;  %v9986_v22 = vld [vmem:[%s11595_s8 + $0x11e0] ss:$8 sps:$4 sm:$0xff]   ;;  %v9991_v23 = vld [vmem:[%s11595_s8 + $0x1f4] ss:$8 sps:$4 sm:$0xff]  }
  0x90   : > { %7646 = vmatprep.mubr.bf16.mxu0 %v1584_v24  ;;  %v9994_v24 = vld [vmem:[%s11595_s8 + $0x11f4] ss:$8 sps:$4 sm:$0xff]  }
  0x91   : > { %6961 = vmatpush1.bf16.msra.mxu1 %v9905_v25  ;;  %v11784_v25 = vrot.slane %v1341_v19, %v11675_v50  ;;  %v10061_v19 = vld [vmem:[%s11595_s8 + $0x2b0] ss:$8 sps:$4 sm:$0xff]  }
  0x92   : > { %7617 = vmatpush1.bf16.msra.mxu0 %v9908_v26  ;;  %6962 = vmatprep.subr.bf16.mxu1 %v9913_v27  ;;  %v11787_v26 = vrot.slane %v1537_v20, %v11675_v50  ;;  %v9997_v27 = vld [vmem:[%s11595_s8 + $0x204] ss:$8 sps:$4 sm:$0xff]   ;;  %v10064_v20 = vld [vmem:[%s11595_s8 + $0x12b0] ss:$8 sps:$4 sm:$0xff]  }
  0x93   : > { %7618 = vmatprep.subr.bf16.mxu0 %v9916_v28  ;;  %v10000_v28 = vld [vmem:[%s11595_s8 + $0x1204] ss:$8 sps:$4 sm:$0xff]  }
  0x95   : > { %6963 = vmatpush1.bf16.msra.mxu1 %v9911_v29  ;;  %v1357_v29 = vcombine.high %v11784_v25, %v11784_v25 }
  0x96   : > { %7619 = vmatpush1.bf16.msra.mxu0 %v9914_v30  ;;  %6964 = vmatprep.subr.bf16.mxu1 %v9919_v31  ;;  %v1553_v30 = vcombine.high %v11787_v26, %v11787_v26  ;;  %v1386_v31 = vcombine.high %v11712_v17, %v11712_v17 }
  0x97   : > { %7620 = vmatprep.subr.bf16.mxu0 %v9922_v32  ;;  %v1582_v32 = vcombine.high %v11715_v18, %v11715_v18  ;;  %v10001_v18 = vld [vmem:[%s11595_s8 + $0x210] ss:$8 sps:$4 sm:$0xff]  }
  0x98   : > { %v11809_v17 = vrot.slane %v1553_v30, %v11675_v50  ;;  %v10084_v30 = vld [vmem:[%s11595_s8 + $0x12e4] ss:$8 sps:$4 sm:$0xff]  }
  0x99   : > { %6965 = vmatpush1.bf16.msra.mxu1 %v9917_v33  ;;  %v9995_v33 = vld [vmem:[%s11595_s8 + $0x200] ss:$8 sps:$4 sm:$0xff]  }
  0x9a   : > { %7621 = vmatpush1.bf16.msra.mxu0 %v9920_v34  ;;  %6966 = vmatprep.subr.bf16.mxu1 %v9925_v35  ;;  %v9998_v34 = vld [vmem:[%s11595_s8 + $0x1200] ss:$8 sps:$4 sm:$0xff]   ;;  %v10003_v35 = vld [vmem:[%s11595_s8 + $0x214] ss:$8 sps:$4 sm:$0xff]  }
  0x9b   : > { %7622 = vmatprep.subr.bf16.mxu0 %v9928_v36  ;;  %v10006_v36 = vld [vmem:[%s11595_s8 + $0x1214] ss:$8 sps:$4 sm:$0xff]  }
  0x9d   : > { %6967 = vmatpush1.bf16.msra.mxu1 %v9923_v37  ;;  %v11806_v37 = vrot.slane %v1357_v29, %v11675_v50  ;;  %v10081_v29 = vld [vmem:[%s11595_s8 + $0x2e4] ss:$8 sps:$4 sm:$0xff]  }
  0x9e   : > { %7623 = vmatpush1.bf16.msra.mxu0 %v9926_v38  ;;  %6968 = vmatprep.subr.bf16.mxu1 %v9931_v39  ;;  %v10004_v38 = vld [vmem:[%s11595_s8 + $0x1210] ss:$8 sps:$4 sm:$0xff]   ;;  %v10009_v39 = vld [vmem:[%s11595_s8 + $0x224] ss:$8 sps:$4 sm:$0xff]  }
  0x9f   : > { %7624 = vmatprep.subr.bf16.mxu0 %v9934_v40  ;;  %v10012_v40 = vld [vmem:[%s11595_s8 + $0x1224] ss:$8 sps:$4 sm:$0xff]  }
  0xa1   : > { %6969 = vmatpush1.bf16.msra.mxu1 %v9929_v41  ;;  %v10007_v41 = vld [vmem:[%s11595_s8 + $0x220] ss:$8 sps:$4 sm:$0xff]  }
  0xa2   : > { %7625 = vmatpush1.bf16.msra.mxu0 %v9932_v42  ;;  %6970 = vmatprep.subr.bf16.mxu1 %v9937_v43  ;;  %v10010_v42 = vld [vmem:[%s11595_s8 + $0x1220] ss:$8 sps:$4 sm:$0xff]   ;;  %v10015_v43 = vld [vmem:[%s11595_s8 + $0x234] ss:$8 sps:$4 sm:$0xff]  }
  0xa3   : > { %7626 = vmatprep.subr.bf16.mxu0 %v9940_v45  ;;  %v10018_v45 = vld [vmem:[%s11595_s8 + $0x1234] ss:$8 sps:$4 sm:$0xff]  }
  0xa5   : > { %6971 = vmatpush1.bf16.msra.mxu1 %v9935_v46  ;;  %v10013_v46 = vld [vmem:[%s11595_s8 + $0x230] ss:$8 sps:$4 sm:$0xff]  }
  0xa6   : > { %7627 = vmatpush1.bf16.msra.mxu0 %v9938_v47  ;;  %6972 = vmatprep.subr.bf16.mxu1 %v9943_v48  ;;  %v10016_v47 = vld [vmem:[%s11595_s8 + $0x1230] ss:$8 sps:$4 sm:$0xff]   ;;  %v10021_v48 = vld [vmem:[%s11595_s8 + $0x244] ss:$8 sps:$4 sm:$0xff]  }
  0xa7   : > { %7628 = vmatprep.subr.bf16.mxu0 %v9946_v49  ;;  %v10024_v49 = vld [vmem:[%s11595_s8 + $0x1244] ss:$8 sps:$4 sm:$0xff]  }
  0xa9   : > { %6973 = vmatpush1.bf16.msra.mxu1 %v9941_v51  ;;  %v10019_v51 = vld [vmem:[%s11595_s8 + $0x240] ss:$8 sps:$4 sm:$0xff]  }
  0xaa   : > { %7629 = vmatpush1.bf16.msra.mxu0 %v9944_v52  ;;  %6974 = vmatprep.subr.bf16.mxu1 %v9949_v54  ;;  %v10022_v52 = vld [vmem:[%s11595_s8 + $0x1240] ss:$8 sps:$4 sm:$0xff]   ;;  %v10027_v54 = vld [vmem:[%s11595_s8 + $0x254] ss:$8 sps:$4 sm:$0xff]  }
  0xab   : > { %7630 = vmatprep.subr.bf16.mxu0 %v9952_v55  ;;  %v10030_v55 = vld [vmem:[%s11595_s8 + $0x1254] ss:$8 sps:$4 sm:$0xff]  }
  0xad   : > { %6975 = vmatpush1.bf16.msra.mxu1 %v9947_v56  ;;  %v10025_v56 = vld [vmem:[%s11595_s8 + $0x250] ss:$8 sps:$4 sm:$0xff]  }
  0xae   : > { %7631 = vmatpush1.bf16.msra.mxu0 %v9950_v58  ;;  %6976 = vmatprep.subr.bf16.mxu1 %v9955_v59  ;;  %v10028_v58 = vld [vmem:[%s11595_s8 + $0x1250] ss:$8 sps:$4 sm:$0xff]   ;;  %v10033_v59 = vld [vmem:[%s11595_s8 + $0x264] ss:$8 sps:$4 sm:$0xff]  }
  0xaf   : > { %7632 = vmatprep.subr.bf16.mxu0 %v9958_v60  ;;  %v10036_v60 = vld [vmem:[%s11595_s8 + $0x1264] ss:$8 sps:$4 sm:$0xff]  }
  0xb1   : > { %6977 = vmatpush1.bf16.msra.mxu1 %v9953_v61  ;;  %v10031_v61 = vld [vmem:[%s11595_s8 + $0x260] ss:$8 sps:$4 sm:$0xff]  }
  0xb2   : > { %7633 = vmatpush1.bf16.msra.mxu0 %v9956_v62  ;;  %6978 = vmatprep.subr.bf16.mxu1 %v9961_v63  ;;  %v10034_v62 = vld [vmem:[%s11595_s8 + $0x1260] ss:$8 sps:$4 sm:$0xff]   ;;  %v10039_v63 = vld [vmem:[%s11595_s8 + $0x274] ss:$8 sps:$4 sm:$0xff]  }
  0xb3   : > { %7634 = vmatprep.subr.bf16.mxu0 %v9964_v0  ;;  %v10042_v0 = vld [vmem:[%s11595_s8 + $0x1274] ss:$8 sps:$4 sm:$0xff]  }
  0xb5   : > { %6979 = vmatpush1.bf16.msra.mxu1 %v9959_v1  ;;  %v10037_v1 = vld [vmem:[%s11595_s8 + $0x270] ss:$8 sps:$4 sm:$0xff]  }
  0xb6   : > { %7635 = vmatpush1.bf16.msra.mxu0 %v9962_v2  ;;  %6980 = vmatprep.subr.bf16.mxu1 %v9967_v3  ;;  %v10040_v2 = vld [vmem:[%s11595_s8 + $0x1270] ss:$8 sps:$4 sm:$0xff]   ;;  %v10045_v3 = vld [vmem:[%s11595_s8 + $0x284] ss:$8 sps:$4 sm:$0xff]  }
  0xb7   : > { %7636 = vmatprep.subr.bf16.mxu0 %v9970_v4  ;;  %v10048_v4 = vld [vmem:[%s11595_s8 + $0x1284] ss:$8 sps:$4 sm:$0xff]  }
  0xb9   : > { %6981 = vmatpush1.bf16.msra.mxu1 %v9965_v5  ;;  %v10043_v5 = vld [vmem:[%s11595_s8 + $0x280] ss:$8 sps:$4 sm:$0xff]  }
  0xba   : > { %7637 = vmatpush1.bf16.msra.mxu0 %v9968_v6  ;;  %6982 = vmatprep.subr.bf16.mxu1 %v9973_v7  ;;  %v10046_v6 = vld [vmem:[%s11595_s8 + $0x1280] ss:$8 sps:$4 sm:$0xff]   ;;  %v10051_v7 = vld [vmem:[%s11595_s8 + $0x294] ss:$8 sps:$4 sm:$0xff]  }
  0xbb   : > { %7638 = vmatprep.subr.bf16.mxu0 %v9976_v8  ;;  %v10054_v8 = vld [vmem:[%s11595_s8 + $0x1294] ss:$8 sps:$4 sm:$0xff]  }
  0xbd   : > { %6983 = vmatpush1.bf16.msra.mxu1 %v9971_v9  ;;  %v10049_v9 = vld [vmem:[%s11595_s8 + $0x290] ss:$8 sps:$4 sm:$0xff]  }
  0xbe   : > { %7639 = vmatpush1.bf16.msra.mxu0 %v9974_v10  ;;  %6984 = vmatprep.subr.bf16.mxu1 %v9979_v11  ;;  %v10052_v10 = vld [vmem:[%s11595_s8 + $0x1290] ss:$8 sps:$4 sm:$0xff]   ;;  %v10057_v11 = vld [vmem:[%s11595_s8 + $0x2a4] ss:$8 sps:$4 sm:$0xff]  }
  0xbf   : > { %7640 = vmatprep.subr.bf16.mxu0 %v9982_v12  ;;  %v10060_v12 = vld [vmem:[%s11595_s8 + $0x12a4] ss:$8 sps:$4 sm:$0xff]  }
  0xc1   : > { %6985 = vmatpush1.bf16.msra.mxu1 %v9977_v13  ;;  %v10055_v13 = vld [vmem:[%s11595_s8 + $0x2a0] ss:$8 sps:$4 sm:$0xff]  }
  0xc2   : > { %7641 = vmatpush1.bf16.msra.mxu0 %v9980_v14  ;;  %6986 = vmatprep.subr.bf16.mxu1 %v9985_v15  ;;  %v10058_v14 = vld [vmem:[%s11595_s8 + $0x12a0] ss:$8 sps:$4 sm:$0xff]   ;;  %v10063_v15 = vld [vmem:[%s11595_s8 + $0x2b4] ss:$8 sps:$4 sm:$0xff]  }
  0xc3   : > { %7642 = vmatprep.subr.bf16.mxu0 %v9988_v16  ;;  %v10066_v16 = vld [vmem:[%s11595_s8 + $0x12b4] ss:$8 sps:$4 sm:$0xff]  }
  0xc5   : > { %6987 = vmatpush1.bf16.msra.mxu1 %v9983_v21  ;;  %v10069_v21 = vld [vmem:[%s11595_s8 + $0x2c4] ss:$8 sps:$4 sm:$0xff]  }
  0xc6   : > { %7643 = vmatpush1.bf16.msra.mxu0 %v9986_v22  ;;  %6988 = vmatprep.subr.bf16.mxu1 %v9991_v23  ;;  %v10072_v22 = vld [vmem:[%s11595_s8 + $0x12c4] ss:$8 sps:$4 sm:$0xff]   ;;  %v10067_v23 = vld [vmem:[%s11595_s8 + $0x2c0] ss:$8 sps:$4 sm:$0xff]  }
  0xc7   : > { %7644 = vmatprep.subr.bf16.mxu0 %v9994_v24  ;;  %v10070_v24 = vld [vmem:[%s11595_s8 + $0x12c0] ss:$8 sps:$4 sm:$0xff]  }
  0xc9   : > { %6989 = vmatpush1.bf16.msra.mxu1 %v9989_v53  ;;  %v10075_v53 = vld [vmem:[%s11595_s8 + $0x2d4] ss:$8 sps:$4 sm:$0xff]  }
  0xca   : > { %7645 = vmatpush1.bf16.msra.mxu0 %v9992_v57  ;;  %6999 = vmatprep.subr.bf16.mxu1 %v9997_v27  ;;  %v10078_v57 = vld [vmem:[%s11595_s8 + $0x12d4] ss:$8 sps:$4 sm:$0xff]   ;;  %v10073_v27 = vld [vmem:[%s11595_s8 + $0x2d0] ss:$8 sps:$4 sm:$0xff]  }
  0xcb   : > { %7655 = vmatprep.subr.bf16.mxu0 %v10000_v28  ;;  %v10076_v28 = vld [vmem:[%s11595_s8 + $0x12d0] ss:$8 sps:$4 sm:$0xff]  }
  0xcc   : > { %6991 = vmatmul.mubr.bf16.vlgmr.msra.gmra.mrb[0].mxu1 %v1386_v31  ;;  %v10079_v31 = vld [vmem:[%s11595_s8 + $0x2e0] ss:$8 sps:$4 sm:$0xff]  }
  0xcd   : > { %7647 = vmatmul.mubr.bf16.vlgmr.msra.gmra.mrb[0].mxu0 %v1582_v32  ;;  %7000 = vmatpush1.bf16.msra.mxu1 %v9995_v33  ;;  %v10082_v32 = vld [vmem:[%s11595_s8 + $0x12e0] ss:$8 sps:$4 sm:$0xff]   ;;  %v10087_v33 = vld [vmem:[%s11595_s8 + $0x2f4] ss:$8 sps:$4 sm:$0xff]  }
  0xce   : > { %7656 = vmatpush1.bf16.msra.mxu0 %v9998_v34  ;;  %7001 = vmatprep.subr.bf16.mxu1 %v10003_v35  ;;  %v10090_v34 = vld [vmem:[%s11595_s8 + $0x12f4] ss:$8 sps:$4 sm:$0xff]   ;;  %v10085_v35 = vld [vmem:[%s11595_s8 + $0x2f0] ss:$8 sps:$4 sm:$0xff]  }
  0xcf   : > { %7657 = vmatprep.subr.bf16.mxu0 %v10006_v36  ;;  %7031 = vmatprep.mubr.bf16.mxu1 %v11806_v37  ;;  %v10088_v36 = vld [vmem:[%s11595_s8 + $0x12f0] ss:$8 sps:$4 sm:$0xff]  }
  0xd0   : > { %7687 = vmatprep.mubr.bf16.mxu0 %v11809_v17 }
  0xd1   : > { %7002 = vmatpush1.bf16.msra.mxu1 %v10001_v18  ;;  %v10093_v18 = vld [vmem:[%s11595_s8 + $0x304] ss:$8 sps:$4 sm:$0xff]  }
  0xd2   : > { %7658 = vmatpush1.bf16.msra.mxu0 %v10004_v38  ;;  %7003 = vmatprep.subr.bf16.mxu1 %v10009_v39  ;;  %v10096_v38 = vld [vmem:[%s11595_s8 + $0x1304] ss:$8 sps:$4 sm:$0xff]   ;;  %v11875_v39 = vrot.slane %v11784_v25, %v11675_v50  ;;  %v1389_v25 = vcombine.high %v11806_v37, %v11806_v37 }
  0xd3   : > { %7659 = vmatprep.subr.bf16.mxu0 %v10012_v40  ;;  %v11879_v40 = vrot.slane %v11787_v26, %v11675_v50  ;;  %v10097_v26 = vld [vmem:[%s11595_s8 + $0x310] ss:$8 sps:$4 sm:$0xff]   ;;  %v10105_v37 = vld [vmem:[%s11595_s8 + $0x324] ss:$8 sps:$4 sm:$0xff]  }
  0xd5   : > { %7004 = vmatpush1.bf16.msra.mxu1 %v10007_v41  ;;  %v10091_v41 = vld [vmem:[%s11595_s8 + $0x300] ss:$8 sps:$4 sm:$0xff]  }
  0xd6   : > { %7660 = vmatpush1.bf16.msra.mxu0 %v10010_v42  ;;  %7005 = vmatprep.subr.bf16.mxu1 %v10015_v43  ;;  %v10094_v42 = vld [vmem:[%s11595_s8 + $0x1300] ss:$8 sps:$4 sm:$0xff]   ;;  %v10099_v43 = vld [vmem:[%s11595_s8 + $0x314] ss:$8 sps:$4 sm:$0xff]  }
  0xd7   : > { %7661 = vmatprep.subr.bf16.mxu0 %v10018_v45  ;;  %v10102_v45 = vld [vmem:[%s11595_s8 + $0x1314] ss:$8 sps:$4 sm:$0xff]  }
  0xd9   : > { %7006 = vmatpush1.bf16.msra.mxu1 %v10013_v46  ;;  %v1585_v46 = vcombine.high %v11809_v17, %v11809_v17  ;;  %v10103_v17 = vld [vmem:[%s11595_s8 + $0x320] ss:$8 sps:$4 sm:$0xff]  }
  0xda   : > { %7662 = vmatpush1.bf16.msra.mxu0 %v10016_v47  ;;  %7007 = vmatprep.subr.bf16.mxu1 %v10021_v48  ;;  %v10100_v47 = vld [vmem:[%s11595_s8 + $0x1310] ss:$8 sps:$4 sm:$0xff]   ;;  %v10108_v48 = vld [vmem:[%s11595_s8 + $0x1324] ss:$8 sps:$4 sm:$0xff]  }
  0xdb   : > { %7663 = vmatprep.subr.bf16.mxu0 %v10024_v49  ;;  %v10106_v49 = vld [vmem:[%s11595_s8 + $0x1320] ss:$8 sps:$4 sm:$0xff]  }
  0xdd   : > { %7008 = vmatpush1.bf16.msra.mxu1 %v10019_v51  ;;  %v10111_v51 = vld [vmem:[%s11595_s8 + $0x334] ss:$8 sps:$4 sm:$0xff]  }
  0xde   : > { %7664 = vmatpush1.bf16.msra.mxu0 %v10022_v52  ;;  %7009 = vmatprep.subr.bf16.mxu1 %v10027_v54  ;;  %v10114_v52 = vld [vmem:[%s11595_s8 + $0x1334] ss:$8 sps:$4 sm:$0xff]   ;;  %v10109_v54 = vld [vmem:[%s11595_s8 + $0x330] ss:$8 sps:$4 sm:$0xff]  }
  0xdf   : > { %7665 = vmatprep.subr.bf16.mxu0 %v10030_v55  ;;  %v10112_v55 = vld [vmem:[%s11595_s8 + $0x1330] ss:$8 sps:$4 sm:$0xff]  }
  0xe1   : > { %7010 = vmatpush1.bf16.msra.mxu1 %v10025_v56  ;;  %v10117_v56 = vld [vmem:[%s11595_s8 + $0x344] ss:$8 sps:$4 sm:$0xff]  }
  0xe2   : > { %7666 = vmatpush1.bf16.msra.mxu0 %v10028_v58  ;;  %7011 = vmatprep.subr.bf16.mxu1 %v10033_v59  ;;  %v10120_v58 = vld [vmem:[%s11595_s8 + $0x1344] ss:$8 sps:$4 sm:$0xff]   ;;  %v10115_v59 = vld [vmem:[%s11595_s8 + $0x340] ss:$8 sps:$4 sm:$0xff]  }
  0xe3   : > { %7667 = vmatprep.subr.bf16.mxu0 %v10036_v60  ;;  %v10118_v60 = vld [vmem:[%s11595_s8 + $0x1340] ss:$8 sps:$4 sm:$0xff]  }
  0xe5   : > { %7012 = vmatpush1.bf16.msra.mxu1 %v10031_v61  ;;  %v10123_v61 = vld [vmem:[%s11595_s8 + $0x354] ss:$8 sps:$4 sm:$0xff]  }
  0xe6   : > { %7668 = vmatpush1.bf16.msra.mxu0 %v10034_v62  ;;  %7013 = vmatprep.subr.bf16.mxu1 %v10039_v63  ;;  %v10126_v62 = vld [vmem:[%s11595_s8 + $0x1354] ss:$8 sps:$4 sm:$0xff]   ;;  %v10121_v63 = vld [vmem:[%s11595_s8 + $0x350] ss:$8 sps:$4 sm:$0xff]  }
  0xe7   : > { %7669 = vmatprep.subr.bf16.mxu0 %v10042_v0  ;;  %v10124_v0 = vld [vmem:[%s11595_s8 + $0x1350] ss:$8 sps:$4 sm:$0xff]  }
  0xe9   : > { %7014 = vmatpush1.bf16.msra.mxu1 %v10037_v1  ;;  %v10129_v1 = vld [vmem:[%s11595_s8 + $0x364] ss:$8 sps:$4 sm:$0xff]  }
  0xea   : > { %7670 = vmatpush1.bf16.msra.mxu0 %v10040_v2  ;;  %7015 = vmatprep.subr.bf16.mxu1 %v10045_v3  ;;  %v10132_v2 = vld [vmem:[%s11595_s8 + $0x1364] ss:$8 sps:$4 sm:$0xff]   ;;  %v10127_v3 = vld [vmem:[%s11595_s8 + $0x360] ss:$8 sps:$4 sm:$0xff]  }
  0xeb   : > { %7671 = vmatprep.subr.bf16.mxu0 %v10048_v4  ;;  %v10130_v4 = vld [vmem:[%s11595_s8 + $0x1360] ss:$8 sps:$4 sm:$0xff]  }
  0xed   : > { %7016 = vmatpush1.bf16.msra.mxu1 %v10043_v5  ;;  %v10135_v5 = vld [vmem:[%s11595_s8 + $0x374] ss:$8 sps:$4 sm:$0xff]  }
  0xee   : > { %7672 = vmatpush1.bf16.msra.mxu0 %v10046_v6  ;;  %7017 = vmatprep.subr.bf16.mxu1 %v10051_v7  ;;  %v10138_v6 = vld [vmem:[%s11595_s8 + $0x1374] ss:$8 sps:$4 sm:$0xff]   ;;  %v10133_v7 = vld [vmem:[%s11595_s8 + $0x370] ss:$8 sps:$4 sm:$0xff]  }
  0xef   : > { %7673 = vmatprep.subr.bf16.mxu0 %v10054_v8  ;;  %v10136_v8 = vld [vmem:[%s11595_s8 + $0x1370] ss:$8 sps:$4 sm:$0xff]  }
  0xf1   : > { %7018 = vmatpush1.bf16.msra.mxu1 %v10049_v9  ;;  %v10141_v9 = vld [vmem:[%s11595_s8 + $0x384] ss:$8 sps:$4 sm:$0xff]  }
  0xf2   : > { %7674 = vmatpush1.bf16.msra.mxu0 %v10052_v10  ;;  %7019 = vmatprep.subr.bf16.mxu1 %v10057_v11  ;;  %v10144_v10 = vld [vmem:[%s11595_s8 + $0x1384] ss:$8 sps:$4 sm:$0xff]   ;;  %v10139_v11 = vld [vmem:[%s11595_s8 + $0x380] ss:$8 sps:$4 sm:$0xff]  }
  0xf3   : > { %7675 = vmatprep.subr.bf16.mxu0 %v10060_v12  ;;  %v10142_v12 = vld [vmem:[%s11595_s8 + $0x1380] ss:$8 sps:$4 sm:$0xff]  }
  0xf5   : > { %7020 = vmatpush1.bf16.msra.mxu1 %v10055_v13  ;;  %v10147_v13 = vld [vmem:[%s11595_s8 + $0x394] ss:$8 sps:$4 sm:$0xff]  }
  0xf6   : > { %7676 = vmatpush1.bf16.msra.mxu0 %v10058_v14  ;;  %7021 = vmatprep.subr.bf16.mxu1 %v10063_v15  ;;  %v10150_v14 = vld [vmem:[%s11595_s8 + $0x1394] ss:$8 sps:$4 sm:$0xff]   ;;  %v10145_v15 = vld [vmem:[%s11595_s8 + $0x390] ss:$8 sps:$4 sm:$0xff]  }
  0xf7   : > { %7677 = vmatprep.subr.bf16.mxu0 %v10066_v16  ;;  %v10148_v16 = vld [vmem:[%s11595_s8 + $0x1390] ss:$8 sps:$4 sm:$0xff]  }
  0xf9   : > { %7022 = vmatpush1.bf16.msra.mxu1 %v10061_v19  ;;  %v10153_v19 = vld [vmem:[%s11595_s8 + $0x3a4] ss:$8 sps:$4 sm:$0xff]  }
  0xfa   : > { %7678 = vmatpush1.bf16.msra.mxu0 %v10064_v20  ;;  %7023 = vmatprep.subr.bf16.mxu1 %v10069_v21  ;;  %v10156_v20 = vld [vmem:[%s11595_s8 + $0x13a4] ss:$8 sps:$4 sm:$0xff]   ;;  %v10151_v21 = vld [vmem:[%s11595_s8 + $0x3a0] ss:$8 sps:$4 sm:$0xff]  }
  0xfb   : > { %7679 = vmatprep.subr.bf16.mxu0 %v10072_v22  ;;  %v10154_v22 = vld [vmem:[%s11595_s8 + $0x13a0] ss:$8 sps:$4 sm:$0xff]  }
  0xfd   : > { %7024 = vmatpush1.bf16.msra.mxu1 %v10067_v23  ;;  %v10159_v23 = vld [vmem:[%s11595_s8 + $0x3b4] ss:$8 sps:$4 sm:$0xff]  }
  0xfe   : > { %7680 = vmatpush1.bf16.msra.mxu0 %v10070_v24  ;;  %7025 = vmatprep.subr.bf16.mxu1 %v10075_v53  ;;  %v10162_v24 = vld [vmem:[%s11595_s8 + $0x13b4] ss:$8 sps:$4 sm:$0xff]   ;;  %v10157_v53 = vld [vmem:[%s11595_s8 + $0x3b0] ss:$8 sps:$4 sm:$0xff]  }
  0xff   : > { %7681 = vmatprep.subr.bf16.mxu0 %v10078_v57  ;;  %v10160_v57 = vld [vmem:[%s11595_s8 + $0x13b0] ss:$8 sps:$4 sm:$0xff]  }
 0x101   : > { %7026 = vmatpush1.bf16.msra.mxu1 %v10073_v27  ;;  %v10165_v27 = vld [vmem:[%s11595_s8 + $0x3c4] ss:$8 sps:$4 sm:$0xff]  }
 0x102   : > { %7682 = vmatpush1.bf16.msra.mxu0 %v10076_v28  ;;  %7027 = vmatprep.subr.bf16.mxu1 %v10081_v29  ;;  %v10168_v28 = vld [vmem:[%s11595_s8 + $0x13c4] ss:$8 sps:$4 sm:$0xff]   ;;  %v10163_v29 = vld [vmem:[%s11595_s8 + $0x3c0] ss:$8 sps:$4 sm:$0xff]  }
 0x103   : > { %7683 = vmatprep.subr.bf16.mxu0 %v10084_v30  ;;  %v10166_v30 = vld [vmem:[%s11595_s8 + $0x13c0] ss:$8 sps:$4 sm:$0xff]  }
 0x105   : > { %7028 = vmatpush1.bf16.msra.mxu1 %v10079_v31  ;;  %v10171_v31 = vld [vmem:[%s11595_s8 + $0x3d4] ss:$8 sps:$4 sm:$0xff]  }
 0x106   : > { %7684 = vmatpush1.bf16.msra.mxu0 %v10082_v32  ;;  %7029 = vmatprep.subr.bf16.mxu1 %v10087_v33  ;;  %v10174_v32 = vld [vmem:[%s11595_s8 + $0x13d4] ss:$8 sps:$4 sm:$0xff]   ;;  %v10169_v33 = vld [vmem:[%s11595_s8 + $0x3d0] ss:$8 sps:$4 sm:$0xff]  }
 0x107   : > { %7685 = vmatprep.subr.bf16.mxu0 %v10090_v34  ;;  %v10172_v34 = vld [vmem:[%s11595_s8 + $0x13d0] ss:$8 sps:$4 sm:$0xff]  }
 0x109   : > { %7030 = vmatpush1.bf16.msra.mxu1 %v10085_v35  ;;  %v10177_v35 = vld [vmem:[%s11595_s8 + $0x3e4] ss:$8 sps:$4 sm:$0xff]  }
 0x10a   : > { %7686 = vmatpush1.bf16.msra.mxu0 %v10088_v36  ;;  %7040 = vmatprep.subr.bf16.mxu1 %v10093_v18  ;;  %v10180_v36 = vld [vmem:[%s11595_s8 + $0x13e4] ss:$8 sps:$4 sm:$0xff]   ;;  %v10175_v18 = vld [vmem:[%s11595_s8 + $0x3e0] ss:$8 sps:$4 sm:$0xff]  }
 0x10b   : > { %7696 = vmatprep.subr.bf16.mxu0 %v10096_v38  ;;  %v10178_v38 = vld [vmem:[%s11595_s8 + $0x13e0] ss:$8 sps:$4 sm:$0xff]  }
 0x10c   : > { %7032 = vmatmul.mubr.bf16.vlgmr.msra.gmra.mrb[0].mxu1 %v11875_v39 }
 0x10d   : > { %7688 = vmatmul.mubr.bf16.vlgmr.msra.gmra.mrb[0].mxu0 %v11879_v40  ;;  %7041 = vmatpush1.bf16.msra.mxu1 %v10091_v41  ;;  %v11946_v41 = vld.sshfl [vmem:[%s11610_s29 + $0x8] sm:$0xff pattern:$0x75316420] }
 0x10e   : > { %7697 = vmatpush1.bf16.msra.mxu0 %v10094_v42  ;;  %7042 = vmatprep.subr.bf16.mxu1 %v10099_v43  ;;  %v11949_v42 = vld.sshfl [vmem:[%s11610_s29 + $0x28] sm:$0xff pattern:$0x75316420]  ;;  %v10183_v43 = vld [vmem:[%s11595_s8 + $0x3f4] ss:$8 sps:$4 sm:$0xff]  }
 0x10f   : > { %7698 = vmatprep.subr.bf16.mxu0 %v10102_v45  ;;  %7072 = vmatprep.mubr.bf16.mxu1 %v1389_v25  ;;  %v10186_v45 = vld [vmem:[%s11595_s8 + $0x13f4] ss:$8 sps:$4 sm:$0xff]   ;;  %v10181_v25 = vld [vmem:[%s11595_s8 + $0x3f0] ss:$8 sps:$4 sm:$0xff]  }
 0x110   : > { %7728 = vmatprep.mubr.bf16.mxu0 %v1585_v46  ;;  %v10184_v46 = vld [vmem:[%s11595_s8 + $0x13f0] ss:$8 sps:$4 sm:$0xff]  }
 0x111   : > { %7043 = vmatpush1.bf16.msra.mxu1 %v10097_v26  ;;  %v10189_v26 = vld [vmem:[%s11595_s8 + $0x404] ss:$8 sps:$4 sm:$0xff]  }
 0x112   : > { %7699 = vmatpush1.bf16.msra.mxu0 %v10100_v47  ;;  %7044 = vmatprep.subr.bf16.mxu1 %v10105_v37  ;;  %v10192_v47 = vld [vmem:[%s11595_s8 + $0x1404] ss:$8 sps:$4 sm:$0xff]   ;;  %v1405_v37 = vcombine.high %v11946_v41, %v11946_v41 }
 0x113   : > { %7700 = vmatprep.subr.bf16.mxu0 %v10108_v48  ;;  %v1601_v48 = vcombine.high %v11949_v42, %v11949_v42 }
 0x115   : > { %7045 = vmatpush1.bf16.msra.mxu1 %v10103_v17  ;;  %v10187_v17 = vld [vmem:[%s11595_s8 + $0x400] ss:$8 sps:$4 sm:$0xff]  }
 0x116   : > { %7701 = vmatpush1.bf16.msra.mxu0 %v10106_v49  ;;  %7046 = vmatprep.subr.bf16.mxu1 %v10111_v51  ;;  %v10190_v49 = vld [vmem:[%s11595_s8 + $0x1400] ss:$8 sps:$4 sm:$0xff]   ;;  %v1387_v51 = vcombine.high %v11875_v39, %v11875_v39  ;;  %v10193_v39 = vld [vmem:[%s11595_s8 + $0x410] ss:$8 sps:$4 sm:$0xff]  }
 0x117   : > { %7702 = vmatprep.subr.bf16.mxu0 %v10114_v52  ;;  %v1583_v52 = vcombine.high %v11879_v40, %v11879_v40  ;;  %v10196_v40 = vld [vmem:[%s11595_s8 + $0x1410] ss:$8 sps:$4 sm:$0xff]  }
 0x119   : > { %7047 = vmatpush1.bf16.msra.mxu1 %v10109_v54  ;;  %v10195_v54 = vld [vmem:[%s11595_s8 + $0x414] ss:$8 sps:$4 sm:$0xff]  }
 0x11a   : > { %7703 = vmatpush1.bf16.msra.mxu0 %v10112_v55  ;;  %7048 = vmatprep.subr.bf16.mxu1 %v10117_v56  ;;  %v10198_v55 = vld [vmem:[%s11595_s8 + $0x1414] ss:$8 sps:$4 sm:$0xff]   ;;  %v11970_v56 = vrot.slane %v1405_v37, %v11675_v50  ;;  %v10273_v37 = vld [vmem:[%s11595_s8 + $0x4e4] ss:$8 sps:$4 sm:$0xff]  }
 0x11b   : > { %7704 = vmatprep.subr.bf16.mxu0 %v10120_v58  ;;  %v11973_v58 = vrot.slane %v1601_v48, %v11675_v50  ;;  %v10276_v48 = vld [vmem:[%s11595_s8 + $0x14e4] ss:$8 sps:$4 sm:$0xff]  }
 0x11d   : > { %7049 = vmatpush1.bf16.msra.mxu1 %v10115_v59  ;;  %v10201_v59 = vld [vmem:[%s11595_s8 + $0x424] ss:$8 sps:$4 sm:$0xff]  }
 0x11e   : > { %7705 = vmatpush1.bf16.msra.mxu0 %v10118_v60  ;;  %7050 = vmatprep.subr.bf16.mxu1 %v10123_v61  ;;  %v10204_v60 = vld [vmem:[%s11595_s8 + $0x1424] ss:$8 sps:$4 sm:$0xff]   ;;  %v10199_v61 = vld [vmem:[%s11595_s8 + $0x420] ss:$8 sps:$4 sm:$0xff]  }
 0x11f   : > { %7706 = vmatprep.subr.bf16.mxu0 %v10126_v62  ;;  %v10202_v62 = vld [vmem:[%s11595_s8 + $0x1420] ss:$8 sps:$4 sm:$0xff]  }
 0x121   : > { %7051 = vmatpush1.bf16.msra.mxu1 %v10121_v63  ;;  %v10207_v63 = vld [vmem:[%s11595_s8 + $0x434] ss:$8 sps:$4 sm:$0xff]  }
 0x122   : > { %7707 = vmatpush1.bf16.msra.mxu0 %v10124_v0  ;;  %7052 = vmatprep.subr.bf16.mxu1 %v10129_v1  ;;  %v10210_v0 = vld [vmem:[%s11595_s8 + $0x1434] ss:$8 sps:$4 sm:$0xff]   ;;  %v10205_v1 = vld [vmem:[%s11595_s8 + $0x430] ss:$8 sps:$4 sm:$0xff]  }
 0x123   : > { %7708 = vmatprep.subr.bf16.mxu0 %v10132_v2  ;;  %v10208_v2 = vld [vmem:[%s11595_s8 + $0x1430] ss:$8 sps:$4 sm:$0xff]  }
 0x125   : > { %7053 = vmatpush1.bf16.msra.mxu1 %v10127_v3  ;;  %v10213_v3 = vld [vmem:[%s11595_s8 + $0x444] ss:$8 sps:$4 sm:$0xff]  }
 0x126   : > { %7709 = vmatpush1.bf16.msra.mxu0 %v10130_v4  ;;  %7054 = vmatprep.subr.bf16.mxu1 %v10135_v5  ;;  %v10216_v4 = vld [vmem:[%s11595_s8 + $0x1444] ss:$8 sps:$4 sm:$0xff]   ;;  %v10211_v5 = vld [vmem:[%s11595_s8 + $0x440] ss:$8 sps:$4 sm:$0xff]  }
 0x127   : > { %7710 = vmatprep.subr.bf16.mxu0 %v10138_v6  ;;  %v10214_v6 = vld [vmem:[%s11595_s8 + $0x1440] ss:$8 sps:$4 sm:$0xff]  }
 0x129   : > { %7055 = vmatpush1.bf16.msra.mxu1 %v10133_v7  ;;  %v10219_v7 = vld [vmem:[%s11595_s8 + $0x454] ss:$8 sps:$4 sm:$0xff]  }
 0x12a   : > { %7711 = vmatpush1.bf16.msra.mxu0 %v10136_v8  ;;  %7056 = vmatprep.subr.bf16.mxu1 %v10141_v9  ;;  %v10222_v8 = vld [vmem:[%s11595_s8 + $0x1454] ss:$8 sps:$4 sm:$0xff]   ;;  %v10217_v9 = vld [vmem:[%s11595_s8 + $0x450] ss:$8 sps:$4 sm:$0xff]  }
 0x12b   : > { %7712 = vmatprep.subr.bf16.mxu0 %v10144_v10  ;;  %v10220_v10 = vld [vmem:[%s11595_s8 + $0x1450] ss:$8 sps:$4 sm:$0xff]  }
 0x12d   : > { %7057 = vmatpush1.bf16.msra.mxu1 %v10139_v11  ;;  %v10225_v11 = vld [vmem:[%s11595_s8 + $0x464] ss:$8 sps:$4 sm:$0xff]  }
 0x12e   : > { %7713 = vmatpush1.bf16.msra.mxu0 %v10142_v12  ;;  %7058 = vmatprep.subr.bf16.mxu1 %v10147_v13  ;;  %v10228_v12 = vld [vmem:[%s11595_s8 + $0x1464] ss:$8 sps:$4 sm:$0xff]   ;;  %v10223_v13 = vld [vmem:[%s11595_s8 + $0x460] ss:$8 sps:$4 sm:$0xff]  }
 0x12f   : > { %7714 = vmatprep.subr.bf16.mxu0 %v10150_v14  ;;  %v10226_v14 = vld [vmem:[%s11595_s8 + $0x1460] ss:$8 sps:$4 sm:$0xff]  }
 0x131   : > { %7059 = vmatpush1.bf16.msra.mxu1 %v10145_v15  ;;  %v10231_v15 = vld [vmem:[%s11595_s8 + $0x474] ss:$8 sps:$4 sm:$0xff]  }
 0x132   : > { %7715 = vmatpush1.bf16.msra.mxu0 %v10148_v16  ;;  %7060 = vmatprep.subr.bf16.mxu1 %v10153_v19  ;;  %v10234_v16 = vld [vmem:[%s11595_s8 + $0x1474] ss:$8 sps:$4 sm:$0xff]   ;;  %v10229_v19 = vld [vmem:[%s11595_s8 + $0x470] ss:$8 sps:$4 sm:$0xff]  }
 0x133   : > { %7716 = vmatprep.subr.bf16.mxu0 %v10156_v20  ;;  %v10232_v20 = vld [vmem:[%s11595_s8 + $0x1470] ss:$8 sps:$4 sm:$0xff]  }
 0x135   : > { %7061 = vmatpush1.bf16.msra.mxu1 %v10151_v21  ;;  %v10237_v21 = vld [vmem:[%s11595_s8 + $0x484] ss:$8 sps:$4 sm:$0xff]  }
 0x136   : > { %7717 = vmatpush1.bf16.msra.mxu0 %v10154_v22  ;;  %7062 = vmatprep.subr.bf16.mxu1 %v10159_v23  ;;  %v10240_v22 = vld [vmem:[%s11595_s8 + $0x1484] ss:$8 sps:$4 sm:$0xff]   ;;  %v10235_v23 = vld [vmem:[%s11595_s8 + $0x480] ss:$8 sps:$4 sm:$0xff]  }
 0x137   : > { %7718 = vmatprep.subr.bf16.mxu0 %v10162_v24  ;;  %v10238_v24 = vld [vmem:[%s11595_s8 + $0x1480] ss:$8 sps:$4 sm:$0xff]  }
 0x139   : > { %7063 = vmatpush1.bf16.msra.mxu1 %v10157_v53  ;;  %v10243_v53 = vld [vmem:[%s11595_s8 + $0x494] ss:$8 sps:$4 sm:$0xff]  }
 0x13a   : > { %7719 = vmatpush1.bf16.msra.mxu0 %v10160_v57  ;;  %7064 = vmatprep.subr.bf16.mxu1 %v10165_v27  ;;  %v10246_v57 = vld [vmem:[%s11595_s8 + $0x1494] ss:$8 sps:$4 sm:$0xff]   ;;  %v10241_v27 = vld [vmem:[%s11595_s8 + $0x490] ss:$8 sps:$4 sm:$0xff]  }
 0x13b   : > { %7720 = vmatprep.subr.bf16.mxu0 %v10168_v28  ;;  %v10244_v28 = vld [vmem:[%s11595_s8 + $0x1490] ss:$8 sps:$4 sm:$0xff]  }
 0x13d   : > { %7065 = vmatpush1.bf16.msra.mxu1 %v10163_v29  ;;  %v10249_v29 = vld [vmem:[%s11595_s8 + $0x4a4] ss:$8 sps:$4 sm:$0xff]  }
 0x13e   : > { %7721 = vmatpush1.bf16.msra.mxu0 %v10166_v30  ;;  %7066 = vmatprep.subr.bf16.mxu1 %v10171_v31  ;;  %v10252_v30 = vld [vmem:[%s11595_s8 + $0x14a4] ss:$8 sps:$4 sm:$0xff]   ;;  %v10247_v31 = vld [vmem:[%s11595_s8 + $0x4a0] ss:$8 sps:$4 sm:$0xff]  }
 0x13f   : > { %7722 = vmatprep.subr.bf16.mxu0 %v10174_v32  ;;  %v10250_v32 = vld [vmem:[%s11595_s8 + $0x14a0] ss:$8 sps:$4 sm:$0xff]  }
 0x141   : > { %7067 = vmatpush1.bf16.msra.mxu1 %v10169_v33  ;;  %v10255_v33 = vld [vmem:[%s11595_s8 + $0x4b4] ss:$8 sps:$4 sm:$0xff]  }
 0x142   : > { %7723 = vmatpush1.bf16.msra.mxu0 %v10172_v34  ;;  %7068 = vmatprep.subr.bf16.mxu1 %v10177_v35  ;;  %v10258_v34 = vld [vmem:[%s11595_s8 + $0x14b4] ss:$8 sps:$4 sm:$0xff]   ;;  %v10253_v35 = vld [vmem:[%s11595_s8 + $0x4b0] ss:$8 sps:$4 sm:$0xff]  }
 0x143   : > { %7724 = vmatprep.subr.bf16.mxu0 %v10180_v36  ;;  %v10256_v36 = vld [vmem:[%s11595_s8 + $0x14b0] ss:$8 sps:$4 sm:$0xff]  }
 0x145   : > { %7069 = vmatpush1.bf16.msra.mxu1 %v10175_v18  ;;  %v10261_v18 = vld [vmem:[%s11595_s8 + $0x4c4] ss:$8 sps:$4 sm:$0xff]  }
 0x146   : > { %7725 = vmatpush1.bf16.msra.mxu0 %v10178_v38  ;;  %7070 = vmatprep.subr.bf16.mxu1 %v10183_v43  ;;  %v10264_v38 = vld [vmem:[%s11595_s8 + $0x14c4] ss:$8 sps:$4 sm:$0xff]   ;;  %v10259_v43 = vld [vmem:[%s11595_s8 + $0x4c0] ss:$8 sps:$4 sm:$0xff]  }
 0x147   : > { %7726 = vmatprep.subr.bf16.mxu0 %v10186_v45  ;;  %v10262_v45 = vld [vmem:[%s11595_s8 + $0x14c0] ss:$8 sps:$4 sm:$0xff]  }
 0x149   : > { %7071 = vmatpush1.bf16.msra.mxu1 %v10181_v25  ;;  %v10267_v25 = vld [vmem:[%s11595_s8 + $0x4d4] ss:$8 sps:$4 sm:$0xff]  }
 0x14a   : > { %7727 = vmatpush1.bf16.msra.mxu0 %v10184_v46  ;;  %7081 = vmatprep.subr.bf16.mxu1 %v10189_v26  ;;  %v10270_v46 = vld [vmem:[%s11595_s8 + $0x14d4] ss:$8 sps:$4 sm:$0xff]   ;;  %v10265_v26 = vld [vmem:[%s11595_s8 + $0x4d0] ss:$8 sps:$4 sm:$0xff]  }
 0x14b   : > { %7737 = vmatprep.subr.bf16.mxu0 %v10192_v47  ;;  %v10268_v47 = vld [vmem:[%s11595_s8 + $0x14d0] ss:$8 sps:$4 sm:$0xff]  }
 0x14c   : > { %7073 = vmatmul.mubr.bf16.vlgmr.msra.gmra.mrb[0].mxu1 %v1387_v51  ;;  %v10279_v51 = vld [vmem:[%s11595_s8 + $0x4f4] ss:$8 sps:$4 sm:$0xff]  }
 0x14d   : > { %7729 = vmatmul.mubr.bf16.vlgmr.msra.gmra.mrb[0].mxu0 %v1583_v52  ;;  %7082 = vmatpush1.bf16.msra.mxu1 %v10187_v17  ;;  %v10271_v17 = vld [vmem:[%s11595_s8 + $0x4e0] ss:$8 sps:$4 sm:$0xff]   ;;  %v10282_v52 = vld [vmem:[%s11595_s8 + $0x14f4] ss:$8 sps:$4 sm:$0xff]  }
 0x14e   : > { %7738 = vmatpush1.bf16.msra.mxu0 %v10190_v49  ;;  %7083 = vmatprep.subr.bf16.mxu1 %v10195_v54  ;;  %v10274_v49 = vld [vmem:[%s11595_s8 + $0x14e0] ss:$8 sps:$4 sm:$0xff]   ;;  %v10277_v54 = vld [vmem:[%s11595_s8 + $0x4f0] ss:$8 sps:$4 sm:$0xff]  }
 0x14f   : > { %7739 = vmatprep.subr.bf16.mxu0 %v10198_v55  ;;  %7113 = vmatprep.mubr.bf16.mxu1 %v11970_v56  ;;  %v10280_v55 = vld [vmem:[%s11595_s8 + $0x14f0] ss:$8 sps:$4 sm:$0xff]  }
 0x150   : > { %7769 = vmatprep.mubr.bf16.mxu0 %v11973_v58 }
 0x151   : > { %7084 = vmatpush1.bf16.msra.mxu1 %v10193_v39  ;;  %v10285_v39 = vld [vmem:[%s11595_s8 + $0x504] ss:$8 sps:$4 sm:$0xff]  }
 0x152   : > { %7740 = vmatpush1.bf16.msra.mxu0 %v10196_v40  ;;  %7085 = vmatprep.subr.bf16.mxu1 %v10201_v59  ;;  %v10288_v40 = vld [vmem:[%s11595_s8 + $0x1504] ss:$8 sps:$4 sm:$0xff]   ;;  %v12039_v59 = vrot.slane %v11946_v41, %v11675_v50  ;;  %v1437_v41 = vcombine.high %v11970_v56, %v11970_v56 }
 0x153   : > { %7741 = vmatprep.subr.bf16.mxu0 %v10204_v60  ;;  %v12043_v60 = vrot.slane %v11949_v42, %v11675_v50  ;;  %v10289_v42 = vld [vmem:[%s11595_s8 + $0x510] ss:$8 sps:$4 sm:$0xff]   ;;  %v10297_v56 = vld [vmem:[%s11595_s8 + $0x524] ss:$8 sps:$4 sm:$0xff]  }
 0x155   : > { %7086 = vmatpush1.bf16.msra.mxu1 %v10199_v61  ;;  %v10283_v61 = vld [vmem:[%s11595_s8 + $0x500] ss:$8 sps:$4 sm:$0xff]  }
 0x156   : > { %7742 = vmatpush1.bf16.msra.mxu0 %v10202_v62  ;;  %7087 = vmatprep.subr.bf16.mxu1 %v10207_v63  ;;  %v10286_v62 = vld [vmem:[%s11595_s8 + $0x1500] ss:$8 sps:$4 sm:$0xff]   ;;  %v10291_v63 = vld [vmem:[%s11595_s8 + $0x514] ss:$8 sps:$4 sm:$0xff]  }
 0x157   : > { %7743 = vmatprep.subr.bf16.mxu0 %v10210_v0  ;;  %v10294_v0 = vld [vmem:[%s11595_s8 + $0x1514] ss:$8 sps:$4 sm:$0xff]  }
 0x159   : > { %7088 = vmatpush1.bf16.msra.mxu1 %v10205_v1  ;;  %v1633_v1 = vcombine.high %v11973_v58, %v11973_v58  ;;  %v10295_v58 = vld [vmem:[%s11595_s8 + $0x520] ss:$8 sps:$4 sm:$0xff]  }
 0x15a   : > { %7744 = vmatpush1.bf16.msra.mxu0 %v10208_v2  ;;  %7089 = vmatprep.subr.bf16.mxu1 %v10213_v3  ;;  %v10292_v2 = vld [vmem:[%s11595_s8 + $0x1510] ss:$8 sps:$4 sm:$0xff]   ;;  %v10300_v3 = vld [vmem:[%s11595_s8 + $0x1524] ss:$8 sps:$4 sm:$0xff]  }
 0x15b   : > { %7745 = vmatprep.subr.bf16.mxu0 %v10216_v4  ;;  %v10298_v4 = vld [vmem:[%s11595_s8 + $0x1520] ss:$8 sps:$4 sm:$0xff]  }
 0x15d   : > { %7090 = vmatpush1.bf16.msra.mxu1 %v10211_v5  ;;  %v10303_v5 = vld [vmem:[%s11595_s8 + $0x534] ss:$8 sps:$4 sm:$0xff]  }
 0x15e   : > { %7746 = vmatpush1.bf16.msra.mxu0 %v10214_v6  ;;  %7091 = vmatprep.subr.bf16.mxu1 %v10219_v7  ;;  %v10306_v6 = vld [vmem:[%s11595_s8 + $0x1534] ss:$8 sps:$4 sm:$0xff]   ;;  %v10301_v7 = vld [vmem:[%s11595_s8 + $0x530] ss:$8 sps:$4 sm:$0xff]  }
 0x15f   : > { %7747 = vmatprep.subr.bf16.mxu0 %v10222_v8  ;;  %v10304_v8 = vld [vmem:[%s11595_s8 + $0x1530] ss:$8 sps:$4 sm:$0xff]  }
 0x161   : > { %7092 = vmatpush1.bf16.msra.mxu1 %v10217_v9  ;;  %v10309_v9 = vld [vmem:[%s11595_s8 + $0x544] ss:$8 sps:$4 sm:$0xff]  }
 0x162   : > { %7748 = vmatpush1.bf16.msra.mxu0 %v10220_v10  ;;  %7093 = vmatprep.subr.bf16.mxu1 %v10225_v11  ;;  %v10312_v10 = vld [vmem:[%s11595_s8 + $0x1544] ss:$8 sps:$4 sm:$0xff]   ;;  %v10307_v11 = vld [vmem:[%s11595_s8 + $0x540] ss:$8 sps:$4 sm:$0xff]  }
 0x163   : > { %7749 = vmatprep.subr.bf16.mxu0 %v10228_v12  ;;  %v10310_v12 = vld [vmem:[%s11595_s8 + $0x1540] ss:$8 sps:$4 sm:$0xff]  }
 0x165   : > { %7094 = vmatpush1.bf16.msra.mxu1 %v10223_v13  ;;  %v10315_v13 = vld [vmem:[%s11595_s8 + $0x554] ss:$8 sps:$4 sm:$0xff]  }
 0x166   : > { %7750 = vmatpush1.bf16.msra.mxu0 %v10226_v14  ;;  %7095 = vmatprep.subr.bf16.mxu1 %v10231_v15  ;;  %v10318_v14 = vld [vmem:[%s11595_s8 + $0x1554] ss:$8 sps:$4 sm:$0xff]   ;;  %v10313_v15 = vld [vmem:[%s11595_s8 + $0x550] ss:$8 sps:$4 sm:$0xff]  }
 0x167   : > { %7751 = vmatprep.subr.bf16.mxu0 %v10234_v16  ;;  %v10316_v16 = vld [vmem:[%s11595_s8 + $0x1550] ss:$8 sps:$4 sm:$0xff]  }
 0x169   : > { %7096 = vmatpush1.bf16.msra.mxu1 %v10229_v19  ;;  %v10321_v19 = vld [vmem:[%s11595_s8 + $0x564] ss:$8 sps:$4 sm:$0xff]  }
 0x16a   : > { %7752 = vmatpush1.bf16.msra.mxu0 %v10232_v20  ;;  %7097 = vmatprep.subr.bf16.mxu1 %v10237_v21  ;;  %v10324_v20 = vld [vmem:[%s11595_s8 + $0x1564] ss:$8 sps:$4 sm:$0xff]   ;;  %v10319_v21 = vld [vmem:[%s11595_s8 + $0x560] ss:$8 sps:$4 sm:$0xff]  }
 0x16b   : > { %7753 = vmatprep.subr.bf16.mxu0 %v10240_v22  ;;  %v10322_v22 = vld [vmem:[%s11595_s8 + $0x1560] ss:$8 sps:$4 sm:$0xff]  }
 0x16d   : > { %7098 = vmatpush1.bf16.msra.mxu1 %v10235_v23  ;;  %v10327_v23 = vld [vmem:[%s11595_s8 + $0x574] ss:$8 sps:$4 sm:$0xff]  }
 0x16e   : > { %7754 = vmatpush1.bf16.msra.mxu0 %v10238_v24  ;;  %7099 = vmatprep.subr.bf16.mxu1 %v10243_v53  ;;  %v10330_v24 = vld [vmem:[%s11595_s8 + $0x1574] ss:$8 sps:$4 sm:$0xff]   ;;  %v10325_v53 = vld [vmem:[%s11595_s8 + $0x570] ss:$8 sps:$4 sm:$0xff]  }
 0x16f   : > { %7755 = vmatprep.subr.bf16.mxu0 %v10246_v57  ;;  %v10328_v57 = vld [vmem:[%s11595_s8 + $0x1570] ss:$8 sps:$4 sm:$0xff]  }
 0x171   : > { %7100 = vmatpush1.bf16.msra.mxu1 %v10241_v27  ;;  %v10333_v27 = vld [vmem:[%s11595_s8 + $0x584] ss:$8 sps:$4 sm:$0xff]  }
 0x172   : > { %7756 = vmatpush1.bf16.msra.mxu0 %v10244_v28  ;;  %7101 = vmatprep.subr.bf16.mxu1 %v10249_v29  ;;  %v10336_v28 = vld [vmem:[%s11595_s8 + $0x1584] ss:$8 sps:$4 sm:$0xff]   ;;  %v10331_v29 = vld [vmem:[%s11595_s8 + $0x580] ss:$8 sps:$4 sm:$0xff]  }
 0x173   : > { %7757 = vmatprep.subr.bf16.mxu0 %v10252_v30  ;;  %v10334_v30 = vld [vmem:[%s11595_s8 + $0x1580] ss:$8 sps:$4 sm:$0xff]  }
 0x175   : > { %7102 = vmatpush1.bf16.msra.mxu1 %v10247_v31  ;;  %v10339_v31 = vld [vmem:[%s11595_s8 + $0x594] ss:$8 sps:$4 sm:$0xff]  }
 0x176   : > { %7758 = vmatpush1.bf16.msra.mxu0 %v10250_v32  ;;  %7103 = vmatprep.subr.bf16.mxu1 %v10255_v33  ;;  %v10342_v32 = vld [vmem:[%s11595_s8 + $0x1594] ss:$8 sps:$4 sm:$0xff]   ;;  %v10337_v33 = vld [vmem:[%s11595_s8 + $0x590] ss:$8 sps:$4 sm:$0xff]  }
 0x177   : > { %7759 = vmatprep.subr.bf16.mxu0 %v10258_v34  ;;  %v10340_v34 = vld [vmem:[%s11595_s8 + $0x1590] ss:$8 sps:$4 sm:$0xff]  }
 0x179   : > { %7104 = vmatpush1.bf16.msra.mxu1 %v10253_v35  ;;  %v10345_v35 = vld [vmem:[%s11595_s8 + $0x5a4] ss:$8 sps:$4 sm:$0xff]  }
 0x17a   : > { %7760 = vmatpush1.bf16.msra.mxu0 %v10256_v36  ;;  %7105 = vmatprep.subr.bf16.mxu1 %v10261_v18  ;;  %v10348_v36 = vld [vmem:[%s11595_s8 + $0x15a4] ss:$8 sps:$4 sm:$0xff]   ;;  %v10343_v18 = vld [vmem:[%s11595_s8 + $0x5a0] ss:$8 sps:$4 sm:$0xff]  }
 0x17b   : > { %7761 = vmatprep.subr.bf16.mxu0 %v10264_v38  ;;  %v10346_v38 = vld [vmem:[%s11595_s8 + $0x15a0] ss:$8 sps:$4 sm:$0xff]  }
 0x17d   : > { %7106 = vmatpush1.bf16.msra.mxu1 %v10259_v43  ;;  %v10351_v43 = vld [vmem:[%s11595_s8 + $0x5b4] ss:$8 sps:$4 sm:$0xff]  }
 0x17e   : > { %7762 = vmatpush1.bf16.msra.mxu0 %v10262_v45  ;;  %7107 = vmatprep.subr.bf16.mxu1 %v10267_v25  ;;  %v10354_v45 = vld [vmem:[%s11595_s8 + $0x15b4] ss:$8 sps:$4 sm:$0xff]   ;;  %v10349_v25 = vld [vmem:[%s11595_s8 + $0x5b0] ss:$8 sps:$4 sm:$0xff]  }
 0x17f   : > { %7763 = vmatprep.subr.bf16.mxu0 %v10270_v46  ;;  %v10352_v46 = vld [vmem:[%s11595_s8 + $0x15b0] ss:$8 sps:$4 sm:$0xff]  }
 0x181   : > { %7108 = vmatpush1.bf16.msra.mxu1 %v10265_v26  ;;  %v10357_v26 = vld [vmem:[%s11595_s8 + $0x5c4] ss:$8 sps:$4 sm:$0xff]  }
 0x182   : > { %7764 = vmatpush1.bf16.msra.mxu0 %v10268_v47  ;;  %7109 = vmatprep.subr.bf16.mxu1 %v10273_v37  ;;  %v10360_v47 = vld [vmem:[%s11595_s8 + $0x15c4] ss:$8 sps:$4 sm:$0xff]   ;;  %v10355_v37 = vld [vmem:[%s11595_s8 + $0x5c0] ss:$8 sps:$4 sm:$0xff]  }
 0x183   : > { %7765 = vmatprep.subr.bf16.mxu0 %v10276_v48  ;;  %v10358_v48 = vld [vmem:[%s11595_s8 + $0x15c0] ss:$8 sps:$4 sm:$0xff]  }
 0x185   : > { %7110 = vmatpush1.bf16.msra.mxu1 %v10271_v17  ;;  %v10363_v17 = vld [vmem:[%s11595_s8 + $0x5d4] ss:$8 sps:$4 sm:$0xff]  }
 0x186   : > { %7766 = vmatpush1.bf16.msra.mxu0 %v10274_v49  ;;  %7111 = vmatprep.subr.bf16.mxu1 %v10279_v51  ;;  %v10366_v49 = vld [vmem:[%s11595_s8 + $0x15d4] ss:$8 sps:$4 sm:$0xff]   ;;  %v10361_v51 = vld [vmem:[%s11595_s8 + $0x5d0] ss:$8 sps:$4 sm:$0xff]  }
 0x187   : > { %7767 = vmatprep.subr.bf16.mxu0 %v10282_v52  ;;  %v10364_v52 = vld [vmem:[%s11595_s8 + $0x15d0] ss:$8 sps:$4 sm:$0xff]  }
 0x189   : > { %7112 = vmatpush1.bf16.msra.mxu1 %v10277_v54  ;;  %v10369_v54 = vld [vmem:[%s11595_s8 + $0x5e4] ss:$8 sps:$4 sm:$0xff]  }
 0x18a   : > { %7768 = vmatpush1.bf16.msra.mxu0 %v10280_v55  ;;  %7122 = vmatprep.subr.bf16.mxu1 %v10285_v39  ;;  %v10372_v55 = vld [vmem:[%s11595_s8 + $0x15e4] ss:$8 sps:$4 sm:$0xff]  }
 0x18b   : > { %7778 = vmatprep.subr.bf16.mxu0 %v10288_v40  ;;  %v11345_v39 = vld [vmem:[%s11610_s29 + $0x8] sm:$0xff] }
 0x18c   : > { %7114 = vmatmul.mubr.bf16.vlgmr.msra.gmra.mrb[0].mxu1 %v12039_v59  ;;  %v1390_v40 = vcombine.high %v11345_v39, %v11345_v39  ;;  %v10447_v39 = vld [vmem:[%s11595_s8 + $0x6b4] ss:$8 sps:$4 sm:$0xff]  }
 0x18d   : > { %7770 = vmatmul.mubr.bf16.vlgmr.msra.gmra.mrb[0].mxu0 %v12043_v60  ;;  %7123 = vmatpush1.bf16.msra.mxu1 %v10283_v61  ;;  %v11346_v61 = vld [vmem:[%s11610_s29 + $0x28] sm:$0xff] }
 0x18e   : > { %7779 = vmatpush1.bf16.msra.mxu0 %v10286_v62  ;;  %7124 = vmatprep.subr.bf16.mxu1 %v10291_v63  ;;  %v1586_v62 = vcombine.high %v11346_v61, %v11346_v61  ;;  %v10367_v63 = vld [vmem:[%s11595_s8 + $0x5e0] ss:$8 sps:$4 sm:$0xff]   ;;  %v10445_v61 = vld [vmem:[%s11595_s8 + $0x6b0] ss:$8 sps:$4 sm:$0xff]  }
 0x18f   : > { %7780 = vmatprep.subr.bf16.mxu0 %v10294_v0  ;;  %7154 = vmatprep.mubr.bf16.mxu1 %v1437_v41  ;;  %v10370_v0 = vld [vmem:[%s11595_s8 + $0x15e0] ss:$8 sps:$4 sm:$0xff]   ;;  %v10375_v41 = vld [vmem:[%s11595_s8 + $0x5f4] ss:$8 sps:$4 sm:$0xff]  }
 0x190   : > { %7810 = vmatprep.mubr.bf16.mxu0 %v1633_v1  ;;  %v10378_v1 = vld [vmem:[%s11595_s8 + $0x15f4] ss:$8 sps:$4 sm:$0xff]  }
 0x191   : > { %7125 = vmatpush1.bf16.msra.mxu1 %v10289_v42  ;;  %v12114_v42 = vrot.slane %v1390_v40, %v11675_v50  ;;  %v10450_v40 = vld [vmem:[%s11595_s8 + $0x16b4] ss:$8 sps:$4 sm:$0xff]  }
 0x192   : > { %7781 = vmatpush1.bf16.msra.mxu0 %v10292_v2  ;;  %7126 = vmatprep.subr.bf16.mxu1 %v10297_v56  ;;  %v12117_v2 = vrot.slane %v1586_v62, %v11675_v50  ;;  %v10373_v56 = vld [vmem:[%s11595_s8 + $0x5f0] ss:$8 sps:$4 sm:$0xff]  }
 0x193   : > { %7782 = vmatprep.subr.bf16.mxu0 %v10300_v3  ;;  %v10376_v3 = vld [vmem:[%s11595_s8 + $0x15f0] ss:$8 sps:$4 sm:$0xff]  }
 0x194   : > { %v10448_v62 = vld [vmem:[%s11595_s8 + $0x16b0] ss:$8 sps:$4 sm:$0xff]  }
 0x195   : > { %7127 = vmatpush1.bf16.msra.mxu1 %v10295_v58  ;;  %v10381_v58 = vld [vmem:[%s11595_s8 + $0x604] ss:$8 sps:$4 sm:$0xff]  }
 0x196   : > { %7783 = vmatpush1.bf16.msra.mxu0 %v10298_v4  ;;  %7128 = vmatprep.subr.bf16.mxu1 %v10303_v5  ;;  %v10384_v4 = vld [vmem:[%s11595_s8 + $0x1604] ss:$8 sps:$4 sm:$0xff]   ;;  %v1406_v5 = vcombine.high %v12114_v42, %v12114_v42 }
 0x197   : > { %7784 = vmatprep.subr.bf16.mxu0 %v10306_v6  ;;  %v1602_v6 = vcombine.high %v12117_v2, %v12117_v2 }
 0x199   : > { %7129 = vmatpush1.bf16.msra.mxu1 %v10301_v7  ;;  %v1435_v7 = vcombine.high %v12039_v59, %v12039_v59  ;;  %v12139_v59 = vrot.slane %v1602_v6, %v11675_v50  ;;  %v10468_v6 = vld [vmem:[%s11595_s8 + $0x16e4] ss:$8 sps:$4 sm:$0xff]  }
 0x19a   : > { %7785 = vmatpush1.bf16.msra.mxu0 %v10304_v8  ;;  %7130 = vmatprep.subr.bf16.mxu1 %v10309_v9  ;;  %v1631_v8 = vcombine.high %v12043_v60, %v12043_v60  ;;  %v10379_v9 = vld [vmem:[%s11595_s8 + $0x600] ss:$8 sps:$4 sm:$0xff]   ;;  %v10385_v60 = vld [vmem:[%s11595_s8 + $0x610] ss:$8 sps:$4 sm:$0xff]  }
 0x19b   : > { %7786 = vmatprep.subr.bf16.mxu0 %v10312_v10  ;;  %v10382_v10 = vld [vmem:[%s11595_s8 + $0x1600] ss:$8 sps:$4 sm:$0xff]  }
 0x19d   : > { %7131 = vmatpush1.bf16.msra.mxu1 %v10307_v11  ;;  %v10387_v11 = vld [vmem:[%s11595_s8 + $0x614] ss:$8 sps:$4 sm:$0xff]  }
 0x19e   : > { %7787 = vmatpush1.bf16.msra.mxu0 %v10310_v12  ;;  %7132 = vmatprep.subr.bf16.mxu1 %v10315_v13  ;;  %v10390_v12 = vld [vmem:[%s11595_s8 + $0x1614] ss:$8 sps:$4 sm:$0xff]   ;;  %v12136_v13 = vrot.slane %v1406_v5, %v11675_v50  ;;  %v10465_v5 = vld [vmem:[%s11595_s8 + $0x6e4] ss:$8 sps:$4 sm:$0xff]  }
 0x19f   : > { %7788 = vmatprep.subr.bf16.mxu0 %v10318_v14  ;;  %v10388_v14 = vld [vmem:[%s11595_s8 + $0x1610] ss:$8 sps:$4 sm:$0xff]  }
 0x1a1   : > { %7133 = vmatpush1.bf16.msra.mxu1 %v10313_v15  ;;  %v10393_v15 = vld [vmem:[%s11595_s8 + $0x624] ss:$8 sps:$4 sm:$0xff]  }
 0x1a2   : > { %7789 = vmatpush1.bf16.msra.mxu0 %v10316_v16  ;;  %7134 = vmatprep.subr.bf16.mxu1 %v10321_v19  ;;  %v10396_v16 = vld [vmem:[%s11595_s8 + $0x1624] ss:$8 sps:$4 sm:$0xff]   ;;  %v10391_v19 = vld [vmem:[%s11595_s8 + $0x620] ss:$8 sps:$4 sm:$0xff]  }
 0x1a3   : > { %7790 = vmatprep.subr.bf16.mxu0 %v10324_v20  ;;  %v10394_v20 = vld [vmem:[%s11595_s8 + $0x1620] ss:$8 sps:$4 sm:$0xff]  }
 0x1a5   : > { %7135 = vmatpush1.bf16.msra.mxu1 %v10319_v21  ;;  %v10399_v21 = vld [vmem:[%s11595_s8 + $0x634] ss:$8 sps:$4 sm:$0xff]  }
 0x1a6   : > { %7791 = vmatpush1.bf16.msra.mxu0 %v10322_v22  ;;  %7136 = vmatprep.subr.bf16.mxu1 %v10327_v23  ;;  %v10402_v22 = vld [vmem:[%s11595_s8 + $0x1634] ss:$8 sps:$4 sm:$0xff]   ;;  %v10397_v23 = vld [vmem:[%s11595_s8 + $0x630] ss:$8 sps:$4 sm:$0xff]  }
 0x1a7   : > { %7792 = vmatprep.subr.bf16.mxu0 %v10330_v24  ;;  %v10400_v24 = vld [vmem:[%s11595_s8 + $0x1630] ss:$8 sps:$4 sm:$0xff]  }
 0x1a9   : > { %7137 = vmatpush1.bf16.msra.mxu1 %v10325_v53  ;;  %v10405_v53 = vld [vmem:[%s11595_s8 + $0x644] ss:$8 sps:$4 sm:$0xff]  }
 0x1aa   : > { %7793 = vmatpush1.bf16.msra.mxu0 %v10328_v57  ;;  %7138 = vmatprep.subr.bf16.mxu1 %v10333_v27  ;;  %v10408_v57 = vld [vmem:[%s11595_s8 + $0x1644] ss:$8 sps:$4 sm:$0xff]   ;;  %v10403_v27 = vld [vmem:[%s11595_s8 + $0x640] ss:$8 sps:$4 sm:$0xff]  }
 0x1ab   : > { %7794 = vmatprep.subr.bf16.mxu0 %v10336_v28  ;;  %v10406_v28 = vld [vmem:[%s11595_s8 + $0x1640] ss:$8 sps:$4 sm:$0xff]  }
 0x1ad   : > { %7139 = vmatpush1.bf16.msra.mxu1 %v10331_v29  ;;  %v10411_v29 = vld [vmem:[%s11595_s8 + $0x654] ss:$8 sps:$4 sm:$0xff]  }
 0x1ae   : > { %7795 = vmatpush1.bf16.msra.mxu0 %v10334_v30  ;;  %7140 = vmatprep.subr.bf16.mxu1 %v10339_v31  ;;  %v10414_v30 = vld [vmem:[%s11595_s8 + $0x1654] ss:$8 sps:$4 sm:$0xff]   ;;  %v10409_v31 = vld [vmem:[%s11595_s8 + $0x650] ss:$8 sps:$4 sm:$0xff]  }
 0x1af   : > { %7796 = vmatprep.subr.bf16.mxu0 %v10342_v32  ;;  %v10412_v32 = vld [vmem:[%s11595_s8 + $0x1650] ss:$8 sps:$4 sm:$0xff]  }
 0x1b1   : > { %7141 = vmatpush1.bf16.msra.mxu1 %v10337_v33  ;;  %v10417_v33 = vld [vmem:[%s11595_s8 + $0x664] ss:$8 sps:$4 sm:$0xff]  }
 0x1b2   : > { %7797 = vmatpush1.bf16.msra.mxu0 %v10340_v34  ;;  %7142 = vmatprep.subr.bf16.mxu1 %v10345_v35  ;;  %v10420_v34 = vld [vmem:[%s11595_s8 + $0x1664] ss:$8 sps:$4 sm:$0xff]   ;;  %v10415_v35 = vld [vmem:[%s11595_s8 + $0x660] ss:$8 sps:$4 sm:$0xff]  }
 0x1b3   : > { %7798 = vmatprep.subr.bf16.mxu0 %v10348_v36  ;;  %v10418_v36 = vld [vmem:[%s11595_s8 + $0x1660] ss:$8 sps:$4 sm:$0xff]  }
 0x1b5   : > { %7143 = vmatpush1.bf16.msra.mxu1 %v10343_v18  ;;  %v10423_v18 = vld [vmem:[%s11595_s8 + $0x674] ss:$8 sps:$4 sm:$0xff]  }
 0x1b6   : > { %7799 = vmatpush1.bf16.msra.mxu0 %v10346_v38  ;;  %7144 = vmatprep.subr.bf16.mxu1 %v10351_v43  ;;  %v10426_v38 = vld [vmem:[%s11595_s8 + $0x1674] ss:$8 sps:$4 sm:$0xff]   ;;  %v10421_v43 = vld [vmem:[%s11595_s8 + $0x670] ss:$8 sps:$4 sm:$0xff]  }
 0x1b7   : > { %7800 = vmatprep.subr.bf16.mxu0 %v10354_v45  ;;  %v10424_v45 = vld [vmem:[%s11595_s8 + $0x1670] ss:$8 sps:$4 sm:$0xff]  }
 0x1b9   : > { %7145 = vmatpush1.bf16.msra.mxu1 %v10349_v25  ;;  %v10429_v25 = vld [vmem:[%s11595_s8 + $0x684] ss:$8 sps:$4 sm:$0xff]  }
 0x1ba   : > { %7801 = vmatpush1.bf16.msra.mxu0 %v10352_v46  ;;  %7146 = vmatprep.subr.bf16.mxu1 %v10357_v26  ;;  %v10432_v46 = vld [vmem:[%s11595_s8 + $0x1684] ss:$8 sps:$4 sm:$0xff]   ;;  %v10427_v26 = vld [vmem:[%s11595_s8 + $0x680] ss:$8 sps:$4 sm:$0xff]  }
 0x1bb   : > { %7802 = vmatprep.subr.bf16.mxu0 %v10360_v47  ;;  %v10430_v47 = vld [vmem:[%s11595_s8 + $0x1680] ss:$8 sps:$4 sm:$0xff]  }
 0x1bd   : > { %7147 = vmatpush1.bf16.msra.mxu1 %v10355_v37  ;;  %v10435_v37 = vld [vmem:[%s11595_s8 + $0x694] ss:$8 sps:$4 sm:$0xff]  }
 0x1be   : > { %7803 = vmatpush1.bf16.msra.mxu0 %v10358_v48  ;;  %7148 = vmatprep.subr.bf16.mxu1 %v10363_v17  ;;  %v10438_v48 = vld [vmem:[%s11595_s8 + $0x1694] ss:$8 sps:$4 sm:$0xff]   ;;  %v10433_v17 = vld [vmem:[%s11595_s8 + $0x690] ss:$8 sps:$4 sm:$0xff]  }
 0x1bf   : > { %7804 = vmatprep.subr.bf16.mxu0 %v10366_v49  ;;  %v10436_v49 = vld [vmem:[%s11595_s8 + $0x1690] ss:$8 sps:$4 sm:$0xff]  }
 0x1c1   : > { %7149 = vmatpush1.bf16.msra.mxu1 %v10361_v51  ;;  %v10441_v51 = vld [vmem:[%s11595_s8 + $0x6a4] ss:$8 sps:$4 sm:$0xff]  }
 0x1c2   : > { %7805 = vmatpush1.bf16.msra.mxu0 %v10364_v52  ;;  %7150 = vmatprep.subr.bf16.mxu1 %v10369_v54  ;;  %v10444_v52 = vld [vmem:[%s11595_s8 + $0x16a4] ss:$8 sps:$4 sm:$0xff]   ;;  %v10439_v54 = vld [vmem:[%s11595_s8 + $0x6a0] ss:$8 sps:$4 sm:$0xff]  }
 0x1c3   : > { %7806 = vmatprep.subr.bf16.mxu0 %v10372_v55  ;;  %v10442_v55 = vld [vmem:[%s11595_s8 + $0x16a0] ss:$8 sps:$4 sm:$0xff]  }
 0x1c5   : > { %7151 = vmatpush1.bf16.msra.mxu1 %v10367_v63  ;;  %v10453_v63 = vld [vmem:[%s11595_s8 + $0x6c4] ss:$8 sps:$4 sm:$0xff]  }
 0x1c6   : > { %7807 = vmatpush1.bf16.msra.mxu0 %v10370_v0  ;;  %7152 = vmatprep.subr.bf16.mxu1 %v10375_v41  ;;  %v10456_v0 = vld [vmem:[%s11595_s8 + $0x16c4] ss:$8 sps:$4 sm:$0xff]   ;;  %v10451_v41 = vld [vmem:[%s11595_s8 + $0x6c0] ss:$8 sps:$4 sm:$0xff]  }
 0x1c7   : > { %7808 = vmatprep.subr.bf16.mxu0 %v10378_v1  ;;  %v10454_v1 = vld [vmem:[%s11595_s8 + $0x16c0] ss:$8 sps:$4 sm:$0xff]  }
 0x1c9   : > { %7153 = vmatpush1.bf16.msra.mxu1 %v10373_v56  ;;  %v10459_v56 = vld [vmem:[%s11595_s8 + $0x6d4] ss:$8 sps:$4 sm:$0xff]  }
 0x1ca   : > { %7809 = vmatpush1.bf16.msra.mxu0 %v10376_v3  ;;  %7163 = vmatprep.subr.bf16.mxu1 %v10381_v58  ;;  %v10462_v3 = vld [vmem:[%s11595_s8 + $0x16d4] ss:$8 sps:$4 sm:$0xff]   ;;  %v10457_v58 = vld [vmem:[%s11595_s8 + $0x6d0] ss:$8 sps:$4 sm:$0xff]  }
 0x1cb   : > { %7819 = vmatprep.subr.bf16.mxu0 %v10384_v4  ;;  %v10460_v4 = vld [vmem:[%s11595_s8 + $0x16d0] ss:$8 sps:$4 sm:$0xff]  }
 0x1cc   : > { %7155 = vmatmul.mubr.bf16.vlgmr.msra.gmra.mrb[0].mxu1 %v1435_v7  ;;  %v10463_v7 = vld [vmem:[%s11595_s8 + $0x6e0] ss:$8 sps:$4 sm:$0xff]  }
 0x1cd   : > { %7811 = vmatmul.mubr.bf16.vlgmr.msra.gmra.mrb[0].mxu0 %v1631_v8  ;;  %7164 = vmatpush1.bf16.msra.mxu1 %v10379_v9  ;;  %v10466_v8 = vld [vmem:[%s11595_s8 + $0x16e0] ss:$8 sps:$4 sm:$0xff]   ;;  %v10471_v9 = vld [vmem:[%s11595_s8 + $0x6f4] ss:$8 sps:$4 sm:$0xff]  }
 0x1ce   : > { %7820 = vmatpush1.bf16.msra.mxu0 %v10382_v10  ;;  %7165 = vmatprep.subr.bf16.mxu1 %v10387_v11  ;;  %v10474_v10 = vld [vmem:[%s11595_s8 + $0x16f4] ss:$8 sps:$4 sm:$0xff]   ;;  %v10469_v11 = vld [vmem:[%s11595_s8 + $0x6f0] ss:$8 sps:$4 sm:$0xff]  }
 0x1cf   : > { %7821 = vmatprep.subr.bf16.mxu0 %v10390_v12  ;;  %7195 = vmatprep.mubr.bf16.mxu1 %v12136_v13  ;;  %v10472_v12 = vld [vmem:[%s11595_s8 + $0x16f0] ss:$8 sps:$4 sm:$0xff]  }
 0x1d0   : > { %7851 = vmatprep.mubr.bf16.mxu0 %v12139_v59 }
 0x1d1   : > { %7166 = vmatpush1.bf16.msra.mxu1 %v10385_v60  ;;  %v10478_v60 = vld [vmem:[%s11595_s8 + $0x704] ss:$8 sps:$4 sm:$0xff]  }
 0x1d2   : > { %7822 = vmatpush1.bf16.msra.mxu0 %v10388_v14  ;;  %7167 = vmatprep.subr.bf16.mxu1 %v10393_v15  ;;  %v10482_v14 = vld [vmem:[%s11595_s8 + $0x1704] ss:$8 sps:$4 sm:$0xff]   ;;  %v12205_v15 = vrot.slane %v12114_v42, %v11675_v50  ;;  %v1438_v42 = vcombine.high %v12136_v13, %v12136_v13 }
 0x1d3   : > { %7823 = vmatprep.subr.bf16.mxu0 %v10396_v16  ;;  %v12209_v16 = vrot.slane %v12117_v2, %v11675_v50  ;;  %v10483_v2 = vld [vmem:[%s11595_s8 + $0x710] ss:$8 sps:$4 sm:$0xff]   ;;  %v10491_v13 = vld [vmem:[%s11595_s8 + $0x724] ss:$8 sps:$4 sm:$0xff]  }
 0x1d5   : > { %7168 = vmatpush1.bf16.msra.mxu1 %v10391_v19  ;;  %v10476_v19 = vld [vmem:[%s11595_s8 + $0x700] ss:$8 sps:$4 sm:$0xff]  }
 0x1d6   : > { %7824 = vmatpush1.bf16.msra.mxu0 %v10394_v20  ;;  %7169 = vmatprep.subr.bf16.mxu1 %v10399_v21  ;;  %v10480_v20 = vld [vmem:[%s11595_s8 + $0x1700] ss:$8 sps:$4 sm:$0xff]   ;;  %v10485_v21 = vld [vmem:[%s11595_s8 + $0x714] ss:$8 sps:$4 sm:$0xff]  }
 0x1d7   : > { %7825 = vmatprep.subr.bf16.mxu0 %v10402_v22  ;;  %v10488_v22 = vld [vmem:[%s11595_s8 + $0x1714] ss:$8 sps:$4 sm:$0xff]  }
 0x1d9   : > { %7170 = vmatpush1.bf16.msra.mxu1 %v10397_v23  ;;  %v1634_v23 = vcombine.high %v12139_v59, %v12139_v59  ;;  %v10489_v59 = vld [vmem:[%s11595_s8 + $0x720] ss:$8 sps:$4 sm:$0xff]  }
 0x1da   : > { %7826 = vmatpush1.bf16.msra.mxu0 %v10400_v24  ;;  %7171 = vmatprep.subr.bf16.mxu1 %v10405_v53  ;;  %v10486_v24 = vld [vmem:[%s11595_s8 + $0x1710] ss:$8 sps:$4 sm:$0xff]   ;;  %v10494_v53 = vld [vmem:[%s11595_s8 + $0x1724] ss:$8 sps:$4 sm:$0xff]  }
 0x1db   : > { %7827 = vmatprep.subr.bf16.mxu0 %v10408_v57  ;;  %v10492_v57 = vld [vmem:[%s11595_s8 + $0x1720] ss:$8 sps:$4 sm:$0xff]  }
 0x1dd   : > { %7172 = vmatpush1.bf16.msra.mxu1 %v10403_v27  ;;  %v10497_v27 = vld [vmem:[%s11595_s8 + $0x734] ss:$8 sps:$4 sm:$0xff]  }
 0x1de   : > { %7828 = vmatpush1.bf16.msra.mxu0 %v10406_v28  ;;  %7173 = vmatprep.subr.bf16.mxu1 %v10411_v29  ;;  %v10500_v28 = vld [vmem:[%s11595_s8 + $0x1734] ss:$8 sps:$4 sm:$0xff]   ;;  %v10495_v29 = vld [vmem:[%s11595_s8 + $0x730] ss:$8 sps:$4 sm:$0xff]  }
 0x1df   : > { %7829 = vmatprep.subr.bf16.mxu0 %v10414_v30  ;;  %v10498_v30 = vld [vmem:[%s11595_s8 + $0x1730] ss:$8 sps:$4 sm:$0xff]  }
 0x1e1   : > { %7174 = vmatpush1.bf16.msra.mxu1 %v10409_v31  ;;  %v10503_v31 = vld [vmem:[%s11595_s8 + $0x744] ss:$8 sps:$4 sm:$0xff]  }
 0x1e2   : > { %7830 = vmatpush1.bf16.msra.mxu0 %v10412_v32  ;;  %7175 = vmatprep.subr.bf16.mxu1 %v10417_v33  ;;  %v10506_v32 = vld [vmem:[%s11595_s8 + $0x1744] ss:$8 sps:$4 sm:$0xff]   ;;  %v10501_v33 = vld [vmem:[%s11595_s8 + $0x740] ss:$8 sps:$4 sm:$0xff]  }
 0x1e3   : > { %7831 = vmatprep.subr.bf16.mxu0 %v10420_v34  ;;  %v10504_v34 = vld [vmem:[%s11595_s8 + $0x1740] ss:$8 sps:$4 sm:$0xff]  }
 0x1e5   : > { %7176 = vmatpush1.bf16.msra.mxu1 %v10415_v35  ;;  %v10509_v35 = vld [vmem:[%s11595_s8 + $0x754] ss:$8 sps:$4 sm:$0xff]  }
 0x1e6   : > { %7832 = vmatpush1.bf16.msra.mxu0 %v10418_v36  ;;  %7177 = vmatprep.subr.bf16.mxu1 %v10423_v18  ;;  %v10512_v36 = vld [vmem:[%s11595_s8 + $0x1754] ss:$8 sps:$4 sm:$0xff]   ;;  %v10507_v18 = vld [vmem:[%s11595_s8 + $0x750] ss:$8 sps:$4 sm:$0xff]  }
 0x1e7   : > { %7833 = vmatprep.subr.bf16.mxu0 %v10426_v38  ;;  %v10510_v38 = vld [vmem:[%s11595_s8 + $0x1750] ss:$8 sps:$4 sm:$0xff]  }
 0x1e9   : > { %7178 = vmatpush1.bf16.msra.mxu1 %v10421_v43  ;;  %v10515_v43 = vld [vmem:[%s11595_s8 + $0x764] ss:$8 sps:$4 sm:$0xff]  }
 0x1ea   : > { %7834 = vmatpush1.bf16.msra.mxu0 %v10424_v45  ;;  %7179 = vmatprep.subr.bf16.mxu1 %v10429_v25  ;;  %v10518_v45 = vld [vmem:[%s11595_s8 + $0x1764] ss:$8 sps:$4 sm:$0xff]   ;;  %v10513_v25 = vld [vmem:[%s11595_s8 + $0x760] ss:$8 sps:$4 sm:$0xff]  }
 0x1eb   : > { %7835 = vmatprep.subr.bf16.mxu0 %v10432_v46  ;;  %v10516_v46 = vld [vmem:[%s11595_s8 + $0x1760] ss:$8 sps:$4 sm:$0xff]  }
 0x1ed   : > { %7180 = vmatpush1.bf16.msra.mxu1 %v10427_v26  ;;  %v10521_v26 = vld [vmem:[%s11595_s8 + $0x774] ss:$8 sps:$4 sm:$0xff]  }
 0x1ee   : > { %7836 = vmatpush1.bf16.msra.mxu0 %v10430_v47  ;;  %7181 = vmatprep.subr.bf16.mxu1 %v10435_v37  ;;  %v10524_v47 = vld [vmem:[%s11595_s8 + $0x1774] ss:$8 sps:$4 sm:$0xff]   ;;  %v10519_v37 = vld [vmem:[%s11595_s8 + $0x770] ss:$8 sps:$4 sm:$0xff]  }
 0x1ef   : > { %7837 = vmatprep.subr.bf16.mxu0 %v10438_v48  ;;  %v10522_v48 = vld [vmem:[%s11595_s8 + $0x1770] ss:$8 sps:$4 sm:$0xff]  }
 0x1f1   : > { %7182 = vmatpush1.bf16.msra.mxu1 %v10433_v17  ;;  %v10527_v17 = vld [vmem:[%s11595_s8 + $0x784] ss:$8 sps:$4 sm:$0xff]  }
 0x1f2   : > { %7838 = vmatpush1.bf16.msra.mxu0 %v10436_v49  ;;  %7183 = vmatprep.subr.bf16.mxu1 %v10441_v51  ;;  %v10530_v49 = vld [vmem:[%s11595_s8 + $0x1784] ss:$8 sps:$4 sm:$0xff]   ;;  %v10525_v51 = vld [vmem:[%s11595_s8 + $0x780] ss:$8 sps:$4 sm:$0xff]  }
 0x1f3   : > { %7839 = vmatprep.subr.bf16.mxu0 %v10444_v52  ;;  %v10528_v52 = vld [vmem:[%s11595_s8 + $0x1780] ss:$8 sps:$4 sm:$0xff]  }
 0x1f5   : > { %7184 = vmatpush1.bf16.msra.mxu1 %v10439_v54  ;;  %v10533_v54 = vld [vmem:[%s11595_s8 + $0x794] ss:$8 sps:$4 sm:$0xff]  }
 0x1f6   : > { %7840 = vmatpush1.bf16.msra.mxu0 %v10442_v55  ;;  %7185 = vmatprep.subr.bf16.mxu1 %v10447_v39  ;;  %v10536_v55 = vld [vmem:[%s11595_s8 + $0x1794] ss:$8 sps:$4 sm:$0xff]   ;;  %v10531_v39 = vld [vmem:[%s11595_s8 + $0x790] ss:$8 sps:$4 sm:$0xff]  }
 0x1f7   : > { %7841 = vmatprep.subr.bf16.mxu0 %v10450_v40  ;;  %v10534_v40 = vld [vmem:[%s11595_s8 + $0x1790] ss:$8 sps:$4 sm:$0xff]  }
 0x1f9   : > { %7186 = vmatpush1.bf16.msra.mxu1 %v10445_v61  ;;  %v10539_v61 = vld [vmem:[%s11595_s8 + $0x7a4] ss:$8 sps:$4 sm:$0xff]  }
 0x1fa   : > { %7842 = vmatpush1.bf16.msra.mxu0 %v10448_v62  ;;  %7187 = vmatprep.subr.bf16.mxu1 %v10453_v63  ;;  %v10542_v62 = vld [vmem:[%s11595_s8 + $0x17a4] ss:$8 sps:$4 sm:$0xff]   ;;  %v10537_v63 = vld [vmem:[%s11595_s8 + $0x7a0] ss:$8 sps:$4 sm:$0xff]  }
 0x1fb   : > { %7843 = vmatprep.subr.bf16.mxu0 %v10456_v0  ;;  %v10540_v0 = vld [vmem:[%s11595_s8 + $0x17a0] ss:$8 sps:$4 sm:$0xff]  }
 0x1fd   : > { %7188 = vmatpush1.bf16.msra.mxu1 %v10451_v41  ;;  %v10545_v41 = vld [vmem:[%s11595_s8 + $0x7b4] ss:$8 sps:$4 sm:$0xff]  }
 0x1fe   : > { %7844 = vmatpush1.bf16.msra.mxu0 %v10454_v1  ;;  %7189 = vmatprep.subr.bf16.mxu1 %v10459_v56  ;;  %v10548_v1 = vld [vmem:[%s11595_s8 + $0x17b4] ss:$8 sps:$4 sm:$0xff]   ;;  %v10543_v56 = vld [vmem:[%s11595_s8 + $0x7b0] ss:$8 sps:$4 sm:$0xff]  }
 0x1ff   : > { %7845 = vmatprep.subr.bf16.mxu0 %v10462_v3  ;;  %v10546_v3 = vld [vmem:[%s11595_s8 + $0x17b0] ss:$8 sps:$4 sm:$0xff]  }
 0x201   : > { %7190 = vmatpush1.bf16.msra.mxu1 %v10457_v58  ;;  %v10551_v58 = vld [vmem:[%s11595_s8 + $0x7c4] ss:$8 sps:$4 sm:$0xff]  }
 0x202   : > { %7846 = vmatpush1.bf16.msra.mxu0 %v10460_v4  ;;  %7191 = vmatprep.subr.bf16.mxu1 %v10465_v5  ;;  %v10554_v4 = vld [vmem:[%s11595_s8 + $0x17c4] ss:$8 sps:$4 sm:$0xff]   ;;  %v10549_v5 = vld [vmem:[%s11595_s8 + $0x7c0] ss:$8 sps:$4 sm:$0xff]  }
 0x203   : > { %7847 = vmatprep.subr.bf16.mxu0 %v10468_v6  ;;  %v10552_v6 = vld [vmem:[%s11595_s8 + $0x17c0] ss:$8 sps:$4 sm:$0xff]  }
 0x205   : > { %7192 = vmatpush1.bf16.msra.mxu1 %v10463_v7  ;;  %v10557_v7 = vld [vmem:[%s11595_s8 + $0x7d4] ss:$8 sps:$4 sm:$0xff]  }
 0x206   : > { %7848 = vmatpush1.bf16.msra.mxu0 %v10466_v8  ;;  %7193 = vmatprep.subr.bf16.mxu1 %v10471_v9  ;;  %v10560_v8 = vld [vmem:[%s11595_s8 + $0x17d4] ss:$8 sps:$4 sm:$0xff]   ;;  %v10555_v9 = vld [vmem:[%s11595_s8 + $0x7d0] ss:$8 sps:$4 sm:$0xff]  }
 0x207   : > { %7849 = vmatprep.subr.bf16.mxu0 %v10474_v10  ;;  %v10558_v10 = vld [vmem:[%s11595_s8 + $0x17d0] ss:$8 sps:$4 sm:$0xff]  }
 0x209   : > { %7194 = vmatpush1.bf16.msra.mxu1 %v10469_v11  ;;  %v10563_v11 = vld [vmem:[%s11595_s8 + $0x7e4] ss:$8 sps:$4 sm:$0xff]  }
 0x20a   : > { %7850 = vmatpush1.bf16.msra.mxu0 %v10472_v12  ;;  %7204 = vmatprep.subr.bf16.mxu1 %v10478_v60  ;;  %v10566_v12 = vld [vmem:[%s11595_s8 + $0x17e4] ss:$8 sps:$4 sm:$0xff]  }
 0x20b   : > { %7860 = vmatprep.subr.bf16.mxu0 %v10482_v14  ;;  %v12274_v60 = vld [vmem:[%s11610_s29 + $0x10] sm:$0xff] }
 0x20c   : > { %7196 = vmatmul.mubr.bf16.vlgmr.msra.gmra.mrb[0].mxu1 %v12205_v15  ;;  %v12277_v14 = vld [vmem:[%s11610_s29 + $0x30] sm:$0xff] }
 0x20d   : > { %7852 = vmatmul.mubr.bf16.vlgmr.msra.gmra.mrb[0].mxu0 %v12209_v16  ;;  %7205 = vmatpush1.bf16.msra.mxu1 %v10476_v19  ;;  %v10561_v19 = vld [vmem:[%s11595_s8 + $0x7e0] ss:$8 sps:$4 sm:$0xff]  }
 0x20e   : > { %7861 = vmatpush1.bf16.msra.mxu0 %v10480_v20  ;;  %7206 = vmatprep.subr.bf16.mxu1 %v10485_v21  ;;  %v10564_v20 = vld [vmem:[%s11595_s8 + $0x17e0] ss:$8 sps:$4 sm:$0xff]   ;;  %v10569_v21 = vld [vmem:[%s11595_s8 + $0x7f4] ss:$8 sps:$4 sm:$0xff]  }
 0x20f   : > { %7862 = vmatprep.subr.bf16.mxu0 %v10488_v22  ;;  %7236 = vmatprep.mubr.bf16.mxu1 %v1438_v42  ;;  %v10572_v22 = vld [vmem:[%s11595_s8 + $0x17f4] ss:$8 sps:$4 sm:$0xff]   ;;  %v12285_v42 = vrot.slane %v12274_v60, %v11675_v50 }
 0x210   : > { %7892 = vmatprep.mubr.bf16.mxu0 %v1634_v23  ;;  %v12289_v23 = vrot.slane %v12277_v14, %v11675_v50 }
 0x211   : > { %7207 = vmatpush1.bf16.msra.mxu1 %v10483_v2  ;;  %v10567_v2 = vld [vmem:[%s11595_s8 + $0x7f0] ss:$8 sps:$4 sm:$0xff]  }
 0x212   : > { %7863 = vmatpush1.bf16.msra.mxu0 %v10486_v24  ;;  %7208 = vmatprep.subr.bf16.mxu1 %v10491_v13  ;;  %v10570_v24 = vld [vmem:[%s11595_s8 + $0x17f0] ss:$8 sps:$4 sm:$0xff]   ;;  %v10575_v13 = vld [vmem:[%s11595_s8 + $0x804] ss:$8 sps:$4 sm:$0xff]  }
 0x213   : > { %7864 = vmatprep.subr.bf16.mxu0 %v10494_v53  ;;  %v10578_v53 = vld [vmem:[%s11595_s8 + $0x1804] ss:$8 sps:$4 sm:$0xff]  }
 0x215   : > { %7209 = vmatpush1.bf16.msra.mxu1 %v10489_v59  ;;  %v1454_v59 = vcombine.high %v12285_v42, %v12285_v42 }
 0x216   : > { %7865 = vmatpush1.bf16.msra.mxu0 %v10492_v57  ;;  %7210 = vmatprep.subr.bf16.mxu1 %v10497_v27  ;;  %v1650_v57 = vcombine.high %v12289_v23, %v12289_v23  ;;  %v1436_v27 = vcombine.high %v12205_v15, %v12205_v15 }
 0x217   : > { %7866 = vmatprep.subr.bf16.mxu0 %v10500_v28  ;;  %v1632_v28 = vcombine.high %v12209_v16, %v12209_v16  ;;  %v10579_v16 = vld [vmem:[%s11595_s8 + $0x810] ss:$8 sps:$4 sm:$0xff]  }
 0x218   : > { %v12311_v15 = vrot.slane %v1650_v57, %v11675_v50  ;;  %v10654_v57 = vld [vmem:[%s11595_s8 + $0x18d0] ss:$8 sps:$4 sm:$0xff]  }
 0x219   : > { %7211 = vmatpush1.bf16.msra.mxu1 %v10495_v29  ;;  %v10573_v29 = vld [vmem:[%s11595_s8 + $0x800] ss:$8 sps:$4 sm:$0xff]  }
 0x21a   : > { %7867 = vmatpush1.bf16.msra.mxu0 %v10498_v30  ;;  %7212 = vmatprep.subr.bf16.mxu1 %v10503_v31  ;;  %v10576_v30 = vld [vmem:[%s11595_s8 + $0x1800] ss:$8 sps:$4 sm:$0xff]   ;;  %v10581_v31 = vld [vmem:[%s11595_s8 + $0x814] ss:$8 sps:$4 sm:$0xff]  }
 0x21b   : > { %7868 = vmatprep.subr.bf16.mxu0 %v10506_v32  ;;  %v10584_v32 = vld [vmem:[%s11595_s8 + $0x1814] ss:$8 sps:$4 sm:$0xff]  }
 0x21d   : > { %7213 = vmatpush1.bf16.msra.mxu1 %v10501_v33  ;;  %v12308_v33 = vrot.slane %v1454_v59, %v11675_v50  ;;  %v10651_v59 = vld [vmem:[%s11595_s8 + $0x8d0] ss:$8 sps:$4 sm:$0xff]  }
 0x21e   : > { %7869 = vmatpush1.bf16.msra.mxu0 %v10504_v34  ;;  %7214 = vmatprep.subr.bf16.mxu1 %v10509_v35  ;;  %v10582_v34 = vld [vmem:[%s11595_s8 + $0x1810] ss:$8 sps:$4 sm:$0xff]   ;;  %v10587_v35 = vld [vmem:[%s11595_s8 + $0x824] ss:$8 sps:$4 sm:$0xff]  }
 0x21f   : > { %7870 = vmatprep.subr.bf16.mxu0 %v10512_v36  ;;  %v10590_v36 = vld [vmem:[%s11595_s8 + $0x1824] ss:$8 sps:$4 sm:$0xff]  }
 0x221   : > { %7215 = vmatpush1.bf16.msra.mxu1 %v10507_v18  ;;  %v10585_v18 = vld [vmem:[%s11595_s8 + $0x820] ss:$8 sps:$4 sm:$0xff]  }
 0x222   : > { %7871 = vmatpush1.bf16.msra.mxu0 %v10510_v38  ;;  %7216 = vmatprep.subr.bf16.mxu1 %v10515_v43  ;;  %v10588_v38 = vld [vmem:[%s11595_s8 + $0x1820] ss:$8 sps:$4 sm:$0xff]   ;;  %v10593_v43 = vld [vmem:[%s11595_s8 + $0x834] ss:$8 sps:$4 sm:$0xff]  }
 0x223   : > { %7872 = vmatprep.subr.bf16.mxu0 %v10518_v45  ;;  %v10596_v45 = vld [vmem:[%s11595_s8 + $0x1834] ss:$8 sps:$4 sm:$0xff]  }
 0x225   : > { %7217 = vmatpush1.bf16.msra.mxu1 %v10513_v25  ;;  %v10591_v25 = vld [vmem:[%s11595_s8 + $0x830] ss:$8 sps:$4 sm:$0xff]  }
 0x226   : > { %7873 = vmatpush1.bf16.msra.mxu0 %v10516_v46  ;;  %7218 = vmatprep.subr.bf16.mxu1 %v10521_v26  ;;  %v10594_v46 = vld [vmem:[%s11595_s8 + $0x1830] ss:$8 sps:$4 sm:$0xff]   ;;  %v10599_v26 = vld [vmem:[%s11595_s8 + $0x844] ss:$8 sps:$4 sm:$0xff]  }
 0x227   : > { %7874 = vmatprep.subr.bf16.mxu0 %v10524_v47  ;;  %v10602_v47 = vld [vmem:[%s11595_s8 + $0x1844] ss:$8 sps:$4 sm:$0xff]  }
 0x229   : > { %7219 = vmatpush1.bf16.msra.mxu1 %v10519_v37  ;;  %v10597_v37 = vld [vmem:[%s11595_s8 + $0x840] ss:$8 sps:$4 sm:$0xff]  }
 0x22a   : > { %7875 = vmatpush1.bf16.msra.mxu0 %v10522_v48  ;;  %7220 = vmatprep.subr.bf16.mxu1 %v10527_v17  ;;  %v10600_v48 = vld [vmem:[%s11595_s8 + $0x1840] ss:$8 sps:$4 sm:$0xff]   ;;  %v10605_v17 = vld [vmem:[%s11595_s8 + $0x854] ss:$8 sps:$4 sm:$0xff]  }
 0x22b   : > { %7876 = vmatprep.subr.bf16.mxu0 %v10530_v49  ;;  %v10608_v49 = vld [vmem:[%s11595_s8 + $0x1854] ss:$8 sps:$4 sm:$0xff]  }
 0x22d   : > { %7221 = vmatpush1.bf16.msra.mxu1 %v10525_v51  ;;  %v10603_v51 = vld [vmem:[%s11595_s8 + $0x850] ss:$8 sps:$4 sm:$0xff]  }
 0x22e   : > { %7877 = vmatpush1.bf16.msra.mxu0 %v10528_v52  ;;  %7222 = vmatprep.subr.bf16.mxu1 %v10533_v54  ;;  %v10606_v52 = vld [vmem:[%s11595_s8 + $0x1850] ss:$8 sps:$4 sm:$0xff]   ;;  %v10611_v54 = vld [vmem:[%s11595_s8 + $0x864] ss:$8 sps:$4 sm:$0xff]  }
 0x22f   : > { %7878 = vmatprep.subr.bf16.mxu0 %v10536_v55  ;;  %v10614_v55 = vld [vmem:[%s11595_s8 + $0x1864] ss:$8 sps:$4 sm:$0xff]  }
 0x231   : > { %7223 = vmatpush1.bf16.msra.mxu1 %v10531_v39  ;;  %v10609_v39 = vld [vmem:[%s11595_s8 + $0x860] ss:$8 sps:$4 sm:$0xff]  }
 0x232   : > { %7879 = vmatpush1.bf16.msra.mxu0 %v10534_v40  ;;  %7224 = vmatprep.subr.bf16.mxu1 %v10539_v61  ;;  %v10612_v40 = vld [vmem:[%s11595_s8 + $0x1860] ss:$8 sps:$4 sm:$0xff]   ;;  %v10617_v61 = vld [vmem:[%s11595_s8 + $0x874] ss:$8 sps:$4 sm:$0xff]  }
 0x233   : > { %7880 = vmatprep.subr.bf16.mxu0 %v10542_v62  ;;  %v10620_v62 = vld [vmem:[%s11595_s8 + $0x1874] ss:$8 sps:$4 sm:$0xff]  }
 0x235   : > { %7225 = vmatpush1.bf16.msra.mxu1 %v10537_v63  ;;  %v10615_v63 = vld [vmem:[%s11595_s8 + $0x870] ss:$8 sps:$4 sm:$0xff]  }
 0x236   : > { %7881 = vmatpush1.bf16.msra.mxu0 %v10540_v0  ;;  %7226 = vmatprep.subr.bf16.mxu1 %v10545_v41  ;;  %v10618_v0 = vld [vmem:[%s11595_s8 + $0x1870] ss:$8 sps:$4 sm:$0xff]   ;;  %v10623_v41 = vld [vmem:[%s11595_s8 + $0x884] ss:$8 sps:$4 sm:$0xff]  }
 0x237   : > { %7882 = vmatprep.subr.bf16.mxu0 %v10548_v1  ;;  %v10626_v1 = vld [vmem:[%s11595_s8 + $0x1884] ss:$8 sps:$4 sm:$0xff]  }
 0x239   : > { %7227 = vmatpush1.bf16.msra.mxu1 %v10543_v56  ;;  %v10621_v56 = vld [vmem:[%s11595_s8 + $0x880] ss:$8 sps:$4 sm:$0xff]  }
 0x23a   : > { %7883 = vmatpush1.bf16.msra.mxu0 %v10546_v3  ;;  %7228 = vmatprep.subr.bf16.mxu1 %v10551_v58  ;;  %v10624_v3 = vld [vmem:[%s11595_s8 + $0x1880] ss:$8 sps:$4 sm:$0xff]   ;;  %v10629_v58 = vld [vmem:[%s11595_s8 + $0x894] ss:$8 sps:$4 sm:$0xff]  }
 0x23b   : > { %7884 = vmatprep.subr.bf16.mxu0 %v10554_v4  ;;  %v10632_v4 = vld [vmem:[%s11595_s8 + $0x1894] ss:$8 sps:$4 sm:$0xff]  }
 0x23d   : > { %7229 = vmatpush1.bf16.msra.mxu1 %v10549_v5  ;;  %v10627_v5 = vld [vmem:[%s11595_s8 + $0x890] ss:$8 sps:$4 sm:$0xff]  }
 0x23e   : > { %7885 = vmatpush1.bf16.msra.mxu0 %v10552_v6  ;;  %7230 = vmatprep.subr.bf16.mxu1 %v10557_v7  ;;  %v10630_v6 = vld [vmem:[%s11595_s8 + $0x1890] ss:$8 sps:$4 sm:$0xff]   ;;  %v10635_v7 = vld [vmem:[%s11595_s8 + $0x8a4] ss:$8 sps:$4 sm:$0xff]  }
 0x23f   : > { %7886 = vmatprep.subr.bf16.mxu0 %v10560_v8  ;;  %v10638_v8 = vld [vmem:[%s11595_s8 + $0x18a4] ss:$8 sps:$4 sm:$0xff]  }
 0x241   : > { %7231 = vmatpush1.bf16.msra.mxu1 %v10555_v9  ;;  %v10633_v9 = vld [vmem:[%s11595_s8 + $0x8a0] ss:$8 sps:$4 sm:$0xff]  }
 0x242   : > { %7887 = vmatpush1.bf16.msra.mxu0 %v10558_v10  ;;  %7232 = vmatprep.subr.bf16.mxu1 %v10563_v11  ;;  %v10636_v10 = vld [vmem:[%s11595_s8 + $0x18a0] ss:$8 sps:$4 sm:$0xff]   ;;  %v10641_v11 = vld [vmem:[%s11595_s8 + $0x8b4] ss:$8 sps:$4 sm:$0xff]  }
 0x243   : > { %7888 = vmatprep.subr.bf16.mxu0 %v10566_v12  ;;  %v10644_v12 = vld [vmem:[%s11595_s8 + $0x18b4] ss:$8 sps:$4 sm:$0xff]  }
 0x245   : > { %7233 = vmatpush1.bf16.msra.mxu1 %v10561_v19  ;;  %v10639_v19 = vld [vmem:[%s11595_s8 + $0x8b0] ss:$8 sps:$4 sm:$0xff]  }
 0x246   : > { %7889 = vmatpush1.bf16.msra.mxu0 %v10564_v20  ;;  %7234 = vmatprep.subr.bf16.mxu1 %v10569_v21  ;;  %v10642_v20 = vld [vmem:[%s11595_s8 + $0x18b0] ss:$8 sps:$4 sm:$0xff]   ;;  %v10647_v21 = vld [vmem:[%s11595_s8 + $0x8c4] ss:$8 sps:$4 sm:$0xff]  }
 0x247   : > { %7890 = vmatprep.subr.bf16.mxu0 %v10572_v22  ;;  %v10650_v22 = vld [vmem:[%s11595_s8 + $0x18c4] ss:$8 sps:$4 sm:$0xff]  }
 0x249   : > { %7235 = vmatpush1.bf16.msra.mxu1 %v10567_v2  ;;  %v10645_v2 = vld [vmem:[%s11595_s8 + $0x8c0] ss:$8 sps:$4 sm:$0xff]  }
 0x24a   : > { %7891 = vmatpush1.bf16.msra.mxu0 %v10570_v24  ;;  %7245 = vmatprep.subr.bf16.mxu1 %v10575_v13  ;;  %v10648_v24 = vld [vmem:[%s11595_s8 + $0x18c0] ss:$8 sps:$4 sm:$0xff]   ;;  %v10653_v13 = vld [vmem:[%s11595_s8 + $0x8d4] ss:$8 sps:$4 sm:$0xff]  }
 0x24b   : > { %7901 = vmatprep.subr.bf16.mxu0 %v10578_v53  ;;  %v10656_v53 = vld [vmem:[%s11595_s8 + $0x18d4] ss:$8 sps:$4 sm:$0xff]  }
 0x24c   : > { %7237 = vmatmul.mubr.bf16.vlgmr.msra.gmra.mrb[0].mxu1 %v1436_v27  ;;  %v10659_v27 = vld [vmem:[%s11595_s8 + $0x8e4] ss:$8 sps:$4 sm:$0xff]  }
 0x24d   : > { %7893 = vmatmul.mubr.bf16.vlgmr.msra.gmra.mrb[0].mxu0 %v1632_v28  ;;  %7246 = vmatpush1.bf16.msra.mxu1 %v10573_v29  ;;  %v10662_v28 = vld [vmem:[%s11595_s8 + $0x18e4] ss:$8 sps:$4 sm:$0xff]   ;;  %v10657_v29 = vld [vmem:[%s11595_s8 + $0x8e0] ss:$8 sps:$4 sm:$0xff]  }
 0x24e   : > { %7902 = vmatpush1.bf16.msra.mxu0 %v10576_v30  ;;  %7247 = vmatprep.subr.bf16.mxu1 %v10581_v31  ;;  %v10660_v30 = vld [vmem:[%s11595_s8 + $0x18e0] ss:$8 sps:$4 sm:$0xff]   ;;  %v10665_v31 = vld [vmem:[%s11595_s8 + $0x8f4] ss:$8 sps:$4 sm:$0xff]  }
 0x24f   : > { %7903 = vmatprep.subr.bf16.mxu0 %v10584_v32  ;;  %7277 = vmatprep.mubr.bf16.mxu1 %v12308_v33  ;;  %v10668_v32 = vld [vmem:[%s11595_s8 + $0x18f4] ss:$8 sps:$4 sm:$0xff]  }
 0x250   : > { %7933 = vmatprep.mubr.bf16.mxu0 %v12311_v15 }
 0x251   : > { %7248 = vmatpush1.bf16.msra.mxu1 %v10579_v16  ;;  %v10663_v16 = vld [vmem:[%s11595_s8 + $0x8f0] ss:$8 sps:$4 sm:$0xff]  }
 0x252   : > { %7904 = vmatpush1.bf16.msra.mxu0 %v10582_v34  ;;  %7249 = vmatprep.subr.bf16.mxu1 %v10587_v35  ;;  %v10666_v34 = vld [vmem:[%s11595_s8 + $0x18f0] ss:$8 sps:$4 sm:$0xff]   ;;  %v10671_v35 = vld [vmem:[%s11595_s8 + $0x904] ss:$8 sps:$4 sm:$0xff]  }
 0x253   : > { %7905 = vmatprep.subr.bf16.mxu0 %v10590_v36  ;;  %v10674_v36 = vld [vmem:[%s11595_s8 + $0x1904] ss:$8 sps:$4 sm:$0xff]  }
 0x255   : > { %7250 = vmatpush1.bf16.msra.mxu1 %v10585_v18  ;;  %v12377_v18 = vrot.slane %v12285_v42, %v11675_v50  ;;  %v1486_v42 = vcombine.high %v12308_v33, %v12308_v33  ;;  %v10683_v33 = vld [vmem:[%s11595_s8 + $0x924] ss:$8 sps:$4 sm:$0xff]  }
 0x256   : > { %7906 = vmatpush1.bf16.msra.mxu0 %v10588_v38  ;;  %7251 = vmatprep.subr.bf16.mxu1 %v10593_v43  ;;  %v12381_v38 = vrot.slane %v12289_v23, %v11675_v50  ;;  %v10669_v43 = vld [vmem:[%s11595_s8 + $0x900] ss:$8 sps:$4 sm:$0xff]   ;;  %v10675_v23 = vld [vmem:[%s11595_s8 + $0x910] ss:$8 sps:$4 sm:$0xff]  }
 0x257   : > { %7907 = vmatprep.subr.bf16.mxu0 %v10596_v45  ;;  %v10672_v45 = vld [vmem:[%s11595_s8 + $0x1900] ss:$8 sps:$4 sm:$0xff]  }
 0x259   : > { %7252 = vmatpush1.bf16.msra.mxu1 %v10591_v25  ;;  %v10677_v25 = vld [vmem:[%s11595_s8 + $0x914] ss:$8 sps:$4 sm:$0xff]  }
 0x25a   : > { %7908 = vmatpush1.bf16.msra.mxu0 %v10594_v46  ;;  %7253 = vmatprep.subr.bf16.mxu1 %v10599_v26  ;;  %v10680_v46 = vld [vmem:[%s11595_s8 + $0x1914] ss:$8 sps:$4 sm:$0xff]   ;;  %v1682_v26 = vcombine.high %v12311_v15, %v12311_v15  ;;  %v10681_v15 = vld [vmem:[%s11595_s8 + $0x920] ss:$8 sps:$4 sm:$0xff]  }
 0x25b   : > { %7909 = vmatprep.subr.bf16.mxu0 %v10602_v47  ;;  %v10678_v47 = vld [vmem:[%s11595_s8 + $0x1910] ss:$8 sps:$4 sm:$0xff]  }
 0x25d   : > { %7254 = vmatpush1.bf16.msra.mxu1 %v10597_v37  ;;  %v10686_v37 = vld [vmem:[%s11595_s8 + $0x1924] ss:$8 sps:$4 sm:$0xff]  }
 0x25e   : > { %7910 = vmatpush1.bf16.msra.mxu0 %v10600_v48  ;;  %7255 = vmatprep.subr.bf16.mxu1 %v10605_v17  ;;  %v10684_v48 = vld [vmem:[%s11595_s8 + $0x1920] ss:$8 sps:$4 sm:$0xff]   ;;  %v10689_v17 = vld [vmem:[%s11595_s8 + $0x934] ss:$8 sps:$4 sm:$0xff]  }
 0x25f   : > { %7911 = vmatprep.subr.bf16.mxu0 %v10608_v49  ;;  %v10692_v49 = vld [vmem:[%s11595_s8 + $0x1934] ss:$8 sps:$4 sm:$0xff]  }
 0x261   : > { %7256 = vmatpush1.bf16.msra.mxu1 %v10603_v51  ;;  %v10687_v51 = vld [vmem:[%s11595_s8 + $0x930] ss:$8 sps:$4 sm:$0xff]  }
 0x262   : > { %7912 = vmatpush1.bf16.msra.mxu0 %v10606_v52  ;;  %7257 = vmatprep.subr.bf16.mxu1 %v10611_v54  ;;  %v10690_v52 = vld [vmem:[%s11595_s8 + $0x1930] ss:$8 sps:$4 sm:$0xff]   ;;  %v10695_v54 = vld [vmem:[%s11595_s8 + $0x944] ss:$8 sps:$4 sm:$0xff]  }
 0x263   : > { %7913 = vmatprep.subr.bf16.mxu0 %v10614_v55  ;;  %v10698_v55 = vld [vmem:[%s11595_s8 + $0x1944] ss:$8 sps:$4 sm:$0xff]  }
 0x265   : > { %7258 = vmatpush1.bf16.msra.mxu1 %v10609_v39  ;;  %v10693_v39 = vld [vmem:[%s11595_s8 + $0x940] ss:$8 sps:$4 sm:$0xff]  }
 0x266   : > { %7914 = vmatpush1.bf16.msra.mxu0 %v10612_v40  ;;  %7259 = vmatprep.subr.bf16.mxu1 %v10617_v61  ;;  %v10696_v40 = vld [vmem:[%s11595_s8 + $0x1940] ss:$8 sps:$4 sm:$0xff]   ;;  %v10701_v61 = vld [vmem:[%s11595_s8 + $0x954] ss:$8 sps:$4 sm:$0xff]  }
 0x267   : > { %7915 = vmatprep.subr.bf16.mxu0 %v10620_v62  ;;  %v10704_v62 = vld [vmem:[%s11595_s8 + $0x1954] ss:$8 sps:$4 sm:$0xff]  }
 0x269   : > { %7260 = vmatpush1.bf16.msra.mxu1 %v10615_v63  ;;  %v10699_v63 = vld [vmem:[%s11595_s8 + $0x950] ss:$8 sps:$4 sm:$0xff]  }
 0x26a   : > { %7916 = vmatpush1.bf16.msra.mxu0 %v10618_v0  ;;  %7261 = vmatprep.subr.bf16.mxu1 %v10623_v41  ;;  %v10702_v0 = vld [vmem:[%s11595_s8 + $0x1950] ss:$8 sps:$4 sm:$0xff]   ;;  %v10707_v41 = vld [vmem:[%s11595_s8 + $0x964] ss:$8 sps:$4 sm:$0xff]  }
 0x26b   : > { %7917 = vmatprep.subr.bf16.mxu0 %v10626_v1  ;;  %v10710_v1 = vld [vmem:[%s11595_s8 + $0x1964] ss:$8 sps:$4 sm:$0xff]  }
 0x26d   : > { %7262 = vmatpush1.bf16.msra.mxu1 %v10621_v56  ;;  %v10705_v56 = vld [vmem:[%s11595_s8 + $0x960] ss:$8 sps:$4 sm:$0xff]  }
 0x26e   : > { %7918 = vmatpush1.bf16.msra.mxu0 %v10624_v3  ;;  %7263 = vmatprep.subr.bf16.mxu1 %v10629_v58  ;;  %v10708_v3 = vld [vmem:[%s11595_s8 + $0x1960] ss:$8 sps:$4 sm:$0xff]   ;;  %v10713_v58 = vld [vmem:[%s11595_s8 + $0x974] ss:$8 sps:$4 sm:$0xff]  }
 0x26f   : > { %7919 = vmatprep.subr.bf16.mxu0 %v10632_v4  ;;  %v10716_v4 = vld [vmem:[%s11595_s8 + $0x1974] ss:$8 sps:$4 sm:$0xff]  }
 0x271   : > { %7264 = vmatpush1.bf16.msra.mxu1 %v10627_v5  ;;  %v10711_v5 = vld [vmem:[%s11595_s8 + $0x970] ss:$8 sps:$4 sm:$0xff]  }
 0x272   : > { %7920 = vmatpush1.bf16.msra.mxu0 %v10630_v6  ;;  %7265 = vmatprep.subr.bf16.mxu1 %v10635_v7  ;;  %v10714_v6 = vld [vmem:[%s11595_s8 + $0x1970] ss:$8 sps:$4 sm:$0xff]   ;;  %v10719_v7 = vld [vmem:[%s11595_s8 + $0x984] ss:$8 sps:$4 sm:$0xff]  }
 0x273   : > { %7921 = vmatprep.subr.bf16.mxu0 %v10638_v8  ;;  %v10722_v8 = vld [vmem:[%s11595_s8 + $0x1984] ss:$8 sps:$4 sm:$0xff]  }
 0x275   : > { %7266 = vmatpush1.bf16.msra.mxu1 %v10633_v9  ;;  %v10717_v9 = vld [vmem:[%s11595_s8 + $0x980] ss:$8 sps:$4 sm:$0xff]  }
 0x276   : > { %7922 = vmatpush1.bf16.msra.mxu0 %v10636_v10  ;;  %7267 = vmatprep.subr.bf16.mxu1 %v10641_v11  ;;  %v10720_v10 = vld [vmem:[%s11595_s8 + $0x1980] ss:$8 sps:$4 sm:$0xff]   ;;  %v10725_v11 = vld [vmem:[%s11595_s8 + $0x994] ss:$8 sps:$4 sm:$0xff]  }
 0x277   : > { %7923 = vmatprep.subr.bf16.mxu0 %v10644_v12  ;;  %v10728_v12 = vld [vmem:[%s11595_s8 + $0x1994] ss:$8 sps:$4 sm:$0xff]  }
 0x279   : > { %7268 = vmatpush1.bf16.msra.mxu1 %v10639_v19  ;;  %v10723_v19 = vld [vmem:[%s11595_s8 + $0x990] ss:$8 sps:$4 sm:$0xff]  }
 0x27a   : > { %7924 = vmatpush1.bf16.msra.mxu0 %v10642_v20  ;;  %7269 = vmatprep.subr.bf16.mxu1 %v10647_v21  ;;  %v10726_v20 = vld [vmem:[%s11595_s8 + $0x1990] ss:$8 sps:$4 sm:$0xff]   ;;  %v10731_v21 = vld [vmem:[%s11595_s8 + $0x9a4] ss:$8 sps:$4 sm:$0xff]  }
 0x27b   : > { %7925 = vmatprep.subr.bf16.mxu0 %v10650_v22  ;;  %v10734_v22 = vld [vmem:[%s11595_s8 + $0x19a4] ss:$8 sps:$4 sm:$0xff]  }
 0x27d   : > { %7270 = vmatpush1.bf16.msra.mxu1 %v10645_v2  ;;  %v10729_v2 = vld [vmem:[%s11595_s8 + $0x9a0] ss:$8 sps:$4 sm:$0xff]  }
 0x27e   : > { %7926 = vmatpush1.bf16.msra.mxu0 %v10648_v24  ;;  %7271 = vmatprep.subr.bf16.mxu1 %v10653_v13  ;;  %v10732_v24 = vld [vmem:[%s11595_s8 + $0x19a0] ss:$8 sps:$4 sm:$0xff]   ;;  %v10737_v13 = vld [vmem:[%s11595_s8 + $0x9b4] ss:$8 sps:$4 sm:$0xff]  }
 0x27f   : > { %7927 = vmatprep.subr.bf16.mxu0 %v10656_v53  ;;  %v10740_v53 = vld [vmem:[%s11595_s8 + $0x19b4] ss:$8 sps:$4 sm:$0xff]  }
 0x281   : > { %7272 = vmatpush1.bf16.msra.mxu1 %v10651_v59  ;;  %v10735_v59 = vld [vmem:[%s11595_s8 + $0x9b0] ss:$8 sps:$4 sm:$0xff]  }
 0x282   : > { %7928 = vmatpush1.bf16.msra.mxu0 %v10654_v57  ;;  %7273 = vmatprep.subr.bf16.mxu1 %v10659_v27  ;;  %v10738_v57 = vld [vmem:[%s11595_s8 + $0x19b0] ss:$8 sps:$4 sm:$0xff]   ;;  %v10743_v27 = vld [vmem:[%s11595_s8 + $0x9c4] ss:$8 sps:$4 sm:$0xff]  }
 0x283   : > { %7929 = vmatprep.subr.bf16.mxu0 %v10662_v28  ;;  %v10746_v28 = vld [vmem:[%s11595_s8 + $0x19c4] ss:$8 sps:$4 sm:$0xff]  }
 0x285   : > { %7274 = vmatpush1.bf16.msra.mxu1 %v10657_v29  ;;  %v10741_v29 = vld [vmem:[%s11595_s8 + $0x9c0] ss:$8 sps:$4 sm:$0xff]  }
 0x286   : > { %7930 = vmatpush1.bf16.msra.mxu0 %v10660_v30  ;;  %7275 = vmatprep.subr.bf16.mxu1 %v10665_v31  ;;  %v10744_v30 = vld [vmem:[%s11595_s8 + $0x19c0] ss:$8 sps:$4 sm:$0xff]   ;;  %v10749_v31 = vld [vmem:[%s11595_s8 + $0x9d4] ss:$8 sps:$4 sm:$0xff]  }
 0x287   : > { %7931 = vmatprep.subr.bf16.mxu0 %v10668_v32  ;;  %v10752_v32 = vld [vmem:[%s11595_s8 + $0x19d4] ss:$8 sps:$4 sm:$0xff]  }
 0x289   : > { %7276 = vmatpush1.bf16.msra.mxu1 %v10663_v16  ;;  %v10747_v16 = vld [vmem:[%s11595_s8 + $0x9d0] ss:$8 sps:$4 sm:$0xff]  }
 0x28a   : > { %7932 = vmatpush1.bf16.msra.mxu0 %v10666_v34  ;;  %7286 = vmatprep.subr.bf16.mxu1 %v10671_v35  ;;  %v10750_v34 = vld [vmem:[%s11595_s8 + $0x19d0] ss:$8 sps:$4 sm:$0xff]   ;;  %v10755_v35 = vld [vmem:[%s11595_s8 + $0x9e4] ss:$8 sps:$4 sm:$0xff]  }
 0x28b   : > { %7942 = vmatprep.subr.bf16.mxu0 %v10674_v36  ;;  %v10758_v36 = vld [vmem:[%s11595_s8 + $0x19e4] ss:$8 sps:$4 sm:$0xff]  }
 0x28c   : > { %7278 = vmatmul.mubr.bf16.vlgmr.msra.gmra.mrb[0].mxu1 %v12377_v18 }
 0x28d   : > { %7934 = vmatmul.mubr.bf16.vlgmr.msra.gmra.mrb[0].mxu0 %v12381_v38  ;;  %7287 = vmatpush1.bf16.msra.mxu1 %v10669_v43  ;;  %v1439_v43 = vcombine.high %v12274_v60, %v12274_v60  ;;  %v10759_v60 = vld [vmem:[%s11595_s8 + $0x9f0] ss:$8 sps:$4 sm:$0xff]  }
 0x28e   : > { %7943 = vmatpush1.bf16.msra.mxu0 %v10672_v45  ;;  %7288 = vmatprep.subr.bf16.mxu1 %v10677_v25  ;;  %v1635_v45 = vcombine.high %v12277_v14, %v12277_v14  ;;  %v10753_v25 = vld [vmem:[%s11595_s8 + $0x9e0] ss:$8 sps:$4 sm:$0xff]   ;;  %v10762_v14 = vld [vmem:[%s11595_s8 + $0x19f0] ss:$8 sps:$4 sm:$0xff]  }
 0x28f   : > { %7944 = vmatprep.subr.bf16.mxu0 %v10680_v46  ;;  %7318 = vmatprep.mubr.bf16.mxu1 %v1486_v42  ;;  %v10756_v46 = vld [vmem:[%s11595_s8 + $0x19e0] ss:$8 sps:$4 sm:$0xff]   ;;  %v10761_v42 = vld [vmem:[%s11595_s8 + $0x9f4] ss:$8 sps:$4 sm:$0xff]  }
 0x290   : > { %7974 = vmatprep.mubr.bf16.mxu0 %v1682_v26  ;;  %v10764_v26 = vld [vmem:[%s11595_s8 + $0x19f4] ss:$8 sps:$4 sm:$0xff]  }
 0x291   : > { %7289 = vmatpush1.bf16.msra.mxu1 %v10675_v23  ;;  %v12454_v23 = vrot.slane %v1439_v43, %v11675_v50  ;;  %v10831_v43 = vld [vmem:[%s11595_s8 + $0xab0] ss:$8 sps:$4 sm:$0xff]  }
 0x292   : > { %7945 = vmatpush1.bf16.msra.mxu0 %v10678_v47  ;;  %7290 = vmatprep.subr.bf16.mxu1 %v10683_v33  ;;  %v12457_v47 = vrot.slane %v1635_v45, %v11675_v50  ;;  %v10767_v33 = vld [vmem:[%s11595_s8 + $0xa04] ss:$8 sps:$4 sm:$0xff]   ;;  %v10834_v45 = vld [vmem:[%s11595_s8 + $0x1ab0] ss:$8 sps:$4 sm:$0xff]  }
 0x293   : > { %7946 = vmatprep.subr.bf16.mxu0 %v10686_v37  ;;  %v10770_v37 = vld [vmem:[%s11595_s8 + $0x1a04] ss:$8 sps:$4 sm:$0xff]  }
 0x295   : > { %7291 = vmatpush1.bf16.msra.mxu1 %v10681_v15  ;;  %v1455_v15 = vcombine.high %v12454_v23, %v12454_v23 }
 0x296   : > { %7947 = vmatpush1.bf16.msra.mxu0 %v10684_v48  ;;  %7292 = vmatprep.subr.bf16.mxu1 %v10689_v17  ;;  %v1651_v48 = vcombine.high %v12457_v47, %v12457_v47  ;;  %v1484_v17 = vcombine.high %v12377_v18, %v12377_v18 }
 0x297   : > { %7948 = vmatprep.subr.bf16.mxu0 %v10692_v49  ;;  %v1680_v49 = vcombine.high %v12381_v38, %v12381_v38  ;;  %v10771_v38 = vld [vmem:[%s11595_s8 + $0xa10] ss:$8 sps:$4 sm:$0xff]  }
 0x298   : > { %v12479_v18 = vrot.slane %v1651_v48, %v11675_v50  ;;  %v10854_v48 = vld [vmem:[%s11595_s8 + $0x1ae4] ss:$8 sps:$4 sm:$0xff]  }
 0x299   : > { %7293 = vmatpush1.bf16.msra.mxu1 %v10687_v51  ;;  %v10765_v51 = vld [vmem:[%s11595_s8 + $0xa00] ss:$8 sps:$4 sm:$0xff]  }
 0x29a   : > { %7949 = vmatpush1.bf16.msra.mxu0 %v10690_v52  ;;  %7294 = vmatprep.subr.bf16.mxu1 %v10695_v54  ;;  %v10768_v52 = vld [vmem:[%s11595_s8 + $0x1a00] ss:$8 sps:$4 sm:$0xff]   ;;  %v10773_v54 = vld [vmem:[%s11595_s8 + $0xa14] ss:$8 sps:$4 sm:$0xff]  }
 0x29b   : > { %7950 = vmatprep.subr.bf16.mxu0 %v10698_v55  ;;  %v10776_v55 = vld [vmem:[%s11595_s8 + $0x1a14] ss:$8 sps:$4 sm:$0xff]  }
 0x29d   : > { %7295 = vmatpush1.bf16.msra.mxu1 %v10693_v39  ;;  %v12476_v39 = vrot.slane %v1455_v15, %v11675_v50  ;;  %v10851_v15 = vld [vmem:[%s11595_s8 + $0xae4] ss:$8 sps:$4 sm:$0xff]  }
 0x29e   : > { %7951 = vmatpush1.bf16.msra.mxu0 %v10696_v40  ;;  %7296 = vmatprep.subr.bf16.mxu1 %v10701_v61  ;;  %v10774_v40 = vld [vmem:[%s11595_s8 + $0x1a10] ss:$8 sps:$4 sm:$0xff]   ;;  %v10779_v61 = vld [vmem:[%s11595_s8 + $0xa24] ss:$8 sps:$4 sm:$0xff]  }
 0x29f   : > { %7952 = vmatprep.subr.bf16.mxu0 %v10704_v62  ;;  %v10782_v62 = vld [vmem:[%s11595_s8 + $0x1a24] ss:$8 sps:$4 sm:$0xff]  }
 0x2a1   : > { %7297 = vmatpush1.bf16.msra.mxu1 %v10699_v63  ;;  %v10777_v63 = vld [vmem:[%s11595_s8 + $0xa20] ss:$8 sps:$4 sm:$0xff]  }
 0x2a2   : > { %7953 = vmatpush1.bf16.msra.mxu0 %v10702_v0  ;;  %7298 = vmatprep.subr.bf16.mxu1 %v10707_v41  ;;  %v10780_v0 = vld [vmem:[%s11595_s8 + $0x1a20] ss:$8 sps:$4 sm:$0xff]   ;;  %v10785_v41 = vld [vmem:[%s11595_s8 + $0xa34] ss:$8 sps:$4 sm:$0xff]  }
 0x2a3   : > { %7954 = vmatprep.subr.bf16.mxu0 %v10710_v1  ;;  %v10788_v1 = vld [vmem:[%s11595_s8 + $0x1a34] ss:$8 sps:$4 sm:$0xff]  }
 0x2a5   : > { %7299 = vmatpush1.bf16.msra.mxu1 %v10705_v56  ;;  %v10783_v56 = vld [vmem:[%s11595_s8 + $0xa30] ss:$8 sps:$4 sm:$0xff]  }
 0x2a6   : > { %7955 = vmatpush1.bf16.msra.mxu0 %v10708_v3  ;;  %7300 = vmatprep.subr.bf16.mxu1 %v10713_v58  ;;  %v10786_v3 = vld [vmem:[%s11595_s8 + $0x1a30] ss:$8 sps:$4 sm:$0xff]   ;;  %v10791_v58 = vld [vmem:[%s11595_s8 + $0xa44] ss:$8 sps:$4 sm:$0xff]  }
 0x2a7   : > { %7956 = vmatprep.subr.bf16.mxu0 %v10716_v4  ;;  %v10794_v4 = vld [vmem:[%s11595_s8 + $0x1a44] ss:$8 sps:$4 sm:$0xff]  }
 0x2a9   : > { %7301 = vmatpush1.bf16.msra.mxu1 %v10711_v5  ;;  %v10789_v5 = vld [vmem:[%s11595_s8 + $0xa40] ss:$8 sps:$4 sm:$0xff]  }
 0x2aa   : > { %7957 = vmatpush1.bf16.msra.mxu0 %v10714_v6  ;;  %7302 = vmatprep.subr.bf16.mxu1 %v10719_v7  ;;  %v10792_v6 = vld [vmem:[%s11595_s8 + $0x1a40] ss:$8 sps:$4 sm:$0xff]   ;;  %v10797_v7 = vld [vmem:[%s11595_s8 + $0xa54] ss:$8 sps:$4 sm:$0xff]  }
 0x2ab   : > { %7958 = vmatprep.subr.bf16.mxu0 %v10722_v8  ;;  %v10800_v8 = vld [vmem:[%s11595_s8 + $0x1a54] ss:$8 sps:$4 sm:$0xff]  }
 0x2ad   : > { %7303 = vmatpush1.bf16.msra.mxu1 %v10717_v9  ;;  %v10795_v9 = vld [vmem:[%s11595_s8 + $0xa50] ss:$8 sps:$4 sm:$0xff]  }
 0x2ae   : > { %7959 = vmatpush1.bf16.msra.mxu0 %v10720_v10  ;;  %7304 = vmatprep.subr.bf16.mxu1 %v10725_v11  ;;  %v10798_v10 = vld [vmem:[%s11595_s8 + $0x1a50] ss:$8 sps:$4 sm:$0xff]   ;;  %v10803_v11 = vld [vmem:[%s11595_s8 + $0xa64] ss:$8 sps:$4 sm:$0xff]  }
 0x2af   : > { %7960 = vmatprep.subr.bf16.mxu0 %v10728_v12  ;;  %v10806_v12 = vld [vmem:[%s11595_s8 + $0x1a64] ss:$8 sps:$4 sm:$0xff]  }
 0x2b1   : > { %7305 = vmatpush1.bf16.msra.mxu1 %v10723_v19  ;;  %v10801_v19 = vld [vmem:[%s11595_s8 + $0xa60] ss:$8 sps:$4 sm:$0xff]  }
 0x2b2   : > { %7961 = vmatpush1.bf16.msra.mxu0 %v10726_v20  ;;  %7306 = vmatprep.subr.bf16.mxu1 %v10731_v21  ;;  %v10804_v20 = vld [vmem:[%s11595_s8 + $0x1a60] ss:$8 sps:$4 sm:$0xff]   ;;  %v10809_v21 = vld [vmem:[%s11595_s8 + $0xa74] ss:$8 sps:$4 sm:$0xff]  }
 0x2b3   : > { %7962 = vmatprep.subr.bf16.mxu0 %v10734_v22  ;;  %v10812_v22 = vld [vmem:[%s11595_s8 + $0x1a74] ss:$8 sps:$4 sm:$0xff]  }
 0x2b5   : > { %7307 = vmatpush1.bf16.msra.mxu1 %v10729_v2  ;;  %v10807_v2 = vld [vmem:[%s11595_s8 + $0xa70] ss:$8 sps:$4 sm:$0xff]  }
 0x2b6   : > { %7963 = vmatpush1.bf16.msra.mxu0 %v10732_v24  ;;  %7308 = vmatprep.subr.bf16.mxu1 %v10737_v13  ;;  %v10810_v24 = vld [vmem:[%s11595_s8 + $0x1a70] ss:$8 sps:$4 sm:$0xff]   ;;  %v10815_v13 = vld [vmem:[%s11595_s8 + $0xa84] ss:$8 sps:$4 sm:$0xff]  }
 0x2b7   : > { %7964 = vmatprep.subr.bf16.mxu0 %v10740_v53  ;;  %v10818_v53 = vld [vmem:[%s11595_s8 + $0x1a84] ss:$8 sps:$4 sm:$0xff]  }
 0x2b9   : > { %7309 = vmatpush1.bf16.msra.mxu1 %v10735_v59  ;;  %v10813_v59 = vld [vmem:[%s11595_s8 + $0xa80] ss:$8 sps:$4 sm:$0xff]  }
 0x2ba   : > { %7965 = vmatpush1.bf16.msra.mxu0 %v10738_v57  ;;  %7310 = vmatprep.subr.bf16.mxu1 %v10743_v27  ;;  %v10816_v57 = vld [vmem:[%s11595_s8 + $0x1a80] ss:$8 sps:$4 sm:$0xff]   ;;  %v10821_v27 = vld [vmem:[%s11595_s8 + $0xa94] ss:$8 sps:$4 sm:$0xff]  }
 0x2bb   : > { %7966 = vmatprep.subr.bf16.mxu0 %v10746_v28  ;;  %v10824_v28 = vld [vmem:[%s11595_s8 + $0x1a94] ss:$8 sps:$4 sm:$0xff]  }
 0x2bd   : > { %7311 = vmatpush1.bf16.msra.mxu1 %v10741_v29  ;;  %v10819_v29 = vld [vmem:[%s11595_s8 + $0xa90] ss:$8 sps:$4 sm:$0xff]  }
 0x2be   : > { %7967 = vmatpush1.bf16.msra.mxu0 %v10744_v30  ;;  %7312 = vmatprep.subr.bf16.mxu1 %v10749_v31  ;;  %v10822_v30 = vld [vmem:[%s11595_s8 + $0x1a90] ss:$8 sps:$4 sm:$0xff]   ;;  %v10827_v31 = vld [vmem:[%s11595_s8 + $0xaa4] ss:$8 sps:$4 sm:$0xff]  }
 0x2bf   : > { %7968 = vmatprep.subr.bf16.mxu0 %v10752_v32  ;;  %v10830_v32 = vld [vmem:[%s11595_s8 + $0x1aa4] ss:$8 sps:$4 sm:$0xff]  }
 0x2c1   : > { %7313 = vmatpush1.bf16.msra.mxu1 %v10747_v16  ;;  %v10825_v16 = vld [vmem:[%s11595_s8 + $0xaa0] ss:$8 sps:$4 sm:$0xff]  }
 0x2c2   : > { %7969 = vmatpush1.bf16.msra.mxu0 %v10750_v34  ;;  %7314 = vmatprep.subr.bf16.mxu1 %v10755_v35  ;;  %v10828_v34 = vld [vmem:[%s11595_s8 + $0x1aa0] ss:$8 sps:$4 sm:$0xff]   ;;  %v10833_v35 = vld [vmem:[%s11595_s8 + $0xab4] ss:$8 sps:$4 sm:$0xff]  }
 0x2c3   : > { %7970 = vmatprep.subr.bf16.mxu0 %v10758_v36  ;;  %v10836_v36 = vld [vmem:[%s11595_s8 + $0x1ab4] ss:$8 sps:$4 sm:$0xff]  }
 0x2c5   : > { %7315 = vmatpush1.bf16.msra.mxu1 %v10753_v25  ;;  %v10839_v25 = vld [vmem:[%s11595_s8 + $0xac4] ss:$8 sps:$4 sm:$0xff]  }
 0x2c6   : > { %7971 = vmatpush1.bf16.msra.mxu0 %v10756_v46  ;;  %7316 = vmatprep.subr.bf16.mxu1 %v10761_v42  ;;  %v10842_v46 = vld [vmem:[%s11595_s8 + $0x1ac4] ss:$8 sps:$4 sm:$0xff]   ;;  %v10837_v42 = vld [vmem:[%s11595_s8 + $0xac0] ss:$8 sps:$4 sm:$0xff]  }
 0x2c7   : > { %7972 = vmatprep.subr.bf16.mxu0 %v10764_v26  ;;  %v10840_v26 = vld [vmem:[%s11595_s8 + $0x1ac0] ss:$8 sps:$4 sm:$0xff]  }
 0x2c9   : > { %7317 = vmatpush1.bf16.msra.mxu1 %v10759_v60  ;;  %v10845_v60 = vld [vmem:[%s11595_s8 + $0xad4] ss:$8 sps:$4 sm:$0xff]  }
 0x2ca   : > { %7973 = vmatpush1.bf16.msra.mxu0 %v10762_v14  ;;  %7327 = vmatprep.subr.bf16.mxu1 %v10767_v33  ;;  %v10848_v14 = vld [vmem:[%s11595_s8 + $0x1ad4] ss:$8 sps:$4 sm:$0xff]   ;;  %v10843_v33 = vld [vmem:[%s11595_s8 + $0xad0] ss:$8 sps:$4 sm:$0xff]  }
 0x2cb   : > { %7983 = vmatprep.subr.bf16.mxu0 %v10770_v37  ;;  %v10846_v37 = vld [vmem:[%s11595_s8 + $0x1ad0] ss:$8 sps:$4 sm:$0xff]  }
 0x2cc   : > { %7319 = vmatmul.mubr.bf16.vlgmr.msra.gmra.mrb[0].mxu1 %v1484_v17  ;;  %v10849_v17 = vld [vmem:[%s11595_s8 + $0xae0] ss:$8 sps:$4 sm:$0xff]  }
 0x2cd   : > { %7975 = vmatmul.mubr.bf16.vlgmr.msra.gmra.mrb[0].mxu0 %v1680_v49  ;;  %7328 = vmatpush1.bf16.msra.mxu1 %v10765_v51  ;;  %v10852_v49 = vld [vmem:[%s11595_s8 + $0x1ae0] ss:$8 sps:$4 sm:$0xff]   ;;  %v10857_v51 = vld [vmem:[%s11595_s8 + $0xaf4] ss:$8 sps:$4 sm:$0xff]  }
 0x2ce   : > { %7984 = vmatpush1.bf16.msra.mxu0 %v10768_v52  ;;  %7329 = vmatprep.subr.bf16.mxu1 %v10773_v54  ;;  %v10860_v52 = vld [vmem:[%s11595_s8 + $0x1af4] ss:$8 sps:$4 sm:$0xff]   ;;  %v10855_v54 = vld [vmem:[%s11595_s8 + $0xaf0] ss:$8 sps:$4 sm:$0xff]  }
 0x2cf   : > { %7985 = vmatprep.subr.bf16.mxu0 %v10776_v55  ;;  %7359 = vmatprep.mubr.bf16.mxu1 %v12476_v39  ;;  %v10858_v55 = vld [vmem:[%s11595_s8 + $0x1af0] ss:$8 sps:$4 sm:$0xff]  }
 0x2d0   : > { %8015 = vmatprep.mubr.bf16.mxu0 %v12479_v18 }
 0x2d1   : > { %7330 = vmatpush1.bf16.msra.mxu1 %v10771_v38  ;;  %v10864_v38 = vld [vmem:[%s11595_s8 + $0xb04] ss:$8 sps:$4 sm:$0xff]  }
 0x2d2   : > { %7986 = vmatpush1.bf16.msra.mxu0 %v10774_v40  ;;  %7331 = vmatprep.subr.bf16.mxu1 %v10779_v61  ;;  %v10868_v40 = vld [vmem:[%s11595_s8 + $0x1b04] ss:$8 sps:$4 sm:$0xff]   ;;  %v12545_v61 = vrot.slane %v12454_v23, %v11675_v50  ;;  %v1487_v23 = vcombine.high %v12476_v39, %v12476_v39 }
 0x2d3   : > { %7987 = vmatprep.subr.bf16.mxu0 %v10782_v62  ;;  %v12549_v62 = vrot.slane %v12457_v47, %v11675_v50  ;;  %v10869_v47 = vld [vmem:[%s11595_s8 + $0xb10] ss:$8 sps:$4 sm:$0xff]   ;;  %v10877_v39 = vld [vmem:[%s11595_s8 + $0xb24] ss:$8 sps:$4 sm:$0xff]  }
 0x2d5   : > { %7332 = vmatpush1.bf16.msra.mxu1 %v10777_v63  ;;  %v10862_v63 = vld [vmem:[%s11595_s8 + $0xb00] ss:$8 sps:$4 sm:$0xff]  }
 0x2d6   : > { %7988 = vmatpush1.bf16.msra.mxu0 %v10780_v0  ;;  %7333 = vmatprep.subr.bf16.mxu1 %v10785_v41  ;;  %v10866_v0 = vld [vmem:[%s11595_s8 + $0x1b00] ss:$8 sps:$4 sm:$0xff]   ;;  %v10871_v41 = vld [vmem:[%s11595_s8 + $0xb14] ss:$8 sps:$4 sm:$0xff]  }
 0x2d7   : > { %7989 = vmatprep.subr.bf16.mxu0 %v10788_v1  ;;  %v10874_v1 = vld [vmem:[%s11595_s8 + $0x1b14] ss:$8 sps:$4 sm:$0xff]  }
 0x2d9   : > { %7334 = vmatpush1.bf16.msra.mxu1 %v10783_v56  ;;  %v1683_v56 = vcombine.high %v12479_v18, %v12479_v18  ;;  %v10875_v18 = vld [vmem:[%s11595_s8 + $0xb20] ss:$8 sps:$4 sm:$0xff]  }
 0x2da   : > { %7990 = vmatpush1.bf16.msra.mxu0 %v10786_v3  ;;  %7335 = vmatprep.subr.bf16.mxu1 %v10791_v58  ;;  %v10872_v3 = vld [vmem:[%s11595_s8 + $0x1b10] ss:$8 sps:$4 sm:$0xff]   ;;  %v10880_v58 = vld [vmem:[%s11595_s8 + $0x1b24] ss:$8 sps:$4 sm:$0xff]  }
 0x2db   : > { %7991 = vmatprep.subr.bf16.mxu0 %v10794_v4  ;;  %v10878_v4 = vld [vmem:[%s11595_s8 + $0x1b20] ss:$8 sps:$4 sm:$0xff]  }
 0x2dd   : > { %7336 = vmatpush1.bf16.msra.mxu1 %v10789_v5  ;;  %v10883_v5 = vld [vmem:[%s11595_s8 + $0xb34] ss:$8 sps:$4 sm:$0xff]  }
 0x2de   : > { %7992 = vmatpush1.bf16.msra.mxu0 %v10792_v6  ;;  %7337 = vmatprep.subr.bf16.mxu1 %v10797_v7  ;;  %v10886_v6 = vld [vmem:[%s11595_s8 + $0x1b34] ss:$8 sps:$4 sm:$0xff]   ;;  %v10881_v7 = vld [vmem:[%s11595_s8 + $0xb30] ss:$8 sps:$4 sm:$0xff]  }
 0x2df   : > { %7993 = vmatprep.subr.bf16.mxu0 %v10800_v8  ;;  %v10884_v8 = vld [vmem:[%s11595_s8 + $0x1b30] ss:$8 sps:$4 sm:$0xff]  }
 0x2e1   : > { %7338 = vmatpush1.bf16.msra.mxu1 %v10795_v9  ;;  %v10889_v9 = vld [vmem:[%s11595_s8 + $0xb44] ss:$8 sps:$4 sm:$0xff]  }
 0x2e2   : > { %7994 = vmatpush1.bf16.msra.mxu0 %v10798_v10  ;;  %7339 = vmatprep.subr.bf16.mxu1 %v10803_v11  ;;  %v10892_v10 = vld [vmem:[%s11595_s8 + $0x1b44] ss:$8 sps:$4 sm:$0xff]   ;;  %v10887_v11 = vld [vmem:[%s11595_s8 + $0xb40] ss:$8 sps:$4 sm:$0xff]  }
 0x2e3   : > { %7995 = vmatprep.subr.bf16.mxu0 %v10806_v12  ;;  %v10890_v12 = vld [vmem:[%s11595_s8 + $0x1b40] ss:$8 sps:$4 sm:$0xff]  }
 0x2e5   : > { %7340 = vmatpush1.bf16.msra.mxu1 %v10801_v19  ;;  %v10895_v19 = vld [vmem:[%s11595_s8 + $0xb54] ss:$8 sps:$4 sm:$0xff]  }
 0x2e6   : > { %7996 = vmatpush1.bf16.msra.mxu0 %v10804_v20  ;;  %7341 = vmatprep.subr.bf16.mxu1 %v10809_v21  ;;  %v10898_v20 = vld [vmem:[%s11595_s8 + $0x1b54] ss:$8 sps:$4 sm:$0xff]   ;;  %v10893_v21 = vld [vmem:[%s11595_s8 + $0xb50] ss:$8 sps:$4 sm:$0xff]  }
 0x2e7   : > { %7997 = vmatprep.subr.bf16.mxu0 %v10812_v22  ;;  %v10896_v22 = vld [vmem:[%s11595_s8 + $0x1b50] ss:$8 sps:$4 sm:$0xff]  }
 0x2e9   : > { %7342 = vmatpush1.bf16.msra.mxu1 %v10807_v2  ;;  %v10901_v2 = vld [vmem:[%s11595_s8 + $0xb64] ss:$8 sps:$4 sm:$0xff]  }
 0x2ea   : > { %7998 = vmatpush1.bf16.msra.mxu0 %v10810_v24  ;;  %7343 = vmatprep.subr.bf16.mxu1 %v10815_v13  ;;  %v10904_v24 = vld [vmem:[%s11595_s8 + $0x1b64] ss:$8 sps:$4 sm:$0xff]   ;;  %v10899_v13 = vld [vmem:[%s11595_s8 + $0xb60] ss:$8 sps:$4 sm:$0xff]  }
 0x2eb   : > { %7999 = vmatprep.subr.bf16.mxu0 %v10818_v53  ;;  %v10902_v53 = vld [vmem:[%s11595_s8 + $0x1b60] ss:$8 sps:$4 sm:$0xff]  }
 0x2ed   : > { %7344 = vmatpush1.bf16.msra.mxu1 %v10813_v59  ;;  %v10907_v59 = vld [vmem:[%s11595_s8 + $0xb74] ss:$8 sps:$4 sm:$0xff]  }
 0x2ee   : > { %8000 = vmatpush1.bf16.msra.mxu0 %v10816_v57  ;;  %7345 = vmatprep.subr.bf16.mxu1 %v10821_v27  ;;  %v10910_v57 = vld [vmem:[%s11595_s8 + $0x1b74] ss:$8 sps:$4 sm:$0xff]   ;;  %v10905_v27 = vld [vmem:[%s11595_s8 + $0xb70] ss:$8 sps:$4 sm:$0xff]  }
 0x2ef   : > { %8001 = vmatprep.subr.bf16.mxu0 %v10824_v28  ;;  %v10908_v28 = vld [vmem:[%s11595_s8 + $0x1b70] ss:$8 sps:$4 sm:$0xff]  }
 0x2f1   : > { %7346 = vmatpush1.bf16.msra.mxu1 %v10819_v29  ;;  %v10913_v29 = vld [vmem:[%s11595_s8 + $0xb84] ss:$8 sps:$4 sm:$0xff]  }
 0x2f2   : > { %8002 = vmatpush1.bf16.msra.mxu0 %v10822_v30  ;;  %7347 = vmatprep.subr.bf16.mxu1 %v10827_v31  ;;  %v10916_v30 = vld [vmem:[%s11595_s8 + $0x1b84] ss:$8 sps:$4 sm:$0xff]   ;;  %v10911_v31 = vld [vmem:[%s11595_s8 + $0xb80] ss:$8 sps:$4 sm:$0xff]  }
 0x2f3   : > { %8003 = vmatprep.subr.bf16.mxu0 %v10830_v32  ;;  %v10914_v32 = vld [vmem:[%s11595_s8 + $0x1b80] ss:$8 sps:$4 sm:$0xff]  }
 0x2f5   : > { %7348 = vmatpush1.bf16.msra.mxu1 %v10825_v16  ;;  %v10919_v16 = vld [vmem:[%s11595_s8 + $0xb94] ss:$8 sps:$4 sm:$0xff]  }
 0x2f6   : > { %8004 = vmatpush1.bf16.msra.mxu0 %v10828_v34  ;;  %7349 = vmatprep.subr.bf16.mxu1 %v10833_v35  ;;  %v10922_v34 = vld [vmem:[%s11595_s8 + $0x1b94] ss:$8 sps:$4 sm:$0xff]   ;;  %v10917_v35 = vld [vmem:[%s11595_s8 + $0xb90] ss:$8 sps:$4 sm:$0xff]  }
 0x2f7   : > { %8005 = vmatprep.subr.bf16.mxu0 %v10836_v36  ;;  %v10920_v36 = vld [vmem:[%s11595_s8 + $0x1b90] ss:$8 sps:$4 sm:$0xff]  }
 0x2f9   : > { %7350 = vmatpush1.bf16.msra.mxu1 %v10831_v43  ;;  %v10925_v43 = vld [vmem:[%s11595_s8 + $0xba4] ss:$8 sps:$4 sm:$0xff]  }
 0x2fa   : > { %8006 = vmatpush1.bf16.msra.mxu0 %v10834_v45  ;;  %7351 = vmatprep.subr.bf16.mxu1 %v10839_v25  ;;  %v10928_v45 = vld [vmem:[%s11595_s8 + $0x1ba4] ss:$8 sps:$4 sm:$0xff]   ;;  %v10923_v25 = vld [vmem:[%s11595_s8 + $0xba0] ss:$8 sps:$4 sm:$0xff]  }
 0x2fb   : > { %8007 = vmatprep.subr.bf16.mxu0 %v10842_v46  ;;  %v10926_v46 = vld [vmem:[%s11595_s8 + $0x1ba0] ss:$8 sps:$4 sm:$0xff]  }
 0x2fd   : > { %7352 = vmatpush1.bf16.msra.mxu1 %v10837_v42  ;;  %v10931_v42 = vld [vmem:[%s11595_s8 + $0xbb4] ss:$8 sps:$4 sm:$0xff]  }
 0x2fe   : > { %8008 = vmatpush1.bf16.msra.mxu0 %v10840_v26  ;;  %7353 = vmatprep.subr.bf16.mxu1 %v10845_v60  ;;  %v10934_v26 = vld [vmem:[%s11595_s8 + $0x1bb4] ss:$8 sps:$4 sm:$0xff]   ;;  %v10929_v60 = vld [vmem:[%s11595_s8 + $0xbb0] ss:$8 sps:$4 sm:$0xff]  }
 0x2ff   : > { %8009 = vmatprep.subr.bf16.mxu0 %v10848_v14  ;;  %v10932_v14 = vld [vmem:[%s11595_s8 + $0x1bb0] ss:$8 sps:$4 sm:$0xff]  }
 0x301   : > { %7354 = vmatpush1.bf16.msra.mxu1 %v10843_v33  ;;  %v10937_v33 = vld [vmem:[%s11595_s8 + $0xbc4] ss:$8 sps:$4 sm:$0xff]  }
 0x302   : > { %8010 = vmatpush1.bf16.msra.mxu0 %v10846_v37  ;;  %7355 = vmatprep.subr.bf16.mxu1 %v10851_v15  ;;  %v10940_v37 = vld [vmem:[%s11595_s8 + $0x1bc4] ss:$8 sps:$4 sm:$0xff]   ;;  %v10935_v15 = vld [vmem:[%s11595_s8 + $0xbc0] ss:$8 sps:$4 sm:$0xff]  }
 0x303   : > { %8011 = vmatprep.subr.bf16.mxu0 %v10854_v48  ;;  %v10938_v48 = vld [vmem:[%s11595_s8 + $0x1bc0] ss:$8 sps:$4 sm:$0xff]  }
 0x305   : > { %7356 = vmatpush1.bf16.msra.mxu1 %v10849_v17  ;;  %v10943_v17 = vld [vmem:[%s11595_s8 + $0xbd4] ss:$8 sps:$4 sm:$0xff]  }
 0x306   : > { %8012 = vmatpush1.bf16.msra.mxu0 %v10852_v49  ;;  %7357 = vmatprep.subr.bf16.mxu1 %v10857_v51  ;;  %v10946_v49 = vld [vmem:[%s11595_s8 + $0x1bd4] ss:$8 sps:$4 sm:$0xff]   ;;  %v10941_v51 = vld [vmem:[%s11595_s8 + $0xbd0] ss:$8 sps:$4 sm:$0xff]  }
 0x307   : > { %8013 = vmatprep.subr.bf16.mxu0 %v10860_v52  ;;  %v10944_v52 = vld [vmem:[%s11595_s8 + $0x1bd0] ss:$8 sps:$4 sm:$0xff]  }
 0x309   : > { %7358 = vmatpush1.bf16.msra.mxu1 %v10855_v54  ;;  %v10949_v54 = vld [vmem:[%s11595_s8 + $0xbe4] ss:$8 sps:$4 sm:$0xff]  }
 0x30a   : > { %8014 = vmatpush1.bf16.msra.mxu0 %v10858_v55  ;;  %7368 = vmatprep.subr.bf16.mxu1 %v10864_v38  ;;  %v10952_v55 = vld [vmem:[%s11595_s8 + $0x1be4] ss:$8 sps:$4 sm:$0xff]   ;;  %v12614_v38 = vld [vmem:[%s11610_s29 + $0x18] sm:$0xff] }
 0x30b   : > { %8024 = vmatprep.subr.bf16.mxu0 %v10868_v40  ;;  %v12617_v40 = vld [vmem:[%s11610_s29 + $0x38] sm:$0xff] }
 0x30c   : > { %7360 = vmatmul.mubr.bf16.vlgmr.msra.gmra.mrb[0].mxu1 %v12545_v61 }
 0x30d   : > { %8016 = vmatmul.mubr.bf16.vlgmr.msra.gmra.mrb[0].mxu0 %v12549_v62  ;;  %7369 = vmatpush1.bf16.msra.mxu1 %v10862_v63  ;;  %v10947_v63 = vld [vmem:[%s11595_s8 + $0xbe0] ss:$8 sps:$4 sm:$0xff]  }
 0x30e   : > { %8025 = vmatpush1.bf16.msra.mxu0 %v10866_v0  ;;  %7370 = vmatprep.subr.bf16.mxu1 %v10871_v41  ;;  %v10950_v0 = vld [vmem:[%s11595_s8 + $0x1be0] ss:$8 sps:$4 sm:$0xff]   ;;  %v10955_v41 = vld [vmem:[%s11595_s8 + $0xbf4] ss:$8 sps:$4 sm:$0xff]  }
 0x30f   : > { %8026 = vmatprep.subr.bf16.mxu0 %v10874_v1  ;;  %7400 = vmatprep.mubr.bf16.mxu1 %v1487_v23  ;;  %v10958_v1 = vld [vmem:[%s11595_s8 + $0x1bf4] ss:$8 sps:$4 sm:$0xff]   ;;  %v12625_v23 = vrot.slane %v12614_v38, %v11675_v50 }
 0x310   : > { %8056 = vmatprep.mubr.bf16.mxu0 %v1683_v56  ;;  %v12629_v56 = vrot.slane %v12617_v40, %v11675_v50 }
 0x311   : > { %7371 = vmatpush1.bf16.msra.mxu1 %v10869_v47  ;;  %v10953_v47 = vld [vmem:[%s11595_s8 + $0xbf0] ss:$8 sps:$4 sm:$0xff]  }
 0x312   : > { %8027 = vmatpush1.bf16.msra.mxu0 %v10872_v3  ;;  %7372 = vmatprep.subr.bf16.mxu1 %v10877_v39  ;;  %v10956_v3 = vld [vmem:[%s11595_s8 + $0x1bf0] ss:$8 sps:$4 sm:$0xff]   ;;  %v10961_v39 = vld [vmem:[%s11595_s8 + $0xc04] ss:$8 sps:$4 sm:$0xff]  }
 0x313   : > { %8028 = vmatprep.subr.bf16.mxu0 %v10880_v58  ;;  %v10964_v58 = vld [vmem:[%s11595_s8 + $0x1c04] ss:$8 sps:$4 sm:$0xff]  }
 0x315   : > { %7373 = vmatpush1.bf16.msra.mxu1 %v10875_v18  ;;  %v1503_v18 = vcombine.high %v12625_v23, %v12625_v23 }
 0x316   : > { %8029 = vmatpush1.bf16.msra.mxu0 %v10878_v4  ;;  %7374 = vmatprep.subr.bf16.mxu1 %v10883_v5  ;;  %v1699_v4 = vcombine.high %v12629_v56, %v12629_v56  ;;  %v1485_v5 = vcombine.high %v12545_v61, %v12545_v61 }
 0x317   : > { %8030 = vmatprep.subr.bf16.mxu0 %v10886_v6  ;;  %v1681_v6 = vcombine.high %v12549_v62, %v12549_v62  ;;  %v10965_v62 = vld [vmem:[%s11595_s8 + $0xc10] ss:$8 sps:$4 sm:$0xff]  }
 0x318   : > { %v12651_v61 = vrot.slane %v1699_v4, %v11675_v50  ;;  %v11040_v4 = vld [vmem:[%s11595_s8 + $0x1cd0] ss:$8 sps:$4 sm:$0xff]  }
 0x319   : > { %7375 = vmatpush1.bf16.msra.mxu1 %v10881_v7  ;;  %v10959_v7 = vld [vmem:[%s11595_s8 + $0xc00] ss:$8 sps:$4 sm:$0xff]  }
 0x31a   : > { %8031 = vmatpush1.bf16.msra.mxu0 %v10884_v8  ;;  %7376 = vmatprep.subr.bf16.mxu1 %v10889_v9  ;;  %v10962_v8 = vld [vmem:[%s11595_s8 + $0x1c00] ss:$8 sps:$4 sm:$0xff]   ;;  %v10967_v9 = vld [vmem:[%s11595_s8 + $0xc14] ss:$8 sps:$4 sm:$0xff]  }
 0x31b   : > { %8032 = vmatprep.subr.bf16.mxu0 %v10892_v10  ;;  %v10970_v10 = vld [vmem:[%s11595_s8 + $0x1c14] ss:$8 sps:$4 sm:$0xff]  }
 0x31d   : > { %7377 = vmatpush1.bf16.msra.mxu1 %v10887_v11  ;;  %v12648_v11 = vrot.slane %v1503_v18, %v11675_v50  ;;  %v11037_v18 = vld [vmem:[%s11595_s8 + $0xcd0] ss:$8 sps:$4 sm:$0xff]  }
 0x31e   : > { %8033 = vmatpush1.bf16.msra.mxu0 %v10890_v12  ;;  %7378 = vmatprep.subr.bf16.mxu1 %v10895_v19  ;;  %v10968_v12 = vld [vmem:[%s11595_s8 + $0x1c10] ss:$8 sps:$4 sm:$0xff]   ;;  %v10973_v19 = vld [vmem:[%s11595_s8 + $0xc24] ss:$8 sps:$4 sm:$0xff]  }
 0x31f   : > { %8034 = vmatprep.subr.bf16.mxu0 %v10898_v20  ;;  %v10976_v20 = vld [vmem:[%s11595_s8 + $0x1c24] ss:$8 sps:$4 sm:$0xff]  }
 0x321   : > { %7379 = vmatpush1.bf16.msra.mxu1 %v10893_v21  ;;  %v10971_v21 = vld [vmem:[%s11595_s8 + $0xc20] ss:$8 sps:$4 sm:$0xff]  }
 0x322   : > { %8035 = vmatpush1.bf16.msra.mxu0 %v10896_v22  ;;  %7380 = vmatprep.subr.bf16.mxu1 %v10901_v2  ;;  %v10974_v22 = vld [vmem:[%s11595_s8 + $0x1c20] ss:$8 sps:$4 sm:$0xff]   ;;  %v10979_v2 = vld [vmem:[%s11595_s8 + $0xc34] ss:$8 sps:$4 sm:$0xff]  }
 0x323   : > { %8036 = vmatprep.subr.bf16.mxu0 %v10904_v24  ;;  %v10982_v24 = vld [vmem:[%s11595_s8 + $0x1c34] ss:$8 sps:$4 sm:$0xff]  }
 0x325   : > { %7381 = vmatpush1.bf16.msra.mxu1 %v10899_v13  ;;  %v10977_v13 = vld [vmem:[%s11595_s8 + $0xc30] ss:$8 sps:$4 sm:$0xff]  }
 0x326   : > { %8037 = vmatpush1.bf16.msra.mxu0 %v10902_v53  ;;  %7382 = vmatprep.subr.bf16.mxu1 %v10907_v59  ;;  %v10980_v53 = vld [vmem:[%s11595_s8 + $0x1c30] ss:$8 sps:$4 sm:$0xff]   ;;  %v10985_v59 = vld [vmem:[%s11595_s8 + $0xc44] ss:$8 sps:$4 sm:$0xff]  }
 0x327   : > { %8038 = vmatprep.subr.bf16.mxu0 %v10910_v57  ;;  %v10988_v57 = vld [vmem:[%s11595_s8 + $0x1c44] ss:$8 sps:$4 sm:$0xff]  }
 0x329   : > { %7383 = vmatpush1.bf16.msra.mxu1 %v10905_v27  ;;  %v10983_v27 = vld [vmem:[%s11595_s8 + $0xc40] ss:$8 sps:$4 sm:$0xff]  }
 0x32a   : > { %8039 = vmatpush1.bf16.msra.mxu0 %v10908_v28  ;;  %7384 = vmatprep.subr.bf16.mxu1 %v10913_v29  ;;  %v10986_v28 = vld [vmem:[%s11595_s8 + $0x1c40] ss:$8 sps:$4 sm:$0xff]   ;;  %v10991_v29 = vld [vmem:[%s11595_s8 + $0xc54] ss:$8 sps:$4 sm:$0xff]  }
 0x32b   : > { %8040 = vmatprep.subr.bf16.mxu0 %v10916_v30  ;;  %v10994_v30 = vld [vmem:[%s11595_s8 + $0x1c54] ss:$8 sps:$4 sm:$0xff]  }
 0x32d   : > { %7385 = vmatpush1.bf16.msra.mxu1 %v10911_v31  ;;  %v10989_v31 = vld [vmem:[%s11595_s8 + $0xc50] ss:$8 sps:$4 sm:$0xff]  }
 0x32e   : > { %8041 = vmatpush1.bf16.msra.mxu0 %v10914_v32  ;;  %7386 = vmatprep.subr.bf16.mxu1 %v10919_v16  ;;  %v10992_v32 = vld [vmem:[%s11595_s8 + $0x1c50] ss:$8 sps:$4 sm:$0xff]   ;;  %v10997_v16 = vld [vmem:[%s11595_s8 + $0xc64] ss:$8 sps:$4 sm:$0xff]  }
 0x32f   : > { %8042 = vmatprep.subr.bf16.mxu0 %v10922_v34  ;;  %v11000_v34 = vld [vmem:[%s11595_s8 + $0x1c64] ss:$8 sps:$4 sm:$0xff]  }
 0x331   : > { %7387 = vmatpush1.bf16.msra.mxu1 %v10917_v35  ;;  %v10995_v35 = vld [vmem:[%s11595_s8 + $0xc60] ss:$8 sps:$4 sm:$0xff]  }
 0x332   : > { %8043 = vmatpush1.bf16.msra.mxu0 %v10920_v36  ;;  %7388 = vmatprep.subr.bf16.mxu1 %v10925_v43  ;;  %v10998_v36 = vld [vmem:[%s11595_s8 + $0x1c60] ss:$8 sps:$4 sm:$0xff]   ;;  %v11003_v43 = vld [vmem:[%s11595_s8 + $0xc74] ss:$8 sps:$4 sm:$0xff]  }
 0x333   : > { %8044 = vmatprep.subr.bf16.mxu0 %v10928_v45  ;;  %v11006_v45 = vld [vmem:[%s11595_s8 + $0x1c74] ss:$8 sps:$4 sm:$0xff]  }
 0x335   : > { %7389 = vmatpush1.bf16.msra.mxu1 %v10923_v25  ;;  %v11001_v25 = vld [vmem:[%s11595_s8 + $0xc70] ss:$8 sps:$4 sm:$0xff]  }
 0x336   : > { %8045 = vmatpush1.bf16.msra.mxu0 %v10926_v46  ;;  %7390 = vmatprep.subr.bf16.mxu1 %v10931_v42  ;;  %v11004_v46 = vld [vmem:[%s11595_s8 + $0x1c70] ss:$8 sps:$4 sm:$0xff]   ;;  %v11009_v42 = vld [vmem:[%s11595_s8 + $0xc84] ss:$8 sps:$4 sm:$0xff]  }
 0x337   : > { %8046 = vmatprep.subr.bf16.mxu0 %v10934_v26  ;;  %v11012_v26 = vld [vmem:[%s11595_s8 + $0x1c84] ss:$8 sps:$4 sm:$0xff]  }
 0x339   : > { %7391 = vmatpush1.bf16.msra.mxu1 %v10929_v60  ;;  %v11007_v60 = vld [vmem:[%s11595_s8 + $0xc80] ss:$8 sps:$4 sm:$0xff]  }
 0x33a   : > { %8047 = vmatpush1.bf16.msra.mxu0 %v10932_v14  ;;  %7392 = vmatprep.subr.bf16.mxu1 %v10937_v33  ;;  %v11010_v14 = vld [vmem:[%s11595_s8 + $0x1c80] ss:$8 sps:$4 sm:$0xff]   ;;  %v11015_v33 = vld [vmem:[%s11595_s8 + $0xc94] ss:$8 sps:$4 sm:$0xff]  }
 0x33b   : > { %8048 = vmatprep.subr.bf16.mxu0 %v10940_v37  ;;  %v11018_v37 = vld [vmem:[%s11595_s8 + $0x1c94] ss:$8 sps:$4 sm:$0xff]  }
 0x33d   : > { %7393 = vmatpush1.bf16.msra.mxu1 %v10935_v15  ;;  %v11013_v15 = vld [vmem:[%s11595_s8 + $0xc90] ss:$8 sps:$4 sm:$0xff]  }
 0x33e   : > { %8049 = vmatpush1.bf16.msra.mxu0 %v10938_v48  ;;  %7394 = vmatprep.subr.bf16.mxu1 %v10943_v17  ;;  %v11016_v48 = vld [vmem:[%s11595_s8 + $0x1c90] ss:$8 sps:$4 sm:$0xff]   ;;  %v11021_v17 = vld [vmem:[%s11595_s8 + $0xca4] ss:$8 sps:$4 sm:$0xff]  }
 0x33f   : > { %8050 = vmatprep.subr.bf16.mxu0 %v10946_v49  ;;  %v11024_v49 = vld [vmem:[%s11595_s8 + $0x1ca4] ss:$8 sps:$4 sm:$0xff]  }
 0x341   : > { %7395 = vmatpush1.bf16.msra.mxu1 %v10941_v51  ;;  %v11019_v51 = vld [vmem:[%s11595_s8 + $0xca0] ss:$8 sps:$4 sm:$0xff]  }
 0x342   : > { %8051 = vmatpush1.bf16.msra.mxu0 %v10944_v52  ;;  %7396 = vmatprep.subr.bf16.mxu1 %v10949_v54  ;;  %v11022_v52 = vld [vmem:[%s11595_s8 + $0x1ca0] ss:$8 sps:$4 sm:$0xff]   ;;  %v11027_v54 = vld [vmem:[%s11595_s8 + $0xcb4] ss:$8 sps:$4 sm:$0xff]  }
 0x343   : > { %8052 = vmatprep.subr.bf16.mxu0 %v10952_v55  ;;  %v11030_v55 = vld [vmem:[%s11595_s8 + $0x1cb4] ss:$8 sps:$4 sm:$0xff]  }
 0x345   : > { %7397 = vmatpush1.bf16.msra.mxu1 %v10947_v63  ;;  %v11025_v63 = vld [vmem:[%s11595_s8 + $0xcb0] ss:$8 sps:$4 sm:$0xff]  }
 0x346   : > { %8053 = vmatpush1.bf16.msra.mxu0 %v10950_v0  ;;  %7398 = vmatprep.subr.bf16.mxu1 %v10955_v41  ;;  %v11028_v0 = vld [vmem:[%s11595_s8 + $0x1cb0] ss:$8 sps:$4 sm:$0xff]   ;;  %v11033_v41 = vld [vmem:[%s11595_s8 + $0xcc4] ss:$8 sps:$4 sm:$0xff]  }
 0x347   : > { %8054 = vmatprep.subr.bf16.mxu0 %v10958_v1  ;;  %v11036_v1 = vld [vmem:[%s11595_s8 + $0x1cc4] ss:$8 sps:$4 sm:$0xff]  }
 0x349   : > { %7399 = vmatpush1.bf16.msra.mxu1 %v10953_v47  ;;  %v11031_v47 = vld [vmem:[%s11595_s8 + $0xcc0] ss:$8 sps:$4 sm:$0xff]  }
 0x34a   : > { %8055 = vmatpush1.bf16.msra.mxu0 %v10956_v3  ;;  %7409 = vmatprep.subr.bf16.mxu1 %v10961_v39  ;;  %v11034_v3 = vld [vmem:[%s11595_s8 + $0x1cc0] ss:$8 sps:$4 sm:$0xff]   ;;  %v11039_v39 = vld [vmem:[%s11595_s8 + $0xcd4] ss:$8 sps:$4 sm:$0xff]  }
 0x34b   : > { %8065 = vmatprep.subr.bf16.mxu0 %v10964_v58  ;;  %v11042_v58 = vld [vmem:[%s11595_s8 + $0x1cd4] ss:$8 sps:$4 sm:$0xff]  }
 0x34c   : > { %7401 = vmatmul.mubr.bf16.vlgmr.msra.gmra.mrb[0].mxu1 %v1485_v5  ;;  %v11045_v5 = vld [vmem:[%s11595_s8 + $0xce4] ss:$8 sps:$4 sm:$0xff]  }
 0x34d   : > { %8057 = vmatmul.mubr.bf16.vlgmr.msra.gmra.mrb[0].mxu0 %v1681_v6  ;;  %7410 = vmatpush1.bf16.msra.mxu1 %v10959_v7  ;;  %v11048_v6 = vld [vmem:[%s11595_s8 + $0x1ce4] ss:$8 sps:$4 sm:$0xff]   ;;  %v11043_v7 = vld [vmem:[%s11595_s8 + $0xce0] ss:$8 sps:$4 sm:$0xff]  }
 0x34e   : > { %8066 = vmatpush1.bf16.msra.mxu0 %v10962_v8  ;;  %7411 = vmatprep.subr.bf16.mxu1 %v10967_v9  ;;  %v11046_v8 = vld [vmem:[%s11595_s8 + $0x1ce0] ss:$8 sps:$4 sm:$0xff]   ;;  %v11051_v9 = vld [vmem:[%s11595_s8 + $0xcf4] ss:$8 sps:$4 sm:$0xff]  }
 0x34f   : > { %8067 = vmatprep.subr.bf16.mxu0 %v10970_v10  ;;  %7441 = vmatprep.mubr.bf16.mxu1 %v12648_v11  ;;  %v11054_v10 = vld [vmem:[%s11595_s8 + $0x1cf4] ss:$8 sps:$4 sm:$0xff]  }
 0x350   : > { %8097 = vmatprep.mubr.bf16.mxu0 %v12651_v61 }
 0x351   : > { %7412 = vmatpush1.bf16.msra.mxu1 %v10965_v62  ;;  %v11049_v62 = vld [vmem:[%s11595_s8 + $0xcf0] ss:$8 sps:$4 sm:$0xff]  }
 0x352   : > { %8068 = vmatpush1.bf16.msra.mxu0 %v10968_v12  ;;  %7413 = vmatprep.subr.bf16.mxu1 %v10973_v19  ;;  %v11052_v12 = vld [vmem:[%s11595_s8 + $0x1cf0] ss:$8 sps:$4 sm:$0xff]   ;;  %v11057_v19 = vld [vmem:[%s11595_s8 + $0xd04] ss:$8 sps:$4 sm:$0xff]  }
 0x353   : > { %8069 = vmatprep.subr.bf16.mxu0 %v10976_v20  ;;  %v11060_v20 = vld [vmem:[%s11595_s8 + $0x1d04] ss:$8 sps:$4 sm:$0xff]  }
 0x355   : > { %7414 = vmatpush1.bf16.msra.mxu1 %v10971_v21  ;;  %v12717_v21 = vrot.slane %v12625_v23, %v11675_v50  ;;  %v1535_v23 = vcombine.high %v12648_v11, %v12648_v11  ;;  %v11069_v11 = vld [vmem:[%s11595_s8 + $0xd24] ss:$8 sps:$4 sm:$0xff]  }
 0x356   : > { %8070 = vmatpush1.bf16.msra.mxu0 %v10974_v22  ;;  %7415 = vmatprep.subr.bf16.mxu1 %v10979_v2  ;;  %v12721_v22 = vrot.slane %v12629_v56, %v11675_v50  ;;  %v11055_v2 = vld [vmem:[%s11595_s8 + $0xd00] ss:$8 sps:$4 sm:$0xff]   ;;  %v11061_v56 = vld [vmem:[%s11595_s8 + $0xd10] ss:$8 sps:$4 sm:$0xff]  }
 0x357   : > { %8071 = vmatprep.subr.bf16.mxu0 %v10982_v24  ;;  %v11058_v24 = vld [vmem:[%s11595_s8 + $0x1d00] ss:$8 sps:$4 sm:$0xff]  }
 0x359   : > { %7416 = vmatpush1.bf16.msra.mxu1 %v10977_v13  ;;  %v11063_v13 = vld [vmem:[%s11595_s8 + $0xd14] ss:$8 sps:$4 sm:$0xff]  }
 0x35a   : > { %8072 = vmatpush1.bf16.msra.mxu0 %v10980_v53  ;;  %7417 = vmatprep.subr.bf16.mxu1 %v10985_v59  ;;  %v11066_v53 = vld [vmem:[%s11595_s8 + $0x1d14] ss:$8 sps:$4 sm:$0xff]   ;;  %v1731_v59 = vcombine.high %v12651_v61, %v12651_v61  ;;  %v11067_v61 = vld [vmem:[%s11595_s8 + $0xd20] ss:$8 sps:$4 sm:$0xff]  }
 0x35b   : > { %8073 = vmatprep.subr.bf16.mxu0 %v10988_v57  ;;  %v11064_v57 = vld [vmem:[%s11595_s8 + $0x1d10] ss:$8 sps:$4 sm:$0xff]  }
 0x35d   : > { %7418 = vmatpush1.bf16.msra.mxu1 %v10983_v27  ;;  %v11072_v27 = vld [vmem:[%s11595_s8 + $0x1d24] ss:$8 sps:$4 sm:$0xff]  }
 0x35e   : > { %8074 = vmatpush1.bf16.msra.mxu0 %v10986_v28  ;;  %7419 = vmatprep.subr.bf16.mxu1 %v10991_v29  ;;  %v11070_v28 = vld [vmem:[%s11595_s8 + $0x1d20] ss:$8 sps:$4 sm:$0xff]   ;;  %v11075_v29 = vld [vmem:[%s11595_s8 + $0xd34] ss:$8 sps:$4 sm:$0xff]  }
 0x35f   : > { %8075 = vmatprep.subr.bf16.mxu0 %v10994_v30  ;;  %v11078_v30 = vld [vmem:[%s11595_s8 + $0x1d34] ss:$8 sps:$4 sm:$0xff]  }
 0x361   : > { %7420 = vmatpush1.bf16.msra.mxu1 %v10989_v31  ;;  %v11073_v31 = vld [vmem:[%s11595_s8 + $0xd30] ss:$8 sps:$4 sm:$0xff]  }
 0x362   : > { %8076 = vmatpush1.bf16.msra.mxu0 %v10992_v32  ;;  %7421 = vmatprep.subr.bf16.mxu1 %v10997_v16  ;;  %v11076_v32 = vld [vmem:[%s11595_s8 + $0x1d30] ss:$8 sps:$4 sm:$0xff]   ;;  %v11081_v16 = vld [vmem:[%s11595_s8 + $0xd44] ss:$8 sps:$4 sm:$0xff]  }
 0x363   : > { %8077 = vmatprep.subr.bf16.mxu0 %v11000_v34  ;;  %v11084_v34 = vld [vmem:[%s11595_s8 + $0x1d44] ss:$8 sps:$4 sm:$0xff]  }
 0x365   : > { %7422 = vmatpush1.bf16.msra.mxu1 %v10995_v35  ;;  %v11079_v35 = vld [vmem:[%s11595_s8 + $0xd40] ss:$8 sps:$4 sm:$0xff]  }
 0x366   : > { %8078 = vmatpush1.bf16.msra.mxu0 %v10998_v36  ;;  %7423 = vmatprep.subr.bf16.mxu1 %v11003_v43  ;;  %v11082_v36 = vld [vmem:[%s11595_s8 + $0x1d40] ss:$8 sps:$4 sm:$0xff]   ;;  %v11087_v43 = vld [vmem:[%s11595_s8 + $0xd54] ss:$8 sps:$4 sm:$0xff]  }
 0x367   : > { %8079 = vmatprep.subr.bf16.mxu0 %v11006_v45  ;;  %v11090_v45 = vld [vmem:[%s11595_s8 + $0x1d54] ss:$8 sps:$4 sm:$0xff]  }
 0x369   : > { %7424 = vmatpush1.bf16.msra.mxu1 %v11001_v25  ;;  %v11085_v25 = vld [vmem:[%s11595_s8 + $0xd50] ss:$8 sps:$4 sm:$0xff]  }
 0x36a   : > { %8080 = vmatpush1.bf16.msra.mxu0 %v11004_v46  ;;  %7425 = vmatprep.subr.bf16.mxu1 %v11009_v42  ;;  %v11088_v46 = vld [vmem:[%s11595_s8 + $0x1d50] ss:$8 sps:$4 sm:$0xff]   ;;  %v11093_v42 = vld [vmem:[%s11595_s8 + $0xd64] ss:$8 sps:$4 sm:$0xff]  }
 0x36b   : > { %8081 = vmatprep.subr.bf16.mxu0 %v11012_v26  ;;  %v11096_v26 = vld [vmem:[%s11595_s8 + $0x1d64] ss:$8 sps:$4 sm:$0xff]  }
 0x36d   : > { %7426 = vmatpush1.bf16.msra.mxu1 %v11007_v60  ;;  %v11091_v60 = vld [vmem:[%s11595_s8 + $0xd60] ss:$8 sps:$4 sm:$0xff]  }
 0x36e   : > { %8082 = vmatpush1.bf16.msra.mxu0 %v11010_v14  ;;  %7427 = vmatprep.subr.bf16.mxu1 %v11015_v33  ;;  %v11094_v14 = vld [vmem:[%s11595_s8 + $0x1d60] ss:$8 sps:$4 sm:$0xff]   ;;  %v11099_v33 = vld [vmem:[%s11595_s8 + $0xd74] ss:$8 sps:$4 sm:$0xff]  }
 0x36f   : > { %8083 = vmatprep.subr.bf16.mxu0 %v11018_v37  ;;  %v11102_v37 = vld [vmem:[%s11595_s8 + $0x1d74] ss:$8 sps:$4 sm:$0xff]  }
 0x371   : > { %7428 = vmatpush1.bf16.msra.mxu1 %v11013_v15  ;;  %v11097_v15 = vld [vmem:[%s11595_s8 + $0xd70] ss:$8 sps:$4 sm:$0xff]  }
 0x372   : > { %8084 = vmatpush1.bf16.msra.mxu0 %v11016_v48  ;;  %7429 = vmatprep.subr.bf16.mxu1 %v11021_v17  ;;  %v11100_v48 = vld [vmem:[%s11595_s8 + $0x1d70] ss:$8 sps:$4 sm:$0xff]   ;;  %v11105_v17 = vld [vmem:[%s11595_s8 + $0xd84] ss:$8 sps:$4 sm:$0xff]  }
 0x373   : > { %8085 = vmatprep.subr.bf16.mxu0 %v11024_v49  ;;  %v11108_v49 = vld [vmem:[%s11595_s8 + $0x1d84] ss:$8 sps:$4 sm:$0xff]  }
 0x375   : > { %7430 = vmatpush1.bf16.msra.mxu1 %v11019_v51  ;;  %v11103_v51 = vld [vmem:[%s11595_s8 + $0xd80] ss:$8 sps:$4 sm:$0xff]  }
 0x376   : > { %8086 = vmatpush1.bf16.msra.mxu0 %v11022_v52  ;;  %7431 = vmatprep.subr.bf16.mxu1 %v11027_v54  ;;  %v11106_v52 = vld [vmem:[%s11595_s8 + $0x1d80] ss:$8 sps:$4 sm:$0xff]   ;;  %v11111_v54 = vld [vmem:[%s11595_s8 + $0xd94] ss:$8 sps:$4 sm:$0xff]  }
 0x377   : > { %8087 = vmatprep.subr.bf16.mxu0 %v11030_v55  ;;  %v11114_v55 = vld [vmem:[%s11595_s8 + $0x1d94] ss:$8 sps:$4 sm:$0xff]  }
 0x379   : > { %7432 = vmatpush1.bf16.msra.mxu1 %v11025_v63  ;;  %v11109_v63 = vld [vmem:[%s11595_s8 + $0xd90] ss:$8 sps:$4 sm:$0xff]  }
 0x37a   : > { %8088 = vmatpush1.bf16.msra.mxu0 %v11028_v0  ;;  %7433 = vmatprep.subr.bf16.mxu1 %v11033_v41  ;;  %v11112_v0 = vld [vmem:[%s11595_s8 + $0x1d90] ss:$8 sps:$4 sm:$0xff]   ;;  %v11117_v41 = vld [vmem:[%s11595_s8 + $0xda4] ss:$8 sps:$4 sm:$0xff]  }
 0x37b   : > { %8089 = vmatprep.subr.bf16.mxu0 %v11036_v1  ;;  %v11120_v1 = vld [vmem:[%s11595_s8 + $0x1da4] ss:$8 sps:$4 sm:$0xff]  }
 0x37d   : > { %7434 = vmatpush1.bf16.msra.mxu1 %v11031_v47  ;;  %v11115_v47 = vld [vmem:[%s11595_s8 + $0xda0] ss:$8 sps:$4 sm:$0xff]  }
 0x37e   : > { %8090 = vmatpush1.bf16.msra.mxu0 %v11034_v3  ;;  %7435 = vmatprep.subr.bf16.mxu1 %v11039_v39  ;;  %v11118_v3 = vld [vmem:[%s11595_s8 + $0x1da0] ss:$8 sps:$4 sm:$0xff]   ;;  %v11123_v39 = vld [vmem:[%s11595_s8 + $0xdb4] ss:$8 sps:$4 sm:$0xff]  }
 0x37f   : > { %8091 = vmatprep.subr.bf16.mxu0 %v11042_v58  ;;  %v11126_v58 = vld [vmem:[%s11595_s8 + $0x1db4] ss:$8 sps:$4 sm:$0xff]  }
 0x381   : > { %7436 = vmatpush1.bf16.msra.mxu1 %v11037_v18  ;;  %v11121_v18 = vld [vmem:[%s11595_s8 + $0xdb0] ss:$8 sps:$4 sm:$0xff]  }
 0x382   : > { %8092 = vmatpush1.bf16.msra.mxu0 %v11040_v4  ;;  %7437 = vmatprep.subr.bf16.mxu1 %v11045_v5  ;;  %v11124_v4 = vld [vmem:[%s11595_s8 + $0x1db0] ss:$8 sps:$4 sm:$0xff]   ;;  %v11129_v5 = vld [vmem:[%s11595_s8 + $0xdc4] ss:$8 sps:$4 sm:$0xff]  }
 0x383   : > { %8093 = vmatprep.subr.bf16.mxu0 %v11048_v6  ;;  %v11132_v6 = vld [vmem:[%s11595_s8 + $0x1dc4] ss:$8 sps:$4 sm:$0xff]  }
 0x385   : > { %7438 = vmatpush1.bf16.msra.mxu1 %v11043_v7  ;;  %v11127_v7 = vld [vmem:[%s11595_s8 + $0xdc0] ss:$8 sps:$4 sm:$0xff]  }
 0x386   : > { %8094 = vmatpush1.bf16.msra.mxu0 %v11046_v8  ;;  %7439 = vmatprep.subr.bf16.mxu1 %v11051_v9  ;;  %v11130_v8 = vld [vmem:[%s11595_s8 + $0x1dc0] ss:$8 sps:$4 sm:$0xff]   ;;  %v11135_v9 = vld [vmem:[%s11595_s8 + $0xdd4] ss:$8 sps:$4 sm:$0xff]  }
 0x387   : > { %8095 = vmatprep.subr.bf16.mxu0 %v11054_v10  ;;  %v11138_v10 = vld [vmem:[%s11595_s8 + $0x1dd4] ss:$8 sps:$4 sm:$0xff]  }
 0x389   : > { %7440 = vmatpush1.bf16.msra.mxu1 %v11049_v62  ;;  %v11133_v62 = vld [vmem:[%s11595_s8 + $0xdd0] ss:$8 sps:$4 sm:$0xff]  }
 0x38a   : > { %8096 = vmatpush1.bf16.msra.mxu0 %v11052_v12  ;;  %7450 = vmatprep.subr.bf16.mxu1 %v11057_v19  ;;  %v11136_v12 = vld [vmem:[%s11595_s8 + $0x1dd0] ss:$8 sps:$4 sm:$0xff]   ;;  %v11141_v19 = vld [vmem:[%s11595_s8 + $0xde4] ss:$8 sps:$4 sm:$0xff]  }
 0x38b   : > { %8106 = vmatprep.subr.bf16.mxu0 %v11060_v20  ;;  %v11144_v20 = vld [vmem:[%s11595_s8 + $0x1de4] ss:$8 sps:$4 sm:$0xff]  }
 0x38c   : > { %7442 = vmatmul.mubr.bf16.vlgmr.msra.gmra.mrb[0].mxu1 %v12717_v21 }
 0x38d   : > { %8098 = vmatmul.mubr.bf16.vlgmr.msra.gmra.mrb[0].mxu0 %v12721_v22  ;;  %7451 = vmatpush1.bf16.msra.mxu1 %v11055_v2  ;;  %v1488_v2 = vcombine.high %v12614_v38, %v12614_v38  ;;  %v11145_v38 = vld [vmem:[%s11595_s8 + $0xdf0] ss:$8 sps:$4 sm:$0xff]  }
 0x38e   : > { %8107 = vmatpush1.bf16.msra.mxu0 %v11058_v24  ;;  %7452 = vmatprep.subr.bf16.mxu1 %v11063_v13  ;;  %v1684_v24 = vcombine.high %v12617_v40, %v12617_v40  ;;  %v11139_v13 = vld [vmem:[%s11595_s8 + $0xde0] ss:$8 sps:$4 sm:$0xff]   ;;  %v11148_v40 = vld [vmem:[%s11595_s8 + $0x1df0] ss:$8 sps:$4 sm:$0xff]  }
 0x38f   : > { %8108 = vmatprep.subr.bf16.mxu0 %v11066_v53  ;;  %7482 = vmatprep.mubr.bf16.mxu1 %v1535_v23  ;;  %v11142_v53 = vld [vmem:[%s11595_s8 + $0x1de0] ss:$8 sps:$4 sm:$0xff]   ;;  %v11147_v23 = vld [vmem:[%s11595_s8 + $0xdf4] ss:$8 sps:$4 sm:$0xff]  }
 0x390   : > { %8138 = vmatprep.mubr.bf16.mxu0 %v1731_v59  ;;  %v11150_v59 = vld [vmem:[%s11595_s8 + $0x1df4] ss:$8 sps:$4 sm:$0xff]  }
 0x391   : > { %7453 = vmatpush1.bf16.msra.mxu1 %v11061_v56  ;;  %v12794_v56 = vrot.slane %v1488_v2, %v11675_v50  ;;  %v11217_v2 = vld [vmem:[%s11595_s8 + $0xeb0] ss:$8 sps:$4 sm:$0xff]  }
 0x392   : > { %8109 = vmatpush1.bf16.msra.mxu0 %v11064_v57  ;;  %7454 = vmatprep.subr.bf16.mxu1 %v11069_v11  ;;  %v12797_v57 = vrot.slane %v1684_v24, %v11675_v50  ;;  %v11153_v11 = vld [vmem:[%s11595_s8 + $0xe04] ss:$8 sps:$4 sm:$0xff]   ;;  %v11220_v24 = vld [vmem:[%s11595_s8 + $0x1eb0] ss:$8 sps:$4 sm:$0xff]  }
 0x393   : > { %8110 = vmatprep.subr.bf16.mxu0 %v11072_v27  ;;  %v11156_v27 = vld [vmem:[%s11595_s8 + $0x1e04] ss:$8 sps:$4 sm:$0xff]  }
 0x395   : > { %7455 = vmatpush1.bf16.msra.mxu1 %v11067_v61  ;;  %v1504_v61 = vcombine.high %v12794_v56, %v12794_v56 }
 0x396   : > { %8111 = vmatpush1.bf16.msra.mxu0 %v11070_v28  ;;  %7456 = vmatprep.subr.bf16.mxu1 %v11075_v29  ;;  %v1700_v28 = vcombine.high %v12797_v57, %v12797_v57  ;;  %v1533_v29 = vcombine.high %v12717_v21, %v12717_v21 }
 0x397   : > { %8112 = vmatprep.subr.bf16.mxu0 %v11078_v30  ;;  %v1729_v30 = vcombine.high %v12721_v22, %v12721_v22  ;;  %v11157_v22 = vld [vmem:[%s11595_s8 + $0xe10] ss:$8 sps:$4 sm:$0xff]  }
 0x398   : > { %v12819_v21 = vrot.slane %v1700_v28, %v11675_v50  ;;  %v11240_v28 = vld [vmem:[%s11595_s8 + $0x1ee4] ss:$8 sps:$4 sm:$0xff]  }
 0x399   : > { %7457 = vmatpush1.bf16.msra.mxu1 %v11073_v31  ;;  %v11151_v31 = vld [vmem:[%s11595_s8 + $0xe00] ss:$8 sps:$4 sm:$0xff]  }
 0x39a   : > { %8113 = vmatpush1.bf16.msra.mxu0 %v11076_v32  ;;  %7458 = vmatprep.subr.bf16.mxu1 %v11081_v16  ;;  %v11154_v32 = vld [vmem:[%s11595_s8 + $0x1e00] ss:$8 sps:$4 sm:$0xff]   ;;  %v11159_v16 = vld [vmem:[%s11595_s8 + $0xe14] ss:$8 sps:$4 sm:$0xff]  }
 0x39b   : > { %8114 = vmatprep.subr.bf16.mxu0 %v11084_v34  ;;  %v11162_v34 = vld [vmem:[%s11595_s8 + $0x1e14] ss:$8 sps:$4 sm:$0xff]  }
 0x39d   : > { %7459 = vmatpush1.bf16.msra.mxu1 %v11079_v35  ;;  %v12816_v35 = vrot.slane %v1504_v61, %v11675_v50  ;;  %v11237_v61 = vld [vmem:[%s11595_s8 + $0xee4] ss:$8 sps:$4 sm:$0xff]  }
 0x39e   : > { %8115 = vmatpush1.bf16.msra.mxu0 %v11082_v36  ;;  %7460 = vmatprep.subr.bf16.mxu1 %v11087_v43  ;;  %v11160_v36 = vld [vmem:[%s11595_s8 + $0x1e10] ss:$8 sps:$4 sm:$0xff]   ;;  %v11165_v43 = vld [vmem:[%s11595_s8 + $0xe24] ss:$8 sps:$4 sm:$0xff]  }
 0x39f   : > { %8116 = vmatprep.subr.bf16.mxu0 %v11090_v45  ;;  %v11168_v45 = vld [vmem:[%s11595_s8 + $0x1e24] ss:$8 sps:$4 sm:$0xff]  }
 0x3a1   : > { %7461 = vmatpush1.bf16.msra.mxu1 %v11085_v25  ;;  %v11163_v25 = vld [vmem:[%s11595_s8 + $0xe20] ss:$8 sps:$4 sm:$0xff]  }
 0x3a2   : > { %8117 = vmatpush1.bf16.msra.mxu0 %v11088_v46  ;;  %7462 = vmatprep.subr.bf16.mxu1 %v11093_v42  ;;  %v11166_v46 = vld [vmem:[%s11595_s8 + $0x1e20] ss:$8 sps:$4 sm:$0xff]   ;;  %v11171_v42 = vld [vmem:[%s11595_s8 + $0xe34] ss:$8 sps:$4 sm:$0xff]  }
 0x3a3   : > { %8118 = vmatprep.subr.bf16.mxu0 %v11096_v26  ;;  %v11174_v26 = vld [vmem:[%s11595_s8 + $0x1e34] ss:$8 sps:$4 sm:$0xff]  }
 0x3a5   : > { %7463 = vmatpush1.bf16.msra.mxu1 %v11091_v60  ;;  %v11169_v60 = vld [vmem:[%s11595_s8 + $0xe30] ss:$8 sps:$4 sm:$0xff]  }
 0x3a6   : > { %8119 = vmatpush1.bf16.msra.mxu0 %v11094_v14  ;;  %7464 = vmatprep.subr.bf16.mxu1 %v11099_v33  ;;  %v11172_v14 = vld [vmem:[%s11595_s8 + $0x1e30] ss:$8 sps:$4 sm:$0xff]   ;;  %v11177_v33 = vld [vmem:[%s11595_s8 + $0xe44] ss:$8 sps:$4 sm:$0xff]  }
 0x3a7   : > { %8120 = vmatprep.subr.bf16.mxu0 %v11102_v37  ;;  %v11180_v37 = vld [vmem:[%s11595_s8 + $0x1e44] ss:$8 sps:$4 sm:$0xff]  }
 0x3a9   : > { %7465 = vmatpush1.bf16.msra.mxu1 %v11097_v15  ;;  %v11175_v15 = vld [vmem:[%s11595_s8 + $0xe40] ss:$8 sps:$4 sm:$0xff]  }
 0x3aa   : > { %8121 = vmatpush1.bf16.msra.mxu0 %v11100_v48  ;;  %7466 = vmatprep.subr.bf16.mxu1 %v11105_v17  ;;  %v11178_v48 = vld [vmem:[%s11595_s8 + $0x1e40] ss:$8 sps:$4 sm:$0xff]   ;;  %v11183_v17 = vld [vmem:[%s11595_s8 + $0xe54] ss:$8 sps:$4 sm:$0xff]  }
 0x3ab   : > { %8122 = vmatprep.subr.bf16.mxu0 %v11108_v49  ;;  %v11186_v49 = vld [vmem:[%s11595_s8 + $0x1e54] ss:$8 sps:$4 sm:$0xff]  }
 0x3ad   : > { %7467 = vmatpush1.bf16.msra.mxu1 %v11103_v51  ;;  %v11181_v51 = vld [vmem:[%s11595_s8 + $0xe50] ss:$8 sps:$4 sm:$0xff]  }
 0x3ae   : > { %8123 = vmatpush1.bf16.msra.mxu0 %v11106_v52  ;;  %7468 = vmatprep.subr.bf16.mxu1 %v11111_v54  ;;  %v11184_v52 = vld [vmem:[%s11595_s8 + $0x1e50] ss:$8 sps:$4 sm:$0xff]   ;;  %v11189_v54 = vld [vmem:[%s11595_s8 + $0xe64] ss:$8 sps:$4 sm:$0xff]  }
 0x3af   : > { %8124 = vmatprep.subr.bf16.mxu0 %v11114_v55  ;;  %v11192_v55 = vld [vmem:[%s11595_s8 + $0x1e64] ss:$8 sps:$4 sm:$0xff]  }
 0x3b1   : > { %7469 = vmatpush1.bf16.msra.mxu1 %v11109_v63  ;;  %v11187_v63 = vld [vmem:[%s11595_s8 + $0xe60] ss:$8 sps:$4 sm:$0xff]  }
 0x3b2   : > { %8125 = vmatpush1.bf16.msra.mxu0 %v11112_v0  ;;  %7470 = vmatprep.subr.bf16.mxu1 %v11117_v41  ;;  %v11190_v0 = vld [vmem:[%s11595_s8 + $0x1e60] ss:$8 sps:$4 sm:$0xff]   ;;  %v11195_v41 = vld [vmem:[%s11595_s8 + $0xe74] ss:$8 sps:$4 sm:$0xff]  }
 0x3b3   : > { %8126 = vmatprep.subr.bf16.mxu0 %v11120_v1  ;;  %v11198_v1 = vld [vmem:[%s11595_s8 + $0x1e74] ss:$8 sps:$4 sm:$0xff]  }
 0x3b5   : > { %7471 = vmatpush1.bf16.msra.mxu1 %v11115_v47  ;;  %v11193_v47 = vld [vmem:[%s11595_s8 + $0xe70] ss:$8 sps:$4 sm:$0xff]  }
 0x3b6   : > { %8127 = vmatpush1.bf16.msra.mxu0 %v11118_v3  ;;  %7472 = vmatprep.subr.bf16.mxu1 %v11123_v39  ;;  %v11196_v3 = vld [vmem:[%s11595_s8 + $0x1e70] ss:$8 sps:$4 sm:$0xff]   ;;  %v11201_v39 = vld [vmem:[%s11595_s8 + $0xe84] ss:$8 sps:$4 sm:$0xff]  }
 0x3b7   : > { %8128 = vmatprep.subr.bf16.mxu0 %v11126_v58  ;;  %v11204_v58 = vld [vmem:[%s11595_s8 + $0x1e84] ss:$8 sps:$4 sm:$0xff]  }
 0x3b9   : > { %7473 = vmatpush1.bf16.msra.mxu1 %v11121_v18  ;;  %v11199_v18 = vld [vmem:[%s11595_s8 + $0xe80] ss:$8 sps:$4 sm:$0xff]  }
 0x3ba   : > { %8129 = vmatpush1.bf16.msra.mxu0 %v11124_v4  ;;  %7474 = vmatprep.subr.bf16.mxu1 %v11129_v5  ;;  %v11202_v4 = vld [vmem:[%s11595_s8 + $0x1e80] ss:$8 sps:$4 sm:$0xff]   ;;  %v11207_v5 = vld [vmem:[%s11595_s8 + $0xe94] ss:$8 sps:$4 sm:$0xff]  }
 0x3bb   : > { %8130 = vmatprep.subr.bf16.mxu0 %v11132_v6  ;;  %v11210_v6 = vld [vmem:[%s11595_s8 + $0x1e94] ss:$8 sps:$4 sm:$0xff]  }
 0x3bd   : > { %7475 = vmatpush1.bf16.msra.mxu1 %v11127_v7  ;;  %v11205_v7 = vld [vmem:[%s11595_s8 + $0xe90] ss:$8 sps:$4 sm:$0xff]  }
 0x3be   : > { %8131 = vmatpush1.bf16.msra.mxu0 %v11130_v8  ;;  %7476 = vmatprep.subr.bf16.mxu1 %v11135_v9  ;;  %v11208_v8 = vld [vmem:[%s11595_s8 + $0x1e90] ss:$8 sps:$4 sm:$0xff]   ;;  %v11213_v9 = vld [vmem:[%s11595_s8 + $0xea4] ss:$8 sps:$4 sm:$0xff]  }
 0x3bf   : > { %8132 = vmatprep.subr.bf16.mxu0 %v11138_v10  ;;  %v11216_v10 = vld [vmem:[%s11595_s8 + $0x1ea4] ss:$8 sps:$4 sm:$0xff]  }
 0x3c1   : > { %7477 = vmatpush1.bf16.msra.mxu1 %v11133_v62  ;;  %v11211_v62 = vld [vmem:[%s11595_s8 + $0xea0] ss:$8 sps:$4 sm:$0xff]  }
 0x3c2   : > { %8133 = vmatpush1.bf16.msra.mxu0 %v11136_v12  ;;  %7478 = vmatprep.subr.bf16.mxu1 %v11141_v19  ;;  %v11214_v12 = vld [vmem:[%s11595_s8 + $0x1ea0] ss:$8 sps:$4 sm:$0xff]   ;;  %v11219_v19 = vld [vmem:[%s11595_s8 + $0xeb4] ss:$8 sps:$4 sm:$0xff]  }
 0x3c3   : > { %8134 = vmatprep.subr.bf16.mxu0 %v11144_v20  ;;  %v11222_v20 = vld [vmem:[%s11595_s8 + $0x1eb4] ss:$8 sps:$4 sm:$0xff]  }
 0x3c5   : > { %7479 = vmatpush1.bf16.msra.mxu1 %v11139_v13  ;;  %v11225_v13 = vld [vmem:[%s11595_s8 + $0xec4] ss:$8 sps:$4 sm:$0xff]  }
 0x3c6   : > { %8135 = vmatpush1.bf16.msra.mxu0 %v11142_v53  ;;  %7480 = vmatprep.subr.bf16.mxu1 %v11147_v23  ;;  %v11228_v53 = vld [vmem:[%s11595_s8 + $0x1ec4] ss:$8 sps:$4 sm:$0xff]   ;;  %v11223_v23 = vld [vmem:[%s11595_s8 + $0xec0] ss:$8 sps:$4 sm:$0xff]  }
 0x3c7   : > { %8136 = vmatprep.subr.bf16.mxu0 %v11150_v59  ;;  %v11226_v59 = vld [vmem:[%s11595_s8 + $0x1ec0] ss:$8 sps:$4 sm:$0xff]  }
 0x3c9   : > { %7481 = vmatpush1.bf16.msra.mxu1 %v11145_v38  ;;  %v11231_v38 = vld [vmem:[%s11595_s8 + $0xed4] ss:$8 sps:$4 sm:$0xff]  }
 0x3ca   : > { %8137 = vmatpush1.bf16.msra.mxu0 %v11148_v40  ;;  %7491 = vmatprep.subr.bf16.mxu1 %v11153_v11  ;;  %v11234_v40 = vld [vmem:[%s11595_s8 + $0x1ed4] ss:$8 sps:$4 sm:$0xff]   ;;  %v11229_v11 = vld [vmem:[%s11595_s8 + $0xed0] ss:$8 sps:$4 sm:$0xff]  }
 0x3cb   : > { %8147 = vmatprep.subr.bf16.mxu0 %v11156_v27  ;;  %v11232_v27 = vld [vmem:[%s11595_s8 + $0x1ed0] ss:$8 sps:$4 sm:$0xff]  }
 0x3cc   : > { %7483 = vmatmul.mubr.bf16.vlgmr.msra.gmra.mrb[0].mxu1 %v1533_v29  ;;  %v11235_v29 = vld [vmem:[%s11595_s8 + $0xee0] ss:$8 sps:$4 sm:$0xff]  }
 0x3cd   : > { %8139 = vmatmul.mubr.bf16.vlgmr.msra.gmra.mrb[0].mxu0 %v1729_v30  ;;  %7492 = vmatpush1.bf16.msra.mxu1 %v11151_v31  ;;  %v11238_v30 = vld [vmem:[%s11595_s8 + $0x1ee0] ss:$8 sps:$4 sm:$0xff]   ;;  %v11243_v31 = vld [vmem:[%s11595_s8 + $0xef4] ss:$8 sps:$4 sm:$0xff]  }
 0x3ce   : > { %8148 = vmatpush1.bf16.msra.mxu0 %v11154_v32  ;;  %7493 = vmatprep.subr.bf16.mxu1 %v11159_v16  ;;  %v11246_v32 = vld [vmem:[%s11595_s8 + $0x1ef4] ss:$8 sps:$4 sm:$0xff]   ;;  %v11241_v16 = vld [vmem:[%s11595_s8 + $0xef0] ss:$8 sps:$4 sm:$0xff]  }
 0x3cf   : > { %8149 = vmatprep.subr.bf16.mxu0 %v11162_v34  ;;  %7523 = vmatprep.mubr.bf16.mxu1 %v12816_v35  ;;  %v11244_v34 = vld [vmem:[%s11595_s8 + $0x1ef0] ss:$8 sps:$4 sm:$0xff]  }
 0x3d0   : > { %8179 = vmatprep.mubr.bf16.mxu0 %v12819_v21 }
 0x3d1   : > { %7494 = vmatpush1.bf16.msra.mxu1 %v11157_v22  ;;  %v11250_v22 = vld [vmem:[%s11595_s8 + $0xf04] ss:$8 sps:$4 sm:$0xff]  }
 0x3d2   : > { %8150 = vmatpush1.bf16.msra.mxu0 %v11160_v36  ;;  %7495 = vmatprep.subr.bf16.mxu1 %v11165_v43  ;;  %v11254_v36 = vld [vmem:[%s11595_s8 + $0x1f04] ss:$8 sps:$4 sm:$0xff]   ;;  %v12885_v43 = vrot.slane %v12794_v56, %v11675_v50  ;;  %v1536_v56 = vcombine.high %v12816_v35, %v12816_v35 }
 0x3d3   : > { %8151 = vmatprep.subr.bf16.mxu0 %v11168_v45  ;;  %v12889_v45 = vrot.slane %v12797_v57, %v11675_v50  ;;  %v11255_v50 = vld [vmem:[%s11595_s8 + $0xf10] ss:$8 sps:$4 sm:$0xff]   ;;  %v11263_v35 = vld [vmem:[%s11595_s8 + $0xf24] ss:$8 sps:$4 sm:$0xff]  }
 0x3d4   : > { %v11258_v57 = vld [vmem:[%s11595_s8 + $0x1f10] ss:$8 sps:$4 sm:$0xff]  }
 0x3d5   : > { %7496 = vmatpush1.bf16.msra.mxu1 %v11163_v25  ;;  %v11248_v25 = vld [vmem:[%s11595_s8 + $0xf00] ss:$8 sps:$4 sm:$0xff]  }
 0x3d6   : > { %8152 = vmatpush1.bf16.msra.mxu0 %v11166_v46  ;;  %7497 = vmatprep.subr.bf16.mxu1 %v11171_v42  ;;  %v11252_v46 = vld [vmem:[%s11595_s8 + $0x1f00] ss:$8 sps:$4 sm:$0xff]   ;;  %v11257_v42 = vld [vmem:[%s11595_s8 + $0xf14] ss:$8 sps:$4 sm:$0xff]  }
 0x3d7   : > { %8153 = vmatprep.subr.bf16.mxu0 %v11174_v26  ;;  %v11260_v26 = vld [vmem:[%s11595_s8 + $0x1f14] ss:$8 sps:$4 sm:$0xff]  }
 0x3d9   : > { %7498 = vmatpush1.bf16.msra.mxu1 %v11169_v60  ;;  %v1732_v60 = vcombine.high %v12819_v21, %v12819_v21  ;;  %v11261_v21 = vld [vmem:[%s11595_s8 + $0xf20] ss:$8 sps:$4 sm:$0xff]  }
 0x3da   : > { %8154 = vmatpush1.bf16.msra.mxu0 %v11172_v14  ;;  %7499 = vmatprep.subr.bf16.mxu1 %v11177_v33  ;;  %v11266_v14 = vld [vmem:[%s11595_s8 + $0x1f24] ss:$8 sps:$4 sm:$0xff]   ;;  %v11264_v33 = vld [vmem:[%s11595_s8 + $0x1f20] ss:$8 sps:$4 sm:$0xff]  }
 0x3db   : > { %8155 = vmatprep.subr.bf16.mxu0 %v11180_v37  ;;  %v11269_v37 = vld [vmem:[%s11595_s8 + $0xf34] ss:$8 sps:$4 sm:$0xff]  }
 0x3dd   : > { %7500 = vmatpush1.bf16.msra.mxu1 %v11175_v15  ;;  %v11272_v15 = vld [vmem:[%s11595_s8 + $0x1f34] ss:$8 sps:$4 sm:$0xff]  }
 0x3de   : > { %8156 = vmatpush1.bf16.msra.mxu0 %v11178_v48  ;;  %7501 = vmatprep.subr.bf16.mxu1 %v11183_v17  ;;  %v11267_v48 = vld [vmem:[%s11595_s8 + $0xf30] ss:$8 sps:$4 sm:$0xff]  }
 0x3df   : > { %8157 = vmatprep.subr.bf16.mxu0 %v11186_v49  ;;  %v11270_v17 = vld [vmem:[%s11595_s8 + $0x1f30] ss:$8 sps:$4 sm:$0xff]   ;;  %v11275_v49 = vld [vmem:[%s11595_s8 + $0xf44] ss:$8 sps:$4 sm:$0xff]  }
 0x3e1   : > { %7502 = vmatpush1.bf16.msra.mxu1 %v11181_v51  ;;  %v11278_v51 = vld [vmem:[%s11595_s8 + $0x1f44] ss:$8 sps:$4 sm:$0xff]  }
 0x3e2   : > { %8158 = vmatpush1.bf16.msra.mxu0 %v11184_v52  ;;  %7503 = vmatprep.subr.bf16.mxu1 %v11189_v54  ;;  %v11273_v52 = vld [vmem:[%s11595_s8 + $0xf40] ss:$8 sps:$4 sm:$0xff]  }
 0x3e3   : > { %8159 = vmatprep.subr.bf16.mxu0 %v11192_v55  ;;  %v11276_v54 = vld [vmem:[%s11595_s8 + $0x1f40] ss:$8 sps:$4 sm:$0xff]   ;;  %v11281_v55 = vld [vmem:[%s11595_s8 + $0xf54] ss:$8 sps:$4 sm:$0xff]  }
 0x3e5   : > { %7504 = vmatpush1.bf16.msra.mxu1 %v11187_v63  ;;  %v11284_v63 = vld [vmem:[%s11595_s8 + $0x1f54] ss:$8 sps:$4 sm:$0xff]  }
 0x3e6   : > { %8160 = vmatpush1.bf16.msra.mxu0 %v11190_v0  ;;  %7505 = vmatprep.subr.bf16.mxu1 %v11195_v41  ;;  %v11279_v0 = vld [vmem:[%s11595_s8 + $0xf50] ss:$8 sps:$4 sm:$0xff]  }
 0x3e7   : > { %8161 = vmatprep.subr.bf16.mxu0 %v11198_v1  ;;  %v11282_v41 = vld [vmem:[%s11595_s8 + $0x1f50] ss:$8 sps:$4 sm:$0xff]   ;;  %v11287_v1 = vld [vmem:[%s11595_s8 + $0xf64] ss:$8 sps:$4 sm:$0xff]  }
 0x3e9   : > { %7506 = vmatpush1.bf16.msra.mxu1 %v11193_v47  ;;  %v11290_v47 = vld [vmem:[%s11595_s8 + $0x1f64] ss:$8 sps:$4 sm:$0xff]  }
 0x3ea   : > { %8162 = vmatpush1.bf16.msra.mxu0 %v11196_v3  ;;  %7507 = vmatprep.subr.bf16.mxu1 %v11201_v39  ;;  %v11285_v3 = vld [vmem:[%s11595_s8 + $0xf60] ss:$8 sps:$4 sm:$0xff]  }
 0x3eb   : > { %8163 = vmatprep.subr.bf16.mxu0 %v11204_v58  ;;  %v11288_v39 = vld [vmem:[%s11595_s8 + $0x1f60] ss:$8 sps:$4 sm:$0xff]   ;;  %v11293_v58 = vld [vmem:[%s11595_s8 + $0xf74] ss:$8 sps:$4 sm:$0xff]  }
 0x3ed   : > { %7508 = vmatpush1.bf16.msra.mxu1 %v11199_v18  ;;  %v11296_v18 = vld [vmem:[%s11595_s8 + $0x1f74] ss:$8 sps:$4 sm:$0xff]  }
 0x3ee   : > { %8164 = vmatpush1.bf16.msra.mxu0 %v11202_v4  ;;  %7509 = vmatprep.subr.bf16.mxu1 %v11207_v5  ;;  %v11291_v4 = vld [vmem:[%s11595_s8 + $0xf70] ss:$8 sps:$4 sm:$0xff]  }
 0x3ef   : > { %8165 = vmatprep.subr.bf16.mxu0 %v11210_v6  ;;  %v11294_v5 = vld [vmem:[%s11595_s8 + $0x1f70] ss:$8 sps:$4 sm:$0xff]   ;;  %v11299_v6 = vld [vmem:[%s11595_s8 + $0xf84] ss:$8 sps:$4 sm:$0xff]  }
 0x3f1   : > { %7510 = vmatpush1.bf16.msra.mxu1 %v11205_v7  ;;  %v11302_v7 = vld [vmem:[%s11595_s8 + $0x1f84] ss:$8 sps:$4 sm:$0xff]  }
 0x3f2   : > { %8166 = vmatpush1.bf16.msra.mxu0 %v11208_v8  ;;  %7511 = vmatprep.subr.bf16.mxu1 %v11213_v9  ;;  %v11297_v8 = vld [vmem:[%s11595_s8 + $0xf80] ss:$8 sps:$4 sm:$0xff]  }
 0x3f3   : > { %8167 = vmatprep.subr.bf16.mxu0 %v11216_v10  ;;  %v11300_v9 = vld [vmem:[%s11595_s8 + $0x1f80] ss:$8 sps:$4 sm:$0xff]   ;;  %v11305_v10 = vld [vmem:[%s11595_s8 + $0xf94] ss:$8 sps:$4 sm:$0xff]  }
 0x3f5   : > { %7512 = vmatpush1.bf16.msra.mxu1 %v11211_v62  ;;  %v11308_v62 = vld [vmem:[%s11595_s8 + $0x1f94] ss:$8 sps:$4 sm:$0xff]  }
 0x3f6   : > { %8168 = vmatpush1.bf16.msra.mxu0 %v11214_v12  ;;  %7513 = vmatprep.subr.bf16.mxu1 %v11219_v19  ;;  %v11303_v12 = vld [vmem:[%s11595_s8 + $0xf90] ss:$8 sps:$4 sm:$0xff]  }
 0x3f7   : > { %8169 = vmatprep.subr.bf16.mxu0 %v11222_v20  ;;  %v11306_v19 = vld [vmem:[%s11595_s8 + $0x1f90] ss:$8 sps:$4 sm:$0xff]   ;;  %v11311_v20 = vld [vmem:[%s11595_s8 + $0xfa4] ss:$8 sps:$4 sm:$0xff]  }
 0x3f9   : > { %7514 = vmatpush1.bf16.msra.mxu1 %v11217_v2  ;;  %v11314_v2 = vld [vmem:[%s11595_s8 + $0x1fa4] ss:$8 sps:$4 sm:$0xff]  }
 0x3fa   : > { %8170 = vmatpush1.bf16.msra.mxu0 %v11220_v24  ;;  %7515 = vmatprep.subr.bf16.mxu1 %v11225_v13  ;;  %v11309_v24 = vld [vmem:[%s11595_s8 + $0xfa0] ss:$8 sps:$4 sm:$0xff]  }
 0x3fb   : > { %8171 = vmatprep.subr.bf16.mxu0 %v11228_v53  ;;  %v11312_v13 = vld [vmem:[%s11595_s8 + $0x1fa0] ss:$8 sps:$4 sm:$0xff]   ;;  %v11317_v53 = vld [vmem:[%s11595_s8 + $0xfb4] ss:$8 sps:$4 sm:$0xff]  }
 0x3fd   : > { %7516 = vmatpush1.bf16.msra.mxu1 %v11223_v23  ;;  %v11320_v23 = vld [vmem:[%s11595_s8 + $0x1fb4] ss:$8 sps:$4 sm:$0xff]  }
 0x3fe   : > { %8172 = vmatpush1.bf16.msra.mxu0 %v11226_v59  ;;  %7517 = vmatprep.subr.bf16.mxu1 %v11231_v38  ;;  %v11315_v59 = vld [vmem:[%s11595_s8 + $0xfb0] ss:$8 sps:$4 sm:$0xff]  }
 0x3ff   : > { %8173 = vmatprep.subr.bf16.mxu0 %v11234_v40  ;;  %v11318_v38 = vld [vmem:[%s11595_s8 + $0x1fb0] ss:$8 sps:$4 sm:$0xff]   ;;  %v11323_v40 = vld [vmem:[%s11595_s8 + $0xfc4] ss:$8 sps:$4 sm:$0xff]  }
 0x401   : > { %7518 = vmatpush1.bf16.msra.mxu1 %v11229_v11  ;;  %v11326_v11 = vld [vmem:[%s11595_s8 + $0x1fc4] ss:$8 sps:$4 sm:$0xff]  }
 0x402   : > { %8174 = vmatpush1.bf16.msra.mxu0 %v11232_v27  ;;  %7519 = vmatprep.subr.bf16.mxu1 %v11237_v61  ;;  %v11321_v27 = vld [vmem:[%s11595_s8 + $0xfc0] ss:$8 sps:$4 sm:$0xff]  }
 0x403   : > { %8175 = vmatprep.subr.bf16.mxu0 %v11240_v28  ;;  %v11324_v61 = vld [vmem:[%s11595_s8 + $0x1fc0] ss:$8 sps:$4 sm:$0xff]   ;;  %v11329_v28 = vld [vmem:[%s11595_s8 + $0xfd4] ss:$8 sps:$4 sm:$0xff]  }
 0x405   : > { %7520 = vmatpush1.bf16.msra.mxu1 %v11235_v29  ;;  %v11332_v29 = vld [vmem:[%s11595_s8 + $0x1fd4] ss:$8 sps:$4 sm:$0xff]  }
 0x406   : > { %8176 = vmatpush1.bf16.msra.mxu0 %v11238_v30  ;;  %7521 = vmatprep.subr.bf16.mxu1 %v11243_v31  ;;  %v11327_v30 = vld [vmem:[%s11595_s8 + $0xfd0] ss:$8 sps:$4 sm:$0xff]  }
 0x407   : > { %8177 = vmatprep.subr.bf16.mxu0 %v11246_v32  ;;  %v11330_v31 = vld [vmem:[%s11595_s8 + $0x1fd0] ss:$8 sps:$4 sm:$0xff]   ;;  %v11335_v32 = vld [vmem:[%s11595_s8 + $0xfe4] ss:$8 sps:$4 sm:$0xff]  }
 0x409   : > { %7522 = vmatpush1.bf16.msra.mxu1 %v11241_v16  ;;  %v11338_v16 = vld [vmem:[%s11595_s8 + $0x1fe4] ss:$8 sps:$4 sm:$0xff]  }
 0x40a   : > { %8178 = vmatpush1.bf16.msra.mxu0 %v11244_v34  ;;  %7532 = vmatprep.subr.bf16.mxu1 %v11250_v22  ;;  %v11333_v34 = vld [vmem:[%s11595_s8 + $0xfe0] ss:$8 sps:$4 sm:$0xff]  }
 0x40b   : > { %8188 = vmatprep.subr.bf16.mxu0 %v11254_v36  ;;  %v11336_v22 = vld [vmem:[%s11595_s8 + $0x1fe0] ss:$8 sps:$4 sm:$0xff]   ;;  %v11341_v36 = vld [vmem:[%s11595_s8 + $0xff4] ss:$8 sps:$4 sm:$0xff]  }
 0x40c   : > { %7524 = vmatmul.mubr.bf16.vlgmr.msra.gmra.mrb[0].mxu1 %v12885_v43 }
 0x40d   : > { %8180 = vmatmul.mubr.bf16.vlgmr.msra.gmra.mrb[0].mxu0 %v12889_v45  ;;  %7533 = vmatpush1.bf16.msra.mxu1 %v11248_v25  ;;  %v11344_v25 = vld [vmem:[%s11595_s8 + $0x1ff4] ss:$8 sps:$4 sm:$0xff]  }
 0x40e   : > { %8189 = vmatpush1.bf16.msra.mxu0 %v11252_v46  ;;  %7534 = vmatprep.subr.bf16.mxu1 %v11257_v42  ;;  %v11339_v46 = vld [vmem:[%s11595_s8 + $0xff0] ss:$8 sps:$4 sm:$0xff]  }
 0x40f   : > { %8190 = vmatprep.subr.bf16.mxu0 %v11260_v26  ;;  %7564 = vmatprep.mubr.bf16.mxu1 %v1536_v56  ;;  %v11342_v42 = vld [vmem:[%s11595_s8 + $0x1ff0] ss:$8 sps:$4 sm:$0xff]   ;;  %v1534_v26 = vcombine.high %v12885_v43, %v12885_v43  ;;  %v1730_v56 = vcombine.high %v12889_v45, %v12889_v45 }
 0x410   : > { %8220 = vmatprep.mubr.bf16.mxu0 %v1732_v60  ;;  %v11453_v60 = vmov 1983009808  }
 0x411   : > { %7535 = vmatpush1.bf16.msra.mxu1 %v11255_v50  ;;  %v8233_v50 = vunpack.c.l.s4 %v11453_v60 }
 0x412   : > { %8191 = vmatpush1.bf16.msra.mxu0 %v11258_v57  ;;  %7536 = vmatprep.subr.bf16.mxu1 %v11263_v35 }
 0x413   : > { %8192 = vmatprep.subr.bf16.mxu0 %v11266_v14  ;;  %v8234_v57 = vunpack.c.0.s8 %v8233_v50 }
 0x415   : > { %7537 = vmatpush1.bf16.msra.mxu1 %v11261_v21 }
 0x416   : > { %8193 = vmatpush1.bf16.msra.mxu0 %v11264_v33  ;;  %7538 = vmatprep.subr.bf16.mxu1 %v11269_v37 }
 0x417   : > { %8194 = vmatprep.subr.bf16.mxu0 %v11272_v15 }
 0x419   : > { %7539 = vmatpush1.bf16.msra.mxu1 %v11267_v48  ;;  %v12964_v48 = vsub.s32 %v8234_v57, %v11667_v44 }
 0x41a   : > { %8195 = vmatpush1.bf16.msra.mxu0 %v11270_v17  ;;  %7540 = vmatprep.subr.bf16.mxu1 %v11275_v49 }
 0x41b   : > { %8196 = vmatprep.subr.bf16.mxu0 %v11278_v51 }
 0x41d   : > { %7541 = vmatpush1.bf16.msra.mxu1 %v11273_v52  ;;  %v300_v52 = vld [vmem:[#allocation2] sm:$0xf] }
 0x41e   : > { %8197 = vmatpush1.bf16.msra.mxu0 %v11276_v54  ;;  %7542 = vmatprep.subr.bf16.mxu1 %v11281_v55 }
 0x41f   : > { %8198 = vmatprep.subr.bf16.mxu0 %v11284_v63  ;;  %v8283_v63 = vld [vmem:[%s11620_s30 + $0x80] sm:$0xff] (!%p9531_p9) }
 0x421   : > { %7543 = vmatpush1.bf16.msra.mxu1 %v11279_v0  ;;  %v8284_v0 = vld [vmem:[%s11620_s30 + $0x88] sm:$0xff] (!%p9531_p9) }
 0x422   : > { %8199 = vmatpush1.bf16.msra.mxu0 %v11282_v41  ;;  %7544 = vmatprep.subr.bf16.mxu1 %v11287_v1  ;;  %v8267_v41 = vld [vmem:[%s11620_s30] sm:$0xff] (!%p9531_p9)  ;;  %v9570_v1 = vpack.c.bf16 (!%p9531_p9), %v8284_v0, %v8283_v63 }
 0x423   : > { %8200 = vmatprep.subr.bf16.mxu0 %v11290_v47  ;;  %v8268_v47 = vld [vmem:[%s11620_s30 + $0x8] sm:$0xff] (!%p9531_p9) }
 0x425   : > { %7545 = vmatpush1.bf16.msra.mxu1 %v11285_v3  ;;  %v8285_v3 = vld [vmem:[%s11620_s30 + $0x90] sm:$0xff] (!%p9531_p9) }
 0x426   : > { %8201 = vmatpush1.bf16.msra.mxu0 %v11288_v39  ;;  %7546 = vmatprep.subr.bf16.mxu1 %v11293_v58  ;;  %v8286_v39 = vld [vmem:[%s11620_s30 + $0x98] sm:$0xff] (!%p9531_p9)  ;;  %v9572_v58 = vpack.c.bf16 (!%p9531_p9), %v8268_v47, %v8267_v41 }
 0x427   : > { %8202 = vmatprep.subr.bf16.mxu0 %v11296_v18  ;;  %v9574_v18 = vpack.c.bf16 (!%p9531_p9), %v8286_v39, %v8285_v3 }
 0x429   : > { %7547 = vmatpush1.bf16.msra.mxu1 %v11291_v4  ;;  %v8269_v4 = vld [vmem:[%s11620_s30 + $0x10] sm:$0xff] (!%p9531_p9) }
 0x42a   : > { %8203 = vmatpush1.bf16.msra.mxu0 %v11294_v5  ;;  %7548 = vmatprep.subr.bf16.mxu1 %v11299_v6  ;;  %v8270_v5 = vld [vmem:[%s11620_s30 + $0x18] sm:$0xff] (!%p9531_p9)  ;;  %v8287_v6 = vld [vmem:[%s11620_s30 + $0xa0] sm:$0xff] (!%p9531_p9) }
 0x42b   : > { %8204 = vmatprep.subr.bf16.mxu0 %v11302_v7  ;;  %v8288_v7 = vld [vmem:[%s11620_s30 + $0xa8] sm:$0xff] (!%p9531_p9) }
 0x42d   : > { %7549 = vmatpush1.bf16.msra.mxu1 %v11297_v8  ;;  %v9576_v8 = vpack.c.bf16 (!%p9531_p9), %v8270_v5, %v8269_v4 }
 0x42e   : > { %8205 = vmatpush1.bf16.msra.mxu0 %v11300_v9  ;;  %7550 = vmatprep.subr.bf16.mxu1 %v11305_v10  ;;  %v9578_v9 = vpack.c.bf16 (!%p9531_p9), %v8288_v7, %v8287_v6  ;;  %v8271_v10 = vld [vmem:[%s11620_s30 + $0x20] sm:$0xff] (!%p9531_p9) }
 0x42f   : > { %8206 = vmatprep.subr.bf16.mxu0 %v11308_v62  ;;  %v8272_v62 = vld [vmem:[%s11620_s30 + $0x28] sm:$0xff] (!%p9531_p9) }
 0x431   : > { %7551 = vmatpush1.bf16.msra.mxu1 %v11303_v12  ;;  %v8289_v12 = vld [vmem:[%s11620_s30 + $0xb0] sm:$0xff] (!%p9531_p9) }
 0x432   : > { %8207 = vmatpush1.bf16.msra.mxu0 %v11306_v19  ;;  %7552 = vmatprep.subr.bf16.mxu1 %v11311_v20  ;;  %v8290_v19 = vld [vmem:[%s11620_s30 + $0xb8] sm:$0xff] (!%p9531_p9)  ;;  %v9580_v20 = vpack.c.bf16 (!%p9531_p9), %v8272_v62, %v8271_v10 }
 0x433   : > { %8208 = vmatprep.subr.bf16.mxu0 %v11314_v2  ;;  %v8251_v2 = vsub.s32 (!%p9531_p9), 0, %v11667_v44 }
 0x435   : > { %7553 = vmatpush1.bf16.msra.mxu1 %v11309_v24  ;;  %v8255_v24 = vsub.s32 (!%p9531_p9), 1, %v11667_v44 }
 0x436   : > { %8209 = vmatpush1.bf16.msra.mxu0 %v11312_v13  ;;  %7554 = vmatprep.subr.bf16.mxu1 %v11317_v53  ;;  %v9582_v13 = vpack.c.bf16 (!%p9531_p9), %v8290_v19, %v8289_v12  ;;  %v8273_v53 = vld [vmem:[%s11620_s30 + $0x30] sm:$0xff] (!%p9531_p9) }
 0x437   : > { %8210 = vmatprep.subr.bf16.mxu0 %v11320_v23  ;;  %v8274_v23 = vld [vmem:[%s11620_s30 + $0x38] sm:$0xff] (!%p9531_p9) }
 0x439   : > { %7555 = vmatpush1.bf16.msra.mxu1 %v11315_v59  ;;  %v8291_v59 = vld [vmem:[%s11620_s30 + $0xc0] sm:$0xff] (!%p9531_p9) }
 0x43a   : > { %8211 = vmatpush1.bf16.msra.mxu0 %v11318_v38  ;;  %7556 = vmatprep.subr.bf16.mxu1 %v11323_v40  ;;  %v8292_v38 = vld [vmem:[%s11620_s30 + $0xc8] sm:$0xff] (!%p9531_p9)  ;;  %v8247_v40 = vld [vmem:[%s283_s12] sm:$0x3] (!%p9531_p9) }
 0x43b   : > { %8212 = vmatprep.subr.bf16.mxu0 %v11326_v11  ;;  %v9584_v11 = vpack.c.bf16 (!%p9531_p9), %v8274_v23, %v8273_v53  ;;  %v9586_v44 = vpack.c.bf16 (!%p9531_p9), %v8292_v38, %v8291_v59 }
 0x43d   : > { %7557 = vmatpush1.bf16.msra.mxu1 %v11321_v27  ;;  %v8252_v27 = vrot.slane (!%p9531_p9), %v8247_v40, %v8251_v2 }
 0x43e   : > { %8213 = vmatpush1.bf16.msra.mxu0 %v11324_v61  ;;  %7558 = vmatprep.subr.bf16.mxu1 %v11329_v28  ;;  %v8256_v61 = vrot.slane (!%p9531_p9), %v8247_v40, %v8255_v24  ;;  %v8275_v28 = vld [vmem:[%s11620_s30 + $0x40] sm:$0xff] (!%p9531_p9) }
 0x43f   : > { %8214 = vmatprep.subr.bf16.mxu0 %v11332_v29  ;;  %v8276_v29 = vld [vmem:[%s11620_s30 + $0x48] sm:$0xff] (!%p9531_p9) }
 0x441   : > { %7559 = vmatpush1.bf16.msra.mxu1 %v11327_v30  ;;  %v8293_v30 = vld [vmem:[%s11620_s30 + $0xd0] sm:$0xff] (!%p9531_p9) }
 0x442   : > { %8215 = vmatpush1.bf16.msra.mxu0 %v11330_v31  ;;  %7560 = vmatprep.subr.bf16.mxu1 %v11335_v32  ;;  %v8294_v31 = vld [vmem:[%s11620_s30 + $0xd8] sm:$0xff] (!%p9531_p9)  ;;  %v8257_v32 = vcombine.low (!%p9531_p9), %v8252_v27, %v8256_v61 }
 0x443   : > { %8216 = vmatprep.subr.bf16.mxu0 %v11338_v16 }
 0x445   : > { %7561 = vmatpush1.bf16.msra.mxu1 %v11333_v34  ;;  %v9588_v34 = vpack.c.bf16 (!%p9531_p9), %v8276_v29, %v8275_v28 }
 0x446   : > { %8217 = vmatpush1.bf16.msra.mxu0 %v11336_v22  ;;  %7562 = vmatprep.subr.bf16.mxu1 %v11341_v36  ;;  %v8264_v22 = vrot.slane (!%p9531_p9), %v8257_v32, %v12964_v48  ;;  %v9590_v36 = vpack.c.bf16 (!%p9531_p9), %v8294_v31, %v8293_v30 }
 0x447   : > { %8218 = vmatprep.subr.bf16.mxu0 %v11344_v25  ;;  %v8277_v25 = vld [vmem:[%s11620_s30 + $0x50] sm:$0xff] (!%p9531_p9) }
 0x449   : > { %7563 = vmatpush1.bf16.msra.mxu1 %v11339_v46  ;;  %v8278_v46 = vld [vmem:[%s11620_s30 + $0x58] sm:$0xff] (!%p9531_p9) }
 0x44a   : > { %8219 = vmatpush1.bf16.msra.mxu0 %v11342_v42  ;;  %v8295_v42 = vld [vmem:[%s11620_s30 + $0xe0] sm:$0xff] (!%p9531_p9)  ;;  %v9592_v60 = vpack.c.bf16 (!%p9531_p9), %v8278_v46, %v8277_v25 }
 0x44b   : > { %9571 = vmatprep.subr.bf16.mxu0 (!%p9531_p9), %v9570_v1 }
 0x44c   : > { %7565 = vmatmul.mubr.bf16.vlgmr.msra.gmra.mrb[0].mxu1 %v1534_v26  ;;  %v8296_v26 = vld [vmem:[%s11620_s30 + $0xe8] sm:$0xff] (!%p9531_p9) }
 0x44d   : > { %8221 = vmatmul.mubr.bf16.vlgmr.msra.gmra.mrb[0].mxu0 %v1730_v56  ;;  %v9594_v57 = vpack.c.bf16 (!%p9531_p9), %v8296_v26, %v8295_v42 }
 0x44e   : > { %9573 = vmatpush3.bf16.msra.mxu0 (!%p9531_p9), %v9572_v58 }
 0x44f   : > { %9575 = vmatprep.subr.bf16.mxu0 (!%p9531_p9), %v9574_v18 }
 0x452   : > { %9577 = vmatpush3.bf16.msra.mxu0 (!%p9531_p9), %v9576_v8 }
 0x453   : > { %9579 = vmatprep.subr.bf16.mxu0 (!%p9531_p9), %v9578_v9 }
 0x456   : > { %9581 = vmatpush3.bf16.msra.mxu0 (!%p9531_p9), %v9580_v20 }
 0x457   : > { %9583 = vmatprep.subr.bf16.mxu0 (!%p9531_p9), %v9582_v13 }
 0x45a   : > { %9585 = vmatpush3.bf16.msra.mxu0 (!%p9531_p9), %v9584_v11 }
 0x45b   : > { %9587 = vmatprep.subr.bf16.mxu0 (!%p9531_p9), %v9586_v44 }
 0x45e   : > { %9589 = vmatpush3.bf16.msra.mxu0 (!%p9531_p9), %v9588_v34 }
 0x45f   : > { %9591 = vmatprep.subr.bf16.mxu0 (!%p9531_p9), %v9590_v36 }
 0x462   : > { %9593 = vmatpush3.bf16.msra.mxu0 (!%p9531_p9), %v9592_v60 }
 0x463   : > { %9595 = vmatprep.subr.bf16.mxu0 (!%p9531_p9), %v9594_v57 }
 0x51f   : > { %v7566_v35 = vpop.f32.mrb[0].mxu1 }
 0x520   : > { %v8222_v14 = vpop.f32.mrb[0].mxu0  ;;  %v7568_v33 = vpop.f32.mrb[1].mxu1 }
 0x521   : > { %v9602_v21 = vadd.f32 %v8222_v14, %v7566_v35  ;;  %v8224_v37 = vpop.f32.mrb[1].mxu0  ;;  %v7570_v43 = vpop.f32.mrb[2].mxu1  ;;  %v8279_v35 = vld [vmem:[%s11620_s30 + $0x60] sm:$0xff] (!%p9531_p9)  ;;  %v8280_v14 = vld [vmem:[%s11620_s30 + $0x68] sm:$0xff] (!%p9531_p9) }
 0x522   : > { %v9603_v15 = vadd.f32 %v8224_v37, %v7568_v33  ;;  %v8226_v17 = vpop.f32.mrb[2].mxu0  ;;  %v7571_v49 = vpop.f32.mrb[3].mxu1  ;;  %v8298_v33 = vld [vmem:[%s11620_s30 + $0xf8] sm:$0xff] (!%p9531_p9) }
 0x523   : > { %v8227_v45 = vpop.f32.mrb[3].mxu0  ;;  %v8281_v17 = vld [vmem:[%s11620_s30 + $0x70] sm:$0xff] (!%p9531_p9)  ;;  %v8282_v49 = vld [vmem:[%s11620_s30 + $0x78] sm:$0xff] (!%p9531_p9) }
 0x524   : > { %v8231_v51 = vcombine.low %v9602_v21, %v9603_v15  ;;  %8245 = sbr.rel (%p9531_p9) target bundleno = 1553 (0x611), region = 48  ;;  %v8297_v21 = vld [vmem:[%s11620_s30 + $0xf0] sm:$0xff] (!%p9531_p9)  ;;  %v9596_v15 = vpack.c.bf16 (!%p9531_p9), %v8280_v14, %v8279_v35  ;;  %v9600_v45 = vpack.c.bf16 (!%p9531_p9), %v8282_v49, %v8281_v17 }
 0x525   : > { %v9598_v43 = vpack.c.bf16 (!%p9531_p9), %v8298_v33, %v8297_v21 }
 0x526   : > { %v8238_v54 = vrot.slane %v8231_v51, %v12964_v48  ;;  %9597 = vmatpush3.bf16.msra.mxu0 (!%p9531_p9), %v9596_v15 }
 0x527   : > { %9599 = vmatprep.subr.bf16.mxu0 (!%p9531_p9), %v9598_v43 }
 0x528   : > { %v8240_v55 = vadd.f32 %v8238_v54, %v300_v52 }
 0x52a   : > { %8241 = vst [vmem:[#allocation2] sm:$0xf] %v8240_v55  ;;  %9601 = vmatpush3.bf16.msra.mxu0 (!%p9531_p9), %v9600_v45 }
 0x531   : > { %v8246_v16 = vld [vmem:[#allocation2] sm:$0xf] }
 0x532   : > { %v8266_v56 = vadd.f32 %v8264_v22, %v8246_v16 }
 0x534   : > { %v8306_v50 = vrot.slane %v8266_v56, %v12964_v48 }
 0x536   : > { %v8307_v37 = vcombine.high %v8306_v50, %v8306_v50 }
 0x538   : > { %8374 = vmatprep.mubr.f32.mxu0 %v8307_v37 }
 0x539   : > { %8375 = vmatmul.mubr.f32.vlgmr.msra.gmra.mrb[0].mxu0 %v8306_v50 }
 0x60c   : > { %v9567_v48 = vpop.f32.mrb[0].mxu0 }
 0x60d   : > { %v9568_v51 = vpop.f32.mrb[1].mxu0 }
 0x60e   : > { %v9569_v52 = vadd.f32 %v9568_v51, %v9567_v48 }
 0x610   : > { %8380 = vst [vmem:[%s11625_s27] sm:$0x3] %v9569_v52 }
 0x611 PF: > { %s17_s22 = sadd.s32 1, %s11445_s22   ;;  %s13044_s8 = sld [smem:[#allocation6_spill]] }
 0x612   : > { %p14_p11 = scmp.ge.s32.totalorder %s17_s22, 10   ;;  %s13045_s15 = smov %s11421_s16 }
 0x613   : > { %s13046_s16 = smov %s11425_s17  ;;  %s13047_s17 = smov %s11546_s9 }
 0x614   : > { %s13048_s18 = smov %s11437_s20  ;;  %s13049_s19 = smov %s11441_s21 }
 0x615   : > { %s13051_s21 = smov %s13057_s25  ;;  %16 = sbr.rel (!%p14_p11) target bundleno = 5 (0x5), region = 93 }
 0x617   : > { %s13050_s20 = smov %s13044_s8 }
 0x61c   :  { %8400 = vsyncpa [#allocation4], 1 }
 0x61d   :  { %8402 = vsyncpa [#allocation4 + $0x1], 1 }

</bundles_post_ra>
